<compile_context>
chip_gen: v7x
topology: tpu7x:2x2x1
jax: 0.10.0
libtpu: 0.0.40
codegen_flags: <defaults>
</compile_context>

<pallas_src>
import functools

import numpy as np

import jax
import jax.numpy as jnp
from jax.experimental import pallas as pl
from jax.experimental.pallas import tpu as pltpu

EPS = 1e-5


# ----------------------------- Pallas kernel (fused localization network) ---------------

def _pool2x2(yflat, h, w, c):
    """MaxPool2d(2,2) on a (h*w, c) row-major spatial slab -> (h//2, w//2, c)."""
    y = yflat.reshape(h // 2, 2, w // 2, 2, c)
    y = jnp.max(y, axis=3)
    y = jnp.max(y, axis=1)
    return y  # (h//2, w//2, c)


def _conv3x3(a, w_ref, s_ref, b_ref):
    """Implicit-GEMM 3x3 conv (stride 1, pad 1) + BN epilogue + ReLU.

    a:      (h, w, cin) bf16 activation (in VMEM, as a value)
    w_ref:  (9*cin, cout) bf16 weight matrix, K ordered as (tap, cin)
    s_ref:  (1, cout) f32 BN scale  (gamma / sqrt(var+eps))
    b_ref:  (1, cout) f32 BN bias   (beta - mean*scale)
    returns (h*w, cout) f32
    """
    h, w, cin = a.shape
    # zero halo built with concatenates (no lax.pad, no dynamic ref indexing)
    zr = jnp.zeros((1, w, cin), a.dtype)
    zc = jnp.zeros((h + 2, 1, cin), a.dtype)
    xp = jnp.concatenate([zr, a, zr], axis=0)
    xp = jnp.concatenate([zc, xp, zc], axis=1)            # (h+2, w+2, cin)
    # fold the 9 taps into the contraction dim: patch (h*w, 9*cin)
    slabs = [xp[dy:dy + h, dx:dx + w, :].reshape(h * w, cin)
             for dy in range(3) for dx in range(3)]
    patch = jnp.concatenate(slabs, axis=1)                 # (h*w, 9*cin) bf16
    acc = jnp.dot(patch, w_ref[...], preferred_element_type=jnp.float32)
    y = acc * s_ref[...] + b_ref[...]
    return jnp.maximum(y, 0.0)


def _locnet_kernel(p1_ref,
                   w1_ref, s1_ref, b1_ref,
                   w2_ref, s2_ref, b2_ref,
                   w3_ref, s3_ref, b3_ref,
                   w4_ref, s4_ref, b4_ref,
                   f1w_ref, f1b_ref, f2w_ref, f2b_ref,
                   out_ref, *, H, W):
    """One image per grid step: conv1..4 + 3 maxpools + global-avg-pool + FC head."""
    f32 = jnp.float32
    bf16 = jnp.bfloat16

    # --- conv1 (im2col patch supplied by the wrapper: (H*W, 9*Cin)) ---
    p1 = p1_ref[...].reshape(H * W, p1_ref.shape[2])
    y1 = jnp.dot(p1, w1_ref[...], preferred_element_type=f32)
    y1 = jnp.maximum(y1 * s1_ref[...] + b1_ref[...], 0.0)          # (H*W, 64)
    a1 = _pool2x2(y1, H, W, y1.shape[1]).astype(bf16)               # (H/2, W/2, 64)

    # --- conv2 ---
    y2 = _conv3x3(a1, w2_ref, s2_ref, b2_ref)                       # (H*W/4, 128)
    a2 = _pool2x2(y2, H // 2, W // 2, y2.shape[1]).astype(bf16)     # (H/4, W/4, 128)

    # --- conv3 ---
    y3 = _conv3x3(a2, w3_ref, s3_ref, b3_ref)                       # (H*W/16, 256)
    a3 = _pool2x2(y3, H // 4, W // 4, y3.shape[1]).astype(bf16)     # (H/8, W/8, 256)

    # --- conv4 + AdaptiveAvgPool2d(1) ---
    y4 = _conv3x3(a3, w4_ref, s4_ref, b4_ref)                       # (H*W/64, 512)
    feat = jnp.mean(y4, axis=0, keepdims=True)                      # (1, 512) f32

    # --- FC head: linear -> ReLU -> linear ---
    h1 = jnp.dot(feat.astype(bf16), f1w_ref[...],
                 preferred_element_type=f32) + f1b_ref[...]
    h1 = jnp.maximum(h1, 0.0)
    out = jnp.dot(h1.astype(bf16), f2w_ref[...],
                  preferred_element_type=f32) + f2b_ref[...]        # (1, 2F)
    out_ref[...] = out.reshape(out_ref.shape)


# ----------------------------- wrapper -----------------------------

def _prep_conv(w, bn):
    """w: (Cout, Cin, 3, 3) OIHW; bn = (gamma, beta, mean, var).
    Returns ((9*Cin, Cout) bf16 weight matrix, (1,Cout) f32 scale, (1,Cout) f32 bias)."""
    cout, cin = w.shape[0], w.shape[1]
    wm = jnp.transpose(w, (2, 3, 1, 0)).reshape(9 * cin, cout).astype(jnp.bfloat16)
    gamma, beta, mean, var = bn
    scale = (gamma / jnp.sqrt(var + EPS)).astype(jnp.float32)
    bias = (beta - mean * scale).astype(jnp.float32)
    return wm, scale.reshape(1, cout), bias.reshape(1, cout)


def localization_net(x_nchw, params):
    """x: (N, Cin, H, W) f32 -> C' coordinates flat (N, 2F) f32 (fused Pallas kernel)."""
    N, Cin, H, W = x_nchw.shape
    assert H % 8 == 0 and W % 8 == 0, "need >=8 divisible spatial dims for 3 maxpools"
    F2 = params["fc2_b"].shape[1]
    bf16 = jnp.bfloat16

    # conv1 im2col in XLA (tiny: Cin is 1) so the kernel never sees a lane-width-1 tensor.
    x_nhwc = jnp.transpose(x_nchw, (0, 2, 3, 1)).astype(bf16)
    xpad = jnp.pad(x_nhwc, ((0, 0), (1, 1), (1, 1), (0, 0)))
    cols = [xpad[:, dy:dy + H, dx:dx + W, :].reshape(N, H * W, Cin)
            for dy in range(3) for dx in range(3)]
    patch1 = jnp.concatenate(cols, axis=2)                 # (N, H*W, 9*Cin) bf16

    (w1, bn1), (w2, bn2), (w3, bn3), (w4, bn4) = params["convs"]
    w1m, s1, b1 = _prep_conv(w1, bn1)
    w2m, s2, b2 = _prep_conv(w2, bn2)
    w3m, s3, b3 = _prep_conv(w3, bn3)
    w4m, s4, b4 = _prep_conv(w4, bn4)
    f1w = params["fc1_w"].astype(bf16)
    f1b = params["fc1_b"].astype(jnp.float32)
    f2w = params["fc2_w"].astype(bf16)
    f2b = params["fc2_b"].astype(jnp.float32)

    weights = (w1m, s1, b1, w2m, s2, b2, w3m, s3, b3, w4m, s4, b4, f1w, f1b, f2w, f2b)

    def full_spec(arr):
        nd = arr.ndim
        return pl.BlockSpec(arr.shape, lambda n, _nd=nd: (0,) * _nd)

    kernel = functools.partial(_locnet_kernel, H=H, W=W)
    out = pl.pallas_call(
        kernel,
        out_shape=jax.ShapeDtypeStruct((N, 1, F2), jnp.float32),
        grid=(N,),
        in_specs=[pl.BlockSpec((1, H * W, 9 * Cin), lambda n: (n, 0, 0))]
                 + [full_spec(a) for a in weights],
        out_specs=pl.BlockSpec((1, 1, F2), lambda n: (n, 0, 0)),
        compiler_params=pltpu.CompilerParams(dimension_semantics=("parallel",)),
    )(patch1, *weights)
    return out.reshape(N, F2)


# ----------------------------- GridGenerator constants (numpy, as in PyTorch) ------------

def _build_C(num_f):
    ctrl_pts_x = np.linspace(-1.0, 1.0, num_f // 2)
    top = np.stack([ctrl_pts_x, -np.ones(num_f // 2)], axis=1)
    bot = np.stack([ctrl_pts_x, np.ones(num_f // 2)], axis=1)
    return np.concatenate([top, bot], axis=0)


def _build_inv_delta_C(num_f, C):
    hat_C = np.zeros((num_f, num_f), dtype=float)
    for i in range(num_f):
        for j in range(i, num_f):
            r = np.linalg.norm(C[i] - C[j])
            hat_C[i, j] = r
            hat_C[j, i] = r
    np.fill_diagonal(hat_C, 1)
    hat_C = (hat_C ** 2) * np.log(hat_C)
    delta_C = np.concatenate([
        np.concatenate([np.ones((num_f, 1)), C, hat_C], axis=1),
        np.concatenate([np.zeros((2, 3)), np.transpose(C)], axis=1),
        np.concatenate([np.zeros((1, 3)), np.ones((1, num_f))], axis=1)], axis=0)
    return np.linalg.inv(delta_C)


def _build_P(i_r_width, i_r_height):
    gx = (np.arange(-i_r_width, i_r_width, 2) + 1.0) / i_r_width
    gy = (np.arange(-i_r_height, i_r_height, 2) + 1.0) / i_r_height
    P = np.stack(np.meshgrid(gx, gy), axis=2)
    return P.reshape([-1, 2])


def _build_P_hat(num_f, C, P, eps=1e-6):
    n = P.shape[0]
    P_diff = P[:, None, :] - C[None, :, :]
    rbf_norm = np.linalg.norm(P_diff, ord=2, axis=2)
    rbf = (rbf_norm ** 2) * np.log(rbf_norm + eps)
    return np.concatenate([np.ones((n, 1)), P, rbf], axis=1)


# ----------------------------- grid_sample (border, bilinear, align_corners=False) -------

def grid_sample_border(img, grid):
    """img: (N,C,H,W) f32; grid: (N,Hr,Wr,2) with (x,y) in [-1,1]. Matches
    F.grid_sample(..., padding_mode='border', align_corners=False)."""
    # TODO(synk): data-dependent bilinear gather stays in XLA (no clean Pallas gather here).
    N, C, H, W = img.shape
    gx = grid[..., 0]
    gy = grid[..., 1]
    ix = jnp.clip(((gx + 1.0) * W - 1.0) * 0.5, 0.0, W - 1.0)
    iy = jnp.clip(((gy + 1.0) * H - 1.0) * 0.5, 0.0, H - 1.0)
    x0 = jnp.floor(ix)
    y0 = jnp.floor(iy)
    wx = (ix - x0)[:, None]  # (N,1,Hr,Wr)
    wy = (iy - y0)[:, None]
    x0i = x0.astype(jnp.int32)
    y0i = y0.astype(jnp.int32)
    x1i = jnp.minimum(x0i + 1, W - 1)
    y1i = jnp.minimum(y0i + 1, H - 1)
    flat = img.reshape(N, C, H * W)

    def gather(yi, xi):
        idx = (yi * W + xi).reshape(N, 1, -1)
        idx = jnp.broadcast_to(idx, (N, C, idx.shape[-1]))
        return jnp.take_along_axis(flat, idx, axis=2).reshape(N, C, gx.shape[1], gx.shape[2])

    v00 = gather(y0i, x0i)
    v01 = gather(y0i, x1i)
    v10 = gather(y1i, x0i)
    v11 = gather(y1i, x1i)
    top = v00 * (1.0 - wx) + v01 * wx
    bot = v10 * (1.0 - wx) + v11 * wx
    return top * (1.0 - wy) + bot * wy


# ----------------------------- parameters -----------------------------

def _bn_p(key, c):
    k1, k2, k3, k4 = jax.random.split(key, 4)
    gamma = 1.0 + 0.1 * jax.random.normal(k1, (c,), jnp.float32)
    beta = 0.1 * jax.random.normal(k2, (c,), jnp.float32)
    mean = 0.1 * jax.random.normal(k3, (c,), jnp.float32)
    var = 0.5 + jax.random.uniform(k4, (c,), jnp.float32)
    return gamma, beta, mean, var


def build_params(key, num_f, i_channel_num):
    keys = iter(jax.random.split(key, 32))
    P = {"convs": []}
    for cin, cout in [(i_channel_num, 64), (64, 128), (128, 256), (256, 512)]:
        w = jax.random.normal(next(keys), (cout, cin, 3, 3), jnp.float32) / np.sqrt(cin * 9.0)
        P["convs"].append((w, _bn_p(next(keys), cout)))
    P["fc1_w"] = jax.random.normal(next(keys), (512, 256), jnp.float32) / np.sqrt(512.0)
    P["fc1_b"] = 0.01 * jax.random.normal(next(keys), (1, 256), jnp.float32)
    # fc2: zero weight, bias = initial fiducial points (RARE Fig. 6(a))
    P["fc2_w"] = jnp.zeros((256, 2 * num_f), jnp.float32)
    ctrl_x = np.linspace(-1.0, 1.0, num_f // 2)
    ctrl_y_top = np.linspace(0.0, -1.0, num=num_f // 2)
    ctrl_y_bot = np.linspace(1.0, 0.0, num=num_f // 2)
    init_bias = np.concatenate([np.stack([ctrl_x, ctrl_y_top], axis=1),
                                np.stack([ctrl_x, ctrl_y_bot], axis=1)], axis=0).reshape(-1)
    P["fc2_b"] = jnp.asarray(init_bias, jnp.float32).reshape(1, 2 * num_f)
    return P


# ----------------------------- forward pass -----------------------------

def tps_stn_forward(x, params, inv_delta_C, P_hat, *, i_r_size):
    """x: (N, C, H, W) f32 -> rectified image (N, C, I_r_H, I_r_W) f32."""
    N = x.shape[0]

    # --- LocalizationNetwork (single fused Pallas kernel) ---
    c_prime = localization_net(x, params).reshape(N, -1, 2)        # (N, F, 2)

    # --- GridGenerator.build_P_prime (tiny constant matmuls, XLA) ---
    cz = jnp.concatenate([c_prime, jnp.zeros((N, 3, 2), jnp.float32)], axis=1)  # (N, F+3, 2)
    T = jnp.einsum('ij,njk->nik', inv_delta_C, cz)                 # (N, F+3, 2)
    P_prime = jnp.einsum('pi,nik->npk', P_hat, T)                  # (N, Hr*Wr, 2)
    grid = P_prime.reshape(N, i_r_size[0], i_r_size[1], 2)

    # --- rectification ---
    return grid_sample_border(x, grid)


if __name__ == "__main__":
    F_NUM = 20
    I_SIZE = (16, 32)     # (H, W) of the input image
    I_R_SIZE = (16, 32)   # (H, W) of the rectified image
    I_CH = 1
    N = 2

    key = jax.random.PRNGKey(0)
    kx, kp = jax.random.split(key)
    x = jax.random.normal(kx, (N, I_CH, I_SIZE[0], I_SIZE[1]), jnp.float32)
    params = build_params(kp, F_NUM, I_CH)

    C = _build_C(F_NUM)
    inv_delta_C = jnp.asarray(_build_inv_delta_C(F_NUM, C), jnp.float32)
    P = _build_P(I_R_SIZE[1], I_R_SIZE[0])
    P_hat = jnp.asarray(_build_P_hat(F_NUM, C, P), jnp.float32)

    fwd = jax.jit(functools.partial(tps_stn_forward, i_r_size=I_R_SIZE))
    out = jax.block_until_ready(fwd(x, params, inv_delta_C, P_hat))

    assert out.shape == (N, I_CH, I_R_SIZE[0], I_R_SIZE[1]), out.shape
    assert bool(jnp.all(jnp.isfinite(out)))
    print("KERNEL_OK")
</pallas_src>

<mosaic_0001>
module attributes {stable_mosaic.version = 11 : i64} {
  func.func @_locnet_kernel(%arg0: i32, %arg1: memref<1x512x9xbf16, #tpu.memory_space<vmem>>, %arg2: memref<9x64xbf16, #tpu.memory_space<vmem>>, %arg3: memref<1x64xf32, #tpu.memory_space<vmem>>, %arg4: memref<1x64xf32, #tpu.memory_space<vmem>>, %arg5: memref<576x128xbf16, #tpu.memory_space<vmem>>, %arg6: memref<1x128xf32, #tpu.memory_space<vmem>>, %arg7: memref<1x128xf32, #tpu.memory_space<vmem>>, %arg8: memref<1152x256xbf16, #tpu.memory_space<vmem>>, %arg9: memref<1x256xf32, #tpu.memory_space<vmem>>, %arg10: memref<1x256xf32, #tpu.memory_space<vmem>>, %arg11: memref<2304x512xbf16, #tpu.memory_space<vmem>>, %arg12: memref<1x512xf32, #tpu.memory_space<vmem>>, %arg13: memref<1x512xf32, #tpu.memory_space<vmem>>, %arg14: memref<512x256xbf16, #tpu.memory_space<vmem>>, %arg15: memref<1x256xf32, #tpu.memory_space<vmem>>, %arg16: memref<256x40xbf16, #tpu.memory_space<vmem>>, %arg17: memref<1x40xf32, #tpu.memory_space<vmem>>, %arg18: memref<1x1x40xf32, #tpu.memory_space<vmem>>) attributes {dimension_semantics = [#tpu.dimension_semantics<parallel>], iteration_bounds = array<i64: 2>, scalar_prefetch = 0 : i64, scratch_operands = 0 : i64, tpu.core_type = #tpu.core_type<tc>, window_params = [{transform_indices = @transform_0, window_bounds = array<i64: 1, 512, 9>}, {pipeline_mode = #tpu.pipeline_mode<synchronous>, transform_indices = @transform_1, window_bounds = array<i64: 9, 64>}, {pipeline_mode = #tpu.pipeline_mode<synchronous>, transform_indices = @transform_2, window_bounds = array<i64: 1, 64>}, {pipeline_mode = #tpu.pipeline_mode<synchronous>, transform_indices = @transform_3, window_bounds = array<i64: 1, 64>}, {pipeline_mode = #tpu.pipeline_mode<synchronous>, transform_indices = @transform_4, window_bounds = array<i64: 576, 128>}, {pipeline_mode = #tpu.pipeline_mode<synchronous>, transform_indices = @transform_5, window_bounds = array<i64: 1, 128>}, {pipeline_mode = #tpu.pipeline_mode<synchronous>, transform_indices = @transform_6, window_bounds = array<i64: 1, 128>}, {pipeline_mode = #tpu.pipeline_mode<synchronous>, transform_indices = @transform_7, window_bounds = array<i64: 1152, 256>}, {pipeline_mode = #tpu.pipeline_mode<synchronous>, transform_indices = @transform_8, window_bounds = array<i64: 1, 256>}, {pipeline_mode = #tpu.pipeline_mode<synchronous>, transform_indices = @transform_9, window_bounds = array<i64: 1, 256>}, {pipeline_mode = #tpu.pipeline_mode<synchronous>, transform_indices = @transform_10, window_bounds = array<i64: 2304, 512>}, {pipeline_mode = #tpu.pipeline_mode<synchronous>, transform_indices = @transform_11, window_bounds = array<i64: 1, 512>}, {pipeline_mode = #tpu.pipeline_mode<synchronous>, transform_indices = @transform_12, window_bounds = array<i64: 1, 512>}, {pipeline_mode = #tpu.pipeline_mode<synchronous>, transform_indices = @transform_13, window_bounds = array<i64: 512, 256>}, {pipeline_mode = #tpu.pipeline_mode<synchronous>, transform_indices = @transform_14, window_bounds = array<i64: 1, 256>}, {pipeline_mode = #tpu.pipeline_mode<synchronous>, transform_indices = @transform_15, window_bounds = array<i64: 256, 40>}, {pipeline_mode = #tpu.pipeline_mode<synchronous>, transform_indices = @transform_16, window_bounds = array<i64: 1, 40>}, {transform_indices = @transform_17, window_bounds = array<i64: 1, 1, 40>}]} {
    %c0 = arith.constant 0 : index
    %c0_0 = arith.constant 0 : index
    %c0_1 = arith.constant 0 : index
    %0 = vector.load %arg1[%c0, %c0_0, %c0_1] : memref<1x512x9xbf16, #tpu.memory_space<vmem>>, vector<1x512x9xbf16>
    %1 = vector.shape_cast %0 : vector<1x512x9xbf16> to vector<512x9xbf16>
    %c0_2 = arith.constant 0 : index
    %c0_3 = arith.constant 0 : index
    %2 = vector.load %arg2[%c0_2, %c0_3] : memref<9x64xbf16, #tpu.memory_space<vmem>>, vector<9x64xbf16>
    %cst = arith.constant dense<0.000000e+00> : vector<512x64xf32>
    %3 = tpu.matmul %1, %2, %cst {dimension_numbers = #tpu.dot_dimension_numbers<[1], [0], [0], [1], [0, 0, 1, 1], [], []>} : vector<512x9xbf16>, vector<9x64xbf16>, vector<512x64xf32> -> vector<512x64xf32>
    %c0_4 = arith.constant 0 : index
    %c0_5 = arith.constant 0 : index
    %4 = vector.load %arg3[%c0_4, %c0_5] : memref<1x64xf32, #tpu.memory_space<vmem>>, vector<1x64xf32>
    %5 = vector.broadcast %4 : vector<1x64xf32> to vector<512x64xf32>
    %6 = arith.mulf %3, %5 : vector<512x64xf32>
    %c0_6 = arith.constant 0 : index
    %c0_7 = arith.constant 0 : index
    %7 = vector.load %arg4[%c0_6, %c0_7] : memref<1x64xf32, #tpu.memory_space<vmem>>, vector<1x64xf32>
    %8 = vector.broadcast %7 : vector<1x64xf32> to vector<512x64xf32>
    %9 = arith.addf %6, %8 : vector<512x64xf32>
    %cst_8 = arith.constant 0.000000e+00 : f32
    %10 = vector.broadcast %cst_8 : f32 to vector<512x64xf32>
    %11 = arith.maximumf %9, %10 : vector<512x64xf32>
    %12 = vector.shape_cast %11 : vector<512x64xf32> to vector<8x2x16x2x64xf32>
    %cst_9 = arith.constant dense<0xFF800000> : vector<8x2x16x64xf32>
    %13 = vector.multi_reduction <maximumf>, %12, %cst_9 [3] : vector<8x2x16x2x64xf32> to vector<8x2x16x64xf32>
    %cst_10 = arith.constant dense<0xFF800000> : vector<8x16x64xf32>
    %14 = vector.multi_reduction <maximumf>, %13, %cst_10 [1] : vector<8x2x16x64xf32> to vector<8x16x64xf32>
    %15 = arith.truncf %14 : vector<8x16x64xf32> to vector<8x16x64xbf16>
    %cst_11 = arith.constant 0.000000e+00 : bf16
    %16 = vector.broadcast %cst_11 : bf16 to vector<1x16x64xbf16>
    %cst_12 = arith.constant 0.000000e+00 : bf16
    %17 = vector.broadcast %cst_12 : bf16 to vector<10x1x64xbf16>
    %18 = tpu.concatenate %16, %15, %16 in 0 : vector<1x16x64xbf16>, vector<8x16x64xbf16>, vector<1x16x64xbf16> -> vector<10x16x64xbf16>
    %19 = tpu.concatenate %17, %18, %17 in 1 : vector<10x1x64xbf16>, vector<10x16x64xbf16>, vector<10x1x64xbf16> -> vector<10x18x64xbf16>
    %20 = vector.extract_strided_slice %19 {offsets = [0, 0, 0], sizes = [8, 16, 64], strides = [1, 1, 1]} : vector<10x18x64xbf16> to vector<8x16x64xbf16>
    %21 = vector.shape_cast %20 : vector<8x16x64xbf16> to vector<128x64xbf16>
    %22 = vector.extract_strided_slice %19 {offsets = [0, 1, 0], sizes = [8, 16, 64], strides = [1, 1, 1]} : vector<10x18x64xbf16> to vector<8x16x64xbf16>
    %23 = vector.shape_cast %22 : vector<8x16x64xbf16> to vector<128x64xbf16>
    %24 = vector.extract_strided_slice %19 {offsets = [0, 2, 0], sizes = [8, 16, 64], strides = [1, 1, 1]} : vector<10x18x64xbf16> to vector<8x16x64xbf16>
    %25 = vector.shape_cast %24 : vector<8x16x64xbf16> to vector<128x64xbf16>
    %26 = vector.extract_strided_slice %19 {offsets = [1, 0, 0], sizes = [8, 16, 64], strides = [1, 1, 1]} : vector<10x18x64xbf16> to vector<8x16x64xbf16>
    %27 = vector.shape_cast %26 : vector<8x16x64xbf16> to vector<128x64xbf16>
    %28 = vector.extract_strided_slice %19 {offsets = [1, 1, 0], sizes = [8, 16, 64], strides = [1, 1, 1]} : vector<10x18x64xbf16> to vector<8x16x64xbf16>
    %29 = vector.shape_cast %28 : vector<8x16x64xbf16> to vector<128x64xbf16>
    %30 = vector.extract_strided_slice %19 {offsets = [1, 2, 0], sizes = [8, 16, 64], strides = [1, 1, 1]} : vector<10x18x64xbf16> to vector<8x16x64xbf16>
    %31 = vector.shape_cast %30 : vector<8x16x64xbf16> to vector<128x64xbf16>
    %32 = vector.extract_strided_slice %19 {offsets = [2, 0, 0], sizes = [8, 16, 64], strides = [1, 1, 1]} : vector<10x18x64xbf16> to vector<8x16x64xbf16>
    %33 = vector.shape_cast %32 : vector<8x16x64xbf16> to vector<128x64xbf16>
    %34 = vector.extract_strided_slice %19 {offsets = [2, 1, 0], sizes = [8, 16, 64], strides = [1, 1, 1]} : vector<10x18x64xbf16> to vector<8x16x64xbf16>
    %35 = vector.shape_cast %34 : vector<8x16x64xbf16> to vector<128x64xbf16>
    %36 = vector.extract_strided_slice %19 {offsets = [2, 2, 0], sizes = [8, 16, 64], strides = [1, 1, 1]} : vector<10x18x64xbf16> to vector<8x16x64xbf16>
    %37 = vector.shape_cast %36 : vector<8x16x64xbf16> to vector<128x64xbf16>
    %38 = tpu.concatenate %21, %23, %25, %27, %29, %31, %33, %35, %37 in 1 : vector<128x64xbf16>, vector<128x64xbf16>, vector<128x64xbf16>, vector<128x64xbf16>, vector<128x64xbf16>, vector<128x64xbf16>, vector<128x64xbf16>, vector<128x64xbf16>, vector<128x64xbf16> -> vector<128x576xbf16>
    %c0_13 = arith.constant 0 : index
    %c0_14 = arith.constant 0 : index
    %39 = vector.load %arg5[%c0_13, %c0_14] : memref<576x128xbf16, #tpu.memory_space<vmem>>, vector<576x128xbf16>
    %cst_15 = arith.constant dense<0.000000e+00> : vector<128x128xf32>
    %40 = tpu.matmul %38, %39, %cst_15 {dimension_numbers = #tpu.dot_dimension_numbers<[1], [0], [0], [1], [0, 0, 1, 1], [], []>} : vector<128x576xbf16>, vector<576x128xbf16>, vector<128x128xf32> -> vector<128x128xf32>
    %c0_16 = arith.constant 0 : index
    %c0_17 = arith.constant 0 : index
    %41 = vector.load %arg6[%c0_16, %c0_17] : memref<1x128xf32, #tpu.memory_space<vmem>>, vector<1x128xf32>
    %42 = vector.broadcast %41 : vector<1x128xf32> to vector<128x128xf32>
    %43 = arith.mulf %40, %42 : vector<128x128xf32>
    %c0_18 = arith.constant 0 : index
    %c0_19 = arith.constant 0 : index
    %44 = vector.load %arg7[%c0_18, %c0_19] : memref<1x128xf32, #tpu.memory_space<vmem>>, vector<1x128xf32>
    %45 = vector.broadcast %44 : vector<1x128xf32> to vector<128x128xf32>
    %46 = arith.addf %43, %45 : vector<128x128xf32>
    %cst_20 = arith.constant 0.000000e+00 : f32
    %47 = vector.broadcast %cst_20 : f32 to vector<128x128xf32>
    %48 = arith.maximumf %46, %47 : vector<128x128xf32>
    %49 = vector.shape_cast %48 : vector<128x128xf32> to vector<4x2x8x2x128xf32>
    %cst_21 = arith.constant dense<0xFF800000> : vector<4x2x8x128xf32>
    %50 = vector.multi_reduction <maximumf>, %49, %cst_21 [3] : vector<4x2x8x2x128xf32> to vector<4x2x8x128xf32>
    %cst_22 = arith.constant dense<0xFF800000> : vector<4x8x128xf32>
    %51 = vector.multi_reduction <maximumf>, %50, %cst_22 [1] : vector<4x2x8x128xf32> to vector<4x8x128xf32>
    %52 = arith.truncf %51 : vector<4x8x128xf32> to vector<4x8x128xbf16>
    %cst_23 = arith.constant 0.000000e+00 : bf16
    %53 = vector.broadcast %cst_23 : bf16 to vector<1x8x128xbf16>
    %cst_24 = arith.constant 0.000000e+00 : bf16
    %54 = vector.broadcast %cst_24 : bf16 to vector<6x1x128xbf16>
    %55 = tpu.concatenate %53, %52, %53 in 0 : vector<1x8x128xbf16>, vector<4x8x128xbf16>, vector<1x8x128xbf16> -> vector<6x8x128xbf16>
    %56 = tpu.concatenate %54, %55, %54 in 1 : vector<6x1x128xbf16>, vector<6x8x128xbf16>, vector<6x1x128xbf16> -> vector<6x10x128xbf16>
    %57 = vector.extract_strided_slice %56 {offsets = [0, 0, 0], sizes = [4, 8, 128], strides = [1, 1, 1]} : vector<6x10x128xbf16> to vector<4x8x128xbf16>
    %58 = vector.shape_cast %57 : vector<4x8x128xbf16> to vector<32x128xbf16>
    %59 = vector.extract_strided_slice %56 {offsets = [0, 1, 0], sizes = [4, 8, 128], strides = [1, 1, 1]} : vector<6x10x128xbf16> to vector<4x8x128xbf16>
    %60 = vector.shape_cast %59 : vector<4x8x128xbf16> to vector<32x128xbf16>
    %61 = vector.extract_strided_slice %56 {offsets = [0, 2, 0], sizes = [4, 8, 128], strides = [1, 1, 1]} : vector<6x10x128xbf16> to vector<4x8x128xbf16>
    %62 = vector.shape_cast %61 : vector<4x8x128xbf16> to vector<32x128xbf16>
    %63 = vector.extract_strided_slice %56 {offsets = [1, 0, 0], sizes = [4, 8, 128], strides = [1, 1, 1]} : vector<6x10x128xbf16> to vector<4x8x128xbf16>
    %64 = vector.shape_cast %63 : vector<4x8x128xbf16> to vector<32x128xbf16>
    %65 = vector.extract_strided_slice %56 {offsets = [1, 1, 0], sizes = [4, 8, 128], strides = [1, 1, 1]} : vector<6x10x128xbf16> to vector<4x8x128xbf16>
    %66 = vector.shape_cast %65 : vector<4x8x128xbf16> to vector<32x128xbf16>
    %67 = vector.extract_strided_slice %56 {offsets = [1, 2, 0], sizes = [4, 8, 128], strides = [1, 1, 1]} : vector<6x10x128xbf16> to vector<4x8x128xbf16>
    %68 = vector.shape_cast %67 : vector<4x8x128xbf16> to vector<32x128xbf16>
    %69 = vector.extract_strided_slice %56 {offsets = [2, 0, 0], sizes = [4, 8, 128], strides = [1, 1, 1]} : vector<6x10x128xbf16> to vector<4x8x128xbf16>
    %70 = vector.shape_cast %69 : vector<4x8x128xbf16> to vector<32x128xbf16>
    %71 = vector.extract_strided_slice %56 {offsets = [2, 1, 0], sizes = [4, 8, 128], strides = [1, 1, 1]} : vector<6x10x128xbf16> to vector<4x8x128xbf16>
    %72 = vector.shape_cast %71 : vector<4x8x128xbf16> to vector<32x128xbf16>
    %73 = vector.extract_strided_slice %56 {offsets = [2, 2, 0], sizes = [4, 8, 128], strides = [1, 1, 1]} : vector<6x10x128xbf16> to vector<4x8x128xbf16>
    %74 = vector.shape_cast %73 : vector<4x8x128xbf16> to vector<32x128xbf16>
    %75 = tpu.concatenate %58, %60, %62, %64, %66, %68, %70, %72, %74 in 1 : vector<32x128xbf16>, vector<32x128xbf16>, vector<32x128xbf16>, vector<32x128xbf16>, vector<32x128xbf16>, vector<32x128xbf16>, vector<32x128xbf16>, vector<32x128xbf16>, vector<32x128xbf16> -> vector<32x1152xbf16>
    %c0_25 = arith.constant 0 : index
    %c0_26 = arith.constant 0 : index
    %76 = vector.load %arg8[%c0_25, %c0_26] : memref<1152x256xbf16, #tpu.memory_space<vmem>>, vector<1152x256xbf16>
    %cst_27 = arith.constant dense<0.000000e+00> : vector<32x256xf32>
    %77 = tpu.matmul %75, %76, %cst_27 {dimension_numbers = #tpu.dot_dimension_numbers<[1], [0], [0], [1], [0, 0, 1, 1], [], []>} : vector<32x1152xbf16>, vector<1152x256xbf16>, vector<32x256xf32> -> vector<32x256xf32>
    %c0_28 = arith.constant 0 : index
    %c0_29 = arith.constant 0 : index
    %78 = vector.load %arg9[%c0_28, %c0_29] : memref<1x256xf32, #tpu.memory_space<vmem>>, vector<1x256xf32>
    %79 = vector.broadcast %78 : vector<1x256xf32> to vector<32x256xf32>
    %80 = arith.mulf %77, %79 : vector<32x256xf32>
    %c0_30 = arith.constant 0 : index
    %c0_31 = arith.constant 0 : index
    %81 = vector.load %arg10[%c0_30, %c0_31] : memref<1x256xf32, #tpu.memory_space<vmem>>, vector<1x256xf32>
    %82 = vector.broadcast %81 : vector<1x256xf32> to vector<32x256xf32>
    %83 = arith.addf %80, %82 : vector<32x256xf32>
    %cst_32 = arith.constant 0.000000e+00 : f32
    %84 = vector.broadcast %cst_32 : f32 to vector<32x256xf32>
    %85 = arith.maximumf %83, %84 : vector<32x256xf32>
    %86 = vector.shape_cast %85 : vector<32x256xf32> to vector<2x2x4x2x256xf32>
    %cst_33 = arith.constant dense<0xFF800000> : vector<2x2x4x256xf32>
    %87 = vector.multi_reduction <maximumf>, %86, %cst_33 [3] : vector<2x2x4x2x256xf32> to vector<2x2x4x256xf32>
    %cst_34 = arith.constant dense<0xFF800000> : vector<2x4x256xf32>
    %88 = vector.multi_reduction <maximumf>, %87, %cst_34 [1] : vector<2x2x4x256xf32> to vector<2x4x256xf32>
    %89 = arith.truncf %88 : vector<2x4x256xf32> to vector<2x4x256xbf16>
    %cst_35 = arith.constant 0.000000e+00 : bf16
    %90 = vector.broadcast %cst_35 : bf16 to vector<1x4x256xbf16>
    %cst_36 = arith.constant 0.000000e+00 : bf16
    %91 = vector.broadcast %cst_36 : bf16 to vector<4x1x256xbf16>
    %92 = tpu.concatenate %90, %89, %90 in 0 : vector<1x4x256xbf16>, vector<2x4x256xbf16>, vector<1x4x256xbf16> -> vector<4x4x256xbf16>
    %93 = tpu.concatenate %91, %92, %91 in 1 : vector<4x1x256xbf16>, vector<4x4x256xbf16>, vector<4x1x256xbf16> -> vector<4x6x256xbf16>
    %94 = vector.extract_strided_slice %93 {offsets = [0, 0, 0], sizes = [2, 4, 256], strides = [1, 1, 1]} : vector<4x6x256xbf16> to vector<2x4x256xbf16>
    %95 = vector.shape_cast %94 : vector<2x4x256xbf16> to vector<8x256xbf16>
    %96 = vector.extract_strided_slice %93 {offsets = [0, 1, 0], sizes = [2, 4, 256], strides = [1, 1, 1]} : vector<4x6x256xbf16> to vector<2x4x256xbf16>
    %97 = vector.shape_cast %96 : vector<2x4x256xbf16> to vector<8x256xbf16>
    %98 = vector.extract_strided_slice %93 {offsets = [0, 2, 0], sizes = [2, 4, 256], strides = [1, 1, 1]} : vector<4x6x256xbf16> to vector<2x4x256xbf16>
    %99 = vector.shape_cast %98 : vector<2x4x256xbf16> to vector<8x256xbf16>
    %100 = vector.extract_strided_slice %93 {offsets = [1, 0, 0], sizes = [2, 4, 256], strides = [1, 1, 1]} : vector<4x6x256xbf16> to vector<2x4x256xbf16>
    %101 = vector.shape_cast %100 : vector<2x4x256xbf16> to vector<8x256xbf16>
    %102 = vector.extract_strided_slice %93 {offsets = [1, 1, 0], sizes = [2, 4, 256], strides = [1, 1, 1]} : vector<4x6x256xbf16> to vector<2x4x256xbf16>
    %103 = vector.shape_cast %102 : vector<2x4x256xbf16> to vector<8x256xbf16>
    %104 = vector.extract_strided_slice %93 {offsets = [1, 2, 0], sizes = [2, 4, 256], strides = [1, 1, 1]} : vector<4x6x256xbf16> to vector<2x4x256xbf16>
    %105 = vector.shape_cast %104 : vector<2x4x256xbf16> to vector<8x256xbf16>
    %106 = vector.extract_strided_slice %93 {offsets = [2, 0, 0], sizes = [2, 4, 256], strides = [1, 1, 1]} : vector<4x6x256xbf16> to vector<2x4x256xbf16>
    %107 = vector.shape_cast %106 : vector<2x4x256xbf16> to vector<8x256xbf16>
    %108 = vector.extract_strided_slice %93 {offsets = [2, 1, 0], sizes = [2, 4, 256], strides = [1, 1, 1]} : vector<4x6x256xbf16> to vector<2x4x256xbf16>
    %109 = vector.shape_cast %108 : vector<2x4x256xbf16> to vector<8x256xbf16>
    %110 = vector.extract_strided_slice %93 {offsets = [2, 2, 0], sizes = [2, 4, 256], strides = [1, 1, 1]} : vector<4x6x256xbf16> to vector<2x4x256xbf16>
    %111 = vector.shape_cast %110 : vector<2x4x256xbf16> to vector<8x256xbf16>
    %112 = tpu.concatenate %95, %97, %99, %101, %103, %105, %107, %109, %111 in 1 : vector<8x256xbf16>, vector<8x256xbf16>, vector<8x256xbf16>, vector<8x256xbf16>, vector<8x256xbf16>, vector<8x256xbf16>, vector<8x256xbf16>, vector<8x256xbf16>, vector<8x256xbf16> -> vector<8x2304xbf16>
    %c0_37 = arith.constant 0 : index
    %c0_38 = arith.constant 0 : index
    %113 = vector.load %arg11[%c0_37, %c0_38] : memref<2304x512xbf16, #tpu.memory_space<vmem>>, vector<2304x512xbf16>
    %cst_39 = arith.constant dense<0.000000e+00> : vector<8x512xf32>
    %114 = tpu.matmul %112, %113, %cst_39 {dimension_numbers = #tpu.dot_dimension_numbers<[1], [0], [0], [1], [0, 0, 1, 1], [], []>} : vector<8x2304xbf16>, vector<2304x512xbf16>, vector<8x512xf32> -> vector<8x512xf32>
    %c0_40 = arith.constant 0 : index
    %c0_41 = arith.constant 0 : index
    %115 = vector.load %arg12[%c0_40, %c0_41] : memref<1x512xf32, #tpu.memory_space<vmem>>, vector<1x512xf32>
    %116 = vector.broadcast %115 : vector<1x512xf32> to vector<8x512xf32>
    %117 = arith.mulf %114, %116 : vector<8x512xf32>
    %c0_42 = arith.constant 0 : index
    %c0_43 = arith.constant 0 : index
    %118 = vector.load %arg13[%c0_42, %c0_43] : memref<1x512xf32, #tpu.memory_space<vmem>>, vector<1x512xf32>
    %119 = vector.broadcast %118 : vector<1x512xf32> to vector<8x512xf32>
    %120 = arith.addf %117, %119 : vector<8x512xf32>
    %cst_44 = arith.constant 0.000000e+00 : f32
    %121 = vector.broadcast %cst_44 : f32 to vector<8x512xf32>
    %122 = arith.maximumf %120, %121 : vector<8x512xf32>
    %cst_45 = arith.constant dense<0.000000e+00> : vector<512xf32>
    %123 = vector.multi_reduction <add>, %122, %cst_45 [0] : vector<8x512xf32> to vector<512xf32>
    %124 = vector.shape_cast %123 : vector<512xf32> to vector<1x512xf32>
    %cst_46 = arith.constant 8.000000e+00 : f32
    %125 = vector.broadcast %cst_46 : f32 to vector<1x512xf32>
    %126 = arith.divf %124, %125 : vector<1x512xf32>
    %127 = arith.truncf %126 : vector<1x512xf32> to vector<1x512xbf16>
    %c0_47 = arith.constant 0 : index
    %c0_48 = arith.constant 0 : index
    %128 = vector.load %arg14[%c0_47, %c0_48] : memref<512x256xbf16, #tpu.memory_space<vmem>>, vector<512x256xbf16>
    %cst_49 = arith.constant dense<0.000000e+00> : vector<1x256xf32>
    %129 = tpu.matmul %127, %128, %cst_49 {dimension_numbers = #tpu.dot_dimension_numbers<[1], [0], [0], [1], [0, 0, 1, 1], [], []>} : vector<1x512xbf16>, vector<512x256xbf16>, vector<1x256xf32> -> vector<1x256xf32>
    %c0_50 = arith.constant 0 : index
    %c0_51 = arith.constant 0 : index
    %130 = vector.load %arg15[%c0_50, %c0_51] : memref<1x256xf32, #tpu.memory_space<vmem>>, vector<1x256xf32>
    %131 = arith.addf %129, %130 : vector<1x256xf32>
    %cst_52 = arith.constant 0.000000e+00 : f32
    %132 = vector.broadcast %cst_52 : f32 to vector<1x256xf32>
    %133 = arith.maximumf %131, %132 : vector<1x256xf32>
    %134 = arith.truncf %133 : vector<1x256xf32> to vector<1x256xbf16>
    %c0_53 = arith.constant 0 : index
    %c0_54 = arith.constant 0 : index
    %135 = vector.load %arg16[%c0_53, %c0_54] : memref<256x40xbf16, #tpu.memory_space<vmem>>, vector<256x40xbf16>
    %cst_55 = arith.constant dense<0.000000e+00> : vector<1x40xf32>
    %136 = tpu.matmul %134, %135, %cst_55 {dimension_numbers = #tpu.dot_dimension_numbers<[1], [0], [0], [1], [0, 0, 1, 1], [], []>} : vector<1x256xbf16>, vector<256x40xbf16>, vector<1x40xf32> -> vector<1x40xf32>
    %c0_56 = arith.constant 0 : index
    %c0_57 = arith.constant 0 : index
    %137 = vector.load %arg17[%c0_56, %c0_57] : memref<1x40xf32, #tpu.memory_space<vmem>>, vector<1x40xf32>
    %138 = arith.addf %136, %137 : vector<1x40xf32>
    %139 = vector.shape_cast %138 : vector<1x40xf32> to vector<1x1x40xf32>
    %c0_58 = arith.constant 0 : index
    %c0_59 = arith.constant 0 : index
    %c0_60 = arith.constant 0 : index
    %140 = vector.load %arg18[%c0_58, %c0_59, %c0_60] : memref<1x1x40xf32, #tpu.memory_space<vmem>>, vector<1x1x40xf32>
    tpu.vector_store %arg18[%c0_58, %c0_59, %c0_60], %139 {strides = array<i32>} : memref<1x1x40xf32, #tpu.memory_space<vmem>>, vector<1x1x40xf32>,
    return
  }
  func.func @transform_0(%arg0: i32) -> (i32, i32, i32) {
    %c0_i32 = arith.constant 0 : i32
    %c0_i32_0 = arith.constant 0 : i32
    %c0_i32_1 = arith.constant 0 : i32
    return %arg0, %c0_i32, %c0_i32_0 : i32, i32, i32
  }
  func.func @transform_1(%arg0: i32) -> (i32, i32) {
    %c0_i32 = arith.constant 0 : i32
    %c0_i32_0 = arith.constant 0 : i32
    %c0_i32_1 = arith.constant 0 : i32
    return %c0_i32, %c0_i32_0 : i32, i32
  }
  func.func @transform_2(%arg0: i32) -> (i32, i32) {
    %c0_i32 = arith.constant 0 : i32
    %c0_i32_0 = arith.constant 0 : i32
    %c0_i32_1 = arith.constant 0 : i32
    return %c0_i32, %c0_i32_0 : i32, i32
  }
  func.func @transform_3(%arg0: i32) -> (i32, i32) {
    %c0_i32 = arith.constant 0 : i32
    %c0_i32_0 = arith.constant 0 : i32
    %c0_i32_1 = arith.constant 0 : i32
    return %c0_i32, %c0_i32_0 : i32, i32
  }
  func.func @transform_4(%arg0: i32) -> (i32, i32) {
    %c0_i32 = arith.constant 0 : i32
    %c0_i32_0 = arith.constant 0 : i32
    %c0_i32_1 = arith.constant 0 : i32
    return %c0_i32, %c0_i32_0 : i32, i32
  }
  func.func @transform_5(%arg0: i32) -> (i32, i32) {
    %c0_i32 = arith.constant 0 : i32
    %c0_i32_0 = arith.constant 0 : i32
    %c0_i32_1 = arith.constant 0 : i32
    return %c0_i32, %c0_i32_0 : i32, i32
  }
  func.func @transform_6(%arg0: i32) -> (i32, i32) {
    %c0_i32 = arith.constant 0 : i32
    %c0_i32_0 = arith.constant 0 : i32
    %c0_i32_1 = arith.constant 0 : i32
    return %c0_i32, %c0_i32_0 : i32, i32
  }
  func.func @transform_7(%arg0: i32) -> (i32, i32) {
    %c0_i32 = arith.constant 0 : i32
    %c0_i32_0 = arith.constant 0 : i32
    %c0_i32_1 = arith.constant 0 : i32
    return %c0_i32, %c0_i32_0 : i32, i32
  }
  func.func @transform_8(%arg0: i32) -> (i32, i32) {
    %c0_i32 = arith.constant 0 : i32
    %c0_i32_0 = arith.constant 0 : i32
    %c0_i32_1 = arith.constant 0 : i32
    return %c0_i32, %c0_i32_0 : i32, i32
  }
  func.func @transform_9(%arg0: i32) -> (i32, i32) {
    %c0_i32 = arith.constant 0 : i32
    %c0_i32_0 = arith.constant 0 : i32
    %c0_i32_1 = arith.constant 0 : i32
    return %c0_i32, %c0_i32_0 : i32, i32
  }
  func.func @transform_10(%arg0: i32) -> (i32, i32) {
    %c0_i32 = arith.constant 0 : i32
    %c0_i32_0 = arith.constant 0 : i32
    %c0_i32_1 = arith.constant 0 : i32
    return %c0_i32, %c0_i32_0 : i32, i32
  }
  func.func @transform_11(%arg0: i32) -> (i32, i32) {
    %c0_i32 = arith.constant 0 : i32
    %c0_i32_0 = arith.constant 0 : i32
    %c0_i32_1 = arith.constant 0 : i32
    return %c0_i32, %c0_i32_0 : i32, i32
  }
  func.func @transform_12(%arg0: i32) -> (i32, i32) {
    %c0_i32 = arith.constant 0 : i32
    %c0_i32_0 = arith.constant 0 : i32
    %c0_i32_1 = arith.constant 0 : i32
    return %c0_i32, %c0_i32_0 : i32, i32
  }
  func.func @transform_13(%arg0: i32) -> (i32, i32) {
    %c0_i32 = arith.constant 0 : i32
    %c0_i32_0 = arith.constant 0 : i32
    %c0_i32_1 = arith.constant 0 : i32
    return %c0_i32, %c0_i32_0 : i32, i32
  }
  func.func @transform_14(%arg0: i32) -> (i32, i32) {
    %c0_i32 = arith.constant 0 : i32
    %c0_i32_0 = arith.constant 0 : i32
    %c0_i32_1 = arith.constant 0 : i32
    return %c0_i32, %c0_i32_0 : i32, i32
  }
  func.func @transform_15(%arg0: i32) -> (i32, i32) {
    %c0_i32 = arith.constant 0 : i32
    %c0_i32_0 = arith.constant 0 : i32
    %c0_i32_1 = arith.constant 0 : i32
    return %c0_i32, %c0_i32_0 : i32, i32
  }
  func.func @transform_16(%arg0: i32) -> (i32, i32) {
    %c0_i32 = arith.constant 0 : i32
    %c0_i32_0 = arith.constant 0 : i32
    %c0_i32_1 = arith.constant 0 : i32
    return %c0_i32, %c0_i32_0 : i32, i32
  }
  func.func @transform_17(%arg0: i32) -> (i32, i32, i32) {
    %c0_i32 = arith.constant 0 : i32
    %c0_i32_0 = arith.constant 0 : i32
    %c0_i32_1 = arith.constant 0 : i32
    return %arg0, %c0_i32, %c0_i32_0 : i32, i32, i32
  }
}

</mosaic_0001>

<bundles_post_ra>
// kernel: tps_stn_forward.1
= control target key start
LH: loop header
LB: loop body
LE: loop exit
PB: predicated region body
PF: predicated region fallthrough
CT: control target
= control target key end

     0   :  { %s17387_s24 = smov 0   ;;  %s23443_s0 = inlined_call_operand.vmem [shape: bf16[2,512,9], index: 0, kind: input, shape index: {}]   ;;  %s23444_s1 = inlined_call_operand.vmem [shape: bf16[9,64], index: 1, kind: input, shape index: {}]   ;;  %s23445_s2 = inlined_call_operand.vmem [shape: f32[1,64], index: 2, kind: input, shape index: {}]   ;;  %s23446_s3 = inlined_call_operand.vmem [shape: f32[1,64], index: 3, kind: input, shape index: {}]   ;;  %s23447_s4 = inlined_call_operand.vmem [shape: bf16[576,128], index: 4, kind: input, shape index: {}]   ;;  %s23448_s5 = inlined_call_operand.vmem [shape: f32[1,128], index: 5, kind: input, shape index: {}]   ;;  %s23449_s6 = inlined_call_operand.vmem [shape: f32[1,128], index: 6, kind: input, shape index: {}]   ;;  %s23450_s7 = inlined_call_operand.vmem [shape: bf16[1152,256], index: 7, kind: input, shape index: {}]   ;;  %s23451_s8 = inlined_call_operand.vmem [shape: f32[1,256], index: 8, kind: input, shape index: {}]   ;;  %s23452_s9 = inlined_call_operand.vmem [shape: f32[1,256], index: 9, kind: input, shape index: {}]   ;;  %s23453_s10 = inlined_call_operand.vmem [shape: bf16[2304,512], index: 10, kind: input, shape index: {}]   ;;  %s23454_s11 = inlined_call_operand.vmem [shape: f32[1,512], index: 11, kind: input, shape index: {}]   ;;  %s23455_s12 = inlined_call_operand.vmem [shape: f32[1,512], index: 12, kind: input, shape index: {}]   ;;  %s23456_s13 = inlined_call_operand.vmem [shape: bf16[512,256], index: 13, kind: input, shape index: {}]   ;;  %s23457_s14 = inlined_call_operand.vmem [shape: f32[1,256], index: 14, kind: input, shape index: {}]   ;;  %s23458_s15 = inlined_call_operand.vmem [shape: bf16[256,40], index: 15, kind: input, shape index: {}]   ;;  %s23459_s16 = inlined_call_operand.vmem [shape: f32[1,40], index: 16, kind: input, shape index: {}]   ;;  %s23460_s17 = inlined_call_operand.vmem [shape: f32[2,1,40], index: 17, kind: output, shape index: {}]  }
   0x1   :  { %23478 = sst [smem:[#allocation81_spill]] %s23443_s0 }
   0x2   :  { %23479 = sst [smem:[#allocation82_spill]] %s23444_s1 }
   0x3 LB: > { %s14640_s25 = sadd.s32 4294967295, %s17291_s24   ;;  %p14644_p0 = scmp.ge.s32.totalorder %s17291_s24, 1  ;;  %s17291_s24 = sphi %s17387_s24, %s27_s24  }
   0x4   : > { %p487_p1 = scmp.lt.s32.totalorder %s17291_s24, 3 }
   0x6   : > { %p488_p2 = pnand %p14644_p0, %p487_p1 }
   0x8   : > { %491 = sbr.rel (%p488_p2) target bundleno = 3387 (0xd3b), region = 88 }
   0xf   : > { %s23480_s28 = sld [smem:[#allocation82_spill]]  ;;  %vm874_vm0 = vcmask 1043456   ;;  %vm875_vm1 = vcmask 1044480   ;;  %p537_p3 = scmp.lt.s32.totalorder %s14640_s25, 1  ;;  %v17293_v1 = vmov 65535   ;;  %vm777_vm2 = vcmask 72704  }
  0x10   : > { %v876_v2 = vsel %vm874_vm0, 4294967295, %v17293_v1  ;;  %s23481_s18 = sld [smem:[#allocation81_spill]]  ;;  %v17294_v37 = vmov 1983009808   ;;  %v1444_v39 = vlaneseq  ;;  %v17474_v40 = vld [vmem:[%s23445_s2] ss:$0 sm:$0xff] }
  0x11   : > { %v877_v3 = vsel %vm875_vm1, %v876_v2, 0  ;;  %s23693_s25 = smov (!%p537_p3, %s14640_s25), 1  ;;  %v1442_v38 = vunpack.c.l.s4 %v17294_v37  ;;  %v17479_v41 = vld [vmem:[%s23446_s3] ss:$0 sm:$0xff]  ;;  %vm2784_vm3 = vcmask 517120   ;;  %vm4577_vm4 = vcmask 523264  }
  0x12   : > { %s15595_s29 = sshll.u32 %s23693_s25, 8  ;;  %v17481_v43 = vshrl.u32 %v1444_v39, 7  ;;  %vm5346_vm5 = vcmask 1041409   ;;  %vm5348_vm6 = vcmask 1042434   ;;  %vm5350_vm7 = vcmask 1043459   ;;  %s17295_s20 = smov 64  }
  0x13   : > { %v1443_v42 = vunpack.c.0.s8 %v1442_v38  ;;  %vm5352_vm8 = vcmask 1044484   ;;  %vm5354_vm9 = vcmask 1045509   ;;  %vm5356_vm10 = vcmask 1046534   ;;  %s544_s27 = scalar_lea.vmem %s23460_s17, %s23693_s25 }
  0x14   : > { %23482 = vst [vmem:[#allocation2_spill] sm:$0xff] %v17481_v43  ;;  %vm5358_vm11 = vcmask 1047559   ;;  %vm23477_vm12 = vcmask 1040384   ;;  %vm5555_vm13 = vsmask.f32 256  ;;  %vm5688_vm0 = vcmask 1046528  }
  0x15   : > { %v16011_v0 = vld [vmem:[%s23480_s28] sm:$0x1f]   ;;  %v17487_v50 = vsub.s32 %v1443_v42, %v17481_v43  ;;  %vm19306_vm14 = vmand %vm23477_vm12, %vm5555_vm13  ;;  %vm5575_vm15 = vsmask.f32 7424  ;;  %vm7555_vm13 = vsmask.f32 7440 }
  0x16   : > { %v879_v4 = vand.u32 %v16011_v0, %v877_v3  ;;  %s17405_s19 = scalar_lea.vmem %s23481_s18, %s15595_s29 }
  0x17   : > { %v16012_v5 = vld [vmem:[%s17405_s19] sm:$0xff]   ;;  %v16013_v6 = vld [vmem:[%s17405_s19 + $0x8] sm:$0xff]   ;;  %v16014_v7 = vld [vmem:[%s17405_s19 + $0x10] sm:$0xff]  }
  0x18   : > { %15791 = vmatprep.subr.bf16.mxu0 %v879_v4  ;;  %15793 = vmatprep.mubr.msk.bf16.mxu0 %vm777_vm2, %v16012_v5  ;;  %v16015_v8 = vld [vmem:[%s17405_s19 + $0x18] sm:$0xff]   ;;  %v16016_v9 = vld [vmem:[%s17405_s19 + $0x20] sm:$0xff]   ;;  %v16017_v10 = vld [vmem:[%s17405_s19 + $0x28] sm:$0xff]  }
  0x19   : > { %15792 = vmatpush3.bf16.msra.mxu0 %v879_v4  ;;  %v16018_v11 = vld [vmem:[%s17405_s19 + $0x30] sm:$0xff]   ;;  %v16019_v12 = vld [vmem:[%s17405_s19 + $0x38] sm:$0xff]   ;;  %v16020_v13 = vld [vmem:[%s17405_s19 + $0x40] sm:$0xff]  }
  0x1a   : > { %v16021_v14 = vld [vmem:[%s17405_s19 + $0x48] sm:$0xff]   ;;  %v16022_v15 = vld [vmem:[%s17405_s19 + $0x50] sm:$0xff]   ;;  %v16023_v16 = vld [vmem:[%s17405_s19 + $0x58] sm:$0xff]  }
  0x1b   : > { %v16024_v17 = vld [vmem:[%s17405_s19 + $0x60] sm:$0xff]   ;;  %v16025_v18 = vld [vmem:[%s17405_s19 + $0x68] sm:$0xff]   ;;  %v16026_v19 = vld [vmem:[%s17405_s19 + $0x70] sm:$0xff]  }
  0x1c   : > { %15794 = vmatmul.mubr.msk.bf16.vlgmr.msra.gmra.mrb[0].mxu0 %vm777_vm2, %v16013_v6  ;;  %v16027_v20 = vld [vmem:[%s17405_s19 + $0x78] sm:$0xff]   ;;  %v16028_v21 = vld [vmem:[%s17405_s19 + $0x80] sm:$0xff]   ;;  %v16029_v22 = vld [vmem:[%s17405_s19 + $0x88] sm:$0xff]  }
  0x1d   : > { %15797 = vmatprep.mubr.msk.bf16.mxu0 %vm777_vm2, %v16014_v7  ;;  %v16030_v23 = vld [vmem:[%s17405_s19 + $0x90] sm:$0xff]   ;;  %v16031_v24 = vld [vmem:[%s17405_s19 + $0x98] sm:$0xff]   ;;  %v16032_v25 = vld [vmem:[%s17405_s19 + $0xa0] sm:$0xff]  }
  0x1e   : > { %v16033_v26 = vld [vmem:[%s17405_s19 + $0xa8] sm:$0xff]   ;;  %v16034_v27 = vld [vmem:[%s17405_s19 + $0xb0] sm:$0xff]   ;;  %v16035_v28 = vld [vmem:[%s17405_s19 + $0xb8] sm:$0xff]  }
  0x1f   : > { %v16036_v29 = vld [vmem:[%s17405_s19 + $0xc0] sm:$0xff]   ;;  %v16037_v30 = vld [vmem:[%s17405_s19 + $0xc8] sm:$0xff]   ;;  %v16038_v31 = vld [vmem:[%s17405_s19 + $0xd0] sm:$0xff]  }
  0x20   : > { %v16039_v32 = vld [vmem:[%s17405_s19 + $0xd8] sm:$0xff]   ;;  %v16040_v33 = vld [vmem:[%s17405_s19 + $0xe0] sm:$0xff]   ;;  %v16041_v34 = vld [vmem:[%s17405_s19 + $0xe8] sm:$0xff]  }
  0x21   : > { %v16042_v35 = vld [vmem:[%s17405_s19 + $0xf0] sm:$0xff]   ;;  %v16043_v36 = vld [vmem:[%s17405_s19 + $0xf8] sm:$0xff]  }
  0x24   : > { %15798 = vmatmul.mubr.msk.bf16.gmra.mrb[4].mxu0 %vm777_vm2, %v16015_v8 }
  0x25   : > { %15801 = vmatprep.mubr.msk.bf16.mxu0 %vm777_vm2, %v16016_v9 }
  0x2c   : > { %15802 = vmatmul.mubr.msk.bf16.gmra.mrb[8].mxu0 %vm777_vm2, %v16017_v10 }
  0x2d   : > { %15805 = vmatprep.mubr.msk.bf16.mxu0 %vm777_vm2, %v16018_v11 }
  0x34   : > { %15806 = vmatmul.mubr.msk.bf16.gmra.mrb[12].mxu0 %vm777_vm2, %v16019_v12 }
  0x35   : > { %15809 = vmatprep.mubr.msk.bf16.mxu0 %vm777_vm2, %v16020_v13 }
  0x3c   : > { %15810 = vmatmul.mubr.msk.bf16.gmra.mrb[16].mxu0 %vm777_vm2, %v16021_v14 }
  0x3d   : > { %15813 = vmatprep.mubr.msk.bf16.mxu0 %vm777_vm2, %v16022_v15 }
  0x44   : > { %15814 = vmatmul.mubr.msk.bf16.gmra.mrb[20].mxu0 %vm777_vm2, %v16023_v16 }
  0x45   : > { %15817 = vmatprep.mubr.msk.bf16.mxu0 %vm777_vm2, %v16024_v17 }
  0x4c   : > { %15818 = vmatmul.mubr.msk.bf16.gmra.mrb[24].mxu0 %vm777_vm2, %v16025_v18 }
  0x4d   : > { %15821 = vmatprep.mubr.msk.bf16.mxu0 %vm777_vm2, %v16026_v19 }
  0x54   : > { %15822 = vmatmul.mubr.msk.bf16.gmra.mrb[28].mxu0 %vm777_vm2, %v16027_v20 }
  0x55   : > { %15825 = vmatprep.mubr.msk.bf16.mxu0 %vm777_vm2, %v16028_v21 }
  0x5c   : > { %15826 = vmatmul.mubr.msk.bf16.gmra.mrb[32].mxu0 %vm777_vm2, %v16029_v22 }
  0x5d   : > { %15829 = vmatprep.mubr.msk.bf16.mxu0 %vm777_vm2, %v16030_v23 }
  0x64   : > { %15830 = vmatmul.mubr.msk.bf16.gmra.mrb[36].mxu0 %vm777_vm2, %v16031_v24 }
  0x65   : > { %15833 = vmatprep.mubr.msk.bf16.mxu0 %vm777_vm2, %v16032_v25 }
  0x6c   : > { %15834 = vmatmul.mubr.msk.bf16.gmra.mrb[40].mxu0 %vm777_vm2, %v16033_v26 }
  0x6d   : > { %15837 = vmatprep.mubr.msk.bf16.mxu0 %vm777_vm2, %v16034_v27 }
  0x74   : > { %15838 = vmatmul.mubr.msk.bf16.gmra.mrb[44].mxu0 %vm777_vm2, %v16035_v28 }
  0x75   : > { %15841 = vmatprep.mubr.msk.bf16.mxu0 %vm777_vm2, %v16036_v29 }
  0x7c   : > { %15842 = vmatmul.mubr.msk.bf16.gmra.mrb[48].mxu0 %vm777_vm2, %v16037_v30 }
  0x7d   : > { %15845 = vmatprep.mubr.msk.bf16.mxu0 %vm777_vm2, %v16038_v31 }
  0x84   : > { %15846 = vmatmul.mubr.msk.bf16.gmra.mrb[52].mxu0 %vm777_vm2, %v16039_v32 }
  0x85   : > { %15849 = vmatprep.mubr.msk.bf16.mxu0 %vm777_vm2, %v16040_v33 }
  0x8c   : > { %15850 = vmatmul.mubr.msk.bf16.gmra.mrb[56].mxu0 %vm777_vm2, %v16041_v34 }
  0x8d   : > { %15853 = vmatprep.mubr.msk.bf16.mxu0 %vm777_vm2, %v16042_v35 }
  0x94   : > { %15854 = vmatmul.mubr.msk.bf16.gmra.mrb[60].mxu0 %vm777_vm2, %v16043_v36  ;;  %vm6881_vm2 = vcmask 1041408  }
  0xef   : > { %v15795_v44 = vpop.f32.mrb[0].mxu0 }
  0xf0   : > { %v1179_v45 = vmul.f32 %v15795_v44, %v17474_v40  ;;  %v915_v46 = vpop.f32.mrb[1].mxu0 }
  0xf1   : > { %v1177_v47 = vmul.f32 %v17474_v40, %v915_v46  ;;  %v15796_v48 = vpop.f32.mrb[2].mxu0 }
  0xf2   : > { %v1250_v49 = vadd.f32 %v17479_v41, %v1179_v45  ;;  %v1180_v51 = vmul.f32 %v15796_v48, %v17474_v40  ;;  %v918_v52 = vpop.f32.mrb[3].mxu0 }
  0xf3   : > { %v1248_v53 = vadd.f32 %v17479_v41, %v1177_v47  ;;  %v1178_v54 = vmul.f32 %v17474_v40, %v918_v52 }
  0xf4   : > { %v1314_v55 = vmax.f32 %v1250_v49, 0.0  ;;  %v1251_v56 = vadd.f32 %v17479_v41, %v1180_v51 }
  0xf5   : > { %v1312_v57 = vmax.f32 %v1248_v53, 0.0  ;;  %v1249_v63 = vadd.f32 %v17479_v41, %v1178_v54 }
  0xf6   : > { %v1474_v58 = vcombine.high %v1314_v55, %v1314_v55  ;;  %v1481_v59 = vrot.slane %v1314_v55, %v17487_v50  ;;  %v17494_v60 = vmax.f32 %v1251_v56, 0.0 }
  0xf7   : > { %v1440_v61 = vcombine.high %v1312_v57, %v1312_v57  ;;  %v1447_v62 = vrot.slane %v1312_v57, %v17487_v50  ;;  %v17498_v0 = vpop.f32.mrb[4].mxu0 }
  0xf8   : > { %v1488_v1 = vrot.slane %v1474_v58, %v17487_v50  ;;  %v1489_v2 = vcombine.high %v1481_v59, %v1481_v59  ;;  %v2841_v3 = vsel %vm2784_vm3, %v1481_v59, -inf  ;;  %v1491_v4 = vcombine.high %v17494_v60, %v17494_v60  ;;  %v17504_v5 = vpop.f32.mrb[5].mxu0 }
  0xf9   : > { %v2842_v6 = vrot.slane %v2841_v3, 4  ;;  %v1454_v7 = vrot.slane %v1440_v61, %v17487_v50  ;;  %v1455_v8 = vcombine.high %v1447_v62, %v1447_v62  ;;  %v2785_v9 = vsel %vm2784_vm3, %v1447_v62, -inf  ;;  %v17508_v10 = vpop.f32.mrb[6].mxu0 }
  0xfa   : > { %v1490_v11 = vcombine.high %v1488_v1, %v1488_v1  ;;  %v2848_v12 = vsel %vm2784_vm3, %v1489_v2, -inf  ;;  %v2855_v13 = vsel %vm2784_vm3, %v1488_v1, -inf  ;;  %v2786_v14 = vrot.slane %v2785_v9, 4  ;;  %v17512_v15 = vpop.f32.mrb[7].mxu0 }
  0xfb   : > { %v2843_v16 = vmax.f32 %v2841_v3, %v2842_v6  ;;  %v2849_v17 = vrot.slane %v2848_v12, 4  ;;  %v2856_v18 = vrot.slane %v2855_v13, 4  ;;  %v1456_v19 = vcombine.high %v1454_v7, %v1454_v7 }
  0xfc   : > { %v2862_v20 = vsel %vm2784_vm3, %v1490_v11, -inf  ;;  %v2787_v21 = vmax.f32 %v2785_v9, %v2786_v14  ;;  %v2792_v22 = vsel %vm2784_vm3, %v1455_v8, -inf  ;;  %v2799_v23 = vsel %vm2784_vm3, %v1454_v7, -inf }
  0xfd   : > { %v2844_v24 = vrot.slane %v2843_v16, 2  ;;  %v2850_v25 = vmax.f32 %v2848_v12, %v2849_v17  ;;  %v2857_v26 = vmax.f32 %v2855_v13, %v2856_v18  ;;  %v2863_v27 = vrot.slane %v2862_v20, 4 }
  0xfe   : > { %v2788_v28 = vrot.slane %v2787_v21, 2  ;;  %v2793_v29 = vrot.slane %v2792_v22, 4  ;;  %v2800_v30 = vrot.slane %v2799_v23, 4  ;;  %v2806_v31 = vsel %vm2784_vm3, %v1456_v19, -inf }
  0xff   : > { %v2845_v32 = vmax.f32 %v2843_v16, %v2844_v24  ;;  %v2851_v33 = vrot.slane %v2850_v25, 2  ;;  %v2858_v34 = vrot.slane %v2857_v26, 2  ;;  %v2864_v35 = vmax.f32 %v2862_v20, %v2863_v27  ;;  %v17518_v36 = vpop.f32.mrb[8].mxu0 }
 0x100   : > { %v2789_v37 = vmax.f32 %v2787_v21, %v2788_v28  ;;  %v2794_v38 = vmax.f32 %v2792_v22, %v2793_v29  ;;  %v2801_v39 = vmax.f32 %v2799_v23, %v2800_v30  ;;  %v2807_v42 = vrot.slane %v2806_v31, 4  ;;  %v17520_v44 = vpop.f32.mrb[9].mxu0 }
 0x101   : > { %v2846_v45 = vrot.slane %v2845_v32, 1  ;;  %v2852_v46 = vmax.f32 %v2850_v25, %v2851_v33  ;;  %v2859_v47 = vmax.f32 %v2857_v26, %v2858_v34  ;;  %v2865_v48 = vrot.slane %v2864_v35, 2  ;;  %v17522_v49 = vpop.f32.mrb[10].mxu0 }
 0x102   : > { %v2790_v51 = vrot.slane %v2789_v37, 1  ;;  %v2795_v52 = vrot.slane %v2794_v38, 2  ;;  %v2802_v53 = vrot.slane %v2801_v39, 2  ;;  %v2808_v54 = vmax.f32 %v2806_v31, %v2807_v42  ;;  %v17524_v55 = vpop.f32.mrb[11].mxu0 }
 0x103   : > { %v2847_v56 = vmax.f32 %v2845_v32, %v2846_v45  ;;  %v2853_v57 = vrot.slane %v2852_v46, 1  ;;  %v2860_v58 = vrot.slane %v2859_v47, 1  ;;  %v2866_v59 = vmax.f32 %v2864_v35, %v2865_v48 }
 0x104   : > { %v2791_v61 = vmax.f32 %v2789_v37, %v2790_v51  ;;  %v2796_v62 = vmax.f32 %v2794_v38, %v2795_v52  ;;  %v2803_v1 = vmax.f32 %v2801_v39, %v2802_v53  ;;  %v2809_v2 = vrot.slane %v2808_v54, 2 }
 0x105   : > { %v2867_v3 = vrot.slane %v2866_v59, 1  ;;  %v1313_v6 = vmax.f32 %v1249_v63, 0.0  ;;  %v2854_v7 = vmax.f32 %v2852_v46, %v2853_v57  ;;  %v17527_v11 = vsel %vm4577_vm4, %v2847_v56, -inf }
 0x106   : > { %v2797_v8 = vrot.slane %v2796_v62, 1  ;;  %v2810_v9 = vmax.f32 %v2808_v54, %v2809_v2  ;;  %v1498_v12 = vrot.slane %v17494_v60, %v17487_v50  ;;  %v2861_v14 = vmax.f32 %v2859_v47, %v2860_v58 }
 0x107   : > { %v17531_v13 = vpop.f32.mrb[12].mxu0  ;;  %v2804_v16 = vrot.slane %v2803_v1, 1  ;;  %v17534_v17 = vsel %vm4577_vm4, %v2791_v61, -inf  ;;  %v1505_v63 = vrot.slane %v1491_v4, %v17487_v50  ;;  %v2868_v19 = vmax.f32 %v2866_v59, %v2867_v3 }
 0x108   : > { %v17540_v18 = vpop.f32.mrb[13].mxu0  ;;  %v1506_v20 = vcombine.high %v1498_v12, %v1498_v12  ;;  %v2869_v21 = vsel %vm2784_vm3, %v1498_v12, -inf  ;;  %v1457_v22 = vcombine.high %v1313_v6, %v1313_v6  ;;  %v17546_v24 = vsel %vm4577_vm4, %v2854_v7, -inf }
 0x109   : > { %v17543_v23 = vpop.f32.mrb[14].mxu0  ;;  %v2798_v25 = vmax.f32 %v2796_v62, %v2797_v8  ;;  %v2811_v26 = vrot.slane %v2810_v9, 1  ;;  %v1507_v27 = vcombine.high %v1505_v63, %v1505_v63  ;;  %v2870_v29 = vrot.slane %v2869_v21, 4 }
 0x10a   : > { %v17548_v28 = vpop.f32.mrb[15].mxu0  ;;  %v2876_v60 = vsel %vm2784_vm3, %v1506_v20, -inf  ;;  %v2883_v4 = vsel %vm2784_vm3, %v1505_v63, -inf  ;;  %v1464_v30 = vrot.slane %v1313_v6, %v17487_v50  ;;  %v2805_v31 = vmax.f32 %v2803_v1, %v2804_v16 }
 0x10b   : > { %v2877_v32 = vrot.slane %v2876_v60, 4  ;;  %v2884_v33 = vrot.slane %v2883_v4, 4  ;;  %v2890_v34 = vsel %vm2784_vm3, %v1507_v27, -inf  ;;  %v2871_v35 = vmax.f32 %v2869_v21, %v2870_v29 }
 0x10c   : > { %v2891_v37 = vrot.slane %v2890_v34, 4  ;;  %v1471_v38 = vrot.slane %v1457_v22, %v17487_v50  ;;  %v1472_v39 = vcombine.high %v1464_v30, %v1464_v30  ;;  %v2812_v42 = vmax.f32 %v2810_v9, %v2811_v26 }
 0x10d   : > { %v2878_v45 = vmax.f32 %v2876_v60, %v2877_v32  ;;  %v2885_v46 = vmax.f32 %v2883_v4, %v2884_v33  ;;  %v2813_v47 = vsel %vm2784_vm3, %v1464_v30, -inf  ;;  %v2872_v48 = vrot.slane %v2871_v35, 2 }
 0x10e   : > { %v2892_v51 = vmax.f32 %v2890_v34, %v2891_v37  ;;  %v1473_v52 = vcombine.high %v1471_v38, %v1471_v38  ;;  %v2814_v53 = vrot.slane %v2813_v47, 4  ;;  %v2820_v57 = vsel %vm2784_vm3, %v1472_v39, -inf }
 0x10f   : > { %v2879_v54 = vrot.slane %v2878_v45, 2  ;;  %v2886_v56 = vrot.slane %v2885_v46, 2  ;;  %v2827_v58 = vsel %vm2784_vm3, %v1471_v38, -inf  ;;  %v2873_v59 = vmax.f32 %v2871_v35, %v2872_v48 }
 0x110   : > { %v2893_v61 = vrot.slane %v2892_v51, 2  ;;  %v2815_v62 = vmax.f32 %v2813_v47, %v2814_v53  ;;  %v2821_v1 = vrot.slane %v2820_v57, 4  ;;  %v2828_v6 = vrot.slane %v2827_v58, 4 }
 0x111   : > { %v2880_v2 = vmax.f32 %v2878_v45, %v2879_v54  ;;  %v2887_v3 = vmax.f32 %v2885_v46, %v2886_v56  ;;  %v2834_v7 = vsel %vm2784_vm3, %v1473_v52, -inf  ;;  %v2874_v8 = vrot.slane %v2873_v59, 1 }
 0x112   : > { %v2894_v9 = vmax.f32 %v2892_v51, %v2893_v61  ;;  %v2816_v12 = vrot.slane %v2815_v62, 2  ;;  %v2822_v16 = vmax.f32 %v2820_v57, %v2821_v1  ;;  %v2829_v21 = vmax.f32 %v2827_v58, %v2828_v6 }
 0x113   : > { %v2881_v63 = vrot.slane %v2880_v2, 1  ;;  %v2888_v20 = vrot.slane %v2887_v3, 1  ;;  %v2835_v22 = vrot.slane %v2834_v7, 4  ;;  %v1183_v60 = vmul.f32 %v17498_v0, %v17474_v40 }
 0x114   : > { %v2895_v26 = vrot.slane %v2894_v9, 1  ;;  %v2817_v27 = vmax.f32 %v2815_v62, %v2816_v12  ;;  %v2823_v29 = vrot.slane %v2822_v16, 2  ;;  %v17562_v4 = vsel %vm4577_vm4, %v2861_v14, -inf }
 0x115   : > { %v17565_v30 = vsel %vm4577_vm4, %v2868_v19, -inf  ;;  %v2830_v32 = vrot.slane %v2829_v21, 2  ;;  %v2836_v33 = vmax.f32 %v2834_v7, %v2835_v22  ;;  %v2875_v34 = vmax.f32 %v2873_v59, %v2874_v8 }
 0x116   : > { %v2882_v35 = vmax.f32 %v2880_v2, %v2881_v63  ;;  %v2818_v37 = vrot.slane %v2817_v27, 1  ;;  %v2824_v38 = vmax.f32 %v2822_v16, %v2823_v29  ;;  %v17568_v39 = vsel %vm4577_vm4, %v2798_v25, -inf }
 0x117   : > { %v17571_v45 = vsel %vm4577_vm4, %v2805_v31, -inf  ;;  %v2889_v46 = vmax.f32 %v2887_v3, %v2888_v20  ;;  %v2837_v0 = vrot.slane %v2836_v33, 2  ;;  %v17574_v14 = vsel %vm4577_vm4, %v2812_v42, -inf }
 0x118   : > { %v2896_v47 = vmax.f32 %v2894_v9, %v2895_v26  ;;  %v17576_v19 = vmax.f32 %v2829_v21, %v2830_v32  ;;  %v1254_v48 = vadd.f32 %v17479_v41, %v1183_v60  ;;  %v2819_v51 = vmax.f32 %v2817_v27, %v2818_v37 }
 0x119   : > { %v2825_v52 = vrot.slane %v2824_v38, 1  ;;  %v1181_v53 = vmul.f32 %v17474_v40, %v17504_v5  ;;  %v1184_v25 = vmul.f32 %v17508_v10, %v17474_v40  ;;  %v17584_v31 = vsel %vm4577_vm4, %v2875_v34, -inf  ;;  %v17596_v5 = vpop.f32.mrb[16].mxu0 }
 0x11a   : > { %v17587_v54 = vsel %vm4577_vm4, %v2882_v35, -inf  ;;  %v1318_v42 = vmax.f32 %v1254_v48, 0.0  ;;  %v17590_v56 = vsel %vm4577_vm4, %v2889_v46, -inf  ;;  %v17592_v57 = vmax.f32 %v2836_v33, %v2837_v0 }
 0x11b   : > { %v1252_v58 = vadd.f32 %v17479_v41, %v1181_v53  ;;  %v1255_v59 = vadd.f32 %v17479_v41, %v1184_v25  ;;  %v17599_v10 = vsel %vm4577_vm4, %v2896_v47, -inf  ;;  %v1182_v1 = vmul.f32 %v17474_v40, %v17512_v15  ;;  %v17616_v15 = vpop.f32.mrb[17].mxu0 }
 0x11c   : > { %23483 = vst [vmem:[#allocation3_spill] sm:$0xff] %v17599_v10  ;;  %v1542_v61 = vcombine.high %v1318_v42, %v1318_v42  ;;  %v1549_v62 = vrot.slane %v1318_v42, %v17487_v50  ;;  %v17604_v2 = vmax.f32 %v2824_v38, %v2825_v52  ;;  %v2832_v3 = vrot.slane %v17576_v19, 1 }
 0x11d   : > { %v17608_v6 = vsel %vm4577_vm4, %v2819_v51, -inf  ;;  %v1316_v7 = vmax.f32 %v1252_v58, 0.0  ;;  %v17612_v16 = vmax.f32 %v1255_v59, 0.0  ;;  %v2839_v63 = vrot.slane %v17592_v57, 1 }
 0x11e   : > { %v1556_v8 = vrot.slane %v1542_v61, %v17487_v50  ;;  %v1557_v9 = vcombine.high %v1549_v62, %v1549_v62  ;;  %v2953_v12 = vsel %vm2784_vm3, %v1549_v62, -inf  ;;  %v17621_v29 = vadd.f32 %v17479_v41, %v1182_v1 }
 0x11f   : > { %v2954_v20 = vrot.slane %v2953_v12, 4  ;;  %v1508_v21 = vcombine.high %v1316_v7, %v1316_v7  ;;  %v1515_v40 = vrot.slane %v1316_v7, %v17487_v50  ;;  %v1559_v46 = vcombine.high %v17612_v16, %v17612_v16 }
 0x120   : > { %v1558_v22 = vcombine.high %v1556_v8, %v1556_v8  ;;  %v2960_v26 = vsel %vm2784_vm3, %v1557_v9, -inf  ;;  %v2967_v27 = vsel %vm2784_vm3, %v1556_v8, -inf }
 0x121   : > { %v2955_v60 = vmax.f32 %v2953_v12, %v2954_v20  ;;  %v2961_v32 = vrot.slane %v2960_v26, 4  ;;  %v2968_v33 = vrot.slane %v2967_v27, 4  ;;  %v1522_v34 = vrot.slane %v1508_v21, %v17487_v50 }
 0x122   : > { %v2974_v35 = vsel %vm2784_vm3, %v1558_v22, -inf  ;;  %v1523_v37 = vcombine.high %v1515_v40, %v1515_v40  ;;  %v2897_v38 = vsel %vm2784_vm3, %v1515_v40, -inf }
 0x123   : > { %v2956_v0 = vrot.slane %v2955_v60, 2  ;;  %v2962_v47 = vmax.f32 %v2960_v26, %v2961_v32  ;;  %v2969_v48 = vmax.f32 %v2967_v27, %v2968_v33  ;;  %v2975_v51 = vrot.slane %v2974_v35, 4 }
 0x124   : > { %v1524_v52 = vcombine.high %v1522_v34, %v1522_v34  ;;  %v2898_v41 = vrot.slane %v2897_v38, 4  ;;  %v2904_v53 = vsel %vm2784_vm3, %v1523_v37, -inf  ;;  %v2911_v25 = vsel %vm2784_vm3, %v1522_v34, -inf }
 0x125   : > { %v2957_v42 = vmax.f32 %v2955_v60, %v2956_v0  ;;  %v2963_v58 = vrot.slane %v2962_v47, 2  ;;  %v2970_v59 = vrot.slane %v2969_v48, 2  ;;  %v2976_v61 = vmax.f32 %v2974_v35, %v2975_v51 }
 0x126   : > { %v2899_v62 = vmax.f32 %v2897_v38, %v2898_v41  ;;  %v2905_v1 = vrot.slane %v2904_v53, 4  ;;  %v2912_v7 = vrot.slane %v2911_v25, 4  ;;  %v2918_v8 = vsel %vm2784_vm3, %v1524_v52, -inf }
 0x127   : > { %v2958_v9 = vrot.slane %v2957_v42, 1  ;;  %v2964_v12 = vmax.f32 %v2962_v47, %v2963_v58  ;;  %v2971_v20 = vmax.f32 %v2969_v48, %v2970_v59  ;;  %v2977_v21 = vrot.slane %v2976_v61, 2 }
 0x128   : > { %v2900_v40 = vrot.slane %v2899_v62, 2  ;;  %v2906_v22 = vmax.f32 %v2904_v53, %v2905_v1  ;;  %v2913_v26 = vmax.f32 %v2911_v25, %v2912_v7  ;;  %v2919_v27 = vrot.slane %v2918_v8, 4 }
 0x129   : > { %v2959_v32 = vmax.f32 %v2957_v42, %v2958_v9  ;;  %v2965_v33 = vrot.slane %v2964_v12, 1  ;;  %v2972_v34 = vrot.slane %v2971_v20, 1  ;;  %v2978_v60 = vmax.f32 %v2976_v61, %v2977_v21 }
 0x12a   : > { %v2901_v35 = vmax.f32 %v2899_v62, %v2900_v40  ;;  %v2907_v37 = vrot.slane %v2906_v22, 2  ;;  %v2914_v38 = vrot.slane %v2913_v26, 2  ;;  %v2920_v0 = vmax.f32 %v2918_v8, %v2919_v27  ;;  %v17635_v62 = vpop.f32.mrb[18].mxu0 }
 0x12b   : > { %v2966_v51 = vmax.f32 %v2964_v12, %v2965_v33  ;;  %v2973_v52 = vmax.f32 %v2971_v20, %v2972_v34  ;;  %v2979_v41 = vrot.slane %v2978_v60, 1  ;;  %v4603_v47 = vsel %vm4577_vm4, %v2959_v32, -inf }
 0x12c   : > { %v4604_v48 = vmax.f32 %v17527_v11, %v4603_v47  ;;  %v2902_v53 = vrot.slane %v2901_v35, 1  ;;  %v2908_v25 = vmax.f32 %v2906_v22, %v2907_v37  ;;  %v2915_v58 = vmax.f32 %v2913_v26, %v2914_v38 }
 0x12d   : > { %v2980_v42 = vmax.f32 %v2978_v60, %v2979_v41  ;;  %v4606_v59 = vsel %vm4577_vm4, %v2966_v51, -inf  ;;  %v4609_v61 = vsel %vm4577_vm4, %v2973_v52, -inf  ;;  %v2921_v1 = vrot.slane %v2920_v0, 2 }
 0x12e   : > { %v4607_v7 = vmax.f32 %v17546_v24, %v4606_v59  ;;  %v4610_v8 = vmax.f32 %v17562_v4, %v4609_v61  ;;  %v4970_v9 = vpack.c.bf16 %v4604_v48, %v4604_v48  ;;  %v2903_v12 = vmax.f32 %v2901_v35, %v2902_v53 }
 0x12f   : > { %v4612_v20 = vsel %vm4577_vm4, %v2980_v42, -inf  ;;  %v2909_v11 = vrot.slane %v2908_v25, 1  ;;  %v2916_v21 = vrot.slane %v2915_v58, 1  ;;  %v2922_v40 = vmax.f32 %v2920_v0, %v2921_v1 }
 0x130   : > { %v17641_v22 = vmax.f32 %v17565_v30, %v4612_v20  ;;  %v4971_v26 = vpack.c.bf16 %v4607_v7, %v4607_v7  ;;  %v4972_v27 = vpack.c.bf16 %v4610_v8, %v4610_v8  ;;  %v1566_v32 = vrot.slane %v17612_v16, %v17487_v50 }
 0x131   : > { %v2910_v33 = vmax.f32 %v2908_v25, %v2909_v11  ;;  %v2917_v34 = vmax.f32 %v2915_v58, %v2916_v21  ;;  %v2923_v24 = vrot.slane %v2922_v40, 1  ;;  %v4579_v4 = vsel %vm4577_vm4, %v2903_v12, -inf  ;;  %v17657_v25 = vpop.f32.mrb[19].mxu0 }
 0x132   : > { %v5226_v60 = vunpack.c.l.b16 %v4970_v9  ;;  %v5227_v35 = vunpack.c.l.b16 %v4971_v26  ;;  %v5228_v37 = vunpack.c.l.b16 %v4972_v27  ;;  %v4580_v38 = vmax.f32 %v17534_v17, %v4579_v4 }
 0x133   : > { %v2924_v51 = vmax.f32 %v2922_v40, %v2923_v24  ;;  %v4582_v0 = vsel %vm4577_vm4, %v2910_v33, -inf  ;;  %v4585_v30 = vsel %vm4577_vm4, %v2917_v34, -inf  ;;  %v1573_v52 = vrot.slane %v1559_v46, %v17487_v50 }
 0x134   : > { %v5360_v41 = vsel %vm5346_vm5, %v5227_v35, %v5226_v60  ;;  %v4583_v47 = vmax.f32 %v17568_v39, %v4582_v0  ;;  %v4586_v48 = vmax.f32 %v17571_v45, %v4585_v30  ;;  %v1317_v53 = vmax.f32 %v17621_v29, 0.0 }
 0x135   : > { %v17660_v17 = vsel %vm5348_vm6, %v5228_v37, %v5360_v41  ;;  %v4588_v58 = vsel %vm4577_vm4, %v2924_v51, -inf  ;;  %v4962_v42 = vpack.c.bf16 %v4580_v38, %v4580_v38  ;;  %v1574_v59 = vcombine.high %v1566_v32, %v1566_v32 }
 0x136   : > { %23484 = vst [vmem:[#allocation4_spill] sm:$0xff] %v17660_v17  ;;  %v17664_v16 = vmax.f32 %v17574_v14, %v4588_v58  ;;  %v4963_v46 = vpack.c.bf16 %v4583_v47, %v4583_v47  ;;  %v4964_v61 = vpack.c.bf16 %v4586_v48, %v4586_v48  ;;  %v1575_v1 = vcombine.high %v1573_v52, %v1573_v52 }
 0x137   : > { %v17669_v39 = vmax.f32 %v17576_v19, %v2832_v3  ;;  %v2981_v45 = vsel %vm2784_vm3, %v1566_v32, -inf  ;;  %v2988_v29 = vsel %vm2784_vm3, %v1574_v59, -inf  ;;  %v2995_v7 = vsel %vm2784_vm3, %v1573_v52, -inf }
 0x138   : > { %v5218_v8 = vunpack.c.l.b16 %v4962_v42  ;;  %v5219_v9 = vunpack.c.l.b16 %v4963_v46  ;;  %v5220_v12 = vunpack.c.l.b16 %v4964_v61  ;;  %v2982_v20 = vrot.slane %v2981_v45, 4 }
 0x139   : > { %v2989_v14 = vrot.slane %v2988_v29, 4  ;;  %v2996_v11 = vrot.slane %v2995_v7, 4  ;;  %v3002_v21 = vsel %vm2784_vm3, %v1575_v1, -inf  ;;  %v1525_v40 = vcombine.high %v1317_v53, %v1317_v53 }
 0x13a   : > { %v17677_v26 = vsel %vm4577_vm4, %v17604_v2, -inf  ;;  %v5347_v19 = vsel %vm5346_vm5, %v5219_v9, %v5218_v8  ;;  %v2983_v3 = vmax.f32 %v2981_v45, %v2982_v20  ;;  %v3003_v27 = vrot.slane %v3002_v21, 4 }
 0x13b   : > { %v17681_v32 = vsel %vm5348_vm6, %v5220_v12, %v5347_v19  ;;  %v2990_v33 = vmax.f32 %v2988_v29, %v2989_v14  ;;  %v2997_v34 = vmax.f32 %v2995_v7, %v2996_v11  ;;  %v1532_v24 = vrot.slane %v1317_v53, %v17487_v50 }
 0x13c   : > { %23485 = vst [vmem:[#allocation5_spill] sm:$0xff] %v17681_v32  ;;  %v2840_v4 = vmax.f32 %v17592_v57, %v2839_v63  ;;  %v2984_v60 = vrot.slane %v2983_v3, 2  ;;  %v3004_v35 = vmax.f32 %v3002_v21, %v3003_v27  ;;  %v1539_v2 = vrot.slane %v1525_v40, %v17487_v50  ;;  %v17694_v40 = vpop.f32.mrb[20].mxu0  ;;  %v17700_v27 = vld [vmem:[%s23445_s2] ss:$0 sm:$0xff] }
 0x13d   : > { %v2991_v37 = vrot.slane %v2990_v33, 2  ;;  %v2998_v38 = vrot.slane %v2997_v34, 2  ;;  %v1540_v51 = vcombine.high %v1532_v24, %v1532_v24  ;;  %v2925_v0 = vsel %vm2784_vm3, %v1532_v24, -inf }
 0x13e   : > { %v2985_v30 = vmax.f32 %v2983_v3, %v2984_v60  ;;  %v3005_v52 = vrot.slane %v3004_v35, 2  ;;  %v1541_v41 = vcombine.high %v1539_v2, %v1539_v2  ;;  %v2926_v47 = vrot.slane %v2925_v0, 4 }
 0x13f   : > { %v2992_v48 = vmax.f32 %v2990_v33, %v2991_v37  ;;  %v2999_v58 = vmax.f32 %v2997_v34, %v2998_v38  ;;  %v2932_v53 = vsel %vm2784_vm3, %v1540_v51, -inf  ;;  %v2939_v42 = vsel %vm2784_vm3, %v1539_v2, -inf }
 0x140   : > { %v4973_v57 = vpack.c.bf16 %v17641_v22, %v17641_v22  ;;  %v2986_v63 = vrot.slane %v2985_v30, 1  ;;  %v2927_v59 = vmax.f32 %v2925_v0, %v2926_v47  ;;  %v2933_v46 = vrot.slane %v2932_v53, 4 }
 0x141   : > { %v2993_v61 = vrot.slane %v2992_v48, 1  ;;  %v3000_v1 = vrot.slane %v2999_v58, 1  ;;  %v2940_v45 = vrot.slane %v2939_v42, 4  ;;  %v2946_v29 = vsel %vm2784_vm3, %v1541_v41, -inf }
 0x142   : > { %v2987_v7 = vmax.f32 %v2985_v30, %v2986_v63  ;;  %v3006_v8 = vmax.f32 %v3004_v35, %v3005_v52  ;;  %v2928_v9 = vrot.slane %v2927_v59, 2  ;;  %v2934_v12 = vmax.f32 %v2932_v53, %v2933_v46 }
 0x143   : > { %v2994_v20 = vmax.f32 %v2992_v48, %v2993_v61  ;;  %v3001_v14 = vmax.f32 %v2999_v58, %v3000_v1  ;;  %v2941_v11 = vmax.f32 %v2939_v42, %v2940_v45  ;;  %v2947_v21 = vrot.slane %v2946_v29, 4 }
 0x144   : > { %v4615_v22 = vsel %vm4577_vm4, %v2987_v7, -inf  ;;  %v2929_v19 = vmax.f32 %v2927_v59, %v2928_v9  ;;  %v2935_v3 = vrot.slane %v2934_v12, 2  ;;  %v1187_v33 = vmul.f32 %v17700_v27, %v17518_v36 }
 0x145   : > { %v4616_v34 = vmax.f32 %v17584_v31, %v4615_v22  ;;  %v4618_v24 = vsel %vm4577_vm4, %v2994_v20, -inf  ;;  %v4621_v60 = vsel %vm4577_vm4, %v3001_v14, -inf  ;;  %v2942_v35 = vrot.slane %v2941_v11, 2  ;;  %v17737_v14 = vpop.f32.mrb[21].mxu0 }
 0x146   : > { %v3007_v2 = vrot.slane %v3006_v8, 1  ;;  %v4619_v37 = vmax.f32 %v17587_v54, %v4618_v24  ;;  %v17709_v38 = vmax.f32 %v17590_v56, %v4621_v60  ;;  %v2930_v51 = vrot.slane %v2929_v19, 1  ;;  %v17721_v54 = vld [vmem:[%s23446_s3] ss:$0 sm:$0xff] }
 0x147   : > { %v4596_v0 = vsel %vm4577_vm4, %v17669_v39, -inf  ;;  %v2936_v30 = vmax.f32 %v2934_v12, %v2935_v3  ;;  %v2943_v52 = vmax.f32 %v2941_v11, %v2942_v35  ;;  %v2948_v36 = vmax.f32 %v2946_v29, %v2947_v21 }
 0x148   : > { %v17714_v31 = vsel %vm4577_vm4, %v2840_v4, -inf  ;;  %v17716_v41 = vunpack.c.l.b16 %v4973_v57  ;;  %v2931_v47 = vmax.f32 %v2929_v19, %v2930_v51  ;;  %v1258_v56 = vadd.f32 %v17721_v54, %v1187_v33 }
 0x149   : > { %23486 = vst [vmem:[#allocation6_spill] sm:$0xff] %v17714_v31  ;;  %v4965_v48 = vpack.c.bf16 %v17664_v16, %v17664_v16  ;;  %v2937_v39 = vrot.slane %v2936_v30, 1  ;;  %v2944_v58 = vrot.slane %v2943_v52, 1  ;;  %v2949_v53 = vrot.slane %v2948_v36, 2 }
 0x14a   : > { %23487 = vst [vmem:[#allocation7_spill] sm:$0xff] %v17716_v41  ;;  %v3008_v42 = vmax.f32 %v3006_v8, %v3007_v2  ;;  %v4974_v63 = vpack.c.bf16 %v4616_v34, %v4616_v34  ;;  %v4591_v4 = vsel %vm4577_vm4, %v2931_v47, -inf  ;;  %v1322_v57 = vmax.f32 %v1258_v56, 0.0 }
 0x14b   : > { %v2938_v59 = vmax.f32 %v2936_v30, %v2937_v39  ;;  %v2945_v46 = vmax.f32 %v2943_v52, %v2944_v58  ;;  %v2950_v61 = vmax.f32 %v2948_v36, %v2949_v53  ;;  %v17728_v1 = vmax.f32 %v17608_v6, %v4591_v4  ;;  %v17764_v39 = vpop.f32.mrb[22].mxu0 }
 0x14c   : > { %v4975_v45 = vpack.c.bf16 %v4619_v37, %v4619_v37  ;;  %v1610_v29 = vcombine.high %v1322_v57, %v1322_v57  ;;  %v1617_v7 = vrot.slane %v1322_v57, %v17487_v50  ;;  %v1185_v16 = vmul.f32 %v17700_v27, %v17520_v44 }
 0x14d   : > { %v17733_v9 = vunpack.c.l.b16 %v4965_v48  ;;  %v2951_v8 = vrot.slane %v2950_v61, 1  ;;  %v4594_v12 = vsel %vm4577_vm4, %v2938_v59, -inf  ;;  %v4597_v20 = vsel %vm4577_vm4, %v2945_v46, -inf }
 0x14e   : > { %v17740_v11 = vmax.f32 %v17677_v26, %v4594_v12  ;;  %v17742_v6 = vmax.f32 %v4596_v0, %v4597_v20  ;;  %v1624_v21 = vrot.slane %v1610_v29, %v17487_v50  ;;  %v1625_v22 = vcombine.high %v1617_v7, %v1617_v7 }
 0x14f   : > { %23488 = vst [vmem:[#allocation8_spill] sm:$0xff] %v17733_v9  ;;  %v17746_v19 = vsel %vm4577_vm4, %v3008_v42, -inf  ;;  %v4976_v44 = vpack.c.bf16 %v17709_v38, %v17709_v38  ;;  %v3065_v3 = vsel %vm2784_vm3, %v1617_v7, -inf  ;;  %v1256_v33 = vadd.f32 %v17721_v54, %v1185_v16 }
 0x150   : > { %23489 = vst [vmem:[#allocation9_spill] sm:$0xff] %v17746_v19  ;;  %v17752_v34 = vunpack.c.l.b16 %v4974_v63  ;;  %v17754_v24 = vunpack.c.l.b16 %v4975_v45  ;;  %v1626_v26 = vcombine.high %v1624_v21, %v1624_v21  ;;  %v3066_v60 = vrot.slane %v3065_v3, 4 }
 0x151   : > { %v3072_v35 = vsel %vm2784_vm3, %v1625_v22, -inf  ;;  %v3079_v2 = vsel %vm2784_vm3, %v1624_v21, -inf  ;;  %v1320_v37 = vmax.f32 %v1256_v33, 0.0  ;;  %v1188_v51 = vmul.f32 %v17700_v27, %v17522_v49 }
 0x152   : > { %23490 = vst [vmem:[#allocation10_spill] sm:$0xff] %v17752_v34  ;;  %23491 = vst [vmem:[#allocation11_spill] sm:$0xff] %v17754_v24  ;;  %v2952_v0 = vmax.f32 %v2950_v61, %v2951_v8  ;;  %v4966_v38 = vpack.c.bf16 %v17728_v1, %v17728_v1  ;;  %v3067_v30 = vmax.f32 %v3065_v3, %v3066_v60  ;;  %v3073_v52 = vrot.slane %v3072_v35, 4 }
 0x153   : > { %v3080_v36 = vrot.slane %v3079_v2, 4  ;;  %v3086_v47 = vsel %vm2784_vm3, %v1626_v26, -inf  ;;  %v1576_v56 = vcombine.high %v1320_v37, %v1320_v37  ;;  %v1583_v48 = vrot.slane %v1320_v37, %v17487_v50 }
 0x154   : > { %v4967_v58 = vpack.c.bf16 %v17740_v11, %v17740_v11  ;;  %v3068_v53 = vrot.slane %v3067_v30, 2  ;;  %v3074_v42 = vmax.f32 %v3072_v35, %v3073_v52  ;;  %v3087_v49 = vrot.slane %v3086_v47, 4 }
 0x155   : > { %v3081_v63 = vmax.f32 %v3079_v2, %v3080_v36  ;;  %v1590_v4 = vrot.slane %v1576_v56, %v17487_v50  ;;  %v1591_v57 = vcombine.high %v1583_v48, %v1583_v48  ;;  %v3009_v59 = vsel %vm2784_vm3, %v1583_v48, -inf }
 0x156   : > { %v3069_v46 = vmax.f32 %v3067_v30, %v3068_v53  ;;  %v3075_v61 = vrot.slane %v3074_v42, 2  ;;  %v3088_v1 = vmax.f32 %v3086_v47, %v3087_v49  ;;  %v3010_v45 = vrot.slane %v3009_v59, 4 }
 0x157   : > { %v3082_v29 = vrot.slane %v3081_v63, 2  ;;  %v1592_v7 = vcombine.high %v1590_v4, %v1590_v4  ;;  %v3016_v16 = vsel %vm2784_vm3, %v1591_v57, -inf  ;;  %v3023_v8 = vsel %vm2784_vm3, %v1590_v4, -inf }
 0x158   : > { %v3070_v12 = vrot.slane %v3069_v46, 1  ;;  %v3076_v20 = vmax.f32 %v3074_v42, %v3075_v61  ;;  %v3089_v11 = vrot.slane %v3088_v1, 2  ;;  %v3011_v21 = vmax.f32 %v3009_v59, %v3010_v45 }
 0x159   : > { %v3083_v22 = vmax.f32 %v3081_v63, %v3082_v29  ;;  %v3017_v3 = vrot.slane %v3016_v16, 4  ;;  %v3024_v33 = vrot.slane %v3023_v8, 4  ;;  %v3030_v26 = vsel %vm2784_vm3, %v1592_v7, -inf }
 0x15a   : > { %v3077_v60 = vrot.slane %v3076_v20, 1  ;;  %v3090_v35 = vmax.f32 %v3088_v1, %v3089_v11  ;;  %v3012_v2 = vrot.slane %v3011_v21, 2  ;;  %v1259_v37 = vadd.f32 %v17721_v54, %v1188_v51 }
 0x15b   : > { %v3084_v30 = vrot.slane %v3083_v22, 1  ;;  %v3018_v52 = vmax.f32 %v3016_v16, %v3017_v3  ;;  %v3025_v36 = vmax.f32 %v3023_v8, %v3024_v33  ;;  %v3031_v47 = vrot.slane %v3030_v26, 4 }
 0x15c   : > { %v3071_v56 = vmax.f32 %v3069_v46, %v3070_v12  ;;  %v3078_v48 = vmax.f32 %v3076_v20, %v3077_v60  ;;  %v3091_v53 = vrot.slane %v3090_v35, 1  ;;  %v3013_v42 = vmax.f32 %v3011_v21, %v3012_v2 }
 0x15d   : > { %v17774_v49 = vunpack.c.l.b16 %v4976_v44  ;;  %v3019_v63 = vrot.slane %v3018_v52, 2  ;;  %v3026_v4 = vrot.slane %v3025_v36, 2  ;;  %v3032_v57 = vmax.f32 %v3030_v26, %v3031_v47 }
 0x15e   : > { %v4968_v59 = vpack.c.bf16 %v17742_v6, %v17742_v6  ;;  %v17778_v61 = vunpack.c.l.b16 %v4966_v38  ;;  %v3085_v1 = vmax.f32 %v3083_v22, %v3084_v30  ;;  %v1323_v51 = vmax.f32 %v1259_v37, 0.0 }
 0x15f   : > { %23492 = vst [vmem:[#allocation12_spill] sm:$0xff] %v17774_v49  ;;  %v17781_v45 = vsel %vm4577_vm4, %v2952_v0, -inf  ;;  %v17783_v29 = vunpack.c.l.b16 %v4967_v58  ;;  %v3092_v46 = vmax.f32 %v3090_v35, %v3091_v53  ;;  %v3014_v7 = vrot.slane %v3013_v42, 1 }
 0x160   : > { %23493 = vst [vmem:[#allocation13_spill] sm:$0xff] %v17778_v61  ;;  %23494 = vst [vmem:[#allocation14_spill] sm:$0xff] %v17781_v45  ;;  %v17786_v44 = vsel %vm4577_vm4, %v3071_v56, -inf  ;;  %v17789_v16 = vsel %vm4577_vm4, %v3078_v48, -inf  ;;  %v1627_v8 = vcombine.high %v1323_v51, %v1323_v51  ;;  %v1634_v6 = vrot.slane %v1323_v51, %v17487_v50 }
 0x161   : > { %23495 = vst [vmem:[#allocation15_spill] sm:$0xff] %v17783_v29  ;;  %v3020_v38 = vmax.f32 %v3018_v52, %v3019_v63  ;;  %v3027_v12 = vmax.f32 %v3025_v36, %v3026_v4  ;;  %v3033_v20 = vrot.slane %v3032_v57, 2  ;;  %v1186_v0 = vmul.f32 %v17700_v27, %v17524_v55  ;;  %v17808_v4 = vpop.f32.mrb[23].mxu0 }
 0x162   : > { %v17795_v58 = vsel %vm4577_vm4, %v3085_v1, -inf  ;;  %v1641_v11 = vrot.slane %v1627_v8, %v17487_v50  ;;  %v1642_v21 = vcombine.high %v1634_v6, %v1634_v6  ;;  %v3093_v22 = vsel %vm2784_vm3, %v1634_v6, -inf }
 0x163   : > { %v17799_v3 = vunpack.c.l.b16 %v4968_v59  ;;  %v17802_v33 = vsel %vm4577_vm4, %v3092_v46, -inf  ;;  %v3015_v26 = vmax.f32 %v3013_v42, %v3014_v7  ;;  %v3094_v60 = vrot.slane %v3093_v22, 4 }
 0x164   : > { %v1643_v35 = vcombine.high %v1641_v11, %v1641_v11  ;;  %v3100_v2 = vsel %vm2784_vm3, %v1642_v21, -inf  ;;  %v3107_v55 = vsel %vm2784_vm3, %v1641_v11, -inf  ;;  %v1257_v37 = vadd.f32 %v17721_v54, %v1186_v0 }
 0x165   : > { %23496 = vst [vmem:[#allocation16_spill] sm:$0xff] %v17799_v3  ;;  %v3021_v30 = vrot.slane %v3020_v38, 1  ;;  %v3028_v52 = vrot.slane %v3027_v12, 1  ;;  %v3034_v36 = vmax.f32 %v3032_v57, %v3033_v20  ;;  %v3095_v47 = vmax.f32 %v3093_v22, %v3094_v60 }
 0x166   : > { %v3101_v56 = vrot.slane %v3100_v2, 4  ;;  %v3108_v48 = vrot.slane %v3107_v55, 4  ;;  %v3114_v53 = vsel %vm2784_vm3, %v1643_v35, -inf  ;;  %v1321_v63 = vmax.f32 %v1257_v37, 0.0 }
 0x167   : > { %v17811_v42 = vsel %vm4577_vm4, %v3015_v26, -inf  ;;  %v3096_v59 = vrot.slane %v3095_v47, 2  ;;  %v3115_v1 = vrot.slane %v3114_v53, 4  ;;  %v1191_v51 = vmul.f32 %v17700_v27, %v17531_v13 }
 0x168   : > { %v3102_v46 = vmax.f32 %v3100_v2, %v3101_v56  ;;  %v3109_v7 = vmax.f32 %v3107_v55, %v3108_v48  ;;  %v1593_v8 = vcombine.high %v1321_v63, %v1321_v63  ;;  %v1600_v57 = vrot.slane %v1321_v63, %v17487_v50 }
 0x169   : > { %v3035_v6 = vrot.slane %v3034_v36, 1  ;;  %v3097_v20 = vmax.f32 %v3095_v47, %v3096_v59  ;;  %v3116_v0 = vmax.f32 %v3114_v53, %v3115_v1  ;;  %v1262_v11 = vadd.f32 %v17721_v54, %v1191_v51 }
 0x16a   : > { %v3103_v21 = vrot.slane %v3102_v46, 2  ;;  %v3110_v22 = vrot.slane %v3109_v7, 2  ;;  %v1607_v26 = vrot.slane %v1593_v8, %v17487_v50  ;;  %v1608_v60 = vcombine.high %v1600_v57, %v1600_v57 }
 0x16b   : > { %v3022_v35 = vmax.f32 %v3020_v38, %v3021_v30  ;;  %v3098_v37 = vrot.slane %v3097_v20, 1  ;;  %v3117_v43 = vrot.slane %v3116_v0, 2  ;;  %v3037_v13 = vsel %vm2784_vm3, %v1600_v57, -inf }
 0x16c   : > { %v3104_v2 = vmax.f32 %v3102_v46, %v3103_v21  ;;  %v3111_v55 = vmax.f32 %v3109_v7, %v3110_v22  ;;  %v1609_v56 = vcombine.high %v1607_v26, %v1607_v26  ;;  %v3038_v48 = vrot.slane %v3037_v13, 4 }
 0x16d   : > { %v3118_v63 = vmax.f32 %v3116_v0, %v3117_v43  ;;  %v3044_v47 = vsel %vm2784_vm3, %v1608_v60, -inf  ;;  %v3051_v53 = vsel %vm2784_vm3, %v1607_v26, -inf  ;;  %v1326_v59 = vmax.f32 %v1262_v11, 0.0 }
 0x16e   : > { %v3029_v1 = vmax.f32 %v3027_v12, %v3028_v52  ;;  %v3036_v51 = vmax.f32 %v3034_v36, %v3035_v6  ;;  %v3039_v49 = vmax.f32 %v3037_v13, %v3038_v48  ;;  %v3045_v8 = vrot.slane %v3044_v47, 4 }
 0x16f   : > { %v17822_v38 = vsel %vm4577_vm4, %v3022_v35, -inf  ;;  %v3099_v30 = vmax.f32 %v3097_v20, %v3098_v37  ;;  %v3052_v3 = vrot.slane %v3051_v53, 4  ;;  %v3058_v46 = vsel %vm2784_vm3, %v1609_v56, -inf }
 0x170   : > { %v3105_v7 = vrot.slane %v3104_v2, 1  ;;  %v3112_v57 = vrot.slane %v3111_v55, 1  ;;  %v3040_v21 = vrot.slane %v3039_v49, 2  ;;  %v3046_v43 = vmax.f32 %v3044_v47, %v3045_v8  ;;  %v17838_v47 = vpop.f32.mrb[24].mxu0 }
 0x171   : > { %v3119_v0 = vrot.slane %v3118_v63, 1  ;;  %v3053_v22 = vmax.f32 %v3051_v53, %v3052_v3  ;;  %v3059_v60 = vrot.slane %v3058_v46, 4  ;;  %v1678_v26 = vcombine.high %v1326_v59, %v1326_v59 }
 0x172   : > { %v17826_v12 = vsel %vm4577_vm4, %v3029_v1, -inf  ;;  %v3041_v52 = vmax.f32 %v3039_v49, %v3040_v21  ;;  %v3047_v36 = vrot.slane %v3046_v43, 2  ;;  %v1189_v6 = vmul.f32 %v17700_v27, %v17540_v18 }
 0x173   : > { %v17831_v20 = vsel %vm4577_vm4, %v3036_v51, -inf  ;;  %v3054_v11 = vrot.slane %v3053_v22, 2  ;;  %v3060_v35 = vmax.f32 %v3058_v46, %v3059_v60  ;;  %v1685_v37 = vrot.slane %v1326_v59, %v17487_v50 }
 0x174   : > { %v3106_v13 = vmax.f32 %v3104_v2, %v3105_v7  ;;  %v3113_v56 = vmax.f32 %v3111_v55, %v3112_v57  ;;  %v17835_v3 = vsel %vm4577_vm4, %v3099_v30, -inf  ;;  %v1692_v48 = vrot.slane %v1678_v26, %v17487_v50 }
 0x175   : > { %v3120_v49 = vmax.f32 %v3118_v63, %v3119_v0  ;;  %v3048_v53 = vmax.f32 %v3046_v43, %v3047_v36  ;;  %v1693_v1 = vcombine.high %v1685_v37, %v1685_v37  ;;  %v3177_v18 = vsel %vm2784_vm3, %v1685_v37, -inf }
 0x176   : > { %v3042_v51 = vrot.slane %v3041_v52, 1  ;;  %v1694_v8 = vcombine.high %v1692_v48, %v1692_v48  ;;  %v3178_v21 = vrot.slane %v3177_v18, 4  ;;  %v1260_v46 = vadd.f32 %v17721_v54, %v1189_v6 }
 0x177   : > { %v17842_v59 = vmax.f32 %v3053_v22, %v3054_v11  ;;  %v3061_v2 = vrot.slane %v3060_v35, 2  ;;  %v3184_v55 = vsel %vm2784_vm3, %v1693_v1, -inf  ;;  %v3191_v30 = vsel %vm2784_vm3, %v1692_v48, -inf }
 0x178   : > { %v17847_v7 = vsel %vm4577_vm4, %v3106_v13, -inf  ;;  %v17850_v63 = vsel %vm4577_vm4, %v3113_v56, -inf  ;;  %v3179_v57 = vmax.f32 %v3177_v18, %v3178_v21  ;;  %v3185_v43 = vrot.slane %v3184_v55, 4 }
 0x179   : > { %v17853_v0 = vsel %vm4577_vm4, %v3120_v49, -inf  ;;  %v3049_v60 = vrot.slane %v3048_v53, 1  ;;  %v3192_v26 = vrot.slane %v3191_v30, 4  ;;  %v3198_v22 = vsel %vm2784_vm3, %v1694_v8, -inf }
 0x17a   : > { %23497 = vst [vmem:[#allocation17_spill] sm:$0xff] %v17853_v0  ;;  %v17856_v36 = vmax.f32 %v3041_v52, %v3042_v51  ;;  %v3180_v6 = vrot.slane %v3179_v57, 2  ;;  %v3186_v11 = vmax.f32 %v3184_v55, %v3185_v43  ;;  %v3199_v37 = vrot.slane %v3198_v22, 4 }
 0x17b   : > { %v3056_v13 = vrot.slane %v17842_v59, 1  ;;  %v17859_v48 = vmax.f32 %v3060_v35, %v3061_v2  ;;  %v3193_v56 = vmax.f32 %v3191_v30, %v3192_v26  ;;  %v1324_v1 = vmax.f32 %v1260_v46, 0.0  ;;  %v17869_v26 = vpop.f32.mrb[25].mxu0 }
 0x17c   : > { %v3181_v18 = vmax.f32 %v3179_v57, %v3180_v6  ;;  %v3187_v21 = vrot.slane %v3186_v11, 2  ;;  %v3200_v24 = vmax.f32 %v3198_v22, %v3199_v37  ;;  %v1192_v49 = vmul.f32 %v17700_v27, %v17543_v23  ;;  %v17879_v41 = vpop.f32.mrb[26].mxu0 }
 0x17d   : > { %v17863_v0 = vmax.f32 %v3048_v53, %v3049_v60  ;;  %v3194_v8 = vrot.slane %v3193_v56, 2  ;;  %v1644_v52 = vcombine.high %v1324_v1, %v1324_v1  ;;  %v1651_v51 = vrot.slane %v1324_v1, %v17487_v50 }
 0x17e   : > { %v3182_v55 = vrot.slane %v3181_v18, 1  ;;  %v3188_v43 = vmax.f32 %v3186_v11, %v3187_v21  ;;  %v3201_v29 = vrot.slane %v3200_v24, 2  ;;  %v1263_v35 = vadd.f32 %v17721_v54, %v1192_v49 }
 0x17f   : > { %v3195_v2 = vmax.f32 %v3193_v56, %v3194_v8  ;;  %v1658_v46 = vrot.slane %v1644_v52, %v17487_v50  ;;  %v1659_v30 = vcombine.high %v1651_v51, %v1651_v51  ;;  %v3121_v57 = vsel %vm2784_vm3, %v1651_v51, -inf }
 0x180   : > { %v3183_v23 = vmax.f32 %v3181_v18, %v3182_v55  ;;  %v3189_v53 = vrot.slane %v3188_v43, 1  ;;  %v3202_v60 = vmax.f32 %v3200_v24, %v3201_v29  ;;  %v3122_v22 = vrot.slane %v3121_v57, 4 }
 0x181   : > { %v3196_v6 = vrot.slane %v3195_v2, 1  ;;  %v1660_v37 = vcombine.high %v1658_v46, %v1658_v46  ;;  %v3128_v1 = vsel %vm2784_vm3, %v1659_v30, -inf  ;;  %v3135_v11 = vsel %vm2784_vm3, %v1658_v46, -inf }
 0x182   : > { %v3190_v21 = vmax.f32 %v3188_v43, %v3189_v53  ;;  %v3203_v49 = vrot.slane %v3202_v60, 1  ;;  %v4651_v56 = vsel %vm4577_vm4, %v3183_v23, -inf  ;;  %v3123_v8 = vmax.f32 %v3121_v57, %v3122_v22 }
 0x183   : > { %v3197_v52 = vmax.f32 %v3195_v2, %v3196_v6  ;;  %v4652_v51 = vmax.f32 %v17786_v44, %v4651_v56  ;;  %v3129_v34 = vrot.slane %v3128_v1, 4  ;;  %v3136_v61 = vrot.slane %v3135_v11, 4 }
 0x184   : > { %v3204_v18 = vmax.f32 %v3202_v60, %v3203_v49  ;;  %v4654_v24 = vsel %vm4577_vm4, %v3190_v21, -inf  ;;  %v3124_v29 = vrot.slane %v3123_v8, 2  ;;  %v3142_v55 = vsel %vm2784_vm3, %v1660_v37, -inf }
 0x185   : > { %v4655_v30 = vmax.f32 %v17789_v16, %v4654_v24  ;;  %v4657_v46 = vsel %vm4577_vm4, %v3197_v52, -inf  ;;  %v4986_v43 = vpack.c.bf16 %v4652_v51, %v4652_v51  ;;  %v3130_v53 = vmax.f32 %v3128_v1, %v3129_v34 }
 0x186   : > { %v4658_v2 = vmax.f32 %v17795_v58, %v4657_v46  ;;  %v4660_v44 = vsel %vm4577_vm4, %v3204_v18, -inf  ;;  %v3125_v57 = vmax.f32 %v3123_v8, %v3124_v29  ;;  %v3137_v23 = vmax.f32 %v3135_v11, %v3136_v61 }
 0x187   : > { %v17884_v60 = vmax.f32 %v17842_v59, %v3056_v13  ;;  %v17887_v22 = vmax.f32 %v17802_v33, %v4660_v44  ;;  %v4987_v6 = vpack.c.bf16 %v4655_v30, %v4655_v30  ;;  %v3131_v16 = vrot.slane %v3130_v53, 2 }
 0x188   : > { %v4988_v37 = vpack.c.bf16 %v4658_v2, %v4658_v2  ;;  %v3126_v21 = vrot.slane %v3125_v57, 1  ;;  %v3138_v49 = vrot.slane %v3137_v23, 2  ;;  %v3143_v34 = vrot.slane %v3142_v55, 4 }
 0x189   : > { %v5242_v1 = vunpack.c.l.b16 %v4986_v43  ;;  %v5243_v56 = vunpack.c.l.b16 %v4987_v6  ;;  %v3132_v52 = vmax.f32 %v3130_v53, %v3131_v16  ;;  %v1327_v58 = vmax.f32 %v1263_v35, 0.0 }
 0x18a   : > { %v5244_v51 = vunpack.c.l.b16 %v4988_v37  ;;  %v3127_v18 = vmax.f32 %v3125_v57, %v3126_v21  ;;  %v3139_v8 = vmax.f32 %v3137_v23, %v3138_v49  ;;  %v3144_v61 = vmax.f32 %v3142_v55, %v3143_v34 }
 0x18b   : > { %v3063_v59 = vrot.slane %v17859_v48, 1  ;;  %v5374_v13 = vsel %vm5346_vm5, %v5243_v56, %v5242_v1  ;;  %v3133_v33 = vrot.slane %v3132_v52, 1  ;;  %v1695_v11 = vcombine.high %v1327_v58, %v1327_v58 }
 0x18c   : > { %v17892_v24 = vsel %vm5348_vm6, %v5244_v51, %v5374_v13  ;;  %v3140_v29 = vrot.slane %v3139_v8, 1  ;;  %v3145_v30 = vrot.slane %v3144_v61, 2  ;;  %v4627_v46 = vsel %vm4577_vm4, %v3127_v18, -inf }
 0x18d   : > { %23498 = vst [vmem:[#allocation18_spill] sm:$0xff] %v17892_v24  ;;  %v3134_v43 = vmax.f32 %v3132_v52, %v3133_v33  ;;  %v4628_v35 = vmax.f32 %v17811_v42, %v4627_v46  ;;  %v1702_v53 = vrot.slane %v1327_v58, %v17487_v50  ;;  %v1709_v55 = vrot.slane %v1695_v11, %v17487_v50  ;;  %v17910_v11 = vpop.f32.mrb[27].mxu0 }
 0x18e   : > { %v3141_v2 = vmax.f32 %v3139_v8, %v3140_v29  ;;  %v3146_v44 = vmax.f32 %v3144_v61, %v3145_v30  ;;  %v1190_v57 = vmul.f32 %v17700_v27, %v17548_v28  ;;  %v1195_v23 = vmul.f32 %v17700_v27, %v17596_v5 }
 0x18f   : > { %v4630_v6 = vsel %vm4577_vm4, %v3134_v43, -inf  ;;  %v4978_v16 = vpack.c.bf16 %v4628_v35, %v4628_v35  ;;  %v1710_v37 = vcombine.high %v1702_v53, %v1702_v53  ;;  %v1711_v21 = vcombine.high %v1709_v55, %v1709_v55 }
 0x190   : > { %v3147_v49 = vrot.slane %v3146_v44, 1  ;;  %v4631_v42 = vmax.f32 %v17822_v38, %v4630_v6  ;;  %v4633_v34 = vsel %vm4577_vm4, %v3141_v2, -inf  ;;  %v3205_v1 = vsel %vm2784_vm3, %v1702_v53, -inf }
 0x191   : > { %v4634_v56 = vmax.f32 %v17826_v12, %v4633_v34  ;;  %v5234_v52 = vunpack.c.l.b16 %v4978_v16  ;;  %v3206_v58 = vrot.slane %v3205_v1, 4  ;;  %v3212_v28 = vsel %vm2784_vm3, %v1710_v37, -inf }
 0x192   : > { %v3148_v51 = vmax.f32 %v3146_v44, %v3147_v49  ;;  %v4979_v5 = vpack.c.bf16 %v4631_v42, %v4631_v42  ;;  %v3213_v18 = vrot.slane %v3212_v28, 4  ;;  %v3219_v8 = vsel %vm2784_vm3, %v1709_v55, -inf }
 0x193   : > { %v4980_v61 = vpack.c.bf16 %v4634_v56, %v4634_v56  ;;  %v3207_v13 = vmax.f32 %v3205_v1, %v3206_v58  ;;  %v3220_v33 = vrot.slane %v3219_v8, 4  ;;  %v3226_v38 = vsel %vm2784_vm3, %v1711_v21, -inf }
 0x194   : > { %v4636_v29 = vsel %vm4577_vm4, %v3148_v51, -inf  ;;  %v5235_v30 = vunpack.c.l.b16 %v4979_v5  ;;  %v3214_v12 = vmax.f32 %v3212_v28, %v3213_v18  ;;  %v3227_v46 = vrot.slane %v3226_v38, 4 }
 0x195   : > { %v17914_v43 = vmax.f32 %v17831_v20, %v4636_v29  ;;  %v5236_v35 = vunpack.c.l.b16 %v4980_v61  ;;  %v3208_v53 = vrot.slane %v3207_v13, 2  ;;  %v3221_v2 = vmax.f32 %v3219_v8, %v3220_v33 }
 0x196   : > { %v5367_v55 = vsel %vm5346_vm5, %v5235_v30, %v5234_v52  ;;  %v3215_v44 = vrot.slane %v3214_v12, 2  ;;  %v3228_v6 = vmax.f32 %v3226_v38, %v3227_v46  ;;  %v1261_v16 = vadd.f32 %v17721_v54, %v1190_v57  ;;  %v17940_v38 = vpop.f32.mrb[28].mxu0 }
 0x197   : > { %v3064_v37 = vmax.f32 %v17859_v48, %v3063_v59  ;;  %v17920_v21 = vsel %vm5348_vm6, %v5236_v35, %v5367_v55  ;;  %v3209_v49 = vmax.f32 %v3207_v13, %v3208_v53  ;;  %v3222_v42 = vrot.slane %v3221_v2, 2 }
 0x198   : > { %23499 = vst [vmem:[#allocation19_spill] sm:$0xff] %v17920_v21  ;;  %v3216_v34 = vmax.f32 %v3214_v12, %v3215_v44  ;;  %v3229_v1 = vrot.slane %v3228_v6, 2  ;;  %v1325_v20 = vmax.f32 %v1261_v16, 0.0  ;;  %v1266_v56 = vadd.f32 %v17721_v54, %v1195_v23 }
 0x199   : > { %v17925_v58 = vsel %vm4577_vm4, %v17856_v36, -inf  ;;  %v17929_v52 = vsel %vm4577_vm4, %v17863_v0, -inf  ;;  %v3210_v57 = vrot.slane %v3209_v49, 1  ;;  %v3223_v48 = vmax.f32 %v3221_v2, %v3222_v42 }
 0x19a   : > { %v3217_v59 = vrot.slane %v3216_v34, 1  ;;  %v3230_v28 = vmax.f32 %v3228_v6, %v3229_v1  ;;  %v1661_v51 = vcombine.high %v1325_v20, %v1325_v20  ;;  %v1668_v5 = vrot.slane %v1325_v20, %v17487_v50 }
 0x19b   : > { %v17934_v18 = vsel %vm4577_vm4, %v17884_v60, -inf  ;;  %v17937_v23 = vsel %vm4577_vm4, %v3064_v37, -inf  ;;  %v3211_v36 = vmax.f32 %v3209_v49, %v3210_v57  ;;  %v3224_v8 = vrot.slane %v3223_v48, 1 }
 0x19c   : > { %23500 = vst [vmem:[#allocation20_spill] sm:$0xff] %v17937_v23  ;;  %v3218_v61 = vmax.f32 %v3216_v34, %v3217_v59  ;;  %v1675_v0 = vrot.slane %v1661_v51, %v17487_v50  ;;  %v1676_v13 = vcombine.high %v1668_v5, %v1668_v5  ;;  %v1330_v33 = vmax.f32 %v1266_v56, 0.0 }
 0x19d   : > { %v3225_v29 = vmax.f32 %v3223_v48, %v3224_v8  ;;  %v4663_v30 = vsel %vm4577_vm4, %v3211_v36, -inf  ;;  %v3149_v12 = vsel %vm2784_vm3, %v1668_v5, -inf  ;;  %v1193_v60 = vmul.f32 %v17700_v27, %v17616_v15 }
 0x19e   : > { %v3231_v46 = vrot.slane %v3230_v28, 1  ;;  %v17947_v35 = vmax.f32 %v17835_v3, %v4663_v30  ;;  %v4666_v53 = vsel %vm4577_vm4, %v3218_v61, -inf  ;;  %v1677_v2 = vcombine.high %v1675_v0, %v1675_v0 }
 0x19f   : > { %v17951_v55 = vmax.f32 %v17847_v7, %v4666_v53  ;;  %v4669_v44 = vsel %vm4577_vm4, %v3225_v29, -inf  ;;  %v3150_v6 = vrot.slane %v3149_v12, 4  ;;  %v3156_v16 = vsel %vm2784_vm3, %v1676_v13, -inf }
 0x1a0   : > { %v4989_v37 = vpack.c.bf16 %v17887_v22, %v17887_v22  ;;  %v17958_v15 = vmax.f32 %v17850_v63, %v4669_v44  ;;  %v3157_v27 = vrot.slane %v3156_v16, 4  ;;  %v1746_v3 = vcombine.high %v1330_v33, %v1330_v33 }
 0x1a1   : > { %v4981_v49 = vpack.c.bf16 %v17914_v43, %v17914_v43  ;;  %v3151_v42 = vmax.f32 %v3149_v12, %v3150_v6  ;;  %v3163_v7 = vsel %vm2784_vm3, %v1675_v0, -inf  ;;  %v3170_v34 = vsel %vm2784_vm3, %v1677_v2, -inf }
 0x1a2   : > { %v3232_v1 = vmax.f32 %v3230_v28, %v3231_v46  ;;  %v3158_v20 = vmax.f32 %v3156_v16, %v3157_v27  ;;  %v3164_v56 = vrot.slane %v3163_v7, 4  ;;  %v1264_v57 = vadd.f32 %v17721_v54, %v1193_v60  ;;  %v17972_v60 = vpop.f32.mrb[29].mxu0 }
 0x1a3   : > { %v4990_v22 = vpack.c.bf16 %v17947_v35, %v17947_v35  ;;  %v3152_v63 = vrot.slane %v3151_v42, 2  ;;  %v3171_v48 = vrot.slane %v3170_v34, 4  ;;  %v1753_v59 = vrot.slane %v1330_v33, %v17487_v50 }
 0x1a4   : > { %v4991_v43 = vpack.c.bf16 %v17951_v55, %v17951_v55  ;;  %v3159_v51 = vrot.slane %v3158_v20, 2  ;;  %v3165_v5 = vmax.f32 %v3163_v7, %v3164_v56  ;;  %v1760_v36 = vrot.slane %v1746_v3, %v17487_v50 }
 0x1a5   : > { %v3153_v8 = vmax.f32 %v3151_v42, %v3152_v63  ;;  %v3172_v28 = vmax.f32 %v3170_v34, %v3171_v48  ;;  %v1761_v61 = vcombine.high %v1753_v59, %v1753_v59  ;;  %v3289_v0 = vsel %vm2784_vm3, %v1753_v59, -inf }
 0x1a6   : > { %v3160_v13 = vmax.f32 %v3158_v20, %v3159_v51  ;;  %v3166_v29 = vrot.slane %v3165_v5, 2  ;;  %v1762_v30 = vcombine.high %v1760_v36, %v1760_v36  ;;  %v3290_v12 = vrot.slane %v3289_v0, 4 }
 0x1a7   : > { %v3154_v46 = vrot.slane %v3153_v8, 1  ;;  %v3173_v33 = vrot.slane %v3172_v28, 2  ;;  %v3296_v35 = vsel %vm2784_vm3, %v1761_v61, -inf  ;;  %v3303_v53 = vsel %vm2784_vm3, %v1760_v36, -inf }
 0x1a8   : > { %v3161_v2 = vrot.slane %v3160_v13, 1  ;;  %v3167_v55 = vmax.f32 %v3165_v5, %v3166_v29  ;;  %v3291_v44 = vmax.f32 %v3289_v0, %v3290_v12  ;;  %v3297_v6 = vrot.slane %v3296_v35, 4 }
 0x1a9   : > { %v3155_v16 = vmax.f32 %v3153_v8, %v3154_v46  ;;  %v3174_v27 = vmax.f32 %v3172_v28, %v3173_v33  ;;  %v3304_v3 = vrot.slane %v3303_v53, 4  ;;  %v3310_v42 = vsel %vm2784_vm3, %v1762_v30, -inf }
 0x1aa   : > { %v3162_v7 = vmax.f32 %v3160_v13, %v3161_v2  ;;  %v3168_v34 = vrot.slane %v3167_v55, 1  ;;  %v3292_v20 = vrot.slane %v3291_v44, 2  ;;  %v3298_v56 = vmax.f32 %v3296_v35, %v3297_v6  ;;  %v17984_v35 = vpop.f32.mrb[30].mxu0 }
 0x1ab   : > { %v3175_v63 = vrot.slane %v3174_v27, 1  ;;  %v4639_v48 = vsel %vm4577_vm4, %v3155_v16, -inf  ;;  %v3305_v59 = vmax.f32 %v3303_v53, %v3304_v3  ;;  %v3311_v51 = vrot.slane %v3310_v42, 4 }
 0x1ac   : > { %v3169_v61 = vmax.f32 %v3167_v55, %v3168_v34  ;;  %v4640_v36 = vmax.f32 %v17925_v58, %v4639_v48  ;;  %v4642_v5 = vsel %vm4577_vm4, %v3162_v7, -inf  ;;  %v3293_v0 = vmax.f32 %v3291_v44, %v3292_v20 }
 0x1ad   : > { %v4992_v8 = vpack.c.bf16 %v17958_v15, %v17958_v15  ;;  %v4643_v28 = vmax.f32 %v17929_v52, %v4642_v5  ;;  %v3299_v13 = vrot.slane %v3298_v56, 2  ;;  %v3306_v29 = vrot.slane %v3305_v59, 2 }
 0x1ae   : > { %v3176_v30 = vmax.f32 %v3174_v27, %v3175_v63  ;;  %v4645_v12 = vsel %vm4577_vm4, %v3169_v61, -inf  ;;  %v3294_v46 = vrot.slane %v3293_v0, 1  ;;  %v3312_v33 = vmax.f32 %v3310_v42, %v3311_v51 }
 0x1af   : > { %v17986_v53 = vunpack.c.l.b16 %v4989_v37  ;;  %v17988_v58 = vunpack.c.l.b16 %v4981_v49  ;;  %v4646_v2 = vmax.f32 %v17934_v18, %v4645_v12  ;;  %v4982_v55 = vpack.c.bf16 %v4640_v36, %v4640_v36 }
 0x1b0   : > { %v17992_v15 = vsel %vm4577_vm4, %v3232_v1, -inf  ;;  %v4983_v52 = vpack.c.bf16 %v4643_v28, %v4643_v28  ;;  %v3300_v44 = vmax.f32 %v3298_v56, %v3299_v13  ;;  %v17994_v6 = vmax.f32 %v3305_v59, %v3306_v29  ;;  %v18008_v1 = vld [vmem:[%s23445_s2] ss:$0 sm:$0xff] }
 0x1b1   : > { %23501 = vst [vmem:[#allocation21_spill] sm:$0xff] %v17986_v53  ;;  %23502 = vst [vmem:[#allocation22_spill] sm:$0xff] %v17988_v58  ;;  %v17996_v16 = vunpack.c.l.b16 %v4990_v22  ;;  %v17998_v27 = vunpack.c.l.b16 %v4991_v43  ;;  %v18000_v3 = vunpack.c.l.b16 %v4992_v8  ;;  %v1328_v37 = vmax.f32 %v1264_v57, 0.0 }
 0x1b2   : > { %23503 = vst [vmem:[#allocation23_spill] sm:$0xff] %v17992_v15  ;;  %v18003_v49 = vsel %vm4577_vm4, %v3176_v30, -inf  ;;  %v3295_v42 = vmax.f32 %v3293_v0, %v3294_v46  ;;  %v3313_v18 = vrot.slane %v3312_v33, 2  ;;  %v1196_v7 = vmul.f32 %v18008_v1, %v17635_v62 }
 0x1b3   : > { %23504 = vst [vmem:[#allocation24_spill] sm:$0xff] %v17996_v16  ;;  %23505 = vst [vmem:[#allocation25_spill] sm:$0xff] %v17998_v27  ;;  %v4984_v22 = vpack.c.bf16 %v4646_v2, %v4646_v2  ;;  %v18012_v34 = vunpack.c.l.b16 %v4982_v55  ;;  %v1712_v43 = vcombine.high %v1328_v37, %v1328_v37  ;;  %v1719_v20 = vrot.slane %v1328_v37, %v17487_v50 }
 0x1b4   : > { %23506 = vst [vmem:[#allocation26_spill] sm:$0xff] %v18000_v3  ;;  %23507 = vst [vmem:[#allocation27_spill] sm:$0xff] %v18003_v49  ;;  %v18015_v57 = vunpack.c.l.b16 %v4983_v52  ;;  %v3301_v56 = vrot.slane %v3300_v44, 1  ;;  %v3308_v63 = vrot.slane %v17994_v6, 1  ;;  %v1267_v48 = vadd.f32 %v17721_v54, %v1196_v7  ;;  %v18035_v52 = vld [vmem:[%s23446_s3] ss:$0 sm:$0xff] }
 0x1b5   : > { %23508 = vst [vmem:[#allocation28_spill] sm:$0xff] %v18012_v34  ;;  %v1726_v59 = vrot.slane %v1712_v43, %v17487_v50  ;;  %v1727_v51 = vcombine.high %v1719_v20, %v1719_v20  ;;  %v3233_v61 = vsel %vm2784_vm3, %v1719_v20, -inf  ;;  %v1194_v62 = vmul.f32 %v18008_v1, %v17657_v25  ;;  %v18044_v34 = vpop.f32.mrb[31].mxu0 }
 0x1b6   : > { %23509 = vst [vmem:[#allocation29_spill] sm:$0xff] %v18015_v57  ;;  %v3314_v36 = vmax.f32 %v3312_v33, %v3313_v18  ;;  %v18024_v5 = vsel %vm4577_vm4, %v3295_v42, -inf  ;;  %v3234_v0 = vrot.slane %v3233_v61, 4  ;;  %v1331_v8 = vmax.f32 %v1267_v48, 0.0 }
 0x1b7   : > { %v18026_v28 = vunpack.c.l.b16 %v4984_v22  ;;  %v1728_v13 = vcombine.high %v1726_v59, %v1726_v59  ;;  %v3240_v29 = vsel %vm2784_vm3, %v1727_v51, -inf  ;;  %v3247_v54 = vsel %vm2784_vm3, %v1726_v59, -inf }
 0x1b8   : > { %v3302_v30 = vmax.f32 %v3300_v44, %v3301_v56  ;;  %v3235_v12 = vmax.f32 %v3233_v61, %v3234_v0  ;;  %v3241_v46 = vrot.slane %v3240_v29, 4  ;;  %v3248_v2 = vrot.slane %v3247_v54, 4 }
 0x1b9   : > { %23510 = vst [vmem:[#allocation30_spill] sm:$0xff] %v18026_v28  ;;  %v3254_v55 = vsel %vm2784_vm3, %v1728_v13, -inf  ;;  %v1763_v25 = vcombine.high %v1331_v8, %v1331_v8  ;;  %v1770_v33 = vrot.slane %v1331_v8, %v17487_v50  ;;  %v1265_v37 = vadd.f32 %v18035_v52, %v1194_v62 }
 0x1ba   : > { %v3236_v42 = vrot.slane %v3235_v12, 2  ;;  %v3242_v18 = vmax.f32 %v3240_v29, %v3241_v46  ;;  %v3249_v7 = vmax.f32 %v3247_v54, %v3248_v2  ;;  %v3255_v22 = vrot.slane %v3254_v55, 4 }
 0x1bb   : > { %v3315_v44 = vrot.slane %v3314_v36, 1  ;;  %v1777_v43 = vrot.slane %v1763_v25, %v17487_v50  ;;  %v1778_v20 = vcombine.high %v1770_v33, %v1770_v33  ;;  %v3317_v56 = vsel %vm2784_vm3, %v1770_v33, -inf }
 0x1bc   : > { %v3237_v48 = vmax.f32 %v3235_v12, %v3236_v42  ;;  %v3243_v59 = vrot.slane %v3242_v18, 2  ;;  %v3250_v51 = vrot.slane %v3249_v7, 2  ;;  %v3256_v61 = vmax.f32 %v3254_v55, %v3255_v22 }
 0x1bd   : > { %v1779_v0 = vcombine.high %v1777_v43, %v1777_v43  ;;  %v3318_v8 = vrot.slane %v3317_v56, 4  ;;  %v3324_v13 = vsel %vm2784_vm3, %v1778_v20, -inf  ;;  %v3331_v62 = vsel %vm2784_vm3, %v1777_v43, -inf }
 0x1be   : > { %v3244_v3 = vmax.f32 %v3242_v18, %v3243_v59  ;;  %v3251_v29 = vmax.f32 %v3249_v7, %v3250_v51  ;;  %v3257_v54 = vrot.slane %v3256_v61, 2  ;;  %v1329_v46 = vmax.f32 %v1265_v37, 0.0 }
 0x1bf   : > { %v3319_v2 = vmax.f32 %v3317_v56, %v3318_v8  ;;  %v3325_v27 = vrot.slane %v3324_v13, 4  ;;  %v3332_v25 = vrot.slane %v3331_v62, 4  ;;  %v3338_v28 = vsel %vm2784_vm3, %v1779_v0, -inf }
 0x1c0   : > { %v3309_v12 = vmax.f32 %v17994_v6, %v3308_v63  ;;  %v3238_v33 = vrot.slane %v3237_v48, 1  ;;  %v3245_v42 = vrot.slane %v3244_v3, 1  ;;  %v3258_v55 = vmax.f32 %v3256_v61, %v3257_v54 }
 0x1c1   : > { %v3320_v22 = vrot.slane %v3319_v2, 2  ;;  %v3326_v16 = vmax.f32 %v3324_v13, %v3325_v27  ;;  %v3333_v57 = vmax.f32 %v3331_v62, %v3332_v25  ;;  %v3339_v20 = vrot.slane %v3338_v28, 4 }
 0x1c2   : > { %v3316_v18 = vmax.f32 %v3314_v36, %v3315_v44  ;;  %v18047_v7 = vsel %vm4577_vm4, %v3302_v30, -inf  ;;  %v3252_v37 = vrot.slane %v3251_v29, 1  ;;  %v1729_v43 = vcombine.high %v1329_v46, %v1329_v46 }
 0x1c3   : > { %v3321_v56 = vmax.f32 %v3319_v2, %v3320_v22  ;;  %v3327_v59 = vrot.slane %v3326_v16, 2  ;;  %v3334_v51 = vrot.slane %v3333_v57, 2  ;;  %v3340_v0 = vmax.f32 %v3338_v28, %v3339_v20 }
 0x1c4   : > { %v18050_v6 = vsel %vm4577_vm4, %v3309_v12, -inf  ;;  %v3239_v63 = vmax.f32 %v3237_v48, %v3238_v33  ;;  %v3246_v61 = vmax.f32 %v3244_v3, %v3245_v42  ;;  %v1736_v27 = vrot.slane %v1329_v46, %v17487_v50 }
 0x1c5   : > { %v3259_v8 = vrot.slane %v3258_v55, 1  ;;  %v3328_v13 = vmax.f32 %v3326_v16, %v3327_v59  ;;  %v3335_v62 = vmax.f32 %v3333_v57, %v3334_v51  ;;  %v3341_v36 = vrot.slane %v3340_v0, 2 }
 0x1c6   : > { %v18054_v30 = vsel %vm4577_vm4, %v3316_v18, -inf  ;;  %v1743_v44 = vrot.slane %v1729_v43, %v17487_v50  ;;  %v1744_v54 = vcombine.high %v1736_v27, %v1736_v27  ;;  %v3261_v2 = vsel %vm2784_vm3, %v1736_v27, -inf }
 0x1c7   : > { %v3253_v28 = vmax.f32 %v3251_v29, %v3252_v37  ;;  %v3322_v25 = vrot.slane %v3321_v56, 1  ;;  %v3329_v12 = vrot.slane %v3328_v13, 1  ;;  %v3342_v22 = vmax.f32 %v3340_v0, %v3341_v36 }
 0x1c8   : > { %v1745_v48 = vcombine.high %v1743_v44, %v1743_v44  ;;  %v3262_v3 = vrot.slane %v3261_v2, 4  ;;  %v3268_v46 = vsel %vm2784_vm3, %v1744_v54, -inf  ;;  %v3275_v16 = vsel %vm2784_vm3, %v1743_v44, -inf }
 0x1c9   : > { %v3260_v57 = vmax.f32 %v3258_v55, %v3259_v8  ;;  %v18061_v33 = vsel %vm4577_vm4, %v3239_v63, -inf  ;;  %v18064_v42 = vsel %vm4577_vm4, %v3246_v61, -inf  ;;  %v3336_v20 = vrot.slane %v3335_v62, 1 }
 0x1ca   : > { %v3263_v18 = vmax.f32 %v3261_v2, %v3262_v3  ;;  %v3269_v43 = vrot.slane %v3268_v46, 4  ;;  %v3276_v29 = vrot.slane %v3275_v16, 4  ;;  %v3282_v37 = vsel %vm2784_vm3, %v1745_v48, -inf }
 0x1cb   : > { %v3323_v59 = vmax.f32 %v3321_v56, %v3322_v25  ;;  %v3330_v51 = vmax.f32 %v3328_v13, %v3329_v12  ;;  %v3343_v0 = vrot.slane %v3342_v22, 1  ;;  %v3283_v27 = vrot.slane %v3282_v37, 4 }
 0x1cc   : > { %v3264_v36 = vrot.slane %v3263_v18, 2  ;;  %v3270_v54 = vmax.f32 %v3268_v46, %v3269_v43  ;;  %v3277_v44 = vmax.f32 %v3275_v16, %v3276_v29  ;;  %v1199_v55 = vmul.f32 %v18008_v1, %v17694_v40 }
 0x1cd   : > { %v3337_v63 = vmax.f32 %v3335_v62, %v3336_v20  ;;  %v3284_v8 = vmax.f32 %v3282_v37, %v3283_v27  ;;  %v1197_v61 = vmul.f32 %v18008_v1, %v17737_v14  ;;  %v1200_v2 = vmul.f32 %v18008_v1, %v17764_v39 }
 0x1ce   : > { %v3265_v3 = vmax.f32 %v3263_v18, %v3264_v36  ;;  %v3271_v48 = vrot.slane %v3270_v54, 2  ;;  %v3278_v56 = vrot.slane %v3277_v44, 2  ;;  %v1270_v13 = vadd.f32 %v18035_v52, %v1199_v55 }
 0x1cf   : > { %v18075_v25 = vsel %vm4577_vm4, %v3253_v28, -inf  ;;  %v18078_v12 = vsel %vm4577_vm4, %v3260_v57, -inf  ;;  %v3285_v40 = vrot.slane %v3284_v8, 2  ;;  %v1268_v62 = vadd.f32 %v18035_v52, %v1197_v61  ;;  %v18090_v57 = vpop.f32.mrb[32].mxu0 }
 0x1d0   : > { %v3344_v46 = vmax.f32 %v3342_v22, %v3343_v0  ;;  %v1334_v16 = vmax.f32 %v1270_v13, 0.0  ;;  %v1271_v14 = vadd.f32 %v18035_v52, %v1200_v2  ;;  %v1198_v39 = vmul.f32 %v18008_v1, %v17808_v4 }
 0x1d1   : > { %v18085_v20 = vsel %vm4577_vm4, %v3323_v59, -inf  ;;  %v18088_v18 = vsel %vm4577_vm4, %v3330_v51, -inf  ;;  %v3266_v28 = vrot.slane %v3265_v3, 1  ;;  %v1332_v43 = vmax.f32 %v1268_v62, 0.0 }
 0x1d2   : > { %v18093_v29 = vsel %vm4577_vm4, %v3337_v63, -inf  ;;  %v18095_v22 = vmax.f32 %v3270_v54, %v3271_v48  ;;  %v18097_v37 = vmax.f32 %v3277_v44, %v3278_v56  ;;  %v1814_v0 = vcombine.high %v1334_v16, %v1334_v16  ;;  %v18124_v48 = vpop.f32.mrb[33].mxu0 }
 0x1d3   : > { %v18099_v27 = vmax.f32 %v3284_v8, %v3285_v40  ;;  %v1821_v4 = vrot.slane %v1334_v16, %v17487_v50  ;;  %v1780_v59 = vcombine.high %v1332_v43, %v1332_v43  ;;  %v1787_v51 = vrot.slane %v1332_v43, %v17487_v50 }
 0x1d4   : > { %v18104_v36 = vsel %vm4577_vm4, %v3344_v46, -inf  ;;  %v1828_v55 = vrot.slane %v1814_v0, %v17487_v50  ;;  %v18107_v61 = vmax.f32 %v1271_v14, 0.0  ;;  %v18110_v54 = vadd.f32 %v18035_v52, %v1198_v39 }
 0x1d5   : > { %23511 = vst [vmem:[#allocation31_spill] sm:$0xff] %v18104_v36  ;;  %v18112_v44 = vmax.f32 %v3265_v3, %v3266_v28  ;;  %v1829_v63 = vcombine.high %v1821_v4, %v1821_v4  ;;  %v3401_v8 = vsel %vm2784_vm3, %v1821_v4, -inf  ;;  %v1794_v2 = vrot.slane %v1780_v59, %v17487_v50 }
 0x1d6   : > { %v1830_v13 = vcombine.high %v1828_v55, %v1828_v55  ;;  %v3402_v40 = vrot.slane %v3401_v8, 4  ;;  %v3415_v16 = vsel %vm2784_vm3, %v1828_v55, -inf  ;;  %v1795_v14 = vcombine.high %v1787_v51, %v1787_v51 }
 0x1d7   : > { %v3408_v46 = vsel %vm2784_vm3, %v1829_v63, -inf  ;;  %v3416_v28 = vrot.slane %v3415_v16, 4  ;;  %v1796_v4 = vcombine.high %v1794_v2, %v1794_v2  ;;  %v3345_v59 = vsel %vm2784_vm3, %v1787_v51, -inf }
 0x1d8   : > { %v3403_v3 = vmax.f32 %v3401_v8, %v3402_v40  ;;  %v3409_v39 = vrot.slane %v3408_v46, 4  ;;  %v3422_v43 = vsel %vm2784_vm3, %v1830_v13, -inf  ;;  %v3352_v56 = vsel %vm2784_vm3, %v1795_v14, -inf }
 0x1d9   : > { %v3423_v0 = vrot.slane %v3422_v43, 4  ;;  %v3417_v53 = vmax.f32 %v3415_v16, %v3416_v28  ;;  %v3346_v63 = vrot.slane %v3345_v59, 4  ;;  %v3353_v55 = vrot.slane %v3352_v56, 4 }
 0x1da   : > { %v3404_v36 = vrot.slane %v3403_v3, 2  ;;  %v3410_v62 = vmax.f32 %v3408_v46, %v3409_v39  ;;  %v3359_v8 = vsel %vm2784_vm3, %v1794_v2, -inf  ;;  %v3366_v40 = vsel %vm2784_vm3, %v1796_v4, -inf }
 0x1db   : > { %v3424_v24 = vmax.f32 %v3422_v43, %v3423_v0  ;;  %v3418_v21 = vrot.slane %v3417_v53, 2  ;;  %v3347_v15 = vmax.f32 %v3345_v59, %v3346_v63  ;;  %v3354_v51 = vmax.f32 %v3352_v56, %v3353_v55 }
 0x1dc   : > { %v3405_v58 = vmax.f32 %v3403_v3, %v3404_v36  ;;  %v3411_v13 = vrot.slane %v3410_v62, 2  ;;  %v3360_v49 = vrot.slane %v3359_v8, 4  ;;  %v3367_v14 = vrot.slane %v3366_v40, 4 }
 0x1dd   : > { %v3425_v23 = vrot.slane %v3424_v24, 2  ;;  %v3419_v32 = vmax.f32 %v3417_v53, %v3418_v21  ;;  %v3348_v46 = vrot.slane %v3347_v15, 2  ;;  %v3355_v39 = vrot.slane %v3354_v51, 2 }
 0x1de   : > { %v3406_v17 = vrot.slane %v3405_v58, 1  ;;  %v3412_v9 = vmax.f32 %v3410_v62, %v3411_v13  ;;  %v3361_v28 = vmax.f32 %v3359_v8, %v3360_v49  ;;  %v3368_v43 = vmax.f32 %v3366_v40, %v3367_v14  ;;  %v18132_v49 = vpop.f32.mrb[34].mxu0 }
 0x1df   : > { %v3426_v16 = vmax.f32 %v3424_v24, %v3425_v23  ;;  %v3420_v10 = vrot.slane %v3419_v32, 1  ;;  %v3349_v4 = vmax.f32 %v3347_v15, %v3348_v46  ;;  %v3356_v3 = vmax.f32 %v3354_v51, %v3355_v39 }
 0x1e0   : > { %v3407_v0 = vmax.f32 %v3405_v58, %v3406_v17  ;;  %v3413_v2 = vrot.slane %v3412_v9, 1  ;;  %v3362_v19 = vrot.slane %v3361_v28, 2  ;;  %v3369_v59 = vrot.slane %v3368_v43, 2 }
 0x1e1   : > { %v3427_v36 = vrot.slane %v3426_v16, 1  ;;  %v3421_v56 = vmax.f32 %v3419_v32, %v3420_v10  ;;  %v3350_v31 = vrot.slane %v3349_v4, 1  ;;  %v3357_v24 = vrot.slane %v3356_v3, 1 }
 0x1e2   : > { %v3414_v63 = vmax.f32 %v3412_v9, %v3413_v2  ;;  %v4699_v55 = vsel %vm4577_vm4, %v3407_v0, -inf  ;;  %v3363_v23 = vmax.f32 %v3361_v28, %v3362_v19  ;;  %v3370_v15 = vmax.f32 %v3368_v43, %v3369_v59 }
 0x1e3   : > { %v3428_v62 = vmax.f32 %v3426_v16, %v3427_v36  ;;  %v4700_v21 = vmax.f32 %v18024_v5, %v4699_v55  ;;  %v4705_v17 = vsel %vm4577_vm4, %v3421_v56, -inf  ;;  %v3351_v58 = vmax.f32 %v3349_v4, %v3350_v31 }
 0x1e4   : > { %v4702_v53 = vsel %vm4577_vm4, %v3414_v63, -inf  ;;  %v4706_v10 = vmax.f32 %v18050_v6, %v4705_v17  ;;  %v3358_v5 = vmax.f32 %v3356_v3, %v3357_v24  ;;  %v3364_v19 = vrot.slane %v3363_v23, 1 }
 0x1e5   : > { %v4703_v8 = vmax.f32 %v18047_v7, %v4702_v53  ;;  %v4708_v32 = vsel %vm4577_vm4, %v3428_v62, -inf  ;;  %v5002_v9 = vpack.c.bf16 %v4700_v21, %v4700_v21  ;;  %v3371_v13 = vrot.slane %v3370_v15, 1  ;;  %v18159_v62 = vpop.f32.mrb[35].mxu0 }
 0x1e6   : > { %v18138_v40 = vmax.f32 %v18054_v30, %v4708_v32  ;;  %v23512_v51 = vrot.slane %v18095_v22, 1  ;;  %v5004_v46 = vpack.c.bf16 %v4706_v10, %v4706_v10  ;;  %v4675_v16 = vsel %vm4577_vm4, %v3351_v58, -inf }
 0x1e7   : > { %v5003_v14 = vpack.c.bf16 %v4703_v8, %v4703_v8  ;;  %v5258_v7 = vunpack.c.l.b16 %v5002_v9  ;;  %v3365_v39 = vmax.f32 %v3363_v23, %v3364_v19  ;;  %v3372_v6 = vmax.f32 %v3370_v15, %v3371_v13 }
 0x1e8   : > { %v3274_v31 = vmax.f32 %v18095_v22, %v23512_v51  ;;  %v4676_v28 = vmax.f32 %v18061_v33, %v4675_v16  ;;  %v5260_v0 = vunpack.c.l.b16 %v5004_v46  ;;  %v4678_v30 = vsel %vm4577_vm4, %v3358_v5, -inf }
 0x1e9   : > { %v5259_v43 = vunpack.c.l.b16 %v5003_v14  ;;  %v1831_v2 = vcombine.high %v18107_v61, %v18107_v61  ;;  %v23513_v4 = vrot.slane %v18097_v37, 1  ;;  %v4679_v36 = vmax.f32 %v18064_v42, %v4678_v30 }
 0x1ea   : > { %v4681_v3 = vsel %vm4577_vm4, %v3365_v39, -inf  ;;  %v4684_v59 = vsel %vm4577_vm4, %v3372_v6, -inf  ;;  %v4994_v55 = vpack.c.bf16 %v4676_v28, %v4676_v28  ;;  %v1838_v42 = vrot.slane %v18107_v61, %v17487_v50 }
 0x1eb   : > { %v3281_v22 = vmax.f32 %v18097_v37, %v23513_v4  ;;  %v5388_v63 = vsel %vm5346_vm5, %v5259_v43, %v5258_v7  ;;  %v4682_v33 = vmax.f32 %v18075_v25, %v4681_v3  ;;  %v18157_v56 = vmax.f32 %v18078_v12, %v4684_v59 }
 0x1ec   : > { %v18162_v21 = vsel %vm5348_vm6, %v5260_v0, %v5388_v63  ;;  %v4995_v37 = vpack.c.bf16 %v4679_v36, %v4679_v36  ;;  %v1845_v24 = vrot.slane %v1831_v2, %v17487_v50  ;;  %v18169_v23 = vsel %vm4577_vm4, %v18112_v44, -inf }
 0x1ed   : > { %23514 = vst [vmem:[#allocation32_spill] sm:$0xff] %v18162_v21  ;;  %v4996_v25 = vpack.c.bf16 %v4682_v33, %v4682_v33  ;;  %v5250_v53 = vunpack.c.l.b16 %v4994_v55  ;;  %v1333_v12 = vmax.f32 %v18110_v54, 0.0  ;;  %v1846_v58 = vcombine.high %v1838_v42, %v1838_v42 }
 0x1ee   : > { %v5251_v17 = vunpack.c.l.b16 %v4995_v37  ;;  %v1847_v15 = vcombine.high %v1845_v24, %v1845_v24  ;;  %v3429_v8 = vsel %vm2784_vm3, %v1838_v42, -inf  ;;  %v23515_v10 = vrot.slane %v18099_v27, 1 }
 0x1ef   : > { %v5252_v61 = vunpack.c.l.b16 %v4996_v25  ;;  %v3430_v9 = vrot.slane %v3429_v8, 4  ;;  %v3443_v5 = vsel %vm2784_vm3, %v1845_v24, -inf  ;;  %v3436_v19 = vsel %vm2784_vm3, %v1846_v58, -inf }
 0x1f0   : > { %v3288_v32 = vmax.f32 %v18099_v27, %v23515_v10  ;;  %v5381_v44 = vsel %vm5346_vm5, %v5251_v17, %v5250_v53  ;;  %v3444_v13 = vrot.slane %v3443_v5, 4  ;;  %v3450_v54 = vsel %vm2784_vm3, %v1847_v15, -inf }
 0x1f1   : > { %v18181_v51 = vsel %vm5348_vm6, %v5252_v61, %v5381_v44  ;;  %v3431_v14 = vmax.f32 %v3429_v8, %v3430_v9  ;;  %v3437_v46 = vrot.slane %v3436_v19, 4  ;;  %v3451_v16 = vrot.slane %v3450_v54, 4 }
 0x1f2   : > { %23516 = vst [vmem:[#allocation33_spill] sm:$0xff] %v18181_v51  ;;  %v18184_v7 = vsel %vm4577_vm4, %v3274_v31, -inf  ;;  %v3445_v27 = vmax.f32 %v3443_v5, %v3444_v13  ;;  %v1797_v39 = vcombine.high %v1333_v12, %v1333_v12  ;;  %v1804_v6 = vrot.slane %v1333_v12, %v17487_v50 }
 0x1f3   : > { %v18188_v28 = vsel %vm4577_vm4, %v3281_v22, -inf  ;;  %v3432_v43 = vrot.slane %v3431_v14, 2  ;;  %v3438_v0 = vmax.f32 %v3436_v19, %v3437_v46  ;;  %v3452_v30 = vmax.f32 %v3450_v54, %v3451_v16 }
 0x1f4   : > { %v3446_v2 = vrot.slane %v3445_v27, 2  ;;  %v1811_v4 = vrot.slane %v1797_v39, %v17487_v50  ;;  %v1812_v36 = vcombine.high %v1804_v6, %v1804_v6  ;;  %v3373_v3 = vsel %vm2784_vm3, %v1804_v6, -inf }
 0x1f5   : > { %v3433_v59 = vmax.f32 %v3431_v14, %v3432_v43  ;;  %v3439_v63 = vrot.slane %v3438_v0, 2  ;;  %v3453_v31 = vrot.slane %v3452_v30, 2  ;;  %v3374_v33 = vrot.slane %v3373_v3, 4 }
 0x1f6   : > { %v3447_v55 = vmax.f32 %v3445_v27, %v3446_v2  ;;  %v1813_v37 = vcombine.high %v1811_v4, %v1811_v4  ;;  %v3380_v42 = vsel %vm2784_vm3, %v1812_v36, -inf  ;;  %v3387_v22 = vsel %vm2784_vm3, %v1811_v4, -inf }
 0x1f7   : > { %v3434_v24 = vrot.slane %v3433_v59, 1  ;;  %v3440_v25 = vmax.f32 %v3438_v0, %v3439_v63  ;;  %v3454_v53 = vmax.f32 %v3452_v30, %v3453_v31  ;;  %v3375_v12 = vmax.f32 %v3373_v3, %v3374_v33  ;;  %v18200_v30 = vpop.f32.mrb[36].mxu0 }
 0x1f8   : > { %v3448_v17 = vrot.slane %v3447_v55, 1  ;;  %v3381_v58 = vrot.slane %v3380_v42, 4  ;;  %v3388_v15 = vrot.slane %v3387_v22, 4  ;;  %v3394_v8 = vsel %vm2784_vm3, %v1813_v37, -inf  ;;  %v18212_v31 = vpop.f32.mrb[37].mxu0 }
 0x1f9   : > { %v3435_v10 = vmax.f32 %v3433_v59, %v3434_v24  ;;  %v3441_v61 = vrot.slane %v3440_v25, 1  ;;  %v3376_v9 = vrot.slane %v3375_v12, 2  ;;  %v1203_v5 = vmul.f32 %v18008_v1, %v17838_v47 }
 0x1fa   : > { %v3449_v44 = vmax.f32 %v3447_v55, %v3448_v17  ;;  %v3455_v19 = vrot.slane %v3454_v53, 1  ;;  %v3382_v13 = vmax.f32 %v3380_v42, %v3381_v58  ;;  %v3389_v54 = vmax.f32 %v3387_v22, %v3388_v15 }
 0x1fb   : > { %v3442_v14 = vmax.f32 %v3440_v25, %v3441_v61  ;;  %v4711_v46 = vsel %vm4577_vm4, %v3435_v10, -inf  ;;  %v3377_v16 = vmax.f32 %v3375_v12, %v3376_v9  ;;  %v3395_v27 = vrot.slane %v3394_v8, 4 }
 0x1fc   : > { %v4712_v39 = vmax.f32 %v18085_v20, %v4711_v46  ;;  %v4717_v6 = vsel %vm4577_vm4, %v3449_v44, -inf  ;;  %v3383_v43 = vrot.slane %v3382_v13, 2  ;;  %v3390_v0 = vrot.slane %v3389_v54, 2 }
 0x1fd   : > { %v18203_v2 = vsel %vm4577_vm4, %v3288_v32, -inf  ;;  %v4714_v47 = vsel %vm4577_vm4, %v3442_v14, -inf  ;;  %v4718_v4 = vmax.f32 %v18093_v29, %v4717_v6  ;;  %v3378_v36 = vrot.slane %v3377_v16, 1 }
 0x1fe   : > { %23517 = vst [vmem:[#allocation34_spill] sm:$0xff] %v18203_v2  ;;  %v5005_v3 = vpack.c.bf16 %v18138_v40, %v18138_v40  ;;  %v18210_v59 = vmax.f32 %v18088_v18, %v4714_v47  ;;  %v3384_v20 = vmax.f32 %v3382_v13, %v3383_v43  ;;  %v3391_v63 = vmax.f32 %v3389_v54, %v3390_v0 }
 0x1ff   : > { %v3379_v33 = vmax.f32 %v3377_v16, %v3378_v36  ;;  %v3396_v55 = vmax.f32 %v3394_v8, %v3395_v27  ;;  %v1274_v32 = vadd.f32 %v18035_v52, %v1203_v5  ;;  %v1201_v37 = vmul.f32 %v18008_v1, %v17869_v26 }
 0x200   : > { %23518 = vst [vmem:[#allocation35_spill] sm:$0xff] %v18210_v59  ;;  %v4997_v29 = vpack.c.bf16 %v18157_v56, %v18157_v56  ;;  %v3456_v42 = vmax.f32 %v3454_v53, %v3455_v19  ;;  %v3385_v22 = vrot.slane %v3384_v20, 1  ;;  %v3392_v40 = vrot.slane %v3391_v63, 1 }
 0x201   : > { %v5006_v24 = vpack.c.bf16 %v4712_v39, %v4712_v39  ;;  %v3397_v18 = vrot.slane %v3396_v55, 2  ;;  %v4687_v25 = vsel %vm4577_vm4, %v3379_v33, -inf  ;;  %v1338_v12 = vmax.f32 %v1274_v32, 0.0 }
 0x202   : > { %v5008_v17 = vpack.c.bf16 %v4718_v4, %v4718_v4  ;;  %v3386_v58 = vmax.f32 %v3384_v20, %v3385_v22  ;;  %v3393_v15 = vmax.f32 %v3391_v63, %v3392_v40  ;;  %v18221_v8 = vmax.f32 %v18169_v23, %v4687_v25 }
 0x203   : > { %v3398_v10 = vmax.f32 %v3396_v55, %v3397_v18  ;;  %v1882_v61 = vcombine.high %v1338_v12, %v1338_v12  ;;  %v1889_v26 = vrot.slane %v1338_v12, %v17487_v50  ;;  %v1272_v56 = vadd.f32 %v18035_v52, %v1201_v37 }
 0x204   : > { %23519 = vst [vmem:[#allocation36_spill] sm:$0xff] %v18221_v8  ;;  %v18225_v53 = vunpack.c.l.b16 %v5005_v3  ;;  %v18227_v9 = vunpack.c.l.b16 %v4997_v29  ;;  %v4690_v5 = vsel %vm4577_vm4, %v3386_v58, -inf  ;;  %v4693_v44 = vsel %vm4577_vm4, %v3393_v15, -inf }
 0x205   : > { %v3399_v19 = vrot.slane %v3398_v10, 1  ;;  %v18232_v13 = vmax.f32 %v18184_v7, %v4690_v5  ;;  %v18235_v23 = vmax.f32 %v18188_v28, %v4693_v44  ;;  %v1896_v54 = vrot.slane %v1882_v61, %v17487_v50 }
 0x206   : > { %23520 = vst [vmem:[#allocation37_spill] sm:$0xff] %v18225_v53  ;;  %23521 = vst [vmem:[#allocation38_spill] sm:$0xff] %v18227_v9  ;;  %v18239_v14 = vsel %vm4577_vm4, %v3456_v42, -inf  ;;  %v1897_v46 = vcombine.high %v1889_v26, %v1889_v26  ;;  %v3513_v16 = vsel %vm2784_vm3, %v1889_v26, -inf  ;;  %v1336_v27 = vmax.f32 %v1272_v56, 0.0 }
 0x207   : > { %23522 = vst [vmem:[#allocation39_spill] sm:$0xff] %v18232_v13  ;;  %23523 = vst [vmem:[#allocation40_spill] sm:$0xff] %v18235_v23  ;;  %v18244_v6 = vunpack.c.l.b16 %v5006_v24  ;;  %v18246_v43 = vunpack.c.l.b16 %v5008_v17  ;;  %v1898_v7 = vcombine.high %v1896_v54, %v1896_v54  ;;  %v3514_v0 = vrot.slane %v3513_v16, 4 }
 0x208   : > { %23524 = vst [vmem:[#allocation41_spill] sm:$0xff] %v18239_v14  ;;  %v3520_v28 = vsel %vm2784_vm3, %v1897_v46, -inf  ;;  %v3527_v47 = vsel %vm2784_vm3, %v1896_v54, -inf  ;;  %v1848_v4 = vcombine.high %v1336_v27, %v1336_v27  ;;  %v3400_v36 = vmax.f32 %v3398_v10, %v3399_v19 }
 0x209   : > { %23525 = vst [vmem:[#allocation42_spill] sm:$0xff] %v18244_v6  ;;  %23526 = vst [vmem:[#allocation43_spill] sm:$0xff] %v18246_v43  ;;  %v3521_v20 = vrot.slane %v3520_v28, 4  ;;  %v1204_v63 = vmul.f32 %v18008_v1, %v17879_v41  ;;  %v3515_v33 = vmax.f32 %v3513_v16, %v3514_v0  ;;  %v3528_v55 = vrot.slane %v3527_v47, 4  ;;  %v18263_v0 = vpop.f32.mrb[38].mxu0 }
 0x20a   : > { %v3534_v32 = vsel %vm2784_vm3, %v1898_v7, -inf  ;;  %v1855_v37 = vrot.slane %v1336_v27, %v17487_v50  ;;  %v1862_v40 = vrot.slane %v1848_v4, %v17487_v50 }
 0x20b   : > { %v3522_v42 = vmax.f32 %v3520_v28, %v3521_v20  ;;  %v3535_v22 = vrot.slane %v3534_v32, 4  ;;  %v3516_v24 = vrot.slane %v3515_v33, 2  ;;  %v3529_v18 = vmax.f32 %v3527_v47, %v3528_v55 }
 0x20c   : > { %v1863_v25 = vcombine.high %v1855_v37, %v1855_v37  ;;  %v3457_v12 = vsel %vm2784_vm3, %v1855_v37, -inf  ;;  %v1864_v58 = vcombine.high %v1862_v40, %v1862_v40  ;;  %v3471_v56 = vsel %vm2784_vm3, %v1862_v40, -inf }
 0x20d   : > { %v3523_v17 = vrot.slane %v3522_v42, 2  ;;  %v3536_v41 = vmax.f32 %v3534_v32, %v3535_v22  ;;  %v3458_v15 = vrot.slane %v3457_v12, 4  ;;  %v3517_v10 = vmax.f32 %v3515_v33, %v3516_v24 }
 0x20e   : > { %v3530_v61 = vrot.slane %v3529_v18, 2  ;;  %v3464_v26 = vsel %vm2784_vm3, %v1863_v25, -inf  ;;  %v3472_v27 = vrot.slane %v3471_v56, 4  ;;  %v3478_v7 = vsel %vm2784_vm3, %v1864_v58, -inf }
 0x20f   : > { %v3524_v5 = vmax.f32 %v3522_v42, %v3523_v17  ;;  %v3537_v44 = vrot.slane %v3536_v41, 2  ;;  %v3459_v19 = vmax.f32 %v3457_v12, %v3458_v15  ;;  %v3465_v54 = vrot.slane %v3464_v26, 4 }
 0x210   : > { %v3518_v46 = vrot.slane %v3517_v10, 1  ;;  %v3531_v16 = vmax.f32 %v3529_v18, %v3530_v61  ;;  %v3473_v55 = vmax.f32 %v3471_v56, %v3472_v27  ;;  %v3479_v32 = vrot.slane %v3478_v7, 4 }
 0x211   : > { %v3525_v28 = vrot.slane %v3524_v5, 1  ;;  %v3538_v47 = vmax.f32 %v3536_v41, %v3537_v44  ;;  %v3460_v4 = vrot.slane %v3459_v19, 2  ;;  %v3466_v20 = vmax.f32 %v3464_v26, %v3465_v54 }
 0x212   : > { %v3532_v33 = vrot.slane %v3531_v16, 1  ;;  %v1275_v37 = vadd.f32 %v18035_v52, %v1204_v63  ;;  %v3519_v42 = vmax.f32 %v3517_v10, %v3518_v46  ;;  %v18267_v18 = vsel %vm4577_vm4, %v3400_v36, -inf }
 0x213   : > { %v3539_v22 = vrot.slane %v3538_v47, 1  ;;  %v3461_v40 = vmax.f32 %v3459_v19, %v3460_v4  ;;  %v3467_v24 = vrot.slane %v3466_v20, 2  ;;  %23527 = vst [vmem:[#allocation44_spill] sm:$0xff] %v18267_v18  ;;  %v3474_v12 = vrot.slane %v3473_v55, 2 }
 0x214   : > { %v3480_v17 = vmax.f32 %v3478_v7, %v3479_v32  ;;  %v3526_v41 = vmax.f32 %v3524_v5, %v3525_v28  ;;  %v3533_v58 = vmax.f32 %v3531_v16, %v3532_v33  ;;  %v1339_v63 = vmax.f32 %v1275_v37, 0.0 }
 0x215   : > { %v3462_v15 = vrot.slane %v3461_v40, 1  ;;  %v3468_v61 = vmax.f32 %v3466_v20, %v3467_v24  ;;  %v3540_v26 = vmax.f32 %v3538_v47, %v3539_v22  ;;  %v3475_v56 = vmax.f32 %v3473_v55, %v3474_v12 }
 0x216   : > { %v3481_v44 = vrot.slane %v3480_v17, 2  ;;  %v18272_v10 = vsel %vm4577_vm4, %v3519_v42, -inf  ;;  %v1202_v36 = vmul.f32 %v18008_v1, %v17910_v11  ;;  %v1899_v4 = vcombine.high %v1339_v63, %v1339_v63 }
 0x217   : > { %v3463_v19 = vmax.f32 %v3461_v40, %v3462_v15  ;;  %v3469_v54 = vrot.slane %v3468_v61, 1  ;;  %v3476_v46 = vrot.slane %v3475_v56, 1  ;;  %v1906_v5 = vrot.slane %v1339_v63, %v17487_v50  ;;  %v18294_v40 = vpop.f32.mrb[39].mxu0 }
 0x218   : > { %v3482_v27 = vmax.f32 %v3480_v17, %v3481_v44  ;;  %v18278_v16 = vsel %vm4577_vm4, %v3526_v41, -inf  ;;  %v18281_v7 = vsel %vm4577_vm4, %v3533_v58, -inf  ;;  %v1273_v47 = vadd.f32 %v18035_v52, %v1202_v36 }
 0x219   : > { %v3470_v28 = vmax.f32 %v3468_v61, %v3469_v54  ;;  %v18285_v20 = vsel %vm4577_vm4, %v3540_v26, -inf  ;;  %v1913_v33 = vrot.slane %v1899_v4, %v17487_v50  ;;  %v1914_v11 = vcombine.high %v1906_v5, %v1906_v5 }
 0x21a   : > { %v1207_v55 = vmul.f32 %v18008_v1, %v17940_v38  ;;  %v3477_v32 = vmax.f32 %v3475_v56, %v3476_v46  ;;  %v18291_v37 = vsel %vm4577_vm4, %v3463_v19, -inf  ;;  %v3541_v42 = vsel %vm2784_vm3, %v1906_v5, -inf }
 0x21b   : > { %v1337_v22 = vmax.f32 %v1273_v47, 0.0  ;;  %v3483_v24 = vrot.slane %v3482_v27, 1  ;;  %v18297_v12 = vsel %vm4577_vm4, %v3470_v28, -inf  ;;  %v1915_v17 = vcombine.high %v1913_v33, %v1913_v33 }
 0x21c   : > { %v3542_v41 = vrot.slane %v3541_v42, 4  ;;  %v3548_v58 = vsel %vm2784_vm3, %v1914_v11, -inf  ;;  %v3555_v15 = vsel %vm2784_vm3, %v1913_v33, -inf  ;;  %v1278_v63 = vadd.f32 %v18035_v52, %v1207_v55 }
 0x21d   : > { %v1865_v38 = vcombine.high %v1337_v22, %v1337_v22  ;;  %v1872_v61 = vrot.slane %v1337_v22, %v17487_v50  ;;  %v3549_v56 = vrot.slane %v3548_v58, 4  ;;  %v3556_v44 = vrot.slane %v3555_v15, 4 }
 0x21e   : > { %v3543_v26 = vmax.f32 %v3541_v42, %v3542_v41  ;;  %v3562_v19 = vsel %vm2784_vm3, %v1915_v17, -inf }
 0x21f   : > { %v1879_v54 = vrot.slane %v1865_v38, %v17487_v50  ;;  %v1880_v36 = vcombine.high %v1872_v61, %v1872_v61  ;;  %v3485_v46 = vsel %vm2784_vm3, %v1872_v61, -inf  ;;  %v3550_v5 = vmax.f32 %v3548_v58, %v3549_v56 }
 0x220   : > { %v3544_v4 = vrot.slane %v3543_v26, 2  ;;  %v3557_v28 = vmax.f32 %v3555_v15, %v3556_v44  ;;  %v3563_v47 = vrot.slane %v3562_v19, 4  ;;  %v3486_v11 = vrot.slane %v3485_v46, 4 }
 0x221   : > { %v1881_v33 = vcombine.high %v1879_v54, %v1879_v54  ;;  %v3492_v22 = vsel %vm2784_vm3, %v1880_v36, -inf  ;;  %v3499_v42 = vsel %vm2784_vm3, %v1879_v54, -inf  ;;  %v3551_v25 = vrot.slane %v3550_v5, 2 }
 0x222   : > { %v3545_v41 = vmax.f32 %v3543_v26, %v3544_v4  ;;  %v3558_v55 = vrot.slane %v3557_v28, 2  ;;  %v3564_v29 = vmax.f32 %v3562_v19, %v3563_v47  ;;  %v3487_v17 = vmax.f32 %v3485_v46, %v3486_v11 }
 0x223   : > { %v3493_v3 = vrot.slane %v3492_v22, 4  ;;  %v3500_v38 = vrot.slane %v3499_v42, 4  ;;  %v3506_v39 = vsel %vm2784_vm3, %v1881_v33, -inf  ;;  %v3552_v43 = vmax.f32 %v3550_v5, %v3551_v25 }
 0x224   : > { %v3546_v61 = vrot.slane %v3545_v41, 1  ;;  %v3559_v58 = vmax.f32 %v3557_v28, %v3558_v55  ;;  %v3565_v15 = vrot.slane %v3564_v29, 2  ;;  %v3488_v56 = vrot.slane %v3487_v17, 2 }
 0x225   : > { %v3494_v44 = vmax.f32 %v3492_v22, %v3493_v3  ;;  %v3501_v6 = vmax.f32 %v3499_v42, %v3500_v38  ;;  %v3507_v53 = vrot.slane %v3506_v39, 4  ;;  %v3484_v36 = vmax.f32 %v3482_v27, %v3483_v24 }
 0x226   : > { %v3553_v21 = vrot.slane %v3552_v43, 1  ;;  %v3560_v54 = vrot.slane %v3559_v58, 1  ;;  %v3566_v26 = vmax.f32 %v3564_v29, %v3565_v15  ;;  %v3489_v4 = vmax.f32 %v3487_v17, %v3488_v56  ;;  %v18340_v15 = vpop.f32.mrb[40].mxu0 }
 0x227   : > { %v3495_v23 = vrot.slane %v3494_v44, 2  ;;  %v3502_v19 = vrot.slane %v3501_v6, 2  ;;  %v3508_v46 = vmax.f32 %v3506_v39, %v3507_v53  ;;  %v3547_v47 = vmax.f32 %v3545_v41, %v3546_v61 }
 0x228   : > { %v3554_v11 = vmax.f32 %v3552_v43, %v3553_v21  ;;  %v3561_v13 = vmax.f32 %v3559_v58, %v3560_v54  ;;  %v3567_v33 = vrot.slane %v3566_v26, 1  ;;  %v3490_v8 = vrot.slane %v3489_v4, 1 }
 0x229   : > { %v3496_v25 = vmax.f32 %v3494_v44, %v3495_v23  ;;  %v3503_v5 = vmax.f32 %v3501_v6, %v3502_v19  ;;  %v3509_v28 = vrot.slane %v3508_v46, 2  ;;  %v18310_v3 = vsel %vm4577_vm4, %v3477_v32, -inf }
 0x22a   : > { %v18313_v27 = vsel %vm4577_vm4, %v3484_v36, -inf  ;;  %v3568_v24 = vmax.f32 %v3566_v26, %v3567_v33  ;;  %v1342_v29 = vmax.f32 %v1278_v63, 0.0  ;;  %v3491_v22 = vmax.f32 %v3489_v4, %v3490_v8 }
 0x22b   : > { %v3497_v42 = vrot.slane %v3496_v25, 1  ;;  %v3504_v55 = vrot.slane %v3503_v5, 1  ;;  %v3510_v53 = vmax.f32 %v3508_v46, %v3509_v28  ;;  %v18316_v21 = vsel %vm4577_vm4, %v3547_v47, -inf  ;;  %v18346_v47 = vpop.f32.mrb[41].mxu0 }
 0x22c   : > { %v1950_v39 = vcombine.high %v1342_v29, %v1342_v29  ;;  %v1957_v23 = vrot.slane %v1342_v29, %v17487_v50  ;;  %v1205_v6 = vmul.f32 %v18008_v1, %v17972_v60  ;;  %v18322_v43 = vsel %vm4577_vm4, %v3554_v11, -inf }
 0x22d   : > { %v18325_v32 = vsel %vm4577_vm4, %v3561_v13, -inf  ;;  %v18328_v8 = vsel %vm4577_vm4, %v3568_v24, -inf  ;;  %v3511_v63 = vrot.slane %v3510_v53, 1  ;;  %v18333_v58 = vmax.f32 %v3496_v25, %v3497_v42 }
 0x22e   : > { %23528 = vst [vmem:[#allocation45_spill] sm:$0xff] %v18328_v8  ;;  %v1964_v41 = vrot.slane %v1950_v39, %v17487_v50  ;;  %v1965_v17 = vcombine.high %v1957_v23, %v1957_v23  ;;  %v3625_v38 = vsel %vm2784_vm3, %v1957_v23, -inf  ;;  %v1276_v61 = vadd.f32 %v18035_v52, %v1205_v6 }
 0x22f   : > { %v18335_v60 = vmax.f32 %v3503_v5, %v3504_v55  ;;  %v18338_v1 = vsel %vm4577_vm4, %v3491_v22, -inf  ;;  %v3626_v13 = vrot.slane %v3625_v38, 4  ;;  %v18344_v26 = vmax.f32 %v3510_v53, %v3511_v63  ;;  %v18353_v5 = vld [vmem:[%s23445_s2] ss:$0 sm:$0xff] }
 0x230   : > { %v1966_v56 = vcombine.high %v1964_v41, %v1964_v41  ;;  %v3632_v44 = vsel %vm2784_vm3, %v1965_v17, -inf  ;;  %v3639_v36 = vsel %vm2784_vm3, %v1964_v41, -inf  ;;  %v1340_v54 = vmax.f32 %v1276_v61, 0.0 }
 0x231   : > { %v3627_v4 = vmax.f32 %v3625_v38, %v3626_v13  ;;  %v3633_v19 = vrot.slane %v3632_v44, 4  ;;  %v3640_v46 = vrot.slane %v3639_v36, 4  ;;  %v1208_v28 = vmul.f32 %v18353_v5, %v17984_v35 }
 0x232   : > { %v3646_v11 = vsel %vm2784_vm3, %v1966_v56, -inf  ;;  %v1916_v33 = vcombine.high %v1340_v54, %v1340_v54  ;;  %v1923_v25 = vrot.slane %v1340_v54, %v17487_v50 }
 0x233   : > { %v3628_v24 = vrot.slane %v3627_v4, 2  ;;  %v3634_v29 = vmax.f32 %v3632_v44, %v3633_v19  ;;  %v3641_v22 = vmax.f32 %v3639_v36, %v3640_v46  ;;  %v3647_v42 = vrot.slane %v3646_v11, 4 }
 0x234   : > { %v1930_v55 = vrot.slane %v1916_v33, %v17487_v50  ;;  %v1931_v53 = vcombine.high %v1923_v25, %v1923_v25  ;;  %v3569_v39 = vsel %vm2784_vm3, %v1923_v25, -inf  ;;  %v1279_v23 = vadd.f32 %v18035_v52, %v1208_v28 }
 0x235   : > { %v3629_v6 = vmax.f32 %v3627_v4, %v3628_v24  ;;  %v3635_v63 = vrot.slane %v3634_v29, 2  ;;  %v3642_v41 = vrot.slane %v3641_v22, 2  ;;  %v3648_v17 = vmax.f32 %v3646_v11, %v3647_v42 }
 0x236   : > { %v1932_v38 = vcombine.high %v1930_v55, %v1930_v55  ;;  %v3570_v61 = vrot.slane %v3569_v39, 4  ;;  %v3576_v13 = vsel %vm2784_vm3, %v1931_v53, -inf  ;;  %v3583_v35 = vsel %vm2784_vm3, %v1930_v55, -inf }
 0x237   : > { %v3630_v56 = vrot.slane %v3629_v6, 1  ;;  %v3636_v44 = vmax.f32 %v3634_v29, %v3635_v63  ;;  %v3643_v36 = vmax.f32 %v3641_v22, %v3642_v41  ;;  %v3649_v54 = vrot.slane %v3648_v17, 2 }
 0x238   : > { %v3571_v19 = vmax.f32 %v3569_v39, %v3570_v61  ;;  %v3577_v46 = vrot.slane %v3576_v13, 4  ;;  %v3584_v33 = vrot.slane %v3583_v35, 4  ;;  %v3590_v25 = vsel %vm2784_vm3, %v1932_v38, -inf }
 0x239   : > { %v3631_v52 = vmax.f32 %v3629_v6, %v3630_v56  ;;  %v3637_v4 = vrot.slane %v3636_v44, 1  ;;  %v3644_v28 = vrot.slane %v3643_v36, 1  ;;  %v3650_v24 = vmax.f32 %v3648_v17, %v3649_v54 }
 0x23a   : > { %v3572_v11 = vrot.slane %v3571_v19, 2  ;;  %v3578_v42 = vmax.f32 %v3576_v13, %v3577_v46  ;;  %v3585_v9 = vmax.f32 %v3583_v35, %v3584_v33  ;;  %v3591_v51 = vrot.slane %v3590_v25, 4 }
 0x23b   : > { %v3638_v53 = vmax.f32 %v3636_v44, %v3637_v4  ;;  %v3645_v59 = vmax.f32 %v3643_v36, %v3644_v28  ;;  %v3651_v55 = vrot.slane %v3650_v24, 1  ;;  %v4747_v29 = vsel %vm4577_vm4, %v3631_v52, -inf }
 0x23c   : > { %v4748_v22 = vmax.f32 %v18272_v10, %v4747_v29  ;;  %v3573_v39 = vmax.f32 %v3571_v19, %v3572_v11  ;;  %v3579_v63 = vrot.slane %v3578_v42, 2  ;;  %v3586_v41 = vrot.slane %v3585_v9, 2 }
 0x23d   : > { %v3652_v61 = vmax.f32 %v3650_v24, %v3651_v55  ;;  %v4750_v6 = vsel %vm4577_vm4, %v3638_v53, -inf  ;;  %v4753_v38 = vsel %vm4577_vm4, %v3645_v59, -inf  ;;  %v3592_v17 = vmax.f32 %v3590_v25, %v3591_v51 }
 0x23e   : > { %v4751_v13 = vmax.f32 %v18278_v16, %v4750_v6  ;;  %v4754_v35 = vmax.f32 %v18281_v7, %v4753_v38  ;;  %v5018_v56 = vpack.c.bf16 %v4748_v22, %v4748_v22  ;;  %v3574_v44 = vrot.slane %v3573_v39, 1  ;;  %v18375_v7 = vpop.f32.mrb[42].mxu0 }
 0x23f   : > { %v4756_v36 = vsel %vm4577_vm4, %v3652_v61, -inf  ;;  %v3580_v54 = vmax.f32 %v3578_v42, %v3579_v63  ;;  %v3587_v46 = vmax.f32 %v3585_v9, %v3586_v41  ;;  %v3593_v10 = vrot.slane %v3592_v17, 2  ;;  %v18389_v6 = vpop.f32.mrb[43].mxu0 }
 0x240   : > { %v18372_v19 = vsel %vm4577_vm4, %v18333_v58, -inf  ;;  %v4757_v33 = vmax.f32 %v18285_v20, %v4756_v36  ;;  %v5019_v52 = vpack.c.bf16 %v4751_v13, %v4751_v13  ;;  %v5020_v59 = vpack.c.bf16 %v4754_v35, %v4754_v35 }
 0x241   : > { %v3575_v51 = vmax.f32 %v3573_v39, %v3574_v44  ;;  %v3581_v25 = vrot.slane %v3580_v54, 1  ;;  %v3588_v16 = vrot.slane %v3587_v46, 1  ;;  %v3594_v4 = vmax.f32 %v3592_v17, %v3593_v10 }
 0x242   : > { %v5274_v28 = vunpack.c.l.b16 %v5018_v56  ;;  %v5275_v24 = vunpack.c.l.b16 %v5019_v52  ;;  %v5276_v11 = vunpack.c.l.b16 %v5020_v59  ;;  %v1343_v42 = vmax.f32 %v1279_v23, 0.0 }
 0x243   : > { %v3582_v9 = vmax.f32 %v3580_v54, %v3581_v25  ;;  %v3589_v53 = vmax.f32 %v3587_v46, %v3588_v16  ;;  %v3595_v55 = vrot.slane %v3594_v4, 1  ;;  %v4723_v58 = vsel %vm4577_vm4, %v3575_v51, -inf }
 0x244   : > { %v18380_v20 = vsel %vm4577_vm4, %v18335_v60, -inf  ;;  %v5402_v29 = vsel %vm5346_vm5, %v5275_v24, %v5274_v28  ;;  %v4724_v22 = vmax.f32 %v18291_v37, %v4723_v58  ;;  %v1967_v39 = vcombine.high %v1343_v42, %v1343_v42  ;;  %v18410_v28 = vld [vmem:[%s23446_s3] ss:$0 sm:$0xff] }
 0x245   : > { %v18385_v63 = vsel %vm5348_vm6, %v5276_v11, %v5402_v29  ;;  %v3596_v41 = vmax.f32 %v3594_v4, %v3595_v55  ;;  %v4726_v23 = vsel %vm4577_vm4, %v3582_v9, -inf  ;;  %v4729_v61 = vsel %vm4577_vm4, %v3589_v53, -inf }
 0x246   : > { %23529 = vst [vmem:[#allocation46_spill] sm:$0xff] %v18385_v63  ;;  %v4727_v38 = vmax.f32 %v18297_v12, %v4726_v23  ;;  %v4730_v60 = vmax.f32 %v18310_v3, %v4729_v61  ;;  %v5010_v17 = vpack.c.bf16 %v4724_v22, %v4724_v22  ;;  %v1974_v13 = vrot.slane %v1343_v42, %v17487_v50 }
 0x247   : > { %v5021_v35 = vpack.c.bf16 %v4757_v33, %v4757_v33  ;;  %v4732_v37 = vsel %vm4577_vm4, %v3596_v41, -inf  ;;  %v1981_v56 = vrot.slane %v1967_v39, %v17487_v50  ;;  %v1206_v44 = vmul.f32 %v18353_v5, %v18044_v34 }
 0x248   : > { %v18399_v36 = vmax.f32 %v18313_v27, %v4732_v37  ;;  %v5011_v54 = vpack.c.bf16 %v4727_v38, %v4727_v38  ;;  %v5012_v46 = vpack.c.bf16 %v4730_v60, %v4730_v60  ;;  %v1211_v12 = vmul.f32 %v18353_v5, %v18090_v57 }
 0x249   : > { %v1982_v3 = vcombine.high %v1974_v13, %v1974_v13  ;;  %v1983_v10 = vcombine.high %v1981_v56, %v1981_v56  ;;  %v3653_v52 = vsel %vm2784_vm3, %v1974_v13, -inf  ;;  %v3667_v33 = vsel %vm2784_vm3, %v1981_v56, -inf }
 0x24a   : > { %v5266_v59 = vunpack.c.l.b16 %v5010_v17  ;;  %v5267_v51 = vunpack.c.l.b16 %v5011_v54  ;;  %v5268_v25 = vunpack.c.l.b16 %v5012_v46  ;;  %v3654_v16 = vrot.slane %v3653_v52, 4 }
 0x24b   : > { %v3660_v34 = vsel %vm2784_vm3, %v1982_v3, -inf  ;;  %v3668_v4 = vrot.slane %v3667_v33, 4  ;;  %v3674_v27 = vsel %vm2784_vm3, %v1983_v10, -inf  ;;  %v1277_v57 = vadd.f32 %v18410_v28, %v1206_v44 }
 0x24c   : > { %v18415_v24 = vsel %vm4577_vm4, %v18344_v26, -inf  ;;  %v5395_v11 = vsel %vm5346_vm5, %v5267_v51, %v5266_v59  ;;  %v3655_v42 = vmax.f32 %v3653_v52, %v3654_v16  ;;  %v3661_v9 = vrot.slane %v3660_v34, 4 }
 0x24d   : > { %23530 = vst [vmem:[#allocation47_spill] sm:$0xff] %v18415_v24  ;;  %v18419_v53 = vsel %vm5348_vm6, %v5268_v25, %v5395_v11  ;;  %v3669_v55 = vmax.f32 %v3667_v33, %v3668_v4  ;;  %v3675_v58 = vrot.slane %v3674_v27, 4  ;;  %v1341_v29 = vmax.f32 %v1277_v57, 0.0 }
 0x24e   : > { %23531 = vst [vmem:[#allocation48_spill] sm:$0xff] %v18419_v53  ;;  %v18421_v22 = vunpack.c.l.b16 %v5021_v35  ;;  %v3656_v39 = vrot.slane %v3655_v42, 2  ;;  %v3662_v41 = vmax.f32 %v3660_v34, %v3661_v9  ;;  %v1282_v23 = vadd.f32 %v18410_v28, %v1211_v12 }
 0x24f   : > { %v3670_v61 = vrot.slane %v3669_v55, 2  ;;  %v3676_v38 = vmax.f32 %v3674_v27, %v3675_v58  ;;  %v1933_v26 = vcombine.high %v1341_v29, %v1341_v29  ;;  %v1940_v60 = vrot.slane %v1341_v29, %v17487_v50 }
 0x250   : > { %23532 = vst [vmem:[#allocation49_spill] sm:$0xff] %v18421_v22  ;;  %v5013_v17 = vpack.c.bf16 %v18399_v36, %v18399_v36  ;;  %v3657_v13 = vmax.f32 %v3655_v42, %v3656_v39  ;;  %v3663_v37 = vrot.slane %v3662_v41, 2  ;;  %v1209_v56 = vmul.f32 %v18353_v5, %v18124_v48 }
 0x251   : > { %v3671_v44 = vmax.f32 %v3669_v55, %v3670_v61  ;;  %v3677_v35 = vrot.slane %v3676_v38, 2  ;;  %v1947_v54 = vrot.slane %v1933_v26, %v17487_v50  ;;  %v1948_v46 = vcombine.high %v1940_v60, %v1940_v60 }
 0x252   : > { %v3658_v3 = vrot.slane %v3657_v13, 1  ;;  %v3664_v12 = vmax.f32 %v3662_v41, %v3663_v37  ;;  %v3597_v10 = vsel %vm2784_vm3, %v1940_v60, -inf  ;;  %v1346_v52 = vmax.f32 %v1282_v23, 0.0 }
 0x253   : > { %v3672_v33 = vrot.slane %v3671_v44, 1  ;;  %v3678_v59 = vmax.f32 %v3676_v38, %v3677_v35  ;;  %v1949_v51 = vcombine.high %v1947_v54, %v1947_v54  ;;  %v3598_v25 = vrot.slane %v3597_v10, 4 }
 0x254   : > { %v3659_v36 = vmax.f32 %v3657_v13, %v3658_v3  ;;  %v3665_v16 = vrot.slane %v3664_v12, 1  ;;  %v3604_v34 = vsel %vm2784_vm3, %v1948_v46, -inf  ;;  %v3611_v48 = vsel %vm2784_vm3, %v1947_v54, -inf  ;;  %v18442_v54 = vpop.f32.mrb[44].mxu0 }
 0x255   : > { %v3673_v4 = vmax.f32 %v3671_v44, %v3672_v33  ;;  %v3679_v27 = vrot.slane %v3678_v59, 1  ;;  %v3599_v57 = vmax.f32 %v3597_v10, %v3598_v25  ;;  %v3605_v11 = vrot.slane %v3604_v34, 4 }
 0x256   : > { %v3666_v42 = vmax.f32 %v3664_v12, %v3665_v16  ;;  %v4759_v9 = vsel %vm4577_vm4, %v3659_v36, -inf  ;;  %v3612_v55 = vrot.slane %v3611_v48, 4  ;;  %v3618_v58 = vsel %vm2784_vm3, %v1949_v51, -inf }
 0x257   : > { %v3680_v29 = vmax.f32 %v3678_v59, %v3679_v27  ;;  %v4760_v39 = vmax.f32 %v18316_v21, %v4759_v9  ;;  %v4765_v41 = vsel %vm4577_vm4, %v3673_v4, -inf  ;;  %v3600_v23 = vrot.slane %v3599_v57, 2 }
 0x258   : > { %v4762_v61 = vsel %vm4577_vm4, %v3666_v42, -inf  ;;  %v4766_v38 = vmax.f32 %v18325_v32, %v4765_v41  ;;  %v3606_v26 = vmax.f32 %v3604_v34, %v3605_v11  ;;  %v3613_v60 = vmax.f32 %v3611_v48, %v3612_v55 }
 0x259   : > { %v18439_v13 = vunpack.c.l.b16 %v5013_v17  ;;  %v4763_v37 = vmax.f32 %v18322_v43, %v4762_v61  ;;  %v3601_v44 = vmax.f32 %v3599_v57, %v3600_v23  ;;  %v2018_v35 = vcombine.high %v1346_v52, %v1346_v52  ;;  %v18449_v17 = vpop.f32.mrb[45].mxu0 }
 0x25a   : > { %v3607_v46 = vrot.slane %v3606_v26, 2  ;;  %v3614_v3 = vrot.slane %v3613_v60, 2  ;;  %v3619_v21 = vrot.slane %v3618_v58, 4  ;;  %v1280_v12 = vadd.f32 %v18410_v28, %v1209_v56 }
 0x25b   : > { %23533 = vst [vmem:[#allocation50_spill] sm:$0xff] %v18439_v13  ;;  %v18446_v10 = vsel %vm4577_vm4, %v3680_v29, -inf  ;;  %v5022_v33 = vpack.c.bf16 %v4760_v39, %v4760_v39  ;;  %v3602_v32 = vrot.slane %v3601_v44, 1  ;;  %v2025_v59 = vrot.slane %v1346_v52, %v17487_v50 }
 0x25c   : > { %23534 = vst [vmem:[#allocation51_spill] sm:$0xff] %v18446_v10  ;;  %v5024_v51 = vpack.c.bf16 %v4766_v38, %v4766_v38  ;;  %v3608_v43 = vmax.f32 %v3606_v26, %v3607_v46  ;;  %v3615_v25 = vmax.f32 %v3613_v60, %v3614_v3  ;;  %v3620_v36 = vmax.f32 %v3618_v58, %v3619_v21 }
 0x25d   : > { %v5023_v16 = vpack.c.bf16 %v4763_v37, %v4763_v37  ;;  %v3603_v34 = vmax.f32 %v3601_v44, %v3602_v32  ;;  %v2032_v48 = vrot.slane %v2018_v35, %v17487_v50  ;;  %v2033_v4 = vcombine.high %v2025_v59, %v2025_v59 }
 0x25e   : > { %v3609_v27 = vrot.slane %v3608_v43, 1  ;;  %v3616_v56 = vrot.slane %v3615_v25, 1  ;;  %v3621_v57 = vrot.slane %v3620_v36, 2  ;;  %v3737_v11 = vsel %vm2784_vm3, %v2025_v59, -inf }
 0x25f   : > { %v4735_v42 = vsel %vm4577_vm4, %v3603_v34, -inf  ;;  %v2034_v9 = vcombine.high %v2032_v48, %v2032_v48  ;;  %v3738_v52 = vrot.slane %v3737_v11, 4  ;;  %v3744_v55 = vsel %vm2784_vm3, %v2033_v4, -inf }
 0x260   : > { %v3610_v29 = vmax.f32 %v3608_v43, %v3609_v27  ;;  %v3617_v39 = vmax.f32 %v3615_v25, %v3616_v56  ;;  %v3622_v41 = vmax.f32 %v3620_v36, %v3621_v57  ;;  %v4736_v58 = vmax.f32 %v18338_v1, %v4735_v42 }
 0x261   : > { %v3739_v23 = vmax.f32 %v3737_v11, %v3738_v52  ;;  %v3745_v61 = vrot.slane %v3744_v55, 4  ;;  %v3751_v38 = vsel %vm2784_vm3, %v2032_v48, -inf  ;;  %v3758_v26 = vsel %vm2784_vm3, %v2034_v9, -inf }
 0x262   : > { %v3623_v60 = vrot.slane %v3622_v41, 1  ;;  %v4738_v37 = vsel %vm4577_vm4, %v3610_v29, -inf  ;;  %v4741_v44 = vsel %vm4577_vm4, %v3617_v39, -inf  ;;  %v5014_v35 = vpack.c.bf16 %v4736_v58, %v4736_v58  ;;  %v18476_v58 = vpop.f32.mrb[46].mxu0 }
 0x263   : > { %v4739_v46 = vmax.f32 %v18372_v19, %v4738_v37  ;;  %v4742_v3 = vmax.f32 %v18380_v20, %v4741_v44  ;;  %v3740_v21 = vrot.slane %v3739_v23, 2  ;;  %v3746_v32 = vmax.f32 %v3744_v55, %v3745_v61 }
 0x264   : > { %v18462_v59 = vunpack.c.l.b16 %v5022_v33  ;;  %v18464_v1 = vunpack.c.l.b16 %v5024_v51  ;;  %v3752_v43 = vrot.slane %v3751_v38, 4  ;;  %v3759_v25 = vrot.slane %v3758_v26, 4 }
 0x265   : > { %v18466_v36 = vunpack.c.l.b16 %v5023_v16  ;;  %v3624_v34 = vmax.f32 %v3622_v41, %v3623_v60  ;;  %v3741_v48 = vmax.f32 %v3739_v23, %v3740_v21  ;;  %v3747_v4 = vrot.slane %v3746_v32, 2 }
 0x266   : > { %23535 = vst [vmem:[#allocation52_spill] sm:$0xff] %v18462_v59  ;;  %23536 = vst [vmem:[#allocation53_spill] sm:$0xff] %v18464_v1  ;;  %v18468_v27 = vunpack.c.l.b16 %v5014_v35  ;;  %v3753_v56 = vmax.f32 %v3751_v38, %v3752_v43  ;;  %v3760_v57 = vmax.f32 %v3758_v26, %v3759_v25  ;;  %v1344_v19 = vmax.f32 %v1280_v12, 0.0 }
 0x267   : > { %23537 = vst [vmem:[#allocation54_spill] sm:$0xff] %v18466_v36  ;;  %v5015_v11 = vpack.c.bf16 %v4739_v46, %v4739_v46  ;;  %v5016_v20 = vpack.c.bf16 %v4742_v3, %v4742_v3  ;;  %v3742_v42 = vrot.slane %v3741_v48, 1  ;;  %v3748_v9 = vmax.f32 %v3746_v32, %v3747_v4 }
 0x268   : > { %23538 = vst [vmem:[#allocation55_spill] sm:$0xff] %v18468_v27  ;;  %v3754_v33 = vrot.slane %v3753_v56, 2  ;;  %v3761_v52 = vrot.slane %v3760_v57, 2  ;;  %v1984_v51 = vcombine.high %v1344_v19, %v1344_v19  ;;  %v1991_v55 = vrot.slane %v1344_v19, %v17487_v50 }
 0x269   : > { %v18472_v16 = vsel %vm4577_vm4, %v3624_v34, -inf  ;;  %v3743_v29 = vmax.f32 %v3741_v48, %v3742_v42  ;;  %v3749_v39 = vrot.slane %v3748_v9, 1  ;;  %v1212_v41 = vmul.f32 %v18353_v5, %v18132_v49 }
 0x26a   : > { %23539 = vst [vmem:[#allocation56_spill] sm:$0xff] %v18472_v16  ;;  %v3755_v12 = vmax.f32 %v3753_v56, %v3754_v33  ;;  %v3762_v23 = vmax.f32 %v3760_v57, %v3761_v52  ;;  %v1998_v61 = vrot.slane %v1984_v51, %v17487_v50  ;;  %v1999_v38 = vcombine.high %v1991_v55, %v1991_v55 }
 0x26b   : > { %v18479_v26 = vunpack.c.l.b16 %v5015_v11  ;;  %v18481_v60 = vunpack.c.l.b16 %v5016_v20  ;;  %v3681_v37 = vsel %vm2784_vm3, %v1991_v55, -inf  ;;  %v1283_v44 = vadd.f32 %v18410_v28, %v1212_v41 }
 0x26c   : > { %v3750_v35 = vmax.f32 %v3748_v9, %v3749_v39  ;;  %v3756_v46 = vrot.slane %v3755_v12, 1  ;;  %v2000_v3 = vcombine.high %v1998_v61, %v1998_v61  ;;  %v3682_v21 = vrot.slane %v3681_v37, 4 }
 0x26d   : > { %23540 = vst [vmem:[#allocation57_spill] sm:$0xff] %v18479_v26  ;;  %23541 = vst [vmem:[#allocation58_spill] sm:$0xff] %v18481_v60  ;;  %v3688_v49 = vsel %vm2784_vm3, %v1999_v38, -inf  ;;  %v3695_v32 = vsel %vm2784_vm3, %v1998_v61, -inf  ;;  %v1347_v43 = vmax.f32 %v1283_v44, 0.0  ;;  %v1210_v25 = vmul.f32 %v18353_v5, %v18159_v62 }
 0x26e   : > { %v3763_v34 = vrot.slane %v3762_v23, 1  ;;  %v18490_v48 = vsel %vm4577_vm4, %v3743_v29, -inf  ;;  %v3683_v4 = vmax.f32 %v3681_v37, %v3682_v21  ;;  %v3689_v56 = vrot.slane %v3688_v49, 4 }
 0x26f   : > { %v3696_v57 = vrot.slane %v3695_v32, 4  ;;  %v3702_v19 = vsel %vm2784_vm3, %v2000_v3, -inf  ;;  %v2035_v11 = vcombine.high %v1347_v43, %v1347_v43  ;;  %v2042_v20 = vrot.slane %v1347_v43, %v17487_v50 }
 0x270   : > { %v3757_v42 = vmax.f32 %v3755_v12, %v3756_v46  ;;  %v18495_v9 = vsel %vm4577_vm4, %v3750_v35, -inf  ;;  %v3684_v33 = vrot.slane %v3683_v4, 2  ;;  %v3690_v52 = vmax.f32 %v3688_v49, %v3689_v56 }
 0x271   : > { %v3697_v51 = vmax.f32 %v3695_v32, %v3696_v57  ;;  %v3703_v62 = vrot.slane %v3702_v19, 4  ;;  %v2049_v55 = vrot.slane %v2035_v11, %v17487_v50  ;;  %v2050_v29 = vcombine.high %v2042_v20, %v2042_v20 }
 0x272   : > { %v3764_v39 = vmax.f32 %v3762_v23, %v3763_v34  ;;  %v3685_v41 = vmax.f32 %v3683_v4, %v3684_v33  ;;  %v3691_v61 = vrot.slane %v3690_v52, 2  ;;  %v3765_v38 = vsel %vm2784_vm3, %v2042_v20, -inf  ;;  %v18503_v20 = vpop.f32.mrb[47].mxu0 }
 0x273   : > { %v3698_v37 = vrot.slane %v3697_v51, 2  ;;  %v3704_v44 = vmax.f32 %v3702_v19, %v3703_v62  ;;  %v2051_v3 = vcombine.high %v2049_v55, %v2049_v55  ;;  %v3766_v21 = vrot.slane %v3765_v38, 4 }
 0x274   : > { %v3686_v12 = vrot.slane %v3685_v41, 1  ;;  %v3692_v46 = vmax.f32 %v3690_v52, %v3691_v61  ;;  %v3772_v35 = vsel %vm2784_vm3, %v2050_v29, -inf  ;;  %v3779_v49 = vsel %vm2784_vm3, %v2049_v55, -inf }
 0x275   : > { %v3699_v32 = vmax.f32 %v3697_v51, %v3698_v37  ;;  %v3705_v43 = vrot.slane %v3704_v44, 2  ;;  %v3767_v56 = vmax.f32 %v3765_v38, %v3766_v21  ;;  %v3773_v57 = vrot.slane %v3772_v35, 4 }
 0x276   : > { %v3693_v11 = vrot.slane %v3692_v46, 1  ;;  %v3780_v23 = vrot.slane %v3779_v49, 4  ;;  %v3786_v34 = vsel %vm2784_vm3, %v2051_v3, -inf  ;;  %v1281_v4 = vadd.f32 %v18410_v28, %v1210_v25 }
 0x277   : > { %v3700_v19 = vrot.slane %v3699_v32, 1  ;;  %v3706_v33 = vmax.f32 %v3704_v44, %v3705_v43  ;;  %v3768_v62 = vrot.slane %v3767_v56, 2  ;;  %v3774_v52 = vmax.f32 %v3772_v35, %v3773_v57 }
 0x278   : > { %v18506_v29 = vsel %vm4577_vm4, %v3757_v42, -inf  ;;  %v18509_v51 = vsel %vm4577_vm4, %v3764_v39, -inf  ;;  %v3781_v55 = vmax.f32 %v3779_v49, %v3780_v23  ;;  %v3787_v61 = vrot.slane %v3786_v34, 4 }
 0x279   : > { %v3687_v38 = vmax.f32 %v3685_v41, %v3686_v12  ;;  %v3707_v37 = vrot.slane %v3706_v33, 1  ;;  %v3769_v21 = vmax.f32 %v3767_v56, %v3768_v62  ;;  %v3775_v3 = vrot.slane %v3774_v52, 2 }
 0x27a   : > { %v3694_v14 = vmax.f32 %v3692_v46, %v3693_v11  ;;  %v3782_v25 = vrot.slane %v3781_v55, 2  ;;  %v3788_v2 = vmax.f32 %v3786_v34, %v3787_v61  ;;  %v1345_v18 = vmax.f32 %v1281_v4, 0.0 }
 0x27b   : > { %v3701_v1 = vmax.f32 %v3699_v32, %v3700_v19  ;;  %v3708_v44 = vmax.f32 %v3706_v33, %v3707_v37  ;;  %v3770_v43 = vrot.slane %v3769_v21, 1  ;;  %v3776_v35 = vmax.f32 %v3774_v52, %v3775_v3 }
 0x27c   : > { %v3783_v57 = vmax.f32 %v3781_v55, %v3782_v25  ;;  %v3789_v42 = vrot.slane %v3788_v2, 2  ;;  %v2001_v45 = vcombine.high %v1345_v18, %v1345_v18  ;;  %v2008_v39 = vrot.slane %v1345_v18, %v17487_v50 }
 0x27d   : > { %v18513_v49 = vsel %vm4577_vm4, %v3687_v38, -inf  ;;  %v3771_v41 = vmax.f32 %v3769_v21, %v3770_v43  ;;  %v3777_v12 = vrot.slane %v3776_v35, 1  ;;  %v1215_v46 = vmul.f32 %v18353_v5, %v18200_v30 }
 0x27e   : > { %v3784_v56 = vrot.slane %v3783_v57, 1  ;;  %v3790_v11 = vmax.f32 %v3788_v2, %v3789_v42  ;;  %v2015_v32 = vrot.slane %v2001_v45, %v17487_v50  ;;  %v2016_v23 = vcombine.high %v2008_v39, %v2008_v39 }
 0x27f   : > { %v18519_v34 = vsel %vm4577_vm4, %v3694_v14, -inf  ;;  %v18522_v4 = vsel %vm4577_vm4, %v3701_v1, -inf  ;;  %v3709_v18 = vsel %vm2784_vm3, %v2008_v39, -inf  ;;  %v1286_v19 = vadd.f32 %v18410_v28, %v1215_v46 }
 0x280   : > { %v18527_v33 = vsel %vm4577_vm4, %v3708_v44, -inf  ;;  %v3791_v62 = vrot.slane %v3790_v11, 1  ;;  %v2017_v30 = vcombine.high %v2015_v32, %v2015_v32  ;;  %v3710_v52 = vrot.slane %v3709_v18, 4 }
 0x281   : > { %v3778_v2 = vmax.f32 %v3776_v35, %v3777_v12  ;;  %v3716_v45 = vsel %vm2784_vm3, %v2016_v23, -inf  ;;  %v3723_v55 = vsel %vm2784_vm3, %v2015_v32, -inf  ;;  %v1350_v14 = vmax.f32 %v1286_v19, 0.0 }
 0x282   : > { %v3785_v61 = vmax.f32 %v3783_v57, %v3784_v56  ;;  %v18532_v1 = vsel %vm4577_vm4, %v3771_v41, -inf  ;;  %v3711_v38 = vmax.f32 %v3709_v18, %v3710_v52  ;;  %v3717_v37 = vrot.slane %v3716_v45, 4 }
 0x283   : > { %v3724_v21 = vrot.slane %v3723_v55, 4  ;;  %v3730_v3 = vsel %vm2784_vm3, %v2017_v30, -inf  ;;  %v2086_v25 = vcombine.high %v1350_v14, %v1350_v14  ;;  %v2093_v44 = vrot.slane %v1350_v14, %v17487_v50 }
 0x284   : > { %v3792_v43 = vmax.f32 %v3790_v11, %v3791_v62  ;;  %v3712_v42 = vrot.slane %v3711_v38, 2  ;;  %v3718_v35 = vmax.f32 %v3716_v45, %v3717_v37  ;;  %v3731_v39 = vrot.slane %v3730_v3, 4  ;;  %v18540_v11 = vpop.f32.mrb[48].mxu0 }
 0x285   : > { %v3725_v12 = vmax.f32 %v3723_v55, %v3724_v21  ;;  %v2100_v46 = vrot.slane %v2086_v25, %v17487_v50  ;;  %v2101_v32 = vcombine.high %v2093_v44, %v2093_v44  ;;  %v3849_v57 = vsel %vm2784_vm3, %v2093_v44, -inf }
 0x286   : > { %v3713_v41 = vmax.f32 %v3711_v38, %v3712_v42  ;;  %v3719_v56 = vrot.slane %v3718_v35, 2  ;;  %v3732_v23 = vmax.f32 %v3730_v3, %v3731_v39  ;;  %v3850_v18 = vrot.slane %v3849_v57, 4 }
 0x287   : > { %v3726_v19 = vrot.slane %v3725_v12, 2  ;;  %v2102_v52 = vcombine.high %v2100_v46, %v2100_v46  ;;  %v3856_v30 = vsel %vm2784_vm3, %v2101_v32, -inf  ;;  %v3863_v14 = vsel %vm2784_vm3, %v2100_v46, -inf }
 0x288   : > { %v3714_v62 = vrot.slane %v3713_v41, 1  ;;  %v3720_v45 = vmax.f32 %v3718_v35, %v3719_v56  ;;  %v3733_v55 = vrot.slane %v3732_v23, 2  ;;  %v3851_v37 = vmax.f32 %v3849_v57, %v3850_v18 }
 0x289   : > { %v3727_v21 = vmax.f32 %v3725_v12, %v3726_v19  ;;  %v3857_v25 = vrot.slane %v3856_v30, 4  ;;  %v3864_v36 = vrot.slane %v3863_v14, 4  ;;  %v3870_v38 = vsel %vm2784_vm3, %v2102_v52, -inf }
 0x28a   : > { %v3715_v44 = vmax.f32 %v3713_v41, %v3714_v62  ;;  %v3721_v3 = vrot.slane %v3720_v45, 1  ;;  %v3734_v42 = vmax.f32 %v3732_v23, %v3733_v55  ;;  %v3852_v39 = vrot.slane %v3851_v37, 2 }
 0x28b   : > { %v3728_v60 = vrot.slane %v3727_v21, 1  ;;  %v3858_v59 = vmax.f32 %v3856_v30, %v3857_v25  ;;  %v3865_v32 = vmax.f32 %v3863_v14, %v3864_v36  ;;  %v3871_v26 = vrot.slane %v3870_v38, 4 }
 0x28c   : > { %v18544_v46 = vsel %vm4577_vm4, %v3778_v2, -inf  ;;  %v18547_v35 = vsel %vm4577_vm4, %v3785_v61, -inf  ;;  %v3735_v57 = vrot.slane %v3734_v42, 1  ;;  %v3853_v12 = vmax.f32 %v3851_v37, %v3852_v39  ;;  %v18564_v37 = vpop.f32.mrb[49].mxu0 }
 0x28d   : > { %v3722_v56 = vmax.f32 %v3720_v45, %v3721_v3  ;;  %v3859_v18 = vrot.slane %v3858_v59, 2  ;;  %v3866_v19 = vrot.slane %v3865_v32, 2  ;;  %v3872_v52 = vmax.f32 %v3870_v38, %v3871_v26 }
 0x28e   : > { %v18550_v41 = vsel %vm4577_vm4, %v3792_v43, -inf  ;;  %v18553_v23 = vsel %vm4577_vm4, %v3715_v44, -inf  ;;  %v3854_v36 = vrot.slane %v3853_v12, 1  ;;  %v1213_v2 = vmul.f32 %v18353_v5, %v18212_v31 }
 0x28f   : > { %v18557_v30 = vmax.f32 %v3727_v21, %v3728_v60  ;;  %v3860_v61 = vmax.f32 %v3858_v59, %v3859_v18  ;;  %v3867_v14 = vmax.f32 %v3865_v32, %v3866_v19  ;;  %v3873_v62 = vrot.slane %v3872_v52, 2 }
 0x290   : > { %v18559_v55 = vmax.f32 %v3734_v42, %v3735_v57  ;;  %v3855_v45 = vmax.f32 %v3853_v12, %v3854_v36  ;;  %v1284_v26 = vadd.f32 %v18410_v28, %v1213_v2  ;;  %v1216_v43 = vmul.f32 %v18353_v5, %v18263_v0 }
 0x291   : > { %v18567_v25 = vsel %vm4577_vm4, %v3722_v56, -inf  ;;  %v3861_v38 = vrot.slane %v3860_v61, 1  ;;  %v3868_v31 = vrot.slane %v3867_v14, 1  ;;  %v3874_v60 = vmax.f32 %v3872_v52, %v3873_v62 }
 0x292   : > { %v4795_v59 = vsel %vm4577_vm4, %v3855_v45, -inf  ;;  %v1348_v21 = vmax.f32 %v1284_v26, 0.0  ;;  %v1287_v44 = vadd.f32 %v18410_v28, %v1216_v43  ;;  %v1214_v3 = vmul.f32 %v18353_v5, %v18294_v40 }
 0x293   : > { %v3862_v42 = vmax.f32 %v3860_v61, %v3861_v38  ;;  %v3869_v39 = vmax.f32 %v3867_v14, %v3868_v31  ;;  %v3875_v32 = vrot.slane %v3874_v60, 1  ;;  %v4796_v0 = vmax.f32 %v18490_v48, %v4795_v59 }
 0x294   : > { %v2052_v57 = vcombine.high %v1348_v21, %v1348_v21  ;;  %v2059_v12 = vrot.slane %v1348_v21, %v17487_v50  ;;  %v1351_v56 = vmax.f32 %v1287_v44, 0.0  ;;  %v18577_v18 = vmul.f32 %v18353_v5, %v18340_v15  ;;  %v18595_v44 = vpop.f32.mrb[50].mxu0 }
 0x295   : > { %v3876_v19 = vmax.f32 %v3874_v60, %v3875_v32  ;;  %v4798_v52 = vsel %vm4577_vm4, %v3862_v42, -inf  ;;  %v4801_v36 = vsel %vm4577_vm4, %v3869_v39, -inf  ;;  %v5034_v2 = vpack.c.bf16 %v4796_v0, %v4796_v0  ;;  %v18609_v13 = vpop.f32.mrb[51].mxu0 }
 0x296   : > { %v4799_v40 = vmax.f32 %v18495_v9, %v4798_v52  ;;  %v4802_v61 = vmax.f32 %v18506_v29, %v4801_v36  ;;  %v2066_v48 = vrot.slane %v2052_v57, %v17487_v50  ;;  %v2067_v14 = vcombine.high %v2059_v12, %v2059_v12 }
 0x297   : > { %v4804_v62 = vsel %vm4577_vm4, %v3876_v19, -inf  ;;  %v3793_v45 = vsel %vm2784_vm3, %v2059_v12, -inf  ;;  %v2103_v26 = vcombine.high %v1351_v56, %v1351_v56  ;;  %v18587_v15 = vadd.f32 %v18410_v28, %v1214_v3 }
 0x298   : > { %v18590_v43 = vmax.f32 %v18509_v51, %v4804_v62  ;;  %v5035_v38 = vpack.c.bf16 %v4799_v40, %v4799_v40  ;;  %v5036_v31 = vpack.c.bf16 %v4802_v61, %v4802_v61  ;;  %v2068_v60 = vcombine.high %v2066_v48, %v2066_v48 }
 0x299   : > { %v3794_v9 = vrot.slane %v3793_v45, 4  ;;  %v3800_v29 = vsel %vm2784_vm3, %v2067_v14, -inf  ;;  %v3807_v59 = vsel %vm2784_vm3, %v2066_v48, -inf  ;;  %v2110_v21 = vrot.slane %v1351_v56, %v17487_v50 }
 0x29a   : > { %v5290_v42 = vunpack.c.l.b16 %v5034_v2  ;;  %v5291_v39 = vunpack.c.l.b16 %v5035_v38  ;;  %v5292_v32 = vunpack.c.l.b16 %v5036_v31  ;;  %v3801_v3 = vrot.slane %v3800_v29, 4 }
 0x29b   : > { %v3795_v0 = vmax.f32 %v3793_v45, %v3794_v9  ;;  %v3808_v57 = vrot.slane %v3807_v59, 4  ;;  %v3814_v51 = vsel %vm2784_vm3, %v2068_v60, -inf  ;;  %v2117_v12 = vrot.slane %v2103_v26, %v17487_v50 }
 0x29c   : > { %v5416_v52 = vsel %vm5346_vm5, %v5291_v39, %v5290_v42  ;;  %v3802_v36 = vmax.f32 %v3800_v29, %v3801_v3  ;;  %v3815_v40 = vrot.slane %v3814_v51, 4  ;;  %v2118_v48 = vcombine.high %v2110_v21, %v2110_v21 }
 0x29d   : > { %v18603_v56 = vsel %vm5348_vm6, %v5292_v32, %v5416_v52  ;;  %v3796_v2 = vrot.slane %v3795_v0, 2  ;;  %v3809_v61 = vmax.f32 %v3807_v59, %v3808_v57  ;;  %v2119_v45 = vcombine.high %v2117_v12, %v2117_v12 }
 0x29e   : > { %v3803_v14 = vrot.slane %v3802_v36, 2  ;;  %v3816_v62 = vmax.f32 %v3814_v51, %v3815_v40  ;;  %v3877_v38 = vsel %vm2784_vm3, %v2110_v21, -inf  ;;  %v3884_v9 = vsel %vm2784_vm3, %v2118_v48, -inf }
 0x29f   : > { %v3797_v31 = vmax.f32 %v3795_v0, %v3796_v2  ;;  %v3810_v26 = vrot.slane %v3809_v61, 2  ;;  %v3878_v60 = vrot.slane %v3877_v38, 4  ;;  %v3885_v29 = vrot.slane %v3884_v9, 4 }
 0x2a0   : > { %v3804_v19 = vmax.f32 %v3802_v36, %v3803_v14  ;;  %v3817_v42 = vrot.slane %v3816_v62, 2  ;;  %v3891_v39 = vsel %vm2784_vm3, %v2117_v12, -inf  ;;  %v3898_v40 = vsel %vm2784_vm3, %v2119_v45, -inf }
 0x2a1   : > { %v3798_v32 = vrot.slane %v3797_v31, 1  ;;  %v3811_v3 = vmax.f32 %v3809_v61, %v3810_v26  ;;  %v3879_v52 = vmax.f32 %v3877_v38, %v3878_v60  ;;  %v3892_v59 = vrot.slane %v3891_v39, 4 }
 0x2a2   : > { %v3805_v57 = vrot.slane %v3804_v19, 1  ;;  %v3818_v27 = vmax.f32 %v3816_v62, %v3817_v42  ;;  %v3886_v51 = vmax.f32 %v3884_v9, %v3885_v29  ;;  %v3899_v14 = vrot.slane %v3898_v40, 4 }
 0x2a3   : > { %v3799_v21 = vmax.f32 %v3797_v31, %v3798_v32  ;;  %v3812_v0 = vrot.slane %v3811_v3, 1  ;;  %v3880_v2 = vrot.slane %v3879_v52, 2  ;;  %v3893_v22 = vmax.f32 %v3891_v39, %v3892_v59 }
 0x2a4   : > { %v3806_v63 = vmax.f32 %v3804_v19, %v3805_v57  ;;  %v3819_v48 = vrot.slane %v3818_v27, 1  ;;  %v3887_v36 = vrot.slane %v3886_v51, 2 }
 0x2a5   : > { %v3813_v12 = vmax.f32 %v3811_v3, %v3812_v0  ;;  %v4771_v61 = vsel %vm4577_vm4, %v3799_v21, -inf  ;;  %v3881_v38 = vmax.f32 %v3879_v52, %v3880_v2  ;;  %v3894_v26 = vrot.slane %v3893_v22, 2 }
 0x2a6   : > { %v3820_v60 = vmax.f32 %v3818_v27, %v3819_v48  ;;  %v4772_v62 = vmax.f32 %v18513_v49, %v4771_v61  ;;  %v4774_v45 = vsel %vm4577_vm4, %v3806_v63, -inf  ;;  %v3888_v31 = vmax.f32 %v3886_v51, %v3887_v36 }
 0x2a7   : > { %v4775_v9 = vmax.f32 %v18519_v34, %v4774_v45  ;;  %v4777_v19 = vsel %vm4577_vm4, %v3813_v12, -inf  ;;  %v3882_v42 = vrot.slane %v3881_v38, 1  ;;  %v3895_v29 = vmax.f32 %v3893_v22, %v3894_v26 }
 0x2a8   : > { %v4778_v39 = vmax.f32 %v18522_v4, %v4777_v19  ;;  %v4780_v32 = vsel %vm4577_vm4, %v3820_v60, -inf  ;;  %v5026_v3 = vpack.c.bf16 %v4772_v62, %v4772_v62  ;;  %v3889_v59 = vrot.slane %v3888_v31, 1 }
 0x2a9   : > { %v4781_v52 = vmax.f32 %v18527_v33, %v4780_v32  ;;  %v5027_v27 = vpack.c.bf16 %v4775_v9, %v4775_v9  ;;  %v3883_v57 = vmax.f32 %v3881_v38, %v3882_v42  ;;  %v3896_v49 = vrot.slane %v3895_v29, 1 }
 0x2aa   : > { %v5028_v21 = vpack.c.bf16 %v4778_v39, %v4778_v39  ;;  %v5282_v63 = vunpack.c.l.b16 %v5026_v3  ;;  %v3890_v51 = vmax.f32 %v3888_v31, %v3889_v59  ;;  %v3900_v0 = vmax.f32 %v3898_v40, %v3899_v14 }
 0x2ab   : > { %v5029_v34 = vpack.c.bf16 %v4781_v52, %v4781_v52  ;;  %v5283_v2 = vunpack.c.l.b16 %v5027_v27  ;;  %v3897_v48 = vmax.f32 %v3895_v29, %v3896_v49  ;;  %v4807_v22 = vsel %vm4577_vm4, %v3883_v57, -inf  ;;  %v18663_v29 = vpop.f32.mrb[52].mxu0 }
 0x2ac   : > { %v5284_v36 = vunpack.c.l.b16 %v5028_v21  ;;  %v3901_v4 = vrot.slane %v3900_v0, 2  ;;  %v4808_v12 = vmax.f32 %v18532_v1, %v4807_v22  ;;  %v4810_v61 = vsel %vm4577_vm4, %v3890_v51, -inf }
 0x2ad   : > { %v18624_v33 = vsel %vm4577_vm4, %v18557_v30, -inf  ;;  %v5409_v38 = vsel %vm5346_vm5, %v5283_v2, %v5282_v63  ;;  %v18628_v26 = vmax.f32 %v18544_v46, %v4810_v61  ;;  %v4813_v40 = vsel %vm4577_vm4, %v3897_v48, -inf }
 0x2ae   : > { %v18632_v14 = vsel %vm5348_vm6, %v5284_v36, %v5409_v38  ;;  %v3902_v60 = vmax.f32 %v3900_v0, %v3901_v4  ;;  %v18635_v62 = vmax.f32 %v18547_v35, %v4813_v40  ;;  %v5038_v1 = vpack.c.bf16 %v4808_v12, %v4808_v12 }
 0x2af   : > { %v18639_v45 = vsel %vm4577_vm4, %v18559_v55, -inf  ;;  %v1349_v30 = vmax.f32 %v18587_v15, 0.0  ;;  %v1290_v46 = vadd.f32 %v18410_v28, %v18577_v18  ;;  %v1217_v31 = vmul.f32 %v18353_v5, %v18346_v47  ;;  %v18656_v55 = vld [vmem:[%s23445_s2] ss:$0 sm:$0xff] }
 0x2b0   : > { %v23542_v9 = vpack.c.bf16 %v18590_v43, %v18590_v43  ;;  %v18651_v35 = vunpack.c.l.b16 %v5029_v34  ;;  %v3903_v42 = vrot.slane %v3902_v60, 1  ;;  %v1220_v15 = vmul.f32 %v18656_v55, %v18375_v7 }
 0x2b1   : > { %v2069_v47 = vcombine.high %v1349_v30, %v1349_v30  ;;  %v2076_v5 = vrot.slane %v1349_v30, %v17487_v50  ;;  %v1354_v43 = vmax.f32 %v1290_v46, 0.0  ;;  %v18669_v3 = vunpack.c.l.b16 %v5038_v1 }
 0x2b2   : > { %v18649_v19 = vunpack.c.l.b16 %v23542_v9  ;;  %v18665_v39 = vmax.f32 %v3902_v60, %v3903_v42  ;;  %v1288_v59 = vadd.f32 %v18410_v28, %v1217_v31  ;;  %v18678_v51 = vadd.f32 %v18410_v28, %v1220_v15  ;;  %v18686_v31 = vpop.f32.mrb[53].mxu0 }
 0x2b3   : > { %23543 = vst [vmem:[#allocation59_spill] sm:$0xff] %v18669_v3  ;;  %v2083_v7 = vrot.slane %v2069_v47, %v17487_v50  ;;  %v2084_v52 = vcombine.high %v2076_v5, %v2076_v5  ;;  %v3821_v27 = vsel %vm2784_vm3, %v2076_v5, -inf  ;;  %v2154_v57 = vcombine.high %v1354_v43, %v1354_v43 }
 0x2b4   : > { %v3822_v49 = vrot.slane %v3821_v27, 4  ;;  %v2161_v21 = vrot.slane %v1354_v43, %v17487_v50  ;;  %v18675_v63 = vmax.f32 %v1288_v59, 0.0 }
 0x2b5   : > { %v2085_v0 = vcombine.high %v2083_v7, %v2083_v7  ;;  %v3828_v34 = vsel %vm2784_vm3, %v2084_v52, -inf  ;;  %v3835_v2 = vsel %vm2784_vm3, %v2083_v7, -inf  ;;  %v2168_v48 = vrot.slane %v2154_v57, %v17487_v50 }
 0x2b6   : > { %v3823_v22 = vmax.f32 %v3821_v27, %v3822_v49  ;;  %v3829_v36 = vrot.slane %v3828_v34, 4  ;;  %v3836_v4 = vrot.slane %v3835_v2, 4  ;;  %v2169_v12 = vcombine.high %v2161_v21, %v2161_v21 }
 0x2b7   : > { %v3842_v61 = vsel %vm2784_vm3, %v2085_v0, -inf  ;;  %v2170_v38 = vcombine.high %v2168_v48, %v2168_v48  ;;  %v3961_v40 = vsel %vm2784_vm3, %v2161_v21, -inf  ;;  %v3975_v60 = vsel %vm2784_vm3, %v2168_v48, -inf }
 0x2b8   : > { %v3824_v28 = vrot.slane %v3823_v22, 2  ;;  %v3830_v1 = vmax.f32 %v3828_v34, %v3829_v36  ;;  %v3837_v30 = vmax.f32 %v3835_v2, %v3836_v4  ;;  %v3843_v46 = vrot.slane %v3842_v61, 4 }
 0x2b9   : > { %v3962_v9 = vrot.slane %v3961_v40, 4  ;;  %v3968_v42 = vsel %vm2784_vm3, %v2169_v12, -inf  ;;  %v3976_v15 = vrot.slane %v3975_v60, 4  ;;  %v3982_v47 = vsel %vm2784_vm3, %v2170_v38, -inf }
 0x2ba   : > { %v3825_v5 = vmax.f32 %v3823_v22, %v3824_v28  ;;  %v3831_v43 = vrot.slane %v3830_v1, 2  ;;  %v3838_v59 = vrot.slane %v3837_v30, 2  ;;  %v3844_v7 = vmax.f32 %v3842_v61, %v3843_v46 }
 0x2bb   : > { %v3963_v52 = vmax.f32 %v3961_v40, %v3962_v9  ;;  %v3969_v27 = vrot.slane %v3968_v42, 4  ;;  %v3977_v57 = vmax.f32 %v3975_v60, %v3976_v15  ;;  %v3983_v49 = vrot.slane %v3982_v47, 4 }
 0x2bc   : > { %v3826_v21 = vrot.slane %v3825_v5, 1  ;;  %v3832_v0 = vmax.f32 %v3830_v1, %v3831_v43  ;;  %v3839_v34 = vmax.f32 %v3837_v30, %v3838_v59  ;;  %v3845_v2 = vrot.slane %v3844_v7, 2 }
 0x2bd   : > { %v3964_v48 = vrot.slane %v3963_v52, 2  ;;  %v3970_v36 = vmax.f32 %v3968_v42, %v3969_v27  ;;  %v3978_v4 = vrot.slane %v3977_v57, 2  ;;  %v3984_v32 = vmax.f32 %v3982_v47, %v3983_v49 }
 0x2be   : > { %v3827_v12 = vmax.f32 %v3825_v5, %v3826_v21  ;;  %v3833_v18 = vrot.slane %v3832_v0, 1  ;;  %v3840_v53 = vrot.slane %v3839_v34, 1  ;;  %v3846_v38 = vmax.f32 %v3844_v7, %v3845_v2  ;;  %v18694_v7 = vpop.f32.mrb[54].mxu0 }
 0x2bf   : > { %v3965_v22 = vmax.f32 %v3963_v52, %v3964_v48  ;;  %v3971_v28 = vrot.slane %v3970_v36, 2  ;;  %v3979_v8 = vmax.f32 %v3977_v57, %v3978_v4  ;;  %v3985_v61 = vrot.slane %v3984_v32, 2 }
 0x2c0   : > { %v3834_v40 = vmax.f32 %v3832_v0, %v3833_v18  ;;  %v3841_v46 = vmax.f32 %v3839_v34, %v3840_v53  ;;  %v3847_v60 = vrot.slane %v3846_v38, 1  ;;  %v4783_v9 = vsel %vm4577_vm4, %v3827_v12, -inf }
 0x2c1   : > { %v4784_v1 = vmax.f32 %v18553_v23, %v4783_v9  ;;  %v3966_v30 = vrot.slane %v3965_v22, 1  ;;  %v3972_v15 = vmax.f32 %v3970_v36, %v3971_v28  ;;  %v3980_v42 = vrot.slane %v3979_v8, 1 }
 0x2c2   : > { %v3848_v43 = vmax.f32 %v3846_v38, %v3847_v60  ;;  %v4786_v47 = vsel %vm4577_vm4, %v3834_v40, -inf  ;;  %v4789_v5 = vsel %vm4577_vm4, %v3841_v46, -inf  ;;  %v3986_v59 = vmax.f32 %v3984_v32, %v3985_v61 }
 0x2c3   : > { %v4787_v52 = vmax.f32 %v18567_v25, %v4786_v47  ;;  %v18698_v53 = vmax.f32 %v18624_v33, %v4789_v5  ;;  %v5030_v18 = vpack.c.bf16 %v4784_v1, %v4784_v1  ;;  %v3967_v27 = vmax.f32 %v3965_v22, %v3966_v30  ;;  %v18747_v30 = vld [vmem:[%s23446_s3] ss:$0 sm:$0xff] }
 0x2c4   : > { %v23544_v23 = vpack.c.bf16 %v18628_v26, %v18628_v26  ;;  %v3973_v49 = vrot.slane %v3972_v15, 1  ;;  %v3981_v21 = vmax.f32 %v3979_v8, %v3980_v42  ;;  %v3987_v0 = vrot.slane %v3986_v59, 1 }
 0x2c5   : > { %v18707_v32 = vsel %vm4577_vm4, %v18665_v39, -inf  ;;  %v23546_v25 = vpack.c.bf16 %v18635_v62, %v18635_v62  ;;  %v18715_v33 = vsel %vm4577_vm4, %v3848_v43, -inf  ;;  %v5031_v2 = vpack.c.bf16 %v4787_v52, %v4787_v52 }
 0x2c6   : > { %v18703_v57 = vunpack.c.l.b16 %v23544_v23  ;;  %v18719_v48 = vunpack.c.l.b16 %v5030_v18  ;;  %v18722_v8 = vsel %vm4577_vm4, %v3967_v27, -inf  ;;  %v2120_v39 = vcombine.high %v18675_v63, %v18675_v63 }
 0x2c7   : > { %v18712_v34 = vunpack.c.l.b16 %v23546_v25  ;;  %v18726_v36 = vmax.f32 %v3972_v15, %v3973_v49  ;;  %v18728_v62 = vmax.f32 %v3986_v59, %v3987_v0  ;;  %v2127_v4 = vrot.slane %v18675_v63, %v17487_v50 }
 0x2c8   : > { %23545 = vst [vmem:[#allocation60_spill] sm:$0xff] %v18703_v57  ;;  %23548 = vst [vmem:[#allocation62_spill] sm:$0xff] %v18719_v48  ;;  %v1355_v12 = vmax.f32 %v18678_v51, 0.0  ;;  %v18733_v38 = vunpack.c.l.b16 %v5031_v2  ;;  %v18736_v22 = vsel %vm4577_vm4, %v3981_v21, -inf  ;;  %v2134_v28 = vrot.slane %v2120_v39, %v17487_v50 }
 0x2c9   : > { %23547 = vst [vmem:[#allocation61_spill] sm:$0xff] %v18712_v34  ;;  %v1218_v61 = vmul.f32 %v18656_v55, %v18389_v6  ;;  %v2135_v40 = vcombine.high %v2127_v4, %v2127_v4  ;;  %v3905_v46 = vsel %vm2784_vm3, %v2127_v4, -inf }
 0x2ca   : > { %23549 = vst [vmem:[#allocation63_spill] sm:$0xff] %v18733_v38  ;;  %v2171_v60 = vcombine.high %v1355_v12, %v1355_v12  ;;  %v2178_v9 = vrot.slane %v1355_v12, %v17487_v50  ;;  %v2136_v1 = vcombine.high %v2134_v28, %v2134_v28  ;;  %v3906_v63 = vrot.slane %v3905_v46, 4 }
 0x2cb   : > { %v3919_v51 = vsel %vm2784_vm3, %v2134_v28, -inf  ;;  %v1289_v15 = vadd.f32 %v18747_v30, %v1218_v61  ;;  %v3912_v42 = vsel %vm2784_vm3, %v2135_v40, -inf }
 0x2cc   : > { %v3920_v6 = vrot.slane %v3919_v51, 4  ;;  %v2185_v43 = vrot.slane %v2171_v60, %v17487_v50  ;;  %v2186_v47 = vcombine.high %v2178_v9, %v2178_v9  ;;  %v3907_v5 = vmax.f32 %v3905_v46, %v3906_v63 }
 0x2cd   : > { %v3913_v59 = vrot.slane %v3912_v42, 4  ;;  %v3926_v52 = vsel %vm2784_vm3, %v2136_v1, -inf  ;;  %v3989_v18 = vsel %vm2784_vm3, %v2178_v9, -inf }
 0x2ce   : > { %v3921_v27 = vmax.f32 %v3919_v51, %v3920_v6  ;;  %v3927_v23 = vrot.slane %v3926_v52, 4  ;;  %v2187_v49 = vcombine.high %v2185_v43, %v2185_v43  ;;  %v3990_v21 = vrot.slane %v3989_v18, 4 }
 0x2cf   : > { %v3908_v0 = vrot.slane %v3907_v5, 2  ;;  %v3914_v25 = vmax.f32 %v3912_v42, %v3913_v59  ;;  %v3996_v2 = vsel %vm2784_vm3, %v2186_v47, -inf  ;;  %v4003_v39 = vsel %vm2784_vm3, %v2185_v43, -inf  ;;  %v18757_v47 = vpop.f32.mrb[55].mxu0 }
 0x2d0   : > { %v3922_v4 = vrot.slane %v3921_v27, 2  ;;  %v3928_v12 = vmax.f32 %v3926_v52, %v3927_v23  ;;  %v3991_v28 = vmax.f32 %v3989_v18, %v3990_v21  ;;  %v3997_v61 = vrot.slane %v3996_v2, 4 }
 0x2d1   : > { %v3909_v40 = vmax.f32 %v3907_v5, %v3908_v0  ;;  %v3915_v46 = vrot.slane %v3914_v25, 2  ;;  %v4004_v60 = vrot.slane %v4003_v39, 4  ;;  %v4010_v1 = vsel %vm2784_vm3, %v2187_v49, -inf }
 0x2d2   : > { %v3923_v9 = vmax.f32 %v3921_v27, %v3922_v4  ;;  %v3929_v63 = vrot.slane %v3928_v12, 2  ;;  %v3992_v51 = vrot.slane %v3991_v28, 2  ;;  %v3998_v6 = vmax.f32 %v3996_v2, %v3997_v61 }
 0x2d3   : > { %v3910_v26 = vrot.slane %v3909_v40, 1  ;;  %v3916_v10 = vmax.f32 %v3914_v25, %v3915_v46  ;;  %v4005_v42 = vmax.f32 %v4003_v39, %v4004_v60  ;;  %v4011_v59 = vrot.slane %v4010_v1, 4 }
 0x2d4   : > { %v3924_v43 = vrot.slane %v3923_v9, 1  ;;  %v3930_v24 = vmax.f32 %v3928_v12, %v3929_v63  ;;  %v3993_v52 = vmax.f32 %v3991_v28, %v3992_v51  ;;  %v3999_v18 = vrot.slane %v3998_v6, 2 }
 0x2d5   : > { %v3911_v23 = vmax.f32 %v3909_v40, %v3910_v26  ;;  %v3917_v5 = vrot.slane %v3916_v10, 1  ;;  %v4006_v21 = vrot.slane %v4005_v42, 2  ;;  %v4012_v0 = vmax.f32 %v4010_v1, %v4011_v59 }
 0x2d6   : > { %v3925_v16 = vmax.f32 %v3923_v9, %v3924_v43  ;;  %v3931_v49 = vrot.slane %v3930_v24, 1  ;;  %v3994_v27 = vrot.slane %v3993_v52, 1  ;;  %v4000_v4 = vmax.f32 %v3998_v6, %v3999_v18 }
 0x2d7   : > { %v23550_v2 = vpack.c.bf16 %v18698_v53, %v18698_v53  ;;  %v3918_v39 = vmax.f32 %v3916_v10, %v3917_v5  ;;  %v4007_v61 = vmax.f32 %v4005_v42, %v4006_v21  ;;  %v4013_v46 = vrot.slane %v4012_v0, 2 }
 0x2d8   : > { %v18766_v12 = vsel %vm4577_vm4, %v18726_v36, -inf  ;;  %v3932_v26 = vmax.f32 %v3930_v24, %v3931_v49  ;;  %v3995_v28 = vmax.f32 %v3993_v52, %v3994_v27  ;;  %v4001_v40 = vrot.slane %v4000_v4, 1 }
 0x2d9   : > { %v18762_v25 = vunpack.c.l.b16 %v23550_v2  ;;  %v18770_v60 = vsel %vm4577_vm4, %v18728_v62, -inf  ;;  %v4008_v1 = vrot.slane %v4007_v61, 1  ;;  %v4014_v9 = vmax.f32 %v4012_v0, %v4013_v46 }
 0x2da   : > { %v1353_v63 = vmax.f32 %v1289_v15, 0.0  ;;  %v18773_v53 = vsel %vm4577_vm4, %v3911_v23, -inf  ;;  %v18776_v10 = vsel %vm4577_vm4, %v3925_v16, -inf  ;;  %v4002_v51 = vmax.f32 %v4000_v4, %v4001_v40 }
 0x2db   : > { %23551 = vst [vmem:[#allocation64_spill] sm:$0xff] %v18762_v25  ;;  %v1223_v36 = vmul.f32 %v18656_v55, %v18442_v54  ;;  %v18781_v24 = vsel %vm4577_vm4, %v3918_v39, -inf  ;;  %v4015_v6 = vrot.slane %v4014_v9, 1  ;;  %v18785_v59 = vsel %vm4577_vm4, %v3932_v26, -inf  ;;  %v18812_v25 = vpop.f32.mrb[56].mxu0 }
 0x2dc   : > { %v2137_v42 = vcombine.high %v1353_v63, %v1353_v63  ;;  %v2144_v62 = vrot.slane %v1353_v63, %v17487_v50  ;;  %v18788_v15 = vsel %vm4577_vm4, %v3995_v28, -inf  ;;  %v1221_v43 = vmul.f32 %v18656_v55, %v18449_v17 }
 0x2dd   : > { %v1294_v16 = vadd.f32 %v18747_v30, %v1223_v36  ;;  %v4009_v52 = vmax.f32 %v4007_v61, %v4008_v1  ;;  %v18794_v54 = vsel %vm4577_vm4, %v4002_v51, -inf  ;;  %v4016_v5 = vmax.f32 %v4014_v9, %v4015_v6 }
 0x2de   : > { %v2151_v18 = vrot.slane %v2137_v42, %v17487_v50  ;;  %v2152_v23 = vcombine.high %v2144_v62, %v2144_v62  ;;  %v3933_v21 = vsel %vm2784_vm3, %v2144_v62, -inf  ;;  %v1224_v49 = vmul.f32 %v18656_v55, %v18476_v58 }
 0x2df   : > { %v1358_v0 = vmax.f32 %v1294_v16, 0.0  ;;  %v3934_v4 = vrot.slane %v3933_v21, 4  ;;  %v1292_v17 = vadd.f32 %v18747_v30, %v1221_v43  ;;  %v18805_v28 = vsel %vm4577_vm4, %v4009_v52, -inf }
 0x2e0   : > { %v2153_v27 = vcombine.high %v2151_v18, %v2151_v18  ;;  %v3940_v2 = vsel %vm2784_vm3, %v2152_v23, -inf  ;;  %v3947_v61 = vsel %vm2784_vm3, %v2151_v18, -inf }
 0x2e1   : > { %v3941_v39 = vrot.slane %v3940_v2, 4  ;;  %v2222_v46 = vcombine.high %v1358_v0, %v1358_v0  ;;  %v2229_v26 = vrot.slane %v1358_v0, %v17487_v50  ;;  %v3935_v40 = vmax.f32 %v3933_v21, %v3934_v4 }
 0x2e2   : > { %v3948_v1 = vrot.slane %v3947_v61, 4  ;;  %v3954_v9 = vsel %vm2784_vm3, %v2153_v27, -inf  ;;  %v1356_v16 = vmax.f32 %v1292_v17, 0.0 }
 0x2e3   : > { %v3942_v58 = vmax.f32 %v3940_v2, %v3941_v39  ;;  %v3955_v63 = vrot.slane %v3954_v9, 4  ;;  %v2236_v51 = vrot.slane %v2222_v46, %v17487_v50  ;;  %v2237_v36 = vcombine.high %v2229_v26, %v2229_v26 }
 0x2e4   : > { %v3936_v6 = vrot.slane %v3935_v40, 2  ;;  %v3949_v42 = vmax.f32 %v3947_v61, %v3948_v1  ;;  %v4073_v62 = vsel %vm2784_vm3, %v2229_v26, -inf }
 0x2e5   : > { %v3943_v43 = vrot.slane %v3942_v58, 2  ;;  %v3956_v18 = vmax.f32 %v3954_v9, %v3955_v63  ;;  %v2238_v23 = vcombine.high %v2236_v51, %v2236_v51  ;;  %v4074_v0 = vrot.slane %v4073_v62, 4 }
 0x2e6   : > { %v3937_v52 = vmax.f32 %v3935_v40, %v3936_v6  ;;  %v3950_v34 = vrot.slane %v3949_v42, 2  ;;  %v4080_v21 = vsel %vm2784_vm3, %v2237_v36, -inf  ;;  %v4087_v27 = vsel %vm2784_vm3, %v2236_v51, -inf }
 0x2e7   : > { %v3944_v4 = vmax.f32 %v3942_v58, %v3943_v43  ;;  %v3957_v2 = vrot.slane %v3956_v18, 2  ;;  %v4075_v39 = vmax.f32 %v4073_v62, %v4074_v0  ;;  %v4081_v46 = vrot.slane %v4080_v21, 4 }
 0x2e8   : > { %v3938_v61 = vrot.slane %v3937_v52, 1  ;;  %v3951_v1 = vmax.f32 %v3949_v42, %v3950_v34  ;;  %v4088_v26 = vrot.slane %v4087_v27, 4  ;;  %v4094_v17 = vsel %vm2784_vm3, %v2238_v23, -inf  ;;  %v18819_v23 = vpop.f32.mrb[57].mxu0 }
 0x2e9   : > { %v3945_v9 = vrot.slane %v3944_v4, 1  ;;  %v3958_v63 = vmax.f32 %v3956_v18, %v3957_v2  ;;  %v4076_v57 = vrot.slane %v4075_v39, 2  ;;  %v4082_v40 = vmax.f32 %v4080_v21, %v4081_v46 }
 0x2ea   : > { %v3939_v6 = vmax.f32 %v3937_v52, %v3938_v61  ;;  %v3952_v38 = vrot.slane %v3951_v1, 1  ;;  %v4089_v36 = vmax.f32 %v4087_v27, %v4088_v26  ;;  %v4095_v3 = vrot.slane %v4094_v17, 4 }
 0x2eb   : > { %v3959_v51 = vrot.slane %v3958_v63, 1  ;;  %v4077_v58 = vmax.f32 %v4075_v39, %v4076_v57  ;;  %v4083_v43 = vrot.slane %v4082_v40, 2  ;;  %v2188_v62 = vcombine.high %v1356_v16, %v1356_v16 }
 0x2ec   : > { %v18816_v0 = vsel %vm4577_vm4, %v4016_v5, -inf  ;;  %v4090_v48 = vrot.slane %v4089_v36, 2  ;;  %v4096_v34 = vmax.f32 %v4094_v17, %v4095_v3  ;;  %v1295_v42 = vadd.f32 %v18747_v30, %v1224_v49 }
 0x2ed   : > { %23552 = vst [vmem:[#allocation65_spill] sm:$0xff] %v18816_v0  ;;  %v3946_v18 = vmax.f32 %v3944_v4, %v3945_v9  ;;  %v3953_v2 = vmax.f32 %v3951_v1, %v3952_v38  ;;  %v4078_v21 = vrot.slane %v4077_v58, 1  ;;  %v4084_v52 = vmax.f32 %v4082_v40, %v4083_v43 }
 0x2ee   : > { %v18822_v27 = vsel %vm4577_vm4, %v3939_v6, -inf  ;;  %v4091_v46 = vmax.f32 %v4089_v36, %v4090_v48  ;;  %v4097_v57 = vrot.slane %v4096_v34, 2  ;;  %v2195_v39 = vrot.slane %v1356_v16, %v17487_v50 }
 0x2ef   : > { %v18825_v61 = vmax.f32 %v3958_v63, %v3959_v51  ;;  %v4079_v5 = vmax.f32 %v4077_v58, %v4078_v21  ;;  %v4085_v26 = vrot.slane %v4084_v52, 1  ;;  %v2202_v3 = vrot.slane %v2188_v62, %v17487_v50 }
 0x2f0   : > { %v4092_v49 = vrot.slane %v4091_v46, 1  ;;  %v4098_v17 = vmax.f32 %v4096_v34, %v4097_v57  ;;  %v2203_v0 = vcombine.high %v2195_v39, %v2195_v39  ;;  %v4017_v38 = vsel %vm2784_vm3, %v2195_v39, -inf }
 0x2f1   : > { %v4086_v4 = vmax.f32 %v4084_v52, %v4085_v26  ;;  %v4843_v1 = vsel %vm4577_vm4, %v4079_v5, -inf  ;;  %v2204_v9 = vcombine.high %v2202_v3, %v2202_v3  ;;  %v4018_v40 = vrot.slane %v4017_v38, 4 }
 0x2f2   : > { %v4093_v48 = vmax.f32 %v4091_v46, %v4092_v49  ;;  %v4099_v6 = vrot.slane %v4098_v17, 1  ;;  %v4844_v16 = vmax.f32 %v18722_v8, %v4843_v1  ;;  %v4024_v63 = vsel %vm2784_vm3, %v2203_v0, -inf }
 0x2f3   : > { %v4846_v36 = vsel %vm4577_vm4, %v4086_v4, -inf  ;;  %v4019_v51 = vmax.f32 %v4017_v38, %v4018_v40  ;;  %v4025_v58 = vrot.slane %v4024_v63, 4  ;;  %v4031_v43 = vsel %vm2784_vm3, %v2202_v3, -inf }
 0x2f4   : > { %v4100_v62 = vmax.f32 %v4098_v17, %v4099_v6  ;;  %v4847_v34 = vmax.f32 %v18766_v12, %v4846_v36  ;;  %v4849_v21 = vsel %vm4577_vm4, %v4093_v48, -inf  ;;  %v5050_v52 = vpack.c.bf16 %v4844_v16, %v4844_v16 }
 0x2f5   : > { %v4850_v57 = vmax.f32 %v18736_v22, %v4849_v21  ;;  %v4020_v46 = vrot.slane %v4019_v51, 2  ;;  %v4026_v39 = vmax.f32 %v4024_v63, %v4025_v58  ;;  %v4032_v5 = vrot.slane %v4031_v43, 4  ;;  %v18842_v22 = vpop.f32.mrb[58].mxu0 }
 0x2f6   : > { %v4852_v8 = vsel %vm4577_vm4, %v4100_v62, -inf  ;;  %v5051_v0 = vpack.c.bf16 %v4847_v34, %v4847_v34  ;;  %v5306_v26 = vunpack.c.l.b16 %v5050_v52  ;;  %v4038_v49 = vsel %vm2784_vm3, %v2204_v9, -inf }
 0x2f7   : > { %v18840_v38 = vmax.f32 %v18770_v60, %v4852_v8  ;;  %v5052_v3 = vpack.c.bf16 %v4850_v57, %v4850_v57  ;;  %v4021_v17 = vmax.f32 %v4019_v51, %v4020_v46  ;;  %v4027_v12 = vrot.slane %v4026_v39, 2 }
 0x2f8   : > { %v5307_v4 = vunpack.c.l.b16 %v5051_v0  ;;  %v4033_v1 = vmax.f32 %v4031_v43, %v4032_v5  ;;  %v4039_v40 = vrot.slane %v4038_v49, 4  ;;  %v1359_v48 = vmax.f32 %v1295_v42, 0.0 }
 0x2f9   : > { %v18845_v6 = vsel %vm4577_vm4, %v3946_v18, -inf  ;;  %v5308_v16 = vunpack.c.l.b16 %v5052_v3  ;;  %v4022_v63 = vrot.slane %v4021_v17, 1  ;;  %v4028_v36 = vmax.f32 %v4026_v39, %v4027_v12 }
 0x2fa   : > { %v5430_v9 = vsel %vm5346_vm5, %v5307_v4, %v5306_v26  ;;  %v4034_v58 = vrot.slane %v4033_v1, 2  ;;  %v4040_v60 = vmax.f32 %v4038_v49, %v4039_v40  ;;  %v2239_v62 = vcombine.high %v1359_v48, %v1359_v48 }
 0x2fb   : > { %v18849_v51 = vsel %vm4577_vm4, %v3953_v2, -inf  ;;  %v18852_v43 = vsel %vm5348_vm6, %v5308_v16, %v5430_v9  ;;  %v4023_v42 = vmax.f32 %v4021_v17, %v4022_v63  ;;  %v4029_v34 = vrot.slane %v4028_v36, 1  ;;  %v18866_v63 = vpop.f32.mrb[59].mxu0 }
 0x2fc   : > { %23553 = vst [vmem:[#allocation66_spill] sm:$0xff] %v18852_v43  ;;  %v4035_v21 = vmax.f32 %v4033_v1, %v4034_v58  ;;  %v4041_v52 = vrot.slane %v4040_v60, 2  ;;  %v2246_v18 = vrot.slane %v1359_v48, %v17487_v50  ;;  %v2253_v57 = vrot.slane %v2239_v62, %v17487_v50 }
 0x2fd   : > { %v5053_v46 = vpack.c.bf16 %v18840_v38, %v18840_v38  ;;  %v4030_v39 = vmax.f32 %v4028_v36, %v4029_v34  ;;  %v4819_v5 = vsel %vm4577_vm4, %v4023_v42, -inf  ;;  %v1222_v2 = vmul.f32 %v18656_v55, %v18503_v20 }
 0x2fe   : > { %v4036_v8 = vrot.slane %v4035_v21, 1  ;;  %v4042_v0 = vmax.f32 %v4040_v60, %v4041_v52  ;;  %v4820_v26 = vmax.f32 %v18773_v53, %v4819_v5  ;;  %v2254_v49 = vcombine.high %v2246_v18, %v2246_v18 }
 0x2ff   : > { %v4822_v3 = vsel %vm4577_vm4, %v4030_v39, -inf  ;;  %v2255_v17 = vcombine.high %v2253_v57, %v2253_v57  ;;  %v4101_v12 = vsel %vm2784_vm3, %v2246_v18, -inf  ;;  %v4115_v4 = vsel %vm2784_vm3, %v2253_v57, -inf }
 0x300   : > { %v4037_v1 = vmax.f32 %v4035_v21, %v4036_v8  ;;  %v4043_v40 = vrot.slane %v4042_v0, 1  ;;  %v4823_v48 = vmax.f32 %v18781_v24, %v4822_v3  ;;  %v5042_v16 = vpack.c.bf16 %v4820_v26, %v4820_v26 }
 0x301   : > { %v4102_v20 = vrot.slane %v4101_v12, 4  ;;  %v4108_v36 = vsel %vm2784_vm3, %v2254_v49, -inf  ;;  %v4116_v9 = vrot.slane %v4115_v4, 4  ;;  %v4122_v53 = vsel %vm2784_vm3, %v2255_v17, -inf }
 0x302   : > { %v4044_v58 = vmax.f32 %v4042_v0, %v4043_v40  ;;  %v4825_v60 = vsel %vm4577_vm4, %v4037_v1, -inf  ;;  %v5043_v62 = vpack.c.bf16 %v4823_v48, %v4823_v48  ;;  %v5298_v42 = vunpack.c.l.b16 %v5042_v16 }
 0x303   : > { %v4826_v34 = vmax.f32 %v18776_v10, %v4825_v60  ;;  %v4103_v21 = vmax.f32 %v4101_v12, %v4102_v20  ;;  %v4109_v52 = vrot.slane %v4108_v36, 4  ;;  %v4117_v18 = vmax.f32 %v4115_v4, %v4116_v9 }
 0x304   : > { %v4828_v24 = vsel %vm4577_vm4, %v4044_v58, -inf  ;;  %v5299_v57 = vunpack.c.l.b16 %v5043_v62  ;;  %v4123_v39 = vrot.slane %v4122_v53, 4  ;;  %v1293_v5 = vadd.f32 %v18747_v30, %v1222_v2 }
 0x305   : > { %v4829_v8 = vmax.f32 %v18785_v59, %v4828_v24  ;;  %v5044_v26 = vpack.c.bf16 %v4826_v34, %v4826_v34  ;;  %v4104_v49 = vrot.slane %v4103_v21, 2  ;;  %v4110_v0 = vmax.f32 %v4108_v36, %v4109_v52 }
 0x306   : > { %v5423_v3 = vsel %vm5346_vm5, %v5299_v57, %v5298_v42  ;;  %v4118_v17 = vrot.slane %v4117_v18, 2  ;;  %v4124_v1 = vmax.f32 %v4122_v53, %v4123_v39  ;;  %v1357_v40 = vmax.f32 %v1293_v5, 0.0 }
 0x307   : > { %v5300_v10 = vunpack.c.l.b16 %v5044_v26  ;;  %v4105_v12 = vmax.f32 %v4103_v21, %v4104_v49  ;;  %v4111_v48 = vrot.slane %v4110_v0, 2  ;;  %v1227_v4 = vmul.f32 %v18656_v55, %v18540_v11 }
 0x308   : > { %v4119_v16 = vmax.f32 %v4117_v18, %v4118_v17  ;;  %v4125_v20 = vrot.slane %v4124_v1, 2  ;;  %v2205_v9 = vcombine.high %v1357_v40, %v1357_v40  ;;  %v2212_v2 = vrot.slane %v1357_v40, %v17487_v50 }
 0x309   : > { %v5045_v59 = vpack.c.bf16 %v4829_v8, %v4829_v8  ;;  %v18880_v58 = vsel %vm5348_vm6, %v5300_v10, %v5423_v3  ;;  %v4106_v36 = vrot.slane %v4105_v12, 1  ;;  %v4112_v60 = vmax.f32 %v4110_v0, %v4111_v48 }
 0x30a   : > { %23554 = vst [vmem:[#allocation67_spill] sm:$0xff] %v18880_v58  ;;  %v4120_v62 = vrot.slane %v4119_v16, 1  ;;  %v4126_v53 = vmax.f32 %v4124_v1, %v4125_v20  ;;  %v2219_v42 = vrot.slane %v2205_v9, %v17487_v50  ;;  %v2220_v34 = vcombine.high %v2212_v2, %v2212_v2 }
 0x30b   : > { %v4107_v21 = vmax.f32 %v4105_v12, %v4106_v36  ;;  %v4113_v52 = vrot.slane %v4112_v60, 1  ;;  %v4045_v11 = vsel %vm2784_vm3, %v2212_v2, -inf  ;;  %v1298_v18 = vadd.f32 %v18747_v30, %v1227_v4 }
 0x30c   : > { %v4121_v24 = vmax.f32 %v4119_v16, %v4120_v62  ;;  %v4127_v57 = vrot.slane %v4126_v53, 1  ;;  %v2221_v39 = vcombine.high %v2219_v42, %v2219_v42  ;;  %v4046_v5 = vrot.slane %v4045_v11, 4 }
 0x30d   : > { %v4114_v8 = vmax.f32 %v4112_v60, %v4113_v52  ;;  %v4855_v26 = vsel %vm4577_vm4, %v4107_v21, -inf  ;;  %v4052_v49 = vsel %vm2784_vm3, %v2220_v34, -inf  ;;  %v4059_v0 = vsel %vm2784_vm3, %v2219_v42, -inf }
 0x30e   : > { %v4128_v3 = vmax.f32 %v4126_v53, %v4127_v57  ;;  %v4856_v17 = vmax.f32 %v18788_v15, %v4855_v26  ;;  %v4861_v1 = vsel %vm4577_vm4, %v4121_v24, -inf  ;;  %v4047_v40 = vmax.f32 %v4045_v11, %v4046_v5 }
 0x30f   : > { %v4858_v10 = vsel %vm4577_vm4, %v4114_v8, -inf  ;;  %v4862_v12 = vmax.f32 %v18805_v28, %v4861_v1  ;;  %v4053_v48 = vrot.slane %v4052_v49, 4  ;;  %v4060_v4 = vrot.slane %v4059_v0, 4 }
 0x310   : > { %v18894_v16 = vsel %vm4577_vm4, %v18825_v61, -inf  ;;  %v18899_v20 = vunpack.c.l.b16 %v5053_v46  ;;  %v4859_v15 = vmax.f32 %v18794_v54, %v4858_v10  ;;  %v4048_v9 = vrot.slane %v4047_v40, 2 }
 0x311   : > { %23555 = vst [vmem:[#allocation68_spill] sm:$0xff] %v18894_v16  ;;  %v18902_v2 = vunpack.c.l.b16 %v5045_v59  ;;  %v4054_v36 = vmax.f32 %v4052_v49, %v4053_v48  ;;  %v4061_v60 = vmax.f32 %v4059_v0, %v4060_v4  ;;  %v4066_v28 = vsel %vm2784_vm3, %v2221_v39, -inf }
 0x312   : > { %23556 = vst [vmem:[#allocation69_spill] sm:$0xff] %v18899_v20  ;;  %v18906_v62 = vsel %vm4577_vm4, %v4128_v3, -inf  ;;  %v5054_v53 = vpack.c.bf16 %v4856_v17, %v4856_v17  ;;  %v4049_v61 = vmax.f32 %v4047_v40, %v4048_v9  ;;  %v4067_v42 = vrot.slane %v4066_v28, 4 }
 0x313   : > { %23557 = vst [vmem:[#allocation70_spill] sm:$0xff] %v18902_v2  ;;  %23558 = vst [vmem:[#allocation71_spill] sm:$0xff] %v18906_v62  ;;  %v5056_v34 = vpack.c.bf16 %v4862_v12, %v4862_v12  ;;  %v4055_v21 = vrot.slane %v4054_v36, 2  ;;  %v4062_v38 = vrot.slane %v4061_v60, 2  ;;  %v1362_v46 = vmax.f32 %v1298_v18, 0.0 }
 0x314   : > { %v5055_v52 = vpack.c.bf16 %v4859_v15, %v4859_v15  ;;  %v4050_v11 = vrot.slane %v4049_v61, 1  ;;  %v4068_v54 = vmax.f32 %v4066_v28, %v4067_v42  ;;  %v1225_v59 = vmul.f32 %v18656_v55, %v18564_v37 }
 0x315   : > { %v4056_v24 = vmax.f32 %v4054_v36, %v4055_v21  ;;  %v4063_v57 = vmax.f32 %v4061_v60, %v4062_v38  ;;  %v2290_v5 = vcombine.high %v1362_v46, %v1362_v46  ;;  %v2297_v39 = vrot.slane %v1362_v46, %v17487_v50 }
 0x316   : > { %v18911_v8 = vunpack.c.l.b16 %v5054_v53  ;;  %v4051_v26 = vmax.f32 %v4049_v61, %v4050_v11  ;;  %v4069_v49 = vrot.slane %v4068_v54, 2  ;;  %v1296_v0 = vadd.f32 %v18747_v30, %v1225_v59 }
 0x317   : > { %v4057_v3 = vrot.slane %v4056_v24, 1  ;;  %v4064_v17 = vrot.slane %v4063_v57, 1  ;;  %v2304_v18 = vrot.slane %v2290_v5, %v17487_v50  ;;  %v2305_v1 = vcombine.high %v2297_v39, %v2297_v39 }
 0x318   : > { %23559 = vst [vmem:[#allocation72_spill] sm:$0xff] %v18911_v8  ;;  %v4070_v40 = vmax.f32 %v4068_v54, %v4069_v49  ;;  %v4831_v10 = vsel %vm4577_vm4, %v4051_v26, -inf  ;;  %v4185_v37 = vsel %vm2784_vm3, %v2297_v39, -inf  ;;  %v1360_v12 = vmax.f32 %v1296_v0, 0.0 }
 0x319   : > { %v4058_v48 = vmax.f32 %v4056_v24, %v4057_v3  ;;  %v4065_v4 = vmax.f32 %v4063_v57, %v4064_v17  ;;  %v4832_v15 = vmax.f32 %v18822_v27, %v4831_v10  ;;  %v2306_v9 = vcombine.high %v2304_v18, %v2304_v18 }
 0x31a   : > { %v4071_v36 = vrot.slane %v4070_v40, 1  ;;  %v4186_v60 = vrot.slane %v4185_v37, 4  ;;  %v4192_v28 = vsel %vm2784_vm3, %v2305_v1, -inf  ;;  %v4199_v53 = vsel %vm2784_vm3, %v2304_v18, -inf }
 0x31b   : > { %v4834_v61 = vsel %vm4577_vm4, %v4058_v48, -inf  ;;  %v4837_v42 = vsel %vm4577_vm4, %v4065_v4, -inf  ;;  %v5046_v21 = vpack.c.bf16 %v4832_v15, %v4832_v15  ;;  %v4193_v38 = vrot.slane %v4192_v28, 4 }
 0x31c   : > { %v4072_v46 = vmax.f32 %v4070_v40, %v4071_v36  ;;  %v4835_v11 = vmax.f32 %v18845_v6, %v4834_v61  ;;  %v4838_v54 = vmax.f32 %v18849_v51, %v4837_v42  ;;  %v4187_v59 = vmax.f32 %v4185_v37, %v4186_v60 }
 0x31d   : > { %v18924_v27 = vunpack.c.l.b16 %v5056_v34  ;;  %v4194_v24 = vmax.f32 %v4192_v28, %v4193_v38  ;;  %v4200_v57 = vrot.slane %v4199_v53, 4  ;;  %v4206_v5 = vsel %vm2784_vm3, %v2306_v9, -inf }
 0x31e   : > { %v18927_v39 = vunpack.c.l.b16 %v5055_v52  ;;  %v18929_v26 = vunpack.c.l.b16 %v5046_v21  ;;  %v4188_v49 = vrot.slane %v4187_v59, 2  ;;  %v1228_v0 = vmul.f32 %v18656_v55, %v18595_v44 }
 0x31f   : > { %23560 = vst [vmem:[#allocation73_spill] sm:$0xff] %v18924_v27  ;;  %v4195_v3 = vrot.slane %v4194_v24, 2  ;;  %v4201_v17 = vmax.f32 %v4199_v53, %v4200_v57  ;;  %v4207_v6 = vrot.slane %v4206_v5, 4  ;;  %v2256_v18 = vcombine.high %v1360_v12, %v1360_v12 }
 0x320   : > { %23561 = vst [vmem:[#allocation74_spill] sm:$0xff] %v18927_v39  ;;  %23562 = vst [vmem:[#allocation75_spill] sm:$0xff] %v18929_v26  ;;  %v18934_v51 = vsel %vm4577_vm4, %v4072_v46, -inf  ;;  %v5047_v34 = vpack.c.bf16 %v4835_v11, %v4835_v11  ;;  %v4189_v1 = vmax.f32 %v4187_v59, %v4188_v49  ;;  %v2263_v40 = vrot.slane %v1360_v12, %v17487_v50 }
 0x321   : > { %23563 = vst [vmem:[#allocation76_spill] sm:$0xff] %v18934_v51  ;;  %v4196_v10 = vmax.f32 %v4194_v24, %v4195_v3  ;;  %v4202_v52 = vrot.slane %v4201_v17, 2  ;;  %v4208_v37 = vmax.f32 %v4206_v5, %v4207_v6  ;;  %v2270_v48 = vrot.slane %v2256_v18, %v17487_v50 }
 0x322   : > { %v5048_v4 = vpack.c.bf16 %v4838_v54, %v4838_v54  ;;  %v4190_v15 = vrot.slane %v4189_v1, 1  ;;  %v2271_v9 = vcombine.high %v2263_v40, %v2263_v40  ;;  %v4129_v44 = vsel %vm2784_vm3, %v2263_v40, -inf }
 0x323   : > { %v4197_v36 = vrot.slane %v4196_v10, 1  ;;  %v4203_v60 = vmax.f32 %v4201_v17, %v4202_v52  ;;  %v4209_v28 = vrot.slane %v4208_v37, 2  ;;  %v2272_v53 = vcombine.high %v2270_v48, %v2270_v48 }
 0x324   : > { %v4130_v61 = vrot.slane %v4129_v44, 4  ;;  %v4136_v42 = vsel %vm2784_vm3, %v2271_v9, -inf  ;;  %v4143_v21 = vsel %vm2784_vm3, %v2270_v48, -inf  ;;  %v1299_v12 = vadd.f32 %v18747_v30, %v1228_v0 }
 0x325   : > { %v4191_v38 = vmax.f32 %v4189_v1, %v4190_v15  ;;  %v4204_v46 = vrot.slane %v4203_v60, 1  ;;  %v4210_v11 = vmax.f32 %v4208_v37, %v4209_v28  ;;  %v4137_v59 = vrot.slane %v4136_v42, 4 }
 0x326   : > { %v18942_v54 = vunpack.c.l.b16 %v5047_v34  ;;  %v4131_v24 = vmax.f32 %v4129_v44, %v4130_v61  ;;  %v4144_v57 = vrot.slane %v4143_v21, 4  ;;  %v4150_v5 = vsel %vm2784_vm3, %v2272_v53, -inf }
 0x327   : > { %v18945_v49 = vunpack.c.l.b16 %v5048_v4  ;;  %v4198_v3 = vmax.f32 %v4196_v10, %v4197_v36  ;;  %v4211_v17 = vrot.slane %v4210_v11, 1  ;;  %v4138_v6 = vmax.f32 %v4136_v42, %v4137_v59 }
 0x328   : > { %23564 = vst [vmem:[#allocation77_spill] sm:$0xff] %v18942_v54  ;;  %v4132_v18 = vrot.slane %v4131_v24, 2  ;;  %v4145_v40 = vmax.f32 %v4143_v21, %v4144_v57  ;;  %v4151_v52 = vrot.slane %v4150_v5, 4  ;;  %v1363_v48 = vmax.f32 %v1299_v12, 0.0 }
 0x329   : > { %23565 = vst [vmem:[#allocation78_spill] sm:$0xff] %v18945_v49  ;;  %v4205_v0 = vmax.f32 %v4203_v60, %v4204_v46  ;;  %v18948_v1 = vsel %vm4577_vm4, %v4191_v38, -inf  ;;  %v4139_v37 = vrot.slane %v4138_v6, 2  ;;  %v1226_v34 = vmul.f32 %v18656_v55, %v18609_v13  ;;  %v18959_v46 = vpop.f32.mrb[60].mxu0 }
 0x32a   : > { %v4133_v15 = vmax.f32 %v4131_v24, %v4132_v18  ;;  %v4146_v9 = vrot.slane %v4145_v40, 2  ;;  %v4152_v44 = vmax.f32 %v4150_v5, %v4151_v52  ;;  %v2307_v4 = vcombine.high %v1363_v48, %v1363_v48 }
 0x32b   : > { %v4212_v28 = vmax.f32 %v4210_v11, %v4211_v17  ;;  %v4140_v10 = vmax.f32 %v4138_v6, %v4139_v37  ;;  %v2314_v36 = vrot.slane %v1363_v48, %v17487_v50  ;;  %v1297_v53 = vadd.f32 %v18747_v30, %v1226_v34 }
 0x32c   : > { %v4134_v61 = vrot.slane %v4133_v15, 1  ;;  %v4147_v42 = vmax.f32 %v4145_v40, %v4146_v9  ;;  %v4153_v60 = vrot.slane %v4152_v44, 2  ;;  %v2321_v21 = vrot.slane %v2307_v4, %v17487_v50 }
 0x32d   : > { %v18956_v12 = vsel %vm4577_vm4, %v4198_v3, -inf  ;;  %v4141_v38 = vrot.slane %v4140_v10, 1  ;;  %v2322_v13 = vcombine.high %v2314_v36, %v2314_v36  ;;  %v4213_v55 = vsel %vm2784_vm3, %v2314_v36, -inf }
 0x32e   : > { %v4135_v11 = vmax.f32 %v4133_v15, %v4134_v61  ;;  %v4148_v59 = vrot.slane %v4147_v42, 1  ;;  %v4154_v24 = vmax.f32 %v4152_v44, %v4153_v60  ;;  %v2323_v57 = vcombine.high %v2321_v21, %v2321_v21 }
 0x32f   : > { %v4214_v5 = vrot.slane %v4213_v55, 4  ;;  %v4220_v17 = vsel %vm2784_vm3, %v2322_v13, -inf  ;;  %v4227_v6 = vsel %vm2784_vm3, %v2321_v21, -inf  ;;  %v1361_v18 = vmax.f32 %v1297_v53, 0.0 }
 0x330   : > { %v18964_v40 = vsel %vm4577_vm4, %v4205_v0, -inf  ;;  %v18967_v3 = vsel %vm4577_vm4, %v4212_v28, -inf  ;;  %v4155_v52 = vrot.slane %v4154_v24, 1  ;;  %v4221_v48 = vrot.slane %v4220_v17, 4 }
 0x331   : > { %v4142_v37 = vmax.f32 %v4140_v10, %v4141_v38  ;;  %v4215_v34 = vmax.f32 %v4213_v55, %v4214_v5  ;;  %v4228_v15 = vrot.slane %v4227_v6, 4  ;;  %v4234_v9 = vsel %vm2784_vm3, %v2323_v57, -inf  ;;  %v18977_v10 = vld [vmem:[%s23445_s2] ss:$0 sm:$0xff] }
 0x332   : > { %v4149_v44 = vmax.f32 %v4147_v42, %v4148_v59  ;;  %v18971_v4 = vsel %vm4577_vm4, %v4135_v11, -inf  ;;  %v4222_v36 = vmax.f32 %v4220_v17, %v4221_v48  ;;  %v4235_v61 = vrot.slane %v4234_v9, 4 }
 0x333   : > { %v4216_v53 = vrot.slane %v4215_v34, 2  ;;  %v4229_v60 = vmax.f32 %v4227_v6, %v4228_v15  ;;  %v2273_v0 = vcombine.high %v1361_v18, %v1361_v18  ;;  %v2280_v21 = vrot.slane %v1361_v18, %v17487_v50 }
 0x334   : > { %v4156_v28 = vmax.f32 %v4154_v24, %v4155_v52  ;;  %v4223_v13 = vrot.slane %v4222_v36, 2  ;;  %v4236_v27 = vmax.f32 %v4234_v9, %v4235_v61  ;;  %v1231_v42 = vmul.f32 %v18977_v10, %v18663_v29 }
 0x335   : > { %v4217_v38 = vmax.f32 %v4215_v34, %v4216_v53  ;;  %v4230_v55 = vrot.slane %v4229_v60, 2  ;;  %v2287_v11 = vrot.slane %v2273_v0, %v17487_v50  ;;  %v2288_v59 = vcombine.high %v2280_v21, %v2280_v21 }
 0x336   : > { %v4224_v57 = vmax.f32 %v4222_v36, %v4223_v13  ;;  %v4237_v5 = vrot.slane %v4236_v27, 2  ;;  %v4157_v17 = vsel %vm2784_vm3, %v2280_v21, -inf  ;;  %v1302_v24 = vadd.f32 %v18747_v30, %v1231_v42 }
 0x337   : > { %v4218_v6 = vrot.slane %v4217_v38, 1  ;;  %v4231_v18 = vmax.f32 %v4229_v60, %v4230_v55  ;;  %v2289_v52 = vcombine.high %v2287_v11, %v2287_v11  ;;  %v4158_v48 = vrot.slane %v4157_v17, 4 }
 0x338   : > { %v4225_v15 = vrot.slane %v4224_v57, 1  ;;  %v4238_v9 = vmax.f32 %v4236_v27, %v4237_v5  ;;  %v4164_v61 = vsel %vm2784_vm3, %v2288_v59, -inf  ;;  %v4171_v29 = vsel %vm2784_vm3, %v2287_v11, -inf  ;;  %v18996_v11 = vpop.f32.mrb[61].mxu0 }
 0x339   : > { %v4219_v34 = vmax.f32 %v4217_v38, %v4218_v6  ;;  %v4232_v53 = vrot.slane %v4231_v18, 1  ;;  %v4159_v0 = vmax.f32 %v4157_v17, %v4158_v48  ;;  %v4165_v39 = vrot.slane %v4164_v61, 4 }
 0x33a   : > { %v18987_v36 = vsel %vm4577_vm4, %v4142_v37, -inf  ;;  %v4239_v21 = vrot.slane %v4238_v9, 1  ;;  %v4172_v13 = vrot.slane %v4171_v29, 4  ;;  %v4178_v42 = vsel %vm2784_vm3, %v2289_v52, -inf }
 0x33b   : > { %v18991_v60 = vsel %vm4577_vm4, %v4149_v44, -inf  ;;  %v18994_v27 = vsel %vm4577_vm4, %v4156_v28, -inf  ;;  %v4160_v55 = vrot.slane %v4159_v0, 2  ;;  %v4166_v59 = vmax.f32 %v4164_v61, %v4165_v39 }
 0x33c   : > { %v4226_v38 = vmax.f32 %v4224_v57, %v4225_v15  ;;  %v4233_v5 = vmax.f32 %v4231_v18, %v4232_v53  ;;  %v4173_v17 = vmax.f32 %v4171_v29, %v4172_v13  ;;  %v4179_v6 = vrot.slane %v4178_v42, 4 }
 0x33d   : > { %v18999_v37 = vsel %vm4577_vm4, %v4219_v34, -inf  ;;  %v4161_v48 = vmax.f32 %v4159_v0, %v4160_v55  ;;  %v4167_v49 = vrot.slane %v4166_v59, 2  ;;  %v1366_v52 = vmax.f32 %v1302_v24, 0.0 }
 0x33e   : > { %v4240_v8 = vmax.f32 %v4238_v9, %v4239_v21  ;;  %v4174_v44 = vrot.slane %v4173_v17, 2  ;;  %v4180_v54 = vmax.f32 %v4178_v42, %v4179_v6  ;;  %v1229_v28 = vmul.f32 %v18977_v10, %v18686_v31 }
 0x33f   : > { %v4162_v26 = vrot.slane %v4161_v48, 1  ;;  %v4168_v39 = vmax.f32 %v4166_v59, %v4167_v49  ;;  %v2358_v61 = vcombine.high %v1366_v52, %v1366_v52  ;;  %v2365_v57 = vrot.slane %v1366_v52, %v17487_v50 }
 0x340   : > { %v19005_v18 = vsel %vm4577_vm4, %v4226_v38, -inf  ;;  %v4175_v15 = vmax.f32 %v4173_v17, %v4174_v44  ;;  %v4181_v29 = vrot.slane %v4180_v54, 2  ;;  %v1300_v34 = vadd.f32 %v18747_v30, %v1229_v28 }
 0x341   : > { %v4163_v53 = vmax.f32 %v4161_v48, %v4162_v26  ;;  %v4169_v24 = vrot.slane %v4168_v39, 1  ;;  %v2372_v9 = vrot.slane %v2358_v61, %v17487_v50  ;;  %v2373_v0 = vcombine.high %v2365_v57, %v2365_v57 }
 0x342   : > { %v4176_v21 = vrot.slane %v4175_v15, 1  ;;  %v19009_v13 = vmax.f32 %v4180_v54, %v4181_v29  ;;  %v4297_v31 = vsel %vm2784_vm3, %v2365_v57, -inf  ;;  %v1364_v49 = vmax.f32 %v1300_v34, 0.0  ;;  %v19029_v57 = vpop.f32.mrb[62].mxu0 }
 0x343   : > { %v19013_v42 = vsel %vm4577_vm4, %v4233_v5, -inf  ;;  %v19016_v55 = vsel %vm4577_vm4, %v4240_v8, -inf  ;;  %v2374_v59 = vcombine.high %v2372_v9, %v2372_v9  ;;  %v4298_v38 = vrot.slane %v4297_v31, 4  ;;  %23567 = vst [vmem:[#allocation80_spill] sm:$0xff] %v19029_v57 }
 0x344   : > { %23566 = vst [vmem:[#allocation79_spill] sm:$0xff] %v19016_v55  ;;  %v4170_v17 = vmax.f32 %v4168_v39, %v4169_v24  ;;  %v4304_v26 = vsel %vm2784_vm3, %v2373_v0, -inf  ;;  %v4311_v6 = vsel %vm2784_vm3, %v2372_v9, -inf  ;;  %v1232_v54 = vmul.f32 %v18977_v10, %v18694_v7 }
 0x345   : > { %v19023_v48 = vsel %vm4577_vm4, %v4163_v53, -inf  ;;  %v4299_v52 = vmax.f32 %v4297_v31, %v4298_v38  ;;  %v4305_v44 = vrot.slane %v4304_v26, 4  ;;  %v4312_v5 = vrot.slane %v4311_v6, 4 }
 0x346   : > { %v19025_v28 = vmax.f32 %v4175_v15, %v4176_v21  ;;  %v4183_v8 = vrot.slane %v19009_v13, 1  ;;  %v4318_v61 = vsel %vm2784_vm3, %v2374_v59, -inf  ;;  %v2324_v39 = vcombine.high %v1364_v49, %v1364_v49 }
 0x347   : > { %v4300_v29 = vrot.slane %v4299_v52, 2  ;;  %v4306_v34 = vmax.f32 %v4304_v26, %v4305_v44  ;;  %v4313_v24 = vmax.f32 %v4311_v6, %v4312_v5  ;;  %v4319_v9 = vrot.slane %v4318_v61, 4 }
 0x348   : > { %v19032_v7 = vsel %vm4577_vm4, %v4170_v17, -inf  ;;  %v2331_v53 = vrot.slane %v1364_v49, %v17487_v50  ;;  %v2338_v0 = vrot.slane %v2324_v39, %v17487_v50  ;;  %v1303_v15 = vadd.f32 %v18747_v30, %v1232_v54 }
 0x349   : > { %v4301_v21 = vmax.f32 %v4299_v52, %v4300_v29  ;;  %v4307_v31 = vrot.slane %v4306_v34, 2  ;;  %v4314_v38 = vrot.slane %v4313_v24, 2  ;;  %v4320_v59 = vmax.f32 %v4318_v61, %v4319_v9 }
 0x34a   : > { %v2339_v55 = vcombine.high %v2331_v53, %v2331_v53  ;;  %v2340_v20 = vcombine.high %v2338_v0, %v2338_v0  ;;  %v4241_v43 = vsel %vm2784_vm3, %v2331_v53, -inf  ;;  %v4255_v26 = vsel %vm2784_vm3, %v2338_v0, -inf }
 0x34b   : > { %v4302_v6 = vrot.slane %v4301_v21, 1  ;;  %v4308_v44 = vmax.f32 %v4306_v34, %v4307_v31  ;;  %v4315_v17 = vmax.f32 %v4313_v24, %v4314_v38  ;;  %v4321_v5 = vrot.slane %v4320_v59, 2 }
 0x34c   : > { %v4242_v2 = vrot.slane %v4241_v43, 4  ;;  %v4248_v49 = vsel %vm2784_vm3, %v2339_v55, -inf  ;;  %v4256_v39 = vrot.slane %v4255_v26, 4  ;;  %v4262_v30 = vsel %vm2784_vm3, %v2340_v20, -inf }
 0x34d   : > { %v4303_v54 = vmax.f32 %v4301_v21, %v4302_v6  ;;  %v4309_v52 = vrot.slane %v4308_v44, 1  ;;  %v4316_v29 = vrot.slane %v4315_v17, 1  ;;  %v4322_v61 = vmax.f32 %v4320_v59, %v4321_v5 }
 0x34e   : > { %v4243_v9 = vmax.f32 %v4241_v43, %v4242_v2  ;;  %v4249_v58 = vrot.slane %v4248_v49, 4  ;;  %v4257_v62 = vmax.f32 %v4255_v26, %v4256_v39  ;;  %v4263_v53 = vrot.slane %v4262_v30, 4 }
 0x34f   : > { %v4310_v16 = vmax.f32 %v4308_v44, %v4309_v52  ;;  %v4317_v0 = vmax.f32 %v4315_v17, %v4316_v29  ;;  %v4323_v51 = vrot.slane %v4322_v61, 1  ;;  %v4891_v34 = vsel %vm4577_vm4, %v4303_v54, -inf  ;;  %v19047_v44 = vpop.f32.mrb[63].mxu0 }
 0x350   : > { %v4892_v24 = vmax.f32 %v18948_v1, %v4891_v34  ;;  %v4244_v31 = vrot.slane %v4243_v9, 2  ;;  %v4250_v55 = vmax.f32 %v4248_v49, %v4249_v58  ;;  %v4258_v38 = vrot.slane %v4257_v62, 2 }
 0x351   : > { %v4324_v57 = vmax.f32 %v4322_v61, %v4323_v51  ;;  %v4894_v20 = vsel %vm4577_vm4, %v4310_v16, -inf  ;;  %v4897_v21 = vsel %vm4577_vm4, %v4317_v0, -inf  ;;  %v4264_v59 = vmax.f32 %v4262_v30, %v4263_v53 }
 0x352   : > { %v4895_v43 = vmax.f32 %v18956_v12, %v4894_v20  ;;  %v4898_v2 = vmax.f32 %v18964_v40, %v4897_v21  ;;  %v5066_v26 = vpack.c.bf16 %v4892_v24, %v4892_v24  ;;  %v4245_v6 = vmax.f32 %v4243_v9, %v4244_v31 }
 0x353   : > { %v4900_v17 = vsel %vm4577_vm4, %v4324_v57, -inf  ;;  %v4251_v1 = vrot.slane %v4250_v55, 2  ;;  %v4259_v5 = vmax.f32 %v4257_v62, %v4258_v38  ;;  %v4265_v58 = vrot.slane %v4264_v59, 2 }
 0x354   : > { %v19051_v51 = vmax.f32 %v19009_v13, %v4183_v8  ;;  %v19054_v16 = vmax.f32 %v18967_v3, %v4900_v17  ;;  %v5067_v49 = vpack.c.bf16 %v4895_v43, %v4895_v43  ;;  %v5068_v39 = vpack.c.bf16 %v4898_v2, %v4898_v2 }
 0x355   : > { %v4246_v12 = vrot.slane %v4245_v6, 1  ;;  %v4252_v30 = vmax.f32 %v4250_v55, %v4251_v1  ;;  %v4260_v40 = vrot.slane %v4259_v5, 1  ;;  %v4266_v54 = vmax.f32 %v4264_v59, %v4265_v58 }
 0x356   : > { %v5322_v52 = vunpack.c.l.b16 %v5066_v26  ;;  %v5323_v29 = vunpack.c.l.b16 %v5067_v49  ;;  %v5324_v61 = vunpack.c.l.b16 %v5068_v39  ;;  %v1367_v9 = vmax.f32 %v1303_v15, 0.0 }
 0x357   : > { %v4247_v57 = vmax.f32 %v4245_v6, %v4246_v12  ;;  %v4253_v53 = vrot.slane %v4252_v30, 1  ;;  %v4261_v62 = vmax.f32 %v4259_v5, %v4260_v40  ;;  %v4267_v0 = vrot.slane %v4266_v54, 1 }
 0x358   : > { %v19058_v13 = vsel %vm4577_vm4, %v19025_v28, -inf  ;;  %v5444_v3 = vsel %vm5346_vm5, %v5323_v29, %v5322_v52  ;;  %v2375_v8 = vcombine.high %v1367_v9, %v1367_v9  ;;  %v2382_v34 = vrot.slane %v1367_v9, %v17487_v50 }
 0x359   : > { %v19063_v24 = vsel %vm5348_vm6, %v5324_v61, %v5444_v3  ;;  %v4254_v31 = vmax.f32 %v4252_v30, %v4253_v53  ;;  %v4268_v55 = vmax.f32 %v4266_v54, %v4267_v0  ;;  %v4867_v15 = vsel %vm4577_vm4, %v4247_v57, -inf }
 0x35a   : > { %v4868_v38 = vmax.f32 %v18971_v4, %v4867_v15  ;;  %v4873_v20 = vsel %vm4577_vm4, %v4261_v62, -inf  ;;  %v2389_v21 = vrot.slane %v2375_v8, %v17487_v50  ;;  %v2390_v28 = vcombine.high %v2382_v34, %v2382_v34 }
 0x35b   : > { %v4870_v59 = vsel %vm4577_vm4, %v4254_v31, -inf  ;;  %v4874_v43 = vmax.f32 %v18991_v60, %v4873_v20  ;;  %v4876_v2 = vsel %vm4577_vm4, %v4268_v55, -inf  ;;  %v4325_v26 = vsel %vm2784_vm3, %v2382_v34, -inf  ;;  %v19093_v20 = vld [vmem:[%s23446_s3] ss:$0 sm:$0xff] }
 0x35c   : > { %v4871_v6 = vmax.f32 %v18987_v36, %v4870_v59  ;;  %v4877_v17 = vmax.f32 %v18994_v27, %v4876_v2  ;;  %v5058_v1 = vpack.c.bf16 %v4868_v38, %v4868_v38  ;;  %v2391_v5 = vcombine.high %v2389_v21, %v2389_v21 }
 0x35d   : > { %v5060_v4 = vpack.c.bf16 %v4874_v43, %v4874_v43  ;;  %v4326_v58 = vrot.slane %v4325_v26, 4  ;;  %v4332_v49 = vsel %vm2784_vm3, %v2390_v28, -inf  ;;  %v4339_v39 = vsel %vm2784_vm3, %v2389_v21, -inf }
 0x35e   : > { %v5069_v12 = vpack.c.bf16 %v19054_v16, %v19054_v16  ;;  %v5059_v60 = vpack.c.bf16 %v4871_v6, %v4871_v6  ;;  %v5061_v30 = vpack.c.bf16 %v4877_v17, %v4877_v17  ;;  %v4333_v40 = vrot.slane %v4332_v49, 4 }
 0x35f   : > { %v5316_v54 = vunpack.c.l.b16 %v5060_v4  ;;  %v4327_v52 = vmax.f32 %v4325_v26, %v4326_v58  ;;  %v4340_v29 = vrot.slane %v4339_v39, 4  ;;  %v4346_v36 = vsel %vm2784_vm3, %v2391_v5, -inf }
 0x360   : > { %v5314_v27 = vunpack.c.l.b16 %v5058_v1  ;;  %v5315_v61 = vunpack.c.l.b16 %v5059_v60  ;;  %v4334_v9 = vmax.f32 %v4332_v49, %v4333_v40  ;;  %v4347_v57 = vrot.slane %v4346_v36, 4 }
 0x361   : > { %v4328_v53 = vrot.slane %v4327_v52, 2  ;;  %v4341_v62 = vmax.f32 %v4339_v39, %v4340_v29  ;;  %v1230_v0 = vmul.f32 %v18977_v10, %v18757_v47  ;;  %v1235_v16 = vmul.f32 %v18977_v10, %v18812_v25 }
 0x362   : > { %v5437_v3 = vsel %vm5346_vm5, %v5315_v61, %v5314_v27  ;;  %v4335_v8 = vrot.slane %v4334_v9, 2  ;;  %v4348_v34 = vmax.f32 %v4346_v36, %v4347_v57  ;;  %v1233_v31 = vmul.f32 %v18977_v10, %v18819_v23 }
 0x363   : > { %v19088_v55 = vsel %vm5348_vm6, %v5316_v54, %v5437_v3  ;;  %v4329_v15 = vmax.f32 %v4327_v52, %v4328_v53  ;;  %v4342_v38 = vrot.slane %v4341_v62, 2  ;;  %v1301_v47 = vadd.f32 %v19093_v20, %v1230_v0 }
 0x364   : > { %v19098_v25 = vsel %vm4577_vm4, %v19051_v51, -inf  ;;  %v4336_v21 = vmax.f32 %v4334_v9, %v4335_v8  ;;  %v4349_v28 = vrot.slane %v4348_v34, 2  ;;  %v1306_v23 = vadd.f32 %v19093_v20, %v1235_v16 }
 0x365   : > { %v19101_v59 = vunpack.c.l.b16 %v5069_v12  ;;  %v4330_v43 = vrot.slane %v4329_v15, 1  ;;  %v4343_v2 = vmax.f32 %v4341_v62, %v4342_v38  ;;  %v1365_v26 = vmax.f32 %v1301_v47, 0.0 }
 0x366   : > { %v19103_v6 = vunpack.c.l.b16 %v5061_v30  ;;  %v4337_v17 = vrot.slane %v4336_v21, 1  ;;  %v4350_v1 = vmax.f32 %v4348_v34, %v4349_v28  ;;  %v1304_v5 = vadd.f32 %v19093_v20, %v1233_v31 }
 0x367   : > { %v4331_v4 = vmax.f32 %v4329_v15, %v4330_v43  ;;  %v4344_v58 = vrot.slane %v4343_v2, 1  ;;  %v2341_v49 = vcombine.high %v1365_v26, %v1365_v26  ;;  %v2348_v51 = vrot.slane %v1365_v26, %v17487_v50 }
 0x368   : > { %v4338_v39 = vmax.f32 %v4336_v21, %v4337_v17  ;;  %v4351_v60 = vrot.slane %v4350_v1, 1  ;;  %v1370_v40 = vmax.f32 %v1306_v23, 0.0  ;;  %v19109_v12 = vmul.f32 %v18977_v10, %v18842_v22 }
 0x369   : > { %v4345_v54 = vmax.f32 %v4343_v2, %v4344_v58  ;;  %v4903_v30 = vsel %vm4577_vm4, %v4331_v4, -inf  ;;  %v2355_v52 = vrot.slane %v2341_v49, %v17487_v50  ;;  %v2356_v29 = vcombine.high %v2348_v51, %v2348_v51 }
 0x36a   : > { %v4352_v36 = vmax.f32 %v4350_v1, %v4351_v60  ;;  %v19114_v27 = vmax.f32 %v18999_v37, %v4903_v30  ;;  %v4906_v61 = vsel %vm4577_vm4, %v4338_v39, -inf  ;;  %v4269_v9 = vsel %vm2784_vm3, %v2348_v51, -inf }
 0x36b   : > { %v19119_v57 = vmax.f32 %v19005_v18, %v4906_v61  ;;  %v4909_v22 = vsel %vm4577_vm4, %v4345_v54, -inf  ;;  %v2357_v53 = vcombine.high %v2355_v52, %v2355_v52  ;;  %v4270_v62 = vrot.slane %v4269_v9, 4 }
 0x36c   : > { %v19123_v0 = vmax.f32 %v19013_v42, %v4909_v22  ;;  %v4276_v16 = vsel %vm2784_vm3, %v2356_v29, -inf  ;;  %v2426_v3 = vcombine.high %v1370_v40, %v1370_v40  ;;  %v2433_v37 = vrot.slane %v1370_v40, %v17487_v50 }
 0x36d   : > { %v4271_v8 = vmax.f32 %v4269_v9, %v4270_v62  ;;  %v4277_v34 = vrot.slane %v4276_v16, 4  ;;  %v4283_v31 = vsel %vm2784_vm3, %v2355_v52, -inf  ;;  %v19128_v15 = vmax.f32 %v1304_v5, 0.0 }
 0x36e   : > { %v19131_v18 = vsel %vm4577_vm4, %v4352_v36, -inf  ;;  %v5070_v38 = vpack.c.bf16 %v19114_v27, %v19114_v27  ;;  %v4284_v47 = vrot.slane %v4283_v31, 4  ;;  %v4290_v42 = vsel %vm2784_vm3, %v2357_v53, -inf }
 0x36f   : > { %v5071_v21 = vpack.c.bf16 %v19119_v57, %v19119_v57  ;;  %v4272_v28 = vrot.slane %v4271_v8, 2  ;;  %v4278_v23 = vmax.f32 %v4276_v16, %v4277_v34  ;;  %v4291_v43 = vrot.slane %v4290_v42, 4 }
 0x370   : > { %v5072_v2 = vpack.c.bf16 %v19123_v0, %v19123_v0  ;;  %v4285_v26 = vmax.f32 %v4283_v31, %v4284_v47  ;;  %v2440_v17 = vrot.slane %v2426_v3, %v17487_v50  ;;  %v2441_v1 = vcombine.high %v2433_v37, %v2433_v37 }
 0x371   : > { %v4273_v5 = vmax.f32 %v4271_v8, %v4272_v28  ;;  %v4279_v4 = vrot.slane %v4278_v23, 2  ;;  %v4292_v58 = vmax.f32 %v4290_v42, %v4291_v43  ;;  %v4409_v49 = vsel %vm2784_vm3, %v2433_v37, -inf  ;;  %v16044_v42 = vld [vmem:[%s23447_s4 + $0x40] sm:$0xff]  }
 0x372   : > { %v4286_v51 = vrot.slane %v4285_v26, 2  ;;  %v2442_v39 = vcombine.high %v2440_v17, %v2440_v17  ;;  %v4410_v60 = vrot.slane %v4409_v49, 4  ;;  %v4416_v40 = vsel %vm2784_vm3, %v2441_v1, -inf  ;;  %15629 = vmatprep.subr.bf16.mxu0 %v16044_v42  ;;  %15881 = vmatprep.subr.bf16.mxu1 %v16044_v42 }
 0x373   : > { %v4274_v54 = vrot.slane %v4273_v5, 1  ;;  %v4280_v30 = vmax.f32 %v4278_v23, %v4279_v4  ;;  %v4293_v52 = vrot.slane %v4292_v58, 2  ;;  %v4417_v29 = vrot.slane %v4416_v40, 4 }
 0x374   : > { %v4287_v36 = vmax.f32 %v4285_v26, %v4286_v51  ;;  %v4411_v27 = vmax.f32 %v4409_v49, %v4410_v60  ;;  %v4423_v61 = vsel %vm2784_vm3, %v2440_v17, -inf  ;;  %v4430_v9 = vsel %vm2784_vm3, %v2442_v39, -inf }
 0x375   : > { %v4275_v57 = vmax.f32 %v4273_v5, %v4274_v54  ;;  %v4281_v22 = vrot.slane %v4280_v30, 1  ;;  %v4294_v53 = vmax.f32 %v4292_v58, %v4293_v52  ;;  %v4418_v62 = vmax.f32 %v4416_v40, %v4417_v29 }
 0x376   : > { %v4288_v0 = vrot.slane %v4287_v36, 1  ;;  %v4412_v16 = vrot.slane %v4411_v27, 2  ;;  %v4424_v3 = vrot.slane %v4423_v61, 4  ;;  %v4431_v37 = vrot.slane %v4430_v9, 4 }
 0x377   : > { %v4282_v8 = vmax.f32 %v4280_v30, %v4281_v22  ;;  %v4295_v34 = vrot.slane %v4294_v53, 1  ;;  %v4879_v31 = vsel %vm4577_vm4, %v4275_v57, -inf  ;;  %v4419_v47 = vrot.slane %v4418_v62, 2  ;;  %v16045_v30 = vld [vmem:[%s23447_s4] sm:$0xff]  }
 0x378   : > { %v4289_v28 = vmax.f32 %v4287_v36, %v4288_v0  ;;  %v4880_v23 = vmax.f32 %v19023_v48, %v4879_v31  ;;  %v4413_v43 = vmax.f32 %v4411_v27, %v4412_v16  ;;  %v4425_v26 = vmax.f32 %v4423_v61, %v4424_v3  ;;  %15630 = vmatpush3.bf16.msra.mxu0 %v16045_v30 }
 0x379   : > { %v4296_v17 = vmax.f32 %v4294_v53, %v4295_v34  ;;  %v4882_v1 = vsel %vm4577_vm4, %v4282_v8, -inf  ;;  %v4420_v5 = vmax.f32 %v4418_v62, %v4419_v47  ;;  %v4432_v4 = vmax.f32 %v4430_v9, %v4431_v37  ;;  %15889 = vmatpush3.bf16.msra.mxu1 %v16045_v30 }
 0x37a   : > { %v4883_v58 = vmax.f32 %v19032_v7, %v4882_v1  ;;  %v4885_v49 = vsel %vm4577_vm4, %v4289_v28, -inf  ;;  %v5062_v51 = vpack.c.bf16 %v4880_v23, %v4880_v23  ;;  %v4414_v39 = vrot.slane %v4413_v43, 1 }
 0x37b   : > { %v19153_v60 = vunpack.c.l.b16 %v5070_v38  ;;  %v4886_v40 = vmax.f32 %v19058_v13, %v4885_v49  ;;  %v4421_v48 = vrot.slane %v4420_v5, 1  ;;  %v4426_v54 = vrot.slane %v4425_v26, 2 }
 0x37c   : > { %v19159_v52 = vunpack.c.l.b16 %v5071_v21  ;;  %v19161_v29 = vunpack.c.l.b16 %v5072_v2  ;;  %v5063_v36 = vpack.c.bf16 %v4883_v58, %v4883_v58  ;;  %v4433_v7 = vrot.slane %v4432_v4, 2 }
 0x37d   : > { %v19164_v27 = vsel %vm4577_vm4, %v4296_v17, -inf  ;;  %v4415_v61 = vmax.f32 %v4413_v43, %v4414_v39  ;;  %v4427_v38 = vmax.f32 %v4425_v26, %v4426_v54  ;;  %v2392_v13 = vcombine.high %v19128_v15, %v19128_v15 }
 0x37e   : > { %v5064_v9 = vpack.c.bf16 %v4886_v40, %v4886_v40  ;;  %v19168_v57 = vunpack.c.l.b16 %v5062_v51  ;;  %v4434_v22 = vmax.f32 %v4432_v4, %v4433_v7  ;;  %v2399_v21 = vrot.slane %v19128_v15, %v17487_v50 }
 0x37f   : > { %v19172_v2 = vunpack.c.l.b16 %v5063_v36  ;;  %v4422_v53 = vmax.f32 %v4420_v5, %v4421_v48  ;;  %v4428_v62 = vrot.slane %v4427_v38, 1  ;;  %v2406_v0 = vrot.slane %v2392_v13, %v17487_v50 }
 0x380   : > { %v4435_v16 = vrot.slane %v4434_v22, 1  ;;  %v2407_v3 = vcombine.high %v2399_v21, %v2399_v21  ;;  %v4353_v37 = vsel %vm2784_vm3, %v2399_v21, -inf  ;;  %v1307_v8 = vadd.f32 %v19093_v20, %v19109_v12 }
 0x381   : > { %v19179_v34 = vsel %vm4577_vm4, %v4415_v61, -inf  ;;  %v2408_v31 = vcombine.high %v2406_v0, %v2406_v0  ;;  %v4354_v47 = vrot.slane %v4353_v37, 4  ;;  %v4367_v15 = vsel %vm2784_vm3, %v2406_v0, -inf }
 0x382   : > { %v19182_v42 = vunpack.c.l.b16 %v5064_v9  ;;  %v4360_v28 = vsel %vm2784_vm3, %v2407_v3, -inf  ;;  %v4368_v23 = vrot.slane %v4367_v15, 4  ;;  %v1371_v43 = vmax.f32 %v1307_v8, 0.0 }
 0x383   : > { %v4429_v26 = vmax.f32 %v4427_v38, %v4428_v62  ;;  %v4355_v17 = vmax.f32 %v4353_v37, %v4354_v47  ;;  %v4361_v1 = vrot.slane %v4360_v28, 4  ;;  %v4374_v5 = vsel %vm2784_vm3, %v2408_v31, -inf }
 0x384   : > { %v4436_v4 = vmax.f32 %v4434_v22, %v4435_v16  ;;  %v4369_v12 = vmax.f32 %v4367_v15, %v4368_v23  ;;  %v4375_v58 = vrot.slane %v4374_v5, 4  ;;  %v2443_v49 = vcombine.high %v1371_v43, %v1371_v43 }
 0x385   : > { %v4356_v51 = vrot.slane %v4355_v17, 2  ;;  %v4362_v39 = vmax.f32 %v4360_v28, %v4361_v1  ;;  %v2450_v40 = vrot.slane %v1371_v43, %v17487_v50  ;;  %v1234_v48 = vmul.f32 %v18977_v10, %v18866_v63 }
 0x386   : > { %v4370_v54 = vrot.slane %v4369_v12, 2  ;;  %v4376_v30 = vmax.f32 %v4374_v5, %v4375_v58  ;;  %v2457_v36 = vrot.slane %v2443_v49, %v17487_v50  ;;  %v19192_v7 = vmax.f32 %v18639_v45, %v18715_v33  ;;  %v16046_v45 = vld [vmem:[%s23447_s4 + $0x48] sm:$0xff]  }
 0x387   : > { %v4357_v61 = vmax.f32 %v4355_v17, %v4356_v51  ;;  %v4363_v38 = vrot.slane %v4362_v39, 2  ;;  %v2458_v13 = vcombine.high %v2450_v40, %v2450_v40  ;;  %v4437_v9 = vsel %vm2784_vm3, %v2450_v40, -inf  ;;  %v16047_v33 = vld [vmem:[%s23447_s4 + $0x8] sm:$0xff]   ;;  %15631 = vmatprep.subr.bf16.mxu0 %v16046_v45  ;;  %15882 = vmatprep.subr.bf16.mxu1 %v16046_v45 }
 0x388   : > { %v4371_v22 = vmax.f32 %v4369_v12, %v4370_v54  ;;  %v4377_v21 = vrot.slane %v4376_v30, 2  ;;  %v2459_v62 = vcombine.high %v2457_v36, %v2457_v36  ;;  %v4438_v0 = vrot.slane %v4437_v9, 4  ;;  %15632 = vmatpush3.bf16.msra.mxu0 %v16047_v33  ;;  %15890 = vmatpush3.bf16.msra.mxu1 %v16047_v33 }
 0x389   : > { %v4358_v16 = vrot.slane %v4357_v61, 1  ;;  %v4364_v3 = vmax.f32 %v4362_v39, %v4363_v38  ;;  %v4444_v63 = vsel %vm2784_vm3, %v2458_v13, -inf  ;;  %v4451_v37 = vsel %vm2784_vm3, %v2457_v36, -inf }
 0x38a   : > { %v4372_v8 = vrot.slane %v4371_v22, 1  ;;  %v4378_v31 = vmax.f32 %v4376_v30, %v4377_v21  ;;  %v4439_v47 = vmax.f32 %v4437_v9, %v4438_v0  ;;  %v4445_v15 = vrot.slane %v4444_v63, 4 }
 0x38b   : > { %v4359_v28 = vmax.f32 %v4357_v61, %v4358_v16  ;;  %v4365_v23 = vrot.slane %v4364_v3, 1  ;;  %v4452_v43 = vrot.slane %v4451_v37, 4  ;;  %v4458_v17 = vsel %vm2784_vm3, %v2459_v62, -inf }
 0x38c   : > { %v19205_v1 = vsel %vm4577_vm4, %v4422_v53, -inf  ;;  %v4379_v5 = vrot.slane %v4378_v31, 1  ;;  %v4440_v12 = vrot.slane %v4439_v47, 2  ;;  %v4446_v58 = vmax.f32 %v4444_v63, %v4445_v15 }
 0x38d   : > { %v19208_v49 = vsel %vm4577_vm4, %v4429_v26, -inf  ;;  %v4373_v51 = vmax.f32 %v4371_v22, %v4372_v8  ;;  %v4453_v39 = vmax.f32 %v4451_v37, %v4452_v43  ;;  %v4459_v40 = vrot.slane %v4458_v17, 4 }
 0x38e   : > { %v19211_v54 = vsel %vm4577_vm4, %v4436_v4, -inf  ;;  %v4366_v30 = vmax.f32 %v4364_v3, %v4365_v23  ;;  %v4441_v36 = vmax.f32 %v4439_v47, %v4440_v12  ;;  %v4447_v61 = vrot.slane %v4446_v58, 2 }
 0x38f   : > { %v19214_v53 = vsel %vm4577_vm4, %v4359_v28, -inf  ;;  %v4454_v38 = vrot.slane %v4453_v39, 2  ;;  %v4460_v13 = vmax.f32 %v4458_v17, %v4459_v40  ;;  %v1305_v9 = vadd.f32 %v19093_v20, %v1234_v48 }
 0x390   : > { %v4380_v21 = vmax.f32 %v4378_v31, %v4379_v5  ;;  %v4442_v62 = vrot.slane %v4441_v36, 1  ;;  %v4448_v26 = vmax.f32 %v4446_v58, %v4447_v61  ;;  %v4817_v22 = vmax.f32 %v18550_v41, %v18707_v32 }
 0x391   : > { %v19220_v0 = vsel %vm4577_vm4, %v4373_v51, -inf  ;;  %v4455_v4 = vmax.f32 %v4453_v39, %v4454_v38  ;;  %v4461_v16 = vrot.slane %v4460_v13, 2  ;;  %v1369_v3 = vmax.f32 %v1305_v9, 0.0 }
 0x392   : > { %v4443_v63 = vmax.f32 %v4441_v36, %v4442_v62  ;;  %v4449_v37 = vrot.slane %v4448_v26, 1  ;;  %v5033_v45 = vpack.c.bf16 %v19192_v7, %v19192_v7  ;;  %v5041_v33 = vpack.c.bf16 %v4817_v22, %v4817_v22 }
 0x393   : > { %v4456_v8 = vrot.slane %v4455_v4, 1  ;;  %v4462_v48 = vmax.f32 %v4460_v13, %v4461_v16  ;;  %v2409_v31 = vcombine.high %v1369_v3, %v1369_v3  ;;  %v2416_v47 = vrot.slane %v1369_v3, %v17487_v50 }
 0x394   : > { %v19226_v15 = vsel %vm4577_vm4, %v4366_v30, -inf  ;;  %v19229_v41 = vsel %vm4577_vm4, %v4380_v21, -inf  ;;  %v4450_v32 = vmax.f32 %v4448_v26, %v4449_v37  ;;  %v19233_v7 = vsel %vm4577_vm4, %v4443_v63, -inf }
 0x395   : > { %v4457_v28 = vmax.f32 %v4455_v4, %v4456_v8  ;;  %v4463_v23 = vrot.slane %v4462_v48, 1  ;;  %v2423_v43 = vrot.slane %v2409_v31, %v17487_v50  ;;  %v2424_v17 = vcombine.high %v2416_v47, %v2416_v47  ;;  %v16048_v4 = vld [vmem:[%s23447_s4 + $0x50] sm:$0xff]   ;;  %v23569_v8 = vld [vmem:[#allocation59_spill] sm:$0xff] }
 0x396   : > { %v4381_v5 = vsel %vm2784_vm3, %v2416_v47, -inf  ;;  %v5289_v12 = vunpack.c.l.b16 %v5033_v45  ;;  %v5297_v58 = vunpack.c.l.b16 %v5041_v33  ;;  %v19237_v51 = vsel %vm4577_vm4, %v4450_v32, -inf  ;;  %v23568_v45 = vld [vmem:[#allocation62_spill] sm:$0xff]  ;;  %15633 = vmatprep.subr.bf16.mxu0 %v16048_v4  ;;  %15883 = vmatprep.subr.bf16.mxu1 %v16048_v4  ;;  %v23570_v32 = vld [vmem:[#allocation63_spill] sm:$0xff] }
 0x397   : > { %v2425_v39 = vcombine.high %v2423_v43, %v2423_v43  ;;  %v4382_v40 = vrot.slane %v4381_v5, 4  ;;  %v4464_v30 = vmax.f32 %v4462_v48, %v4463_v23  ;;  %v4388_v36 = vsel %vm2784_vm3, %v2424_v17, -inf  ;;  %v23571_v23 = vld [vmem:[#allocation60_spill] sm:$0xff] }
 0x398   : > { %v4395_v61 = vsel %vm2784_vm3, %v2423_v43, -inf  ;;  %v19242_v38 = vsel %vm4577_vm4, %v4457_v28, -inf  ;;  %v4389_v9 = vrot.slane %v4388_v36, 4  ;;  %v5411_v26 = vsel %vm5350_vm7, %v18651_v35, %v18632_v14 }
 0x399   : > { %v4383_v13 = vmax.f32 %v4381_v5, %v4382_v40  ;;  %v4396_v21 = vrot.slane %v4395_v61, 4  ;;  %v4402_v62 = vsel %vm2784_vm3, %v2425_v39, -inf  ;;  %v5418_v22 = vsel %vm5350_vm7, %v18649_v19, %v18603_v56  ;;  %v16049_v56 = vld [vmem:[%s23447_s4 + $0x10] sm:$0xff]  }
 0x39a   : > { %v4390_v3 = vmax.f32 %v4388_v36, %v4389_v9  ;;  %v4403_v37 = vrot.slane %v4402_v62, 4  ;;  %v5412_v33 = vsel %vm5352_vm8, %v23568_v45, %v5411_v26  ;;  %v5419_v48 = vsel %vm5352_vm8, %v23569_v8, %v5418_v22  ;;  %15634 = vmatpush3.bf16.msra.mxu0 %v16049_v56  ;;  %15891 = vmatpush3.bf16.msra.mxu1 %v16049_v56 }
 0x39b   : > { %v4384_v16 = vrot.slane %v4383_v13, 2  ;;  %v4397_v63 = vmax.f32 %v4395_v61, %v4396_v21  ;;  %v1239_v14 = vmul.f32 %v18977_v10, %v18959_v46  ;;  %v5413_v28 = vsel %vm5354_vm9, %v23570_v32, %v5412_v33  ;;  %v23573_v21 = vld [vmem:[#allocation61_spill] sm:$0xff] }
 0x39c   : > { %v4391_v35 = vrot.slane %v4390_v3, 2  ;;  %v4404_v47 = vmax.f32 %v4402_v62, %v4403_v37  ;;  %v5420_v43 = vsel %vm5354_vm9, %v23571_v23, %v5419_v48  ;;  %v1237_v46 = vmul.f32 %v18977_v10, %v18996_v11 }
 0x39d   : > { %v4385_v19 = vmax.f32 %v4383_v13, %v4384_v16  ;;  %v4398_v31 = vrot.slane %v4397_v63, 2  ;;  %v1310_v17 = vadd.f32 %v19093_v20, %v1239_v14  ;;  %v19271_v61 = vsel %vm4577_vm4, %v4464_v30, -inf  ;;  %v23572_v13 = vld [vmem:[#allocation64_spill] sm:$0xff] }
 0x39e   : > { %v4392_v39 = vmax.f32 %v4390_v3, %v4391_v35  ;;  %v4405_v36 = vrot.slane %v4404_v47, 2  ;;  %v5414_v9 = vsel %vm5356_vm10, %v23572_v13, %v5413_v28  ;;  %v5421_v62 = vsel %vm5356_vm10, %v23573_v21, %v5420_v43  ;;  %v16050_v13 = vld [vmem:[%s23447_s4 + $0x58] sm:$0xff]  }
 0x39f   : > { %v4386_v5 = vrot.slane %v4385_v19, 1  ;;  %v4399_v40 = vmax.f32 %v4397_v63, %v4398_v31  ;;  %v1374_v26 = vmax.f32 %v1310_v17, 0.0  ;;  %v5415_v37 = vsel %vm5358_vm11, %v5289_v12, %v5414_v9  ;;  %15635 = vmatprep.subr.bf16.mxu0 %v16050_v13  ;;  %15884 = vmatprep.subr.bf16.mxu1 %v16050_v13 }
 0x3a0   : > { %v4393_v4 = vrot.slane %v4392_v39, 1  ;;  %v4406_v11 = vmax.f32 %v4404_v47, %v4405_v36  ;;  %v5422_v3 = vsel %vm5358_vm11, %v5297_v58, %v5421_v62  ;;  %v1308_v33 = vadd.f32 %v19093_v20, %v1237_v46 }
 0x3a1   : > { %v4387_v22 = vmax.f32 %v4385_v19, %v4386_v5  ;;  %v4400_v16 = vrot.slane %v4399_v40, 1  ;;  %v2494_v63 = vcombine.high %v1374_v26, %v1374_v26  ;;  %v2501_v45 = vrot.slane %v1374_v26, %v17487_v50  ;;  %v23574_v26 = vld [vmem:[#allocation80_spill] sm:$0xff] }
 0x3a2   : > { %v4407_v30 = vrot.slane %v4406_v11, 1  ;;  %v5469_v8 = vpack.c.b16 %v5422_v3, %v5415_v37  ;;  %v19283_v19 = vmax.f32 %v4392_v39, %v4393_v4  ;;  %v1372_v36 = vmax.f32 %v1308_v33, 0.0 }
 0x3a3   : > { %v2508_v48 = vrot.slane %v2494_v63, %v17487_v50  ;;  %v2509_v14 = vcombine.high %v2501_v45, %v2501_v45  ;;  %v4521_v56 = vsel %vm2784_vm3, %v2501_v45, -inf  ;;  %v19285_v35 = vmax.f32 %v4399_v40, %v4400_v16 }
 0x3a4   : > { %v19288_v12 = vsel %vm4577_vm4, %v4387_v22, -inf  ;;  %v4522_v58 = vrot.slane %v4521_v56, 4  ;;  %v19290_v31 = vmax.f32 %v4406_v11, %v4407_v30  ;;  %v5509_v47 = vshrl.u32 %v5469_v8, 16 }
 0x3a5   : > { %v2510_v32 = vcombine.high %v2508_v48, %v2508_v48  ;;  %v4528_v28 = vsel %vm2784_vm3, %v2509_v14, -inf  ;;  %v5512_v23 = vshll.u32 %v5469_v8, 16  ;;  %v4535_v46 = vsel %vm2784_vm3, %v2508_v48, -inf }
 0x3a6   : > { %v4523_v43 = vmax.f32 %v4521_v56, %v4522_v58  ;;  %v4529_v17 = vrot.slane %v4528_v28, 4  ;;  %v19294_v5 = vrot.slane %v5509_v47, 7  ;;  %v4536_v39 = vrot.slane %v4535_v46, 4  ;;  %v16051_v56 = vld [vmem:[%s23447_s4 + $0x18] sm:$0xff]  }
 0x3a7   : > { %v4542_v40 = vsel %vm2784_vm3, %v2510_v32, -inf  ;;  %v1240_v22 = vmul.f32 %v18977_v10, %v23574_v26  ;;  %v2460_v11 = vcombine.high %v1372_v36, %v1372_v36  ;;  %v2467_v37 = vrot.slane %v1372_v36, %v17487_v50  ;;  %15636 = vmatpush3.bf16.msra.mxu0 %v16051_v56  ;;  %15892 = vmatpush3.bf16.msra.mxu1 %v16051_v56 }
 0x3a8   : > { %v4524_v9 = vrot.slane %v4523_v43, 2  ;;  %v4530_v21 = vmax.f32 %v4528_v28, %v4529_v17  ;;  %v4543_v62 = vrot.slane %v4542_v40, 4  ;;  %v5514_v4 = vor.u32 %v5512_v23, %v19294_v5 }
 0x3a9   : > { %v4537_v16 = vmax.f32 %v4535_v46, %v4536_v39  ;;  %v23575_v3 = vmov 0  ;;  %v19311_v33 = vadd.f32 %v19093_v20, %v1240_v22  ;;  %v2474_v48 = vrot.slane %v2460_v11, %v17487_v50  ;;  %v16052_v22 = vld [vmem:[%s23447_s4 + $0x60] sm:$0xff]  }
 0x3aa   : > { %v23576_v3 = vsel %vm19306_vm14, 4294967295, %v23575_v3  ;;  %v4525_v63 = vmax.f32 %v4523_v43, %v4524_v9  ;;  %v4531_v45 = vrot.slane %v4530_v21, 2  ;;  %v4544_v30 = vmax.f32 %v4542_v40, %v4543_v62  ;;  %15637 = vmatprep.subr.bf16.mxu0 %v16052_v22  ;;  %15885 = vmatprep.subr.bf16.mxu1 %v16052_v22 }
 0x3ab   : > { %23577 = vst [vmem:[#allocation62_spill] sm:$0xff] %v23576_v3  ;;  %v19315_v10 = vsel %vm19306_vm14, 0, %v5514_v4  ;;  %v4538_v8 = vrot.slane %v4537_v16, 2  ;;  %v2475_v14 = vcombine.high %v2467_v37, %v2467_v37  ;;  %v4465_v28 = vsel %vm2784_vm3, %v2467_v37, -inf  ;;  %v16053_v4 = vld [vmem:[%s23447_s4 + $0x20] sm:$0xff]  }
 0x3ac   : > { %5754 = vrot.lane.b32.xlu0 %v19315_v10, %s17295_s20  ;;  %v4526_v58 = vrot.slane %v4525_v63, 1  ;;  %v4532_v47 = vmax.f32 %v4530_v21, %v4531_v45  ;;  %v4545_v32 = vrot.slane %v4544_v30, 2  ;;  %v2476_v43 = vcombine.high %v2474_v48, %v2474_v48  ;;  %15638 = vmatpush3.bf16.msra.mxu0 %v16053_v4 }
 0x3ad   : > { %v4539_v23 = vmax.f32 %v4537_v16, %v4538_v8  ;;  %v4466_v17 = vrot.slane %v4465_v28, 4  ;;  %v4472_v46 = vsel %vm2784_vm3, %v2475_v14, -inf  ;;  %v4479_v26 = vsel %vm2784_vm3, %v2474_v48, -inf  ;;  %v16054_v16 = vld [vmem:[%s23447_s4 + $0x68] sm:$0xff]   ;;  %15893 = vmatpush3.bf16.msra.mxu1 %v16053_v4 }
 0x3ae   : > { %v4527_v39 = vmax.f32 %v4525_v63, %v4526_v58  ;;  %v4533_v40 = vrot.slane %v4532_v47, 1  ;;  %v4546_v36 = vmax.f32 %v4544_v30, %v4545_v32  ;;  %v4473_v13 = vrot.slane %v4472_v46, 4  ;;  %15639 = vmatprep.subr.bf16.mxu0 %v16054_v16  ;;  %15886 = vmatprep.subr.bf16.mxu1 %v16054_v16 }
 0x3af   : > { %v4540_v9 = vrot.slane %v4539_v23, 1  ;;  %v4467_v62 = vmax.f32 %v4465_v28, %v4466_v17  ;;  %v4486_v21 = vsel %vm2784_vm3, %v2476_v43, -inf  ;;  %v4480_v14 = vrot.slane %v4479_v26, 4 }
 0x3b0   : > { %v4534_v11 = vmax.f32 %v4532_v47, %v4533_v40  ;;  %v4547_v37 = vrot.slane %v4546_v36, 1  ;;  %v4939_v63 = vsel %vm4577_vm4, %v4527_v39, -inf  ;;  %v4474_v45 = vmax.f32 %v4472_v46, %v4473_v13  ;;  %v16055_v47 = vld [vmem:[%s23447_s4 + $0x28] sm:$0xff]   ;;  %v16056_v46 = vld [vmem:[%s23447_s4 + $0x70] sm:$0xff]  }
 0x3b1   : > { %v4541_v30 = vmax.f32 %v4539_v23, %v4540_v9  ;;  %v4940_v8 = vmax.f32 %v19179_v34, %v4939_v63  ;;  %v4468_v48 = vrot.slane %v4467_v62, 2  ;;  %v4487_v28 = vrot.slane %v4486_v21, 4  ;;  %15640 = vmatpush3.bf16.msra.mxu0 %v16055_v47  ;;  %15894 = vmatpush3.bf16.msra.mxu1 %v16055_v47 }
 0x3b2   : > { %v4548_v56 = vmax.f32 %v4546_v36, %v4547_v37  ;;  %v4942_v58 = vsel %vm4577_vm4, %v4534_v11, -inf  ;;  %v4475_v32 = vrot.slane %v4474_v45, 2  ;;  %v4481_v13 = vmax.f32 %v4479_v26, %v4480_v14  ;;  %15887 = vmatprep.subr.bf16.mxu1 %v16056_v46  ;;  %15641 = vmatprep.subr.bf16.mxu0 %v16056_v46  ;;  %v17282_v46 = vld [vmem:[%s23445_s2] ss:$0 sm:$0xff] }
 0x3b3   : > { %v4943_v43 = vmax.f32 %v19205_v1, %v4942_v58  ;;  %v4945_v23 = vsel %vm4577_vm4, %v4541_v30, -inf  ;;  %v5082_v34 = vpack.c.bf16 %v4940_v8, %v4940_v8  ;;  %v4469_v17 = vmax.f32 %v4467_v62, %v4468_v48 }
 0x3b4   : > { %v4946_v39 = vmax.f32 %v19208_v49, %v4945_v23  ;;  %v4948_v40 = vsel %vm4577_vm4, %v4548_v56, -inf  ;;  %v4476_v36 = vmax.f32 %v4474_v45, %v4475_v32  ;;  %v19351_v9 = vsel %vm4577_vm4, %v19283_v19, -inf  ;;  %v16057_v49 = vld [vmem:[%s23447_s4 + $0x30] sm:$0xff]   ;;  %v16059_v23 = vld [vmem:[%s23447_s4 + $0x38] sm:$0xff]  }
 0x3b5   : > { %v19354_v1 = vmax.f32 %v19211_v54, %v4948_v40  ;;  %v5083_v62 = vpack.c.bf16 %v4943_v43, %v4943_v43  ;;  %v4470_v22 = vrot.slane %v4469_v17, 1  ;;  %v4482_v11 = vrot.slane %v4481_v13, 2  ;;  %v16058_v54 = vld [vmem:[%s23447_s4 + $0x78] sm:$0xff]   ;;  %15895 = vmatpush3.bf16.msra.mxu1 %v16057_v49  ;;  %15642 = vmatpush3.bf16.msra.mxu0 %v16057_v49 }
 0x3b6   : > { %v5084_v4 = vpack.c.bf16 %v4946_v39, %v4946_v39  ;;  %v4477_v16 = vrot.slane %v4476_v36, 1  ;;  %v4488_v37 = vmax.f32 %v4486_v21, %v4487_v28  ;;  %v5338_v26 = vunpack.c.l.b16 %v5082_v34  ;;  %15888 = vmatprep.subr.bf16.mxu1 %v16058_v54  ;;  %15643 = vmatprep.subr.bf16.mxu0 %v16058_v54 }
 0x3b7   : > { %v5339_v63 = vunpack.c.l.b16 %v5083_v62  ;;  %v4471_v45 = vmax.f32 %v4469_v17, %v4470_v22  ;;  %v1375_v19 = vmax.f32 %v19311_v33, 0.0  ;;  %v4483_v21 = vmax.f32 %v4481_v13, %v4482_v11 }
 0x3b8   : > { %v5340_v30 = vunpack.c.l.b16 %v5084_v4  ;;  %v4478_v8 = vmax.f32 %v4476_v36, %v4477_v16  ;;  %v4489_v48 = vrot.slane %v4488_v37, 2  ;;  %v19365_v14 = vsel %vm4577_vm4, %v19285_v35, -inf }
 0x3b9   : > { %v5458_v56 = vsel %vm5346_vm5, %v5339_v63, %v5338_v26  ;;  %v4915_v58 = vsel %vm4577_vm4, %v4471_v45, -inf  ;;  %v2511_v32 = vcombine.high %v1375_v19, %v1375_v19  ;;  %v4484_v28 = vrot.slane %v4483_v21, 1  ;;  %15896 = vmatpush3.bf16.msra.mxu1 %v16059_v23  ;;  %15644 = vmatpush3.bf16.msra.mxu0 %v16059_v23 }
 0x3ba   : > { %v19370_v33 = vsel %vm5348_vm6, %v5340_v30, %v5458_v56  ;;  %v4490_v47 = vmax.f32 %v4488_v37, %v4489_v48  ;;  %v4916_v43 = vmax.f32 %v19214_v53, %v4915_v58  ;;  %v4918_v35 = vsel %vm4577_vm4, %v4478_v8, -inf }
 0x3bb   : > { %v2518_v34 = vrot.slane %v1375_v19, %v17487_v50  ;;  %v2525_v17 = vrot.slane %v2511_v32, %v17487_v50  ;;  %v1238_v39 = vmul.f32 %v17282_v46, %v19047_v44  ;;  %v4485_v53 = vmax.f32 %v4483_v21, %v4484_v28 }
 0x3bc   : > { %v4491_v40 = vrot.slane %v4490_v47, 1  ;;  %v4919_v36 = vmax.f32 %v19226_v15, %v4918_v35  ;;  %v5074_v13 = vpack.c.bf16 %v4916_v43, %v4916_v43  ;;  %v5085_v43 = vpack.c.bf16 %v19354_v1, %v19354_v1 }
 0x3bd   : > { %v2526_v62 = vcombine.high %v2518_v34, %v2518_v34  ;;  %v2527_v22 = vcombine.high %v2525_v17, %v2525_v17  ;;  %v4549_v4 = vsel %vm2784_vm3, %v2518_v34, -inf  ;;  %v4563_v16 = vsel %vm2784_vm3, %v2525_v17, -inf }
 0x3be   : > { %v4492_v11 = vmax.f32 %v4490_v47, %v4491_v40  ;;  %v4921_v37 = vsel %vm4577_vm4, %v4485_v53, -inf  ;;  %v5075_v49 = vpack.c.bf16 %v4919_v36, %v4919_v36  ;;  %v5330_v26 = vunpack.c.l.b16 %v5074_v13  ;;  %v23578_v40 = vld [vmem:[#allocation56_spill] sm:$0xff] }
 0x3bf   : > { %v4922_v44 = vmax.f32 %v19220_v0, %v4921_v37  ;;  %v4550_v63 = vrot.slane %v4549_v4, 4  ;;  %v4556_v45 = vsel %vm2784_vm3, %v2526_v62, -inf  ;;  %v4564_v15 = vrot.slane %v4563_v16, 4 }
 0x3c0   : > { %v4924_v19 = vsel %vm4577_vm4, %v4492_v11, -inf  ;;  %v5331_v54 = vunpack.c.l.b16 %v5075_v49  ;;  %v4557_v30 = vrot.slane %v4556_v45, 4  ;;  %v4570_v8 = vsel %vm2784_vm3, %v2527_v22, -inf }
 0x3c1   : > { %v4925_v21 = vmax.f32 %v19229_v41, %v4924_v19  ;;  %v5076_v48 = vpack.c.bf16 %v4922_v44, %v4922_v44  ;;  %v4551_v56 = vmax.f32 %v4549_v4, %v4550_v63  ;;  %v4565_v58 = vmax.f32 %v4563_v16, %v4564_v15  ;;  %v23579_v41 = vld [vmem:[#allocation47_spill] sm:$0xff]  ;;  %v23581_v44 = vld [vmem:[#allocation45_spill] sm:$0xff] }
 0x3c2   : > { %v5451_v32 = vsel %vm5346_vm5, %v5331_v54, %v5330_v26  ;;  %v4558_v28 = vmax.f32 %v4556_v45, %v4557_v30  ;;  %v4571_v47 = vrot.slane %v4570_v8, 4  ;;  %v1309_v0 = vadd.f32 %v19093_v20, %v1238_v39  ;;  %v23580_v26 = vld [vmem:[#allocation51_spill] sm:$0xff] }
 0x3c3   : > { %v5332_v23 = vunpack.c.l.b16 %v5076_v48  ;;  %v4552_v35 = vrot.slane %v4551_v56, 2  ;;  %v4566_v34 = vrot.slane %v4565_v58, 2  ;;  %v4745_v36 = vmax.f32 %v23579_v41, %v23578_v40 }
 0x3c4   : > { %v4559_v17 = vrot.slane %v4558_v28, 2  ;;  %v4572_v46 = vmax.f32 %v4570_v8, %v4571_v47  ;;  %v1373_v53 = vmax.f32 %v1309_v0, 0.0  ;;  %v19400_v13 = vsel %vm4577_vm4, %v19290_v31, -inf }
 0x3c5   : > { %v19403_v62 = vsel %vm5348_vm6, %v5332_v23, %v5451_v32  ;;  %v4553_v20 = vmax.f32 %v4551_v56, %v4552_v35  ;;  %v4567_v39 = vmax.f32 %v4565_v58, %v4566_v34  ;;  %v19406_v11 = vunpack.c.l.b16 %v5085_v43 }
 0x3c6   : > { %v4560_v22 = vmax.f32 %v4558_v28, %v4559_v17  ;;  %v4573_v1 = vrot.slane %v4572_v46, 2  ;;  %v2477_v4 = vcombine.high %v1373_v53, %v1373_v53  ;;  %v2484_v16 = vrot.slane %v1373_v53, %v17487_v50 }
 0x3c7   : > { %v4554_v37 = vrot.slane %v4553_v20, 1  ;;  %v4568_v49 = vrot.slane %v4567_v39, 1  ;;  %v4769_v63 = vmax.f32 %v23581_v44, %v23580_v26  ;;  %v5077_v54 = vpack.c.bf16 %v4925_v21, %v4925_v21 }
 0x3c8   : > { %v4561_v45 = vrot.slane %v4560_v22, 1  ;;  %v4574_v31 = vmax.f32 %v4572_v46, %v4573_v1  ;;  %v2491_v15 = vrot.slane %v2477_v4, %v17487_v50  ;;  %v2492_v19 = vcombine.high %v2484_v16, %v2484_v16 }
 0x3c9   : > { %v4555_v30 = vmax.f32 %v4553_v20, %v4554_v37  ;;  %v4569_v8 = vmax.f32 %v4567_v39, %v4568_v49  ;;  %v4493_v48 = vsel %vm2784_vm3, %v2484_v16, -inf  ;;  %v19420_v20 = vunpack.c.l.b16 %v5077_v54 }
 0x3ca   : > { %v4562_v56 = vmax.f32 %v4560_v22, %v4561_v45  ;;  %v4575_v58 = vrot.slane %v4574_v31, 1  ;;  %v2493_v32 = vcombine.high %v2491_v15, %v2491_v15  ;;  %v4494_v28 = vrot.slane %v4493_v48, 4 }
 0x3cb   : > { %v4951_v47 = vsel %vm4577_vm4, %v4555_v30, -inf  ;;  %v4957_v0 = vsel %vm4577_vm4, %v4569_v8, -inf  ;;  %v4500_v43 = vsel %vm2784_vm3, %v2492_v19, -inf  ;;  %v4507_v23 = vsel %vm2784_vm3, %v2491_v15, -inf  ;;  %v23582_v30 = vld [vmem:[#allocation48_spill] sm:$0xff]  ;;  %v23583_v8 = vld [vmem:[#allocation50_spill] sm:$0xff] }
 0x3cc   : > { %v4576_v35 = vmax.f32 %v4574_v31, %v4575_v58  ;;  %v4952_v34 = vmax.f32 %v19233_v7, %v4951_v47  ;;  %v4954_v21 = vsel %vm4577_vm4, %v4562_v56, -inf  ;;  %v4958_v17 = vmax.f32 %v19242_v38, %v4957_v0  ;;  %v23585_v56 = vld [vmem:[#allocation49_spill] sm:$0xff]  ;;  %v23586_v47 = vld [vmem:[#allocation55_spill] sm:$0xff] }
 0x3cd   : > { %v4955_v46 = vmax.f32 %v19237_v51, %v4954_v21  ;;  %v4495_v53 = vmax.f32 %v4493_v48, %v4494_v28  ;;  %v4501_v40 = vrot.slane %v4500_v43, 4  ;;  %v4508_v41 = vrot.slane %v4507_v23, 4  ;;  %v23584_v48 = vld [vmem:[#allocation46_spill] sm:$0xff]  ;;  %v23588_v21 = vld [vmem:[#allocation52_spill] sm:$0xff] }
 0x3ce   : > { %v5086_v39 = vpack.c.bf16 %v4952_v34, %v4952_v34  ;;  %v4514_v22 = vsel %vm2784_vm3, %v2493_v32, -inf  ;;  %v5017_v1 = vpack.c.bf16 %v4745_v36, %v4745_v36  ;;  %v5025_v49 = vpack.c.bf16 %v4769_v63, %v4769_v63 }
 0x3cf   : > { %v4496_v4 = vrot.slane %v4495_v53, 2  ;;  %v4502_v16 = vmax.f32 %v4500_v43, %v4501_v40  ;;  %v4509_v37 = vmax.f32 %v4507_v23, %v4508_v41  ;;  %v19424_v7 = vsel %vm4577_vm4, %v4576_v35, -inf  ;;  %v23587_v35 = vld [vmem:[#allocation57_spill] sm:$0xff]  ;;  %v23589_v41 = vld [vmem:[#allocation58_spill] sm:$0xff] }
 0x3d0   : > { %v5087_v26 = vpack.c.bf16 %v4955_v46, %v4955_v46  ;;  %v5088_v38 = vpack.c.bf16 %v4958_v17, %v4958_v17  ;;  %v4515_v44 = vrot.slane %v4514_v22, 4  ;;  %v19426_v51 = vunpack.c.l.b16 %v5086_v39 }
 0x3d1   : > { %v4497_v45 = vmax.f32 %v4495_v53, %v4496_v4  ;;  %v4503_v31 = vrot.slane %v4502_v16, 2  ;;  %v4510_v15 = vrot.slane %v4509_v37, 2  ;;  %v5273_v54 = vunpack.c.l.b16 %v5017_v1  ;;  %v23590_v4 = vld [vmem:[#allocation54_spill] sm:$0xff] }
 0x3d2   : > { %v4516_v19 = vmax.f32 %v4514_v22, %v4515_v44  ;;  %v5397_v36 = vsel %vm5350_vm7, %v23583_v8, %v23582_v30  ;;  %v5404_v63 = vsel %vm5350_vm7, %v23585_v56, %v23584_v48  ;;  %v5281_v23 = vunpack.c.l.b16 %v5025_v49  ;;  %v23592_v49 = vld [vmem:[#allocation6_spill] sm:$0xff]  ;;  %v23593_v8 = vld [vmem:[#allocation53_spill] sm:$0xff] }
 0x3d3   : > { %v4498_v58 = vrot.slane %v4497_v45, 1  ;;  %v4504_v32 = vmax.f32 %v4502_v16, %v4503_v31  ;;  %v4511_v28 = vmax.f32 %v4509_v37, %v4510_v15  ;;  %v5398_v0 = vsel %vm5352_vm8, %v23586_v47, %v5397_v36  ;;  %v23591_v37 = vld [vmem:[#allocation14_spill] sm:$0xff]  ;;  %v23594_v56 = vld [vmem:[#allocation9_spill] sm:$0xff] }
 0x3d4   : > { %v4517_v43 = vrot.slane %v4516_v19, 2  ;;  %v5399_v34 = vsel %vm5354_vm9, %v23587_v35, %v5398_v0  ;;  %v5405_v17 = vsel %vm5352_vm8, %v23588_v21, %v5404_v63  ;;  %v4601_v44 = vmax.f32 %v23592_v49, %v23591_v37  ;;  %v23600_v49 = vld [vmem:[#allocation13_spill] sm:$0xff] }
 0x3d5   : > { %v4499_v46 = vmax.f32 %v4497_v45, %v4498_v58  ;;  %v4505_v53 = vrot.slane %v4504_v32, 1  ;;  %v4512_v40 = vrot.slane %v4511_v28, 1  ;;  %v5400_v39 = vsel %vm5356_vm10, %v23589_v41, %v5399_v34 }
 0x3d6   : > { %v4518_v22 = vmax.f32 %v4516_v19, %v4517_v43  ;;  %v5401_v1 = vsel %vm5358_vm11, %v5273_v54, %v5400_v39  ;;  %v5406_v16 = vsel %vm5354_vm9, %v23590_v4, %v5405_v17  ;;  %v23595_v54 = vld [vmem:[#allocation3_spill] sm:$0xff]  ;;  %v19460_v21 = vunpack.c.l.b16 %v5087_v26  ;;  %v23598_v26 = vld [vmem:[#allocation4_spill] sm:$0xff] }
 0x3d7   : > { %v4506_v31 = vmax.f32 %v4504_v32, %v4505_v53  ;;  %v4513_v15 = vmax.f32 %v4511_v28, %v4512_v40  ;;  %v4927_v30 = vsel %vm4577_vm4, %v4499_v46, -inf  ;;  %v5407_v45 = vsel %vm5356_vm10, %v23593_v8, %v5406_v16  ;;  %v23599_v4 = vld [vmem:[#allocation7_spill] sm:$0xff] }
 0x3d8   : > { %v4519_v36 = vrot.slane %v4518_v22, 1  ;;  %v4928_v48 = vmax.f32 %v19288_v12, %v4927_v30  ;;  %v5408_v19 = vsel %vm5358_vm11, %v5281_v23, %v5407_v45  ;;  %v4625_v63 = vmax.f32 %v23595_v54, %v23594_v56  ;;  %v23602_v45 = vld [vmem:[#allocation15_spill] sm:$0xff]  ;;  %v23604_v54 = vld [vmem:[#allocation16_spill] sm:$0xff] }
 0x3d9   : > { %v4930_v58 = vsel %vm4577_vm4, %v4506_v31, -inf  ;;  %v4933_v47 = vsel %vm4577_vm4, %v4513_v15, -inf  ;;  %v5468_v0 = vpack.c.b16 %v5408_v19, %v5401_v1  ;;  %v4969_v32 = vpack.c.bf16 %v4601_v44, %v4601_v44  ;;  %v23601_v31 = vld [vmem:[#allocation10_spill] sm:$0xff] }
 0x3da   : > { %v4520_v28 = vmax.f32 %v4518_v22, %v4519_v36  ;;  %v4931_v43 = vmax.f32 %v19351_v9, %v4930_v58  ;;  %v19458_v35 = vmax.f32 %v19365_v14, %v4933_v47  ;;  %v5078_v34 = vpack.c.bf16 %v4928_v48, %v4928_v48  ;;  %v23596_v22 = vld [vmem:[#allocation5_spill] sm:$0xff]  ;;  %v23597_v14 = vld [vmem:[#allocation8_spill] sm:$0xff]  ;;  %v23603_v48 = vld [vmem:[#allocation11_spill] sm:$0xff] }
 0x3db   : > { %v19462_v12 = vunpack.c.l.b16 %v5088_v38  ;;  %v5502_v23 = vshrl.u32 %v5468_v0, 16  ;;  %v4977_v17 = vpack.c.bf16 %v4625_v63, %v4625_v63  ;;  %v5505_v40 = vshll.u32 %v5468_v0, 16  ;;  %v23605_v58 = vld [vmem:[#allocation12_spill] sm:$0xff] }
 0x3dc   : > { %v19465_v46 = vsel %vm4577_vm4, %v4520_v28, -inf  ;;  %v5079_v53 = vpack.c.bf16 %v4931_v43, %v4931_v43  ;;  %v5225_v41 = vunpack.c.l.b16 %v4969_v32  ;;  %v5080_v39 = vpack.c.bf16 %v19458_v35, %v19458_v35  ;;  %v23606_v0 = vld [vmem:[#allocation76_spill] sm:$0xff] }
 0x3dd   : > { %v5504_v9 = vrot.slane %v5502_v23, 7  ;;  %v5351_v1 = vsel %vm5350_vm7, %v23597_v14, %v23596_v22  ;;  %v5362_v38 = vsel %vm5350_vm7, %v23599_v4, %v23598_v26  ;;  %v19475_v16 = vunpack.c.l.b16 %v5078_v34  ;;  %v23607_v32 = vld [vmem:[#allocation68_spill] sm:$0xff]  ;;  %v23608_v23 = vld [vmem:[#allocation71_spill] sm:$0xff] }
 0x3de   : > { %v5233_v37 = vunpack.c.l.b16 %v4977_v17  ;;  %v5353_v44 = vsel %vm5352_vm8, %v23600_v49, %v5351_v1  ;;  %v5363_v15 = vsel %vm5352_vm8, %v23601_v31, %v5362_v38  ;;  %v4841_v28 = vmax.f32 %v23607_v32, %v23606_v0  ;;  %v23609_v17 = vld [vmem:[#allocation65_spill] sm:$0xff]  ;;  %v23610_v38 = vld [vmem:[#allocation67_spill] sm:$0xff]  ;;  %v23611_v49 = vld [vmem:[#allocation70_spill] sm:$0xff] }
 0x3df   : > { %v5507_v30 = vor.u32 %v5505_v40, %v5504_v9  ;;  %v19483_v8 = vsel %vm19306_vm14, %v5504_v9, 0  ;;  %v5355_v36 = vsel %vm5354_vm9, %v23602_v45, %v5353_v44  ;;  %v5364_v19 = vsel %vm5354_vm9, %v23603_v48, %v5363_v15  ;;  %v23612_v31 = vld [vmem:[#allocation66_spill] sm:$0xff]  ;;  %v23613_v15 = vld [vmem:[#allocation69_spill] sm:$0xff] }
 0x3e0   : > { %v5632_v56 = vshll.u32 %v19483_v8, 16  ;;  %v5357_v63 = vsel %vm5356_vm10, %v23604_v54, %v5355_v36  ;;  %v5365_v47 = vsel %vm5356_vm10, %v23605_v58, %v5364_v19  ;;  %v4865_v40 = vmax.f32 %v23609_v17, %v23608_v23  ;;  %v23614_v36 = vld [vmem:[#allocation75_spill] sm:$0xff]  ;;  %v23616_v58 = vld [vmem:[#allocation72_spill] sm:$0xff] }
 0x3e1   : > { %v19498_v43 = vsel %vm19306_vm14, 0, %v5507_v30  ;;  %v5359_v35 = vsel %vm5358_vm11, %v5225_v41, %v5357_v63  ;;  %v5366_v34 = vsel %vm5358_vm11, %v5233_v37, %v5365_v47  ;;  %v5049_v26 = vpack.c.bf16 %v4841_v28, %v4841_v28  ;;  %v23617_v28 = vld [vmem:[#allocation78_spill] sm:$0xff] }
 0x3e2   : > { %v5625_v9 = vshrl.u32 %v19498_v43, 16  ;;  %v5627_v22 = vshll.u32 %v19498_v43, 16  ;;  %v5634_v14 = vrot.slane %v5632_v56, 1  ;;  %v5465_v1 = vpack.c.b16 %v5366_v34, %v5359_v35  ;;  %v23615_v56 = vld [vmem:[#allocation77_spill] sm:$0xff]  ;;  %v23618_v34 = vld [vmem:[#allocation74_spill] sm:$0xff] }
 0x3e3   : > { %v5057_v4 = vpack.c.bf16 %v4865_v40, %v4865_v40  ;;  %v5425_v44 = vsel %vm5350_vm7, %v23611_v49, %v23610_v38  ;;  %v5432_v41 = vsel %vm5350_vm7, %v23613_v15, %v23612_v31  ;;  %v5305_v19 = vunpack.c.l.b16 %v5049_v26 }
 0x3e4   : > { %v5629_v37 = vrot.slane %v5627_v22, 1  ;;  %v5481_v30 = vshrl.u32 %v5465_v1, 16  ;;  %v5484_v45 = vshll.u32 %v5465_v1, 16  ;;  %v5426_v48 = vsel %vm5352_vm8, %v23614_v36, %v5425_v44  ;;  %v23619_v22 = vld [vmem:[#allocation73_spill] sm:$0xff] }
 0x3e5   : > { %v5313_v54 = vunpack.c.l.b16 %v5057_v4  ;;  %v5427_v63 = vsel %vm5354_vm9, %v23615_v56, %v5426_v48  ;;  %v5433_v47 = vsel %vm5352_vm8, %v23616_v58, %v5432_v41  ;;  %v19522_v17 = vunpack.c.l.b16 %v5079_v53 }
 0x3e6   : > { %v5630_v0 = vor.u32 %v5629_v37, %v5625_v9  ;;  %v5483_v32 = vrot.slane %v5481_v30, 7  ;;  %v5428_v35 = vsel %vm5356_vm10, %v23617_v28, %v5427_v63  ;;  %v5434_v23 = vsel %vm5354_vm9, %v23618_v34, %v5433_v47 }
 0x3e7   : > { %v5429_v40 = vsel %vm5358_vm11, %v5305_v19, %v5428_v35  ;;  %v5435_v1 = vsel %vm5356_vm10, %v23619_v22, %v5434_v23  ;;  %v19530_v26 = vsel %vm19306_vm14, %v19294_v5, 0  ;;  %v5639_v49 = vshll.u32 %v19315_v10, 16 }
 0x3e8   : > { %v19533_v9 = vsel %vm5575_vm15, %v5630_v0, %v5634_v14  ;;  %v5486_v4 = vor.u32 %v5484_v45, %v5483_v32  ;;  %v5436_v38 = vsel %vm5358_vm11, %v5313_v54, %v5435_v1  ;;  %v5644_v44 = vshll.u32 %v19530_v26, 16 }
 0x3e9   : > { %5738 = vrot.lane.b32.xlu0 %v19533_v9, %s17295_s20  ;;  %v5470_v53 = vpack.c.b16 %v5436_v38, %v5429_v40  ;;  %v19542_v31 = vsel %vm19306_vm14, %v5483_v32, 0  ;;  %v5637_v14 = vshrl.u32 %v19315_v10, 16  ;;  %v5641_v15 = vrot.slane %v5639_v49, 1  ;;  %v16060_v32 = vld [vmem:[%s23447_s4 + $0xc0] sm:$0xff]  }
 0x3ea   : > { %v19546_v5 = vsel %vm19306_vm14, 0, %v5486_v4  ;;  %v23471_v41 = vmov 0   ;;  %v19550_v30 = vunpack.c.l.b16 %v5080_v39  ;;  %v5596_v48 = vshll.u32 %v19542_v31, 16  ;;  %15693 = vmatprep.subr.bf16.mxu1 %v16060_v32 }
 0x3eb   : > { %v5476_v37 = vrot.slane %v23471_v41, 7  ;;  %v5516_v45 = vshrl.u32 %v5470_v53, 16  ;;  %v5519_v36 = vshll.u32 %v5470_v53, 16  ;;  %v5642_v19 = vor.u32 %v5641_v15, %v5637_v14  ;;  %v23621_v53 = vld [vmem:[#allocation79_spill] sm:$0xff] }
 0x3ec   : > { %v5591_v63 = vshll.u32 %v19546_v5, 16  ;;  %v5646_v58 = vrot.slane %v5644_v44, 1  ;;  %v5589_v35 = vshrl.u32 %v19546_v5, 16  ;;  %v4889_v23 = vmax.f32 %v19098_v25, %v19164_v27 }
 0x3ed   : > { %v19555_v54 = vsel %vm19306_vm14, 0, %v5476_v37  ;;  %v19559_v56 = vsel %vm19306_vm14, %v5476_v37, 0  ;;  %5746 = vrot.lane.b32.xlu0 %v19546_v5, %s17295_s20  ;;  %v5518_v39 = vrot.slane %v5516_v45, 7  ;;  %v19581_v49 = vrot.slane %v5596_v48, 1 }
 0x3ee   : > { %23620 = vst [vmem:[#allocation59_spill] sm:$0xff] %v19555_v54  ;;  %v5579_v47 = vshll.u32 %v19555_v54, 16  ;;  %v5584_v0 = vshll.u32 %v19559_v56, 16  ;;  %v5577_v28 = vshrl.u32 %v19555_v54, 16  ;;  %v5593_v34 = vrot.slane %v5591_v63, 1 }
 0x3ef   : > { %v5521_v40 = vor.u32 %v5519_v36, %v5518_v39  ;;  %v19574_v22 = vsel %vm5575_vm15, %v5642_v19, %v5646_v58  ;;  %v19578_v4 = vsel %vm19306_vm14, %v5518_v39, 0  ;;  %v4913_v44 = vmax.f32 %v23621_v53, %v19131_v18  ;;  %v23626_v53 = vld [vmem:[#allocation19_spill] sm:$0xff] }
 0x3f0   : > { %v5581_v1 = vrot.slane %v5579_v47, 1  ;;  %v5656_v38 = vshll.u32 %v19578_v4, 16  ;;  %v5065_v14 = vpack.c.bf16 %v4889_v23, %v4889_v23  ;;  %v5586_v27 = vrot.slane %v5584_v0, 1  ;;  %v23623_v47 = vld [vmem:[#allocation20_spill] sm:$0xff]  ;;  %v23625_v23 = vld [vmem:[#allocation17_spill] sm:$0xff] }
 0x3f1   : > { %v19587_v25 = vsel %vm19306_vm14, 0, %v5521_v40  ;;  %v5439_v15 = vsel %vm5350_vm7, %v19103_v6, %v19088_v55  ;;  %v5446_v37 = vsel %vm5350_vm7, %v19101_v59, %v19063_v24  ;;  %v5594_v48 = vor.u32 %v5593_v34, %v5589_v35  ;;  %v23622_v59 = vld [vmem:[#allocation27_spill] sm:$0xff] }
 0x3f2   : > { %5756 = vrot.lane.b32.xlu1 %v19587_v25, %s17295_s20  ;;  %v5582_v45 = vor.u32 %v5581_v1, %v5577_v28  ;;  %v5649_v18 = vshrl.u32 %v19587_v25, 16  ;;  %v5651_v36 = vshll.u32 %v19587_v25, 16  ;;  %v5658_v19 = vrot.slane %v5656_v38, 1  ;;  %v23624_v34 = vld [vmem:[#allocation23_spill] sm:$0xff] }
 0x3f3   : > { %v5073_v63 = vpack.c.bf16 %v4913_v44, %v4913_v44  ;;  %v5321_v39 = vunpack.c.l.b16 %v5065_v14  ;;  %v5440_v58 = vsel %vm5352_vm8, %v19168_v57, %v5439_v15  ;;  %v5447_v24 = vsel %vm5352_vm8, %v19153_v60, %v5446_v37  ;;  %v23627_v44 = vld [vmem:[#allocation22_spill] sm:$0xff]  ;;  %v23629_v15 = vld [vmem:[#allocation21_spill] sm:$0xff] }
 0x3f4   : > { %v5653_v55 = vrot.slane %v5651_v36, 1  ;;  %v5441_v6 = vsel %vm5354_vm9, %v19172_v2, %v5440_v58  ;;  %v4649_v0 = vmax.f32 %v23623_v47, %v23622_v59  ;;  %v5448_v35 = vsel %vm5354_vm9, %v19159_v52, %v5447_v24  ;;  %v23628_v14 = vld [vmem:[#allocation18_spill] sm:$0xff]  ;;  %v23632_v24 = vld [vmem:[#allocation24_spill] sm:$0xff] }
 0x3f5   : > { %v5329_v32 = vunpack.c.l.b16 %v5073_v63  ;;  %v5442_v28 = vsel %vm5356_vm10, %v19182_v42, %v5441_v6  ;;  %v4673_v57 = vmax.f32 %v23625_v23, %v23624_v34  ;;  %v5587_v2 = vsel %vm5575_vm15, %v5582_v45, %v5586_v27  ;;  %v23630_v45 = vld [vmem:[#allocation28_spill] sm:$0xff]  ;;  %v19642_v34 = vld [vmem:[%s23447_s4 + $0x100] sm:$0xff]  }
 0x3f6   : > { %5740 = vrot.lane.b32.xlu1 %v19574_v22, %s17295_s20  ;;  %v5443_v60 = vsel %vm5358_vm11, %v5321_v39, %v5442_v28  ;;  %v5449_v40 = vsel %vm5356_vm10, %v19161_v29, %v5448_v35  ;;  %v4985_v1 = vpack.c.bf16 %v4649_v0, %v4649_v0  ;;  %v5369_v52 = vsel %vm5350_vm7, %v23627_v44, %v23626_v53  ;;  %v23631_v29 = vld [vmem:[#allocation29_spill] sm:$0xff] }
 0x3f7   : > { %v5450_v38 = vsel %vm5358_vm11, %v5329_v32, %v5449_v40  ;;  %v4993_v42 = vpack.c.bf16 %v4673_v57, %v4673_v57  ;;  %v5376_v37 = vsel %vm5350_vm7, %v23629_v15, %v23628_v14  ;;  %v5654_v36 = vor.u32 %v5653_v55, %v5649_v18  ;;  %v23633_v18 = vld [vmem:[#allocation30_spill] sm:$0xff]  ;;  %v23634_v28 = vld [vmem:[#allocation25_spill] sm:$0xff]  ;;  %15857 = vmatprep.subr.bf16.mxu0 %v19642_v34 }
 0x3f8   : > { %v5471_v63 = vpack.c.b16 %v5450_v38, %v5443_v60  ;;  %v5241_v27 = vunpack.c.l.b16 %v4985_v1  ;;  %v5370_v39 = vsel %vm5352_vm8, %v23630_v45, %v5369_v52  ;;  %v5377_v59 = vsel %vm5352_vm8, %v23632_v24, %v5376_v37  ;;  %v23635_v57 = vld [vmem:[#allocation26_spill] sm:$0xff] }
 0x3f9   : > { %v5249_v58 = vunpack.c.l.b16 %v4993_v42  ;;  %v5371_v6 = vsel %vm5354_vm9, %v23631_v29, %v5370_v39  ;;  %v4937_v47 = vmax.f32 %v19400_v13, %v19465_v46  ;;  %v5378_v35 = vsel %vm5354_vm9, %v23634_v28, %v5377_v59  ;;  %v23637_v45 = vld [vmem:[#allocation34_spill] sm:$0xff]  ;;  %v23638_v39 = vld [vmem:[#allocation41_spill] sm:$0xff] }
 0x3fa   : > { %5730 = vrot.lane.b32.xlu1 %v5587_v2, %s17295_s20  ;;  %v5523_v0 = vshrl.u32 %v5471_v63, 16  ;;  %v5526_v32 = vshll.u32 %v5471_v63, 16  ;;  %v5372_v55 = vsel %vm5356_vm10, %v23633_v18, %v5371_v6  ;;  %v5379_v13 = vsel %vm5356_vm10, %v23635_v57, %v5378_v35 }
 0x3fb   : > { %v5373_v23 = vsel %vm5358_vm11, %v5241_v27, %v5372_v55  ;;  %v4961_v46 = vmax.f32 %v19271_v61, %v19424_v7  ;;  %v5081_v2 = vpack.c.bf16 %v4937_v47, %v4937_v47  ;;  %v5380_v40 = vsel %vm5358_vm11, %v5249_v58, %v5379_v13  ;;  %v23636_v27 = vld [vmem:[#allocation44_spill] sm:$0xff]  ;;  %v23639_v58 = vld [vmem:[#allocation31_spill] sm:$0xff]  ;;  %v23642_v13 = vld [vmem:[#allocation33_spill] sm:$0xff] }
 0x3fc   : > { %v5525_v60 = vrot.slane %v5523_v0, 7  ;;  %v5453_v1 = vsel %vm5350_vm7, %v19420_v20, %v19403_v62  ;;  %v5460_v38 = vsel %vm5350_vm7, %v19406_v11, %v19370_v33  ;;  %v19658_v42 = vsel %vm5575_vm15, %v5654_v36, %v5658_v19  ;;  %v23640_v0 = vld [vmem:[#allocation35_spill] sm:$0xff] }
 0x3fd   : > { %v5466_v53 = vpack.c.b16 %v5380_v40, %v5373_v23  ;;  %v5089_v44 = vpack.c.bf16 %v4961_v46, %v4961_v46  ;;  %v5454_v61 = vsel %vm5352_vm8, %v19475_v16, %v5453_v1  ;;  %v5461_v11 = vsel %vm5352_vm8, %v19426_v51, %v5460_v38  ;;  %v23643_v46 = vld [vmem:[#allocation38_spill] sm:$0xff]  ;;  %v23646_v38 = vld [vmem:[#allocation39_spill] sm:$0xff] }
 0x3fe   : > { %5742 = vrot.lane.b32.xlu1 %v19658_v42, %s17295_s20  ;;  %v5528_v7 = vor.u32 %v5526_v32, %v5525_v60  ;;  %v19666_v62 = vsel %vm19306_vm14, %v5525_v60, 0  ;;  %v5455_v33 = vsel %vm5354_vm9, %v19522_v17, %v5454_v61  ;;  %v19674_v20 = vsel %vm5575_vm15, %v5594_v48, %v19581_v49  ;;  %v23644_v60 = vld [vmem:[#allocation36_spill] sm:$0xff] }
 0x3ff   : > { %v5488_v19 = vshrl.u32 %v5466_v53, 16  ;;  %v5491_v16 = vshll.u32 %v5466_v53, 16  ;;  %v5337_v52 = vunpack.c.l.b16 %v5081_v2  ;;  %v5668_v15 = vshll.u32 %v19666_v62, 16 }
 0x400   : > { %v19678_v14 = vsel %vm19306_vm14, 0, %v5528_v7  ;;  %v5456_v37 = vsel %vm5356_vm10, %v19550_v30, %v5455_v33  ;;  %v5462_v17 = vsel %vm5354_vm9, %v19460_v21, %v5461_v11  ;;  %v5345_v36 = vunpack.c.l.b16 %v5089_v44  ;;  %v23648_v33 = vld [vmem:[#allocation40_spill] sm:$0xff] }
 0x401   : > { %5758 = vrot.lane.b32.xlu0 %v19678_v14, %s17295_s20  ;;  %v5490_v51 = vrot.slane %v5488_v19, 7  ;;  %v5661_v49 = vshrl.u32 %v19678_v14, 16  ;;  %v5663_v48 = vshll.u32 %v19678_v14, 16  ;;  %v5457_v63 = vsel %vm5358_vm11, %v5337_v52, %v5456_v37 }
 0x402   : > { %5732 = vrot.lane.b32.xlu1 %v19674_v20, %s17295_s20  ;;  %v5463_v30 = vsel %vm5356_vm10, %v19462_v12, %v5462_v17  ;;  %v4697_v21 = vmax.f32 %v23637_v45, %v23636_v27  ;;  %v4721_v29 = vmax.f32 %v23639_v58, %v23638_v39  ;;  %v23641_v32 = vpack.c.bf16 %v23640_v0, %v23640_v0  ;;  %v23651_v27 = vld [vmem:[#allocation37_spill] sm:$0xff] }
 0x403   : > { %v5493_v6 = vor.u32 %v5491_v16, %v5490_v51  ;;  %v5665_v24 = vrot.slane %v5663_v48, 1  ;;  %v5568_v59 = vsel %vm19306_vm14, %v5490_v51, 0  ;;  %v5464_v47 = vsel %vm5358_vm11, %v5345_v36, %v5463_v30  ;;  %v23650_v30 = vld [vmem:[#allocation32_spill] sm:$0xff] }
 0x404   : > { %v5263_v18 = vunpack.c.l.b16 %v23641_v32  ;;  %v5670_v55 = vrot.slane %v5668_v15, 1  ;;  %v5608_v28 = vshll.u32 %v5568_v59, 16  ;;  %v5472_v12 = vpack.c.b16 %v5464_v47, %v5457_v63 }
 0x405   : > { %v19706_v35 = vsel %vm19306_vm14, 0, %v5493_v6  ;;  %v5666_v23 = vor.u32 %v5665_v24, %v5661_v49  ;;  %v5001_v57 = vpack.c.bf16 %v4697_v21, %v4697_v21  ;;  %v5383_v2 = vsel %vm5350_vm7, %v23643_v46, %v23642_v13 }
 0x406   : > { %v23645_v40 = vpack.c.bf16 %v23644_v60, %v23644_v60  ;;  %v23647_v53 = vpack.c.bf16 %v23646_v38, %v23646_v38  ;;  %5748 = vrot.lane.b32.xlu0 %v19706_v35, %s17295_s20  ;;  %v5603_v61 = vshll.u32 %v19706_v35, 16  ;;  %v5530_v7 = vshrl.u32 %v5472_v12, 16 }
 0x407   : > { %v23649_v11 = vpack.c.bf16 %v23648_v33, %v23648_v33  ;;  %v19724_v16 = vsel %vm5575_vm15, %v5666_v23, %v5670_v55  ;;  %v5601_v52 = vshrl.u32 %v19706_v35, 16  ;;  %v5009_v15 = vpack.c.bf16 %v4721_v29, %v4721_v29  ;;  %v23652_v29 = vld [vmem:[#allocation42_spill] sm:$0xff] }
 0x408   : > { %v5254_v1 = vunpack.c.l.b16 %v23645_v40  ;;  %v5255_v44 = vunpack.c.l.b16 %v23647_v53  ;;  %5744 = vrot.lane.b32.xlu1 %v19724_v16, %s17295_s20  ;;  %v5605_v37 = vrot.slane %v5603_v61, 1  ;;  %v5532_v17 = vrot.slane %v5530_v7, 7 }
 0x409   : > { %v5256_v19 = vunpack.c.l.b16 %v23649_v11  ;;  %v5533_v51 = vshll.u32 %v5472_v12, 16  ;;  %v5610_v48 = vrot.slane %v5608_v28, 1  ;;  %v5257_v36 = vunpack.c.l.b16 %v5001_v57  ;;  %v23653_v28 = vld [vmem:[#allocation43_spill] sm:$0xff] }
 0x40a   : > { %v5384_v49 = vsel %vm5352_vm8, %v5254_v1, %v5383_v2  ;;  %v5390_v45 = vsel %vm5350_vm7, %v23651_v27, %v23650_v30  ;;  %v5606_v21 = vor.u32 %v5605_v37, %v5601_v52  ;;  %v5265_v24 = vunpack.c.l.b16 %v5009_v15 }
 0x40b   : > { %v5385_v63 = vsel %vm5354_vm9, %v5255_v44, %v5384_v49  ;;  %v5535_v39 = vor.u32 %v5533_v51, %v5532_v17  ;;  %v5391_v6 = vsel %vm5352_vm8, %v23652_v29, %v5390_v45  ;;  %v5695_v13 = vrot.slane %v19706_v35, 1 }
 0x40c   : > { %v5386_v58 = vsel %vm5356_vm10, %v5256_v19, %v5385_v63  ;;  %v5392_v0 = vsel %vm5354_vm9, %v5263_v18, %v5391_v6  ;;  %v19740_v32 = vsel %vm5575_vm15, %v5606_v21, %v5610_v48  ;;  %v19755_v18 = vsel %vm19306_vm14, %v5532_v17, 0 }
 0x40d   : > { %v5387_v47 = vsel %vm5358_vm11, %v5257_v36, %v5386_v58  ;;  %v19744_v55 = vsel %vm19306_vm14, 0, %v5535_v39  ;;  %v5393_v12 = vsel %vm5356_vm10, %v23653_v28, %v5392_v0  ;;  %5734 = vrot.lane.b32.xlu1 %v19740_v32, %s17295_s20  ;;  %v5696_v2 = vrot.slane %v5568_v59, 1 }
 0x40e   : > { %5760 = vrot.lane.b32.xlu0 %v19744_v55, %s17295_s20  ;;  %v5394_v23 = vsel %vm5358_vm11, %v5265_v24, %v5393_v12  ;;  %v5716_v40 = vshll.u32 %v19744_v55, 16  ;;  %v5721_v38 = vshll.u32 %v19755_v18, 16  ;;  %v5689_v53 = vrot.slane %v19555_v54, 1 }
 0x40f   : > { %v5467_v57 = vpack.c.b16 %v5394_v23, %v5387_v47  ;;  %v5690_v44 = vrot.slane %v19559_v56, 1  ;;  %v5714_v61 = vshrl.u32 %v19744_v55, 16  ;;  %v19766_v33 = vsel %vm5688_vm0, %v5695_v13, %v5696_v2 }
 0x410   : > { %v5718_v7 = vrot.slane %v5716_v40, 1  ;;  %v5701_v59 = vrot.slane %v19498_v43, 1  ;;  %v5702_v37 = vrot.slane %v19483_v8, 1  ;;  %v5692_v17 = vrot.slane %v19546_v5, 1 }
 0x411   : > { %v5495_v46 = vshrl.u32 %v5467_v57, 16  ;;  %5752 = vrot.lane.b32.xlu1 %v19498_v43, %s17295_s20  ;;  %v5498_v60 = vshll.u32 %v5467_v57, 16  ;;  %v19770_v19 = vsel %vm5688_vm0, %v5689_v53, %v5690_v44  ;;  %v5723_v51 = vrot.slane %v5721_v38, 1  ;;  %v16062_v38 = vld [vmem:[%s23447_s4 + $0xc8] sm:$0xff]  }
 0x412   : > { %v5719_v56 = vor.u32 %v5718_v7, %v5714_v61  ;;  %v5693_v49 = vrot.slane %v19542_v31, 1  ;;  %v19787_v36 = vsel %vm5688_vm0, %v5701_v59, %v5702_v37  ;;  %v5707_v63 = vrot.slane %v19587_v25, 1  ;;  %v16064_v61 = vld [vmem:[%s23447_s4 + $0xd0] sm:$0xff]  }
 0x413   : > { %v5497_v1 = vrot.slane %v5495_v46, 7  ;;  %v5708_v31 = vrot.slane %v19578_v4, 1  ;;  %v5710_v6 = vrot.slane %v19678_v14, 1  ;;  %v5711_v47 = vrot.slane %v19666_v62, 1 }
 0x414   : > { %v19791_v27 = vsel %vm5575_vm15, %v5719_v56, %v5723_v51  ;;  %v19797_v21 = vsel %vm5688_vm0, %v5692_v17, %v5693_v49  ;;  %v5704_v62 = vrot.slane %v19315_v10, 1  ;;  %v5705_v13 = vrot.slane %v19530_v26, 1  ;;  %v16061_v26 = vld [vmem:[%s23447_s4 + $0x80] sm:$0xff]   ;;  %v16068_v56 = vld [vmem:[%s23447_s4 + $0x98] sm:$0xff]  }
 0x415   : > { %v5500_v11 = vor.u32 %v5498_v60, %v5497_v1  ;;  %5764 = vrot.lane.b32.xlu1 %v19766_v33, %s17295_s20  ;;  %v5569_v52 = vsel %vm19306_vm14, %v5497_v1, 0  ;;  %v19803_v58 = vsel %vm5688_vm0, %v5707_v63, %v5708_v31  ;;  %v19818_v12 = vsel %vm5688_vm0, %v5710_v6, %v5711_v47  ;;  %v16069_v17 = vld [vmem:[%s23447_s4 + $0xe0] sm:$0xff]   ;;  %v16071_v63 = vld [vmem:[%s23447_s4 + $0xe8] sm:$0xff]   ;;  %v16074_v31 = vld [vmem:[%s23447_s4 + $0xf0] sm:$0xff]  }
 0x416   : > { %v5620_v30 = vshll.u32 %v5569_v52, 16  ;;  %v5699_v23 = vrot.slane %v5569_v52, 1  ;;  %v19830_v46 = vsel %vm5688_vm0, %v5704_v62, %v5705_v13  ;;  %v5727_v2 = vrot.slane %v19744_v55, 1  ;;  %v16070_v49 = vld [vmem:[%s23447_s4 + $0xa0] sm:$0xff]   ;;  %v16076_v47 = vld [vmem:[%s23447_s4 + $0xf8] sm:$0xff]  }
 0x417   : > { %v19778_v15 = vsel %vm19306_vm14, 0, %v5500_v11  ;;  %v5728_v60 = vrot.slane %v19755_v18, 1  ;;  %v16063_v18 = vld [vmem:[%s23447_s4 + $0x88] sm:$0xff]   ;;  %v16066_v11 = vld [vmem:[%s23447_s4 + $0xd8] sm:$0xff]   ;;  %vm7527_vm3 = vsmask.f32 4352 }
 0x418   : > { %5750 = vrot.lane.b32.xlu0 %v19778_v15, %s17295_s20  ;;  %v5615_v48 = vshll.u32 %v19778_v15, 16  ;;  %v5613_v8 = vshrl.u32 %v19778_v15, 16  ;;  %v5622_v29 = vrot.slane %v5620_v30, 1  ;;  %v5698_v4 = vrot.slane %v19778_v15, 1  ;;  %v16072_v30 = vld [vmem:[%s23447_s4 + $0x108] sm:$0xff]  }
 0x419   : > { %5768 = vrot.lane.b32.xlu1 %v19787_v36, %s17295_s20  ;;  %v19839_v40 = vsel %vm5688_vm0, %v5727_v2, %v5728_v60 }
 0x41a   : > { %v5617_v45 = vrot.slane %v5615_v48, 1  ;;  %v19823_v57 = vsel %vm5688_vm0, %v5698_v4, %v5699_v23  ;;  %v16079_v4 = vld [vmem:[%s23447_s4 + $0x118] sm:$0xff]   ;;  %vm7613_vm0 = vcmask 1042432  }
 0x41b   : > { %v16078_v23 = vld [vmem:[%s23447_s4 + $0xb8] sm:$0xff]  }
 0x41c   : > { %5762 = vrot.lane.b32.xlu0 %v19797_v21, %s17295_s20  ;;  %v5618_v39 = vor.u32 %v5617_v45, %v5613_v8  ;;  %v16073_v8 = vld [vmem:[%s23447_s4 + $0xa8] sm:$0xff]  }
 0x41d   : > { %5772 = vrot.lane.b32.xlu1 %v19803_v58, %s17295_s20 }
 0x41e   : > { %v19809_v24 = vsel %vm5575_vm15, %v5618_v39, %v5622_v29  ;;  %v5755_v0 = vpop.permute.xlu0 %5754  ;;  %v16077_v39 = vld [vmem:[%s23447_s4 + $0x110] sm:$0xff]  }
 0x41f   : > { %v5822_v28 = vsel %vm4577_vm4, %v19787_v36, %v5755_v0 }
 0x420   : > { %5736 = vrot.lane.b32.xlu0 %v19809_v24, %s17295_s20  ;;  %6240 = vmatprep.mubr.bf16.mxu1 %v5822_v28 }
 0x421   : > { %5774 = vrot.lane.b32.xlu1 %v19818_v12, %s17295_s20 }
 0x424   : > { %5766 = vrot.lane.b32.xlu0 %v19823_v57, %s17295_s20 }
 0x428   : > { %5770 = vrot.lane.b32.xlu0 %v19830_v46, %s17295_s20 }
 0x42c   : > { %5778 = vrot.lane.b32.xlu0 %v19791_v27, %s17295_s20 }
 0x430   : > { %5776 = vrot.lane.b32.xlu0 %v19839_v40, %s17295_s20 }
 0x45b   : > { %v5739_v1 = vpop.permute.xlu0 %5738 }
 0x45c   : > { %v19851_v53 = vsel %vm4577_vm4, %v19498_v43, %v5739_v1  ;;  %v16065_v43 = vld [vmem:[%s23447_s4 + $0x90] sm:$0xff]  }
 0x45d   : > { %6241 = vmatmul.mubr.bf16.vlgmr.msra.gmra.mrb[0].mxu1 %v19851_v53 }
 0x45e   : > { %15694 = vmatpush3.bf16.msra.mxu1 %v16061_v26 }
 0x45f   : > { %v5747_v44 = vpop.permute.xlu0 %5746  ;;  %15695 = vmatprep.subr.bf16.mxu1 %v16062_v38 }
 0x460   : > { %v5806_v7 = vsel %vm4577_vm4, %v19770_v19, %v5747_v44 }
 0x461   : > { %6208 = vmatprep.mubr.bf16.mxu0 %v5806_v7 }
 0x462   : > { %15696 = vmatpush3.bf16.msra.mxu1 %v16063_v18 }
 0x463   : > { %15697 = vmatprep.subr.bf16.mxu1 %v16064_v61 }
 0x464   : > { %v5757_v59 = vpop.permute.xlu1 %5756 }
 0x465   : > { %v5826_v52 = vsel %vm4577_vm4, %v19830_v46, %v5757_v59 }
 0x466   : > { %6248 = vmatprep.mubr.bf16.mxu1 %v5826_v52  ;;  %15698 = vmatpush3.bf16.msra.mxu1 %v16065_v43 }
 0x467   : > { %15699 = vmatprep.subr.bf16.mxu1 %v16066_v11 }
 0x468   : > { %v5741_v37 = vpop.permute.xlu1 %5740 }
 0x469   : > { %v19878_v51 = vsel %vm4577_vm4, %v19315_v10, %v5741_v37 }
 0x46a   : > { %6249 = vmatmul.mubr.bf16.gmra.mrb[4].mxu1 %v19878_v51 }
 0x46b   : > { %15700 = vmatpush3.bf16.msra.mxu1 %v16068_v56 }
 0x46c   : > { %v5731_v48 = vpop.permute.xlu1 %5730  ;;  %15701 = vmatprep.subr.bf16.mxu1 %v16069_v17 }
 0x46d   : > { %v19892_v10 = vsel %vm4577_vm4, %v19555_v54, %v5731_v48 }
 0x46e   : > { %6209 = vmatmul.mubr.bf16.vlgmr.msra.gmra.mrb[64].mxu0 %v19892_v10 }
 0x46f   : > { %15858 = vmatpush3.bf16.msra.mxu0 %v19642_v34  ;;  %15702 = vmatpush3.bf16.msra.mxu1 %v16070_v49  ;;  %v16075_v34 = vld [vmem:[%s23447_s4 + $0xb0] sm:$0xff]  }
 0x470   : > { %v5743_v45 = vpop.permute.xlu1 %5742  ;;  %15703 = vmatprep.subr.bf16.mxu1 %v16071_v63  ;;  %15859 = vmatprep.subr.bf16.mxu0 %v16072_v30  ;;  %v16089_v63 = vld [vmem:[%s23450_s7 + $0x30] ss:$8 sps:$4 sm:$0xff]  }
 0x471   : > { %v5799_v0 = vsel %vm4577_vm4, %v19587_v25, %v5743_v45 }
 0x473   : > { %v5759_v29 = vpop.permute.xlu0 %5758  ;;  %15704 = vmatpush3.bf16.msra.mxu1 %v16073_v8  ;;  %15860 = vmatpush3.bf16.msra.mxu0 %v16072_v30  ;;  %v16091_v30 = vld [vmem:[%s23450_s7 + $0x34] ss:$8 sps:$4 sm:$0xff]  }
 0x474   : > { %v5830_v6 = vsel %vm4577_vm4, %v19803_v58, %v5759_v29  ;;  %15705 = vmatprep.subr.bf16.mxu1 %v16074_v31  ;;  %15861 = vmatprep.subr.bf16.mxu0 %v16077_v39  ;;  %v5733_v28 = vpop.permute.xlu1 %5732 }
 0x475   : > { %6256 = vmatprep.mubr.bf16.mxu1 %v5830_v6  ;;  %v5784_v2 = vsel %vm4577_vm4, %v19546_v5, %v5733_v28 }
 0x476   : > { %6257 = vmatmul.mubr.bf16.gmra.mrb[8].mxu1 %v5799_v0 }
 0x477   : > { %15706 = vmatpush3.bf16.msra.mxu1 %v16075_v34  ;;  %15862 = vmatpush3.bf16.msra.mxu0 %v16077_v39 }
 0x478   : > { %v5749_v62 = vpop.permute.xlu0 %5748  ;;  %15707 = vmatprep.subr.bf16.mxu1 %v16076_v47  ;;  %15863 = vmatprep.subr.bf16.mxu0 %v16079_v4 }
 0x479   : > { %v5810_v13 = vsel %vm4577_vm4, %v19797_v21, %v5749_v62 }
 0x47a   : > { %6216 = vmatprep.mubr.bf16.mxu0 %v5810_v13  ;;  %v5745_v60 = vpop.permute.xlu1 %5744 }
 0x47b   : > { %6217 = vmatmul.mubr.bf16.gmra.mrb[68].mxu0 %v5784_v2  ;;  %15708 = vmatpush3.bf16.msra.mxu1 %v16078_v23  ;;  %v5802_v38 = vsel %vm4577_vm4, %v19678_v14, %v5745_v60 }
 0x47c   : > { %15864 = vmatpush3.bf16.msra.mxu0 %v16079_v4 }
 0x47f   : > { %v5735_v25 = vpop.permute.xlu1 %5734 }
 0x480   : > { %v5761_v26 = vpop.permute.xlu0 %5760  ;;  %v5787_v21 = vsel %vm4577_vm4, %v19706_v35, %v5735_v25 }
 0x481   : > { %v5834_v1 = vsel %vm4577_vm4, %v19818_v12, %v5761_v26 }
 0x482   : > { %6264 = vmatprep.mubr.bf16.mxu1 %v5834_v1 }
 0x483   : > { %6265 = vmatmul.mubr.bf16.gmra.mrb[12].mxu1 %v5802_v38  ;;  %v5753_v18 = vpop.permute.xlu1 %5752 }
 0x484   : > { %6305 = vmatprep.mubr.bf16.mxu1 %v5787_v21  ;;  %v5818_v61 = vsel %vm4577_vm4, %v19823_v57, %v5753_v18 }
 0x487   : > { %v5765_v11 = vpop.permute.xlu1 %5764 }
 0x488   : > { %v5842_v59 = vsel %vm4577_vm4, %v19740_v32, %v5765_v11 }
 0x48a   : > { %v5751_v5 = vpop.permute.xlu0 %5750 }
 0x48b   : > { %v5814_v44 = vsel %vm4577_vm4, %v19766_v33, %v5751_v5 }
 0x48c   : > { %6224 = vmatprep.mubr.bf16.mxu0 %v5814_v44  ;;  %v16092_v44 = vld [vmem:[%s23450_s7 + $0x40] ss:$8 sps:$4 sm:$0xff]  }
 0x48d   : > { %6225 = vmatmul.mubr.bf16.gmra.mrb[72].mxu0 %v5787_v21 }
 0x48e   : > { %6232 = vmatprep.mubr.bf16.mxu0 %v5818_v61  ;;  %v5763_v7 = vpop.permute.xlu0 %5762  ;;  %v16094_v61 = vld [vmem:[%s23450_s7 + $0x44] ss:$8 sps:$4 sm:$0xff]  }
 0x48f   : > { %v5838_v14 = vsel %vm4577_vm4, %v19674_v20, %v5763_v7  ;;  %v16097_v7 = vld [vmem:[%s23450_s7 + $0x54] ss:$8 sps:$4 sm:$0xff]  }
 0x490   : > { %6306 = vmatmul.mubr.bf16.vlgmr.msra.gmra.mrb[16].mxu1 %v5838_v14 }
 0x492   : > { %v5737_v43 = vpop.permute.xlu0 %5736 }
 0x493   : > { %v5790_v35 = vsel %vm4577_vm4, %v19778_v15, %v5737_v43  ;;  %v16095_v43 = vld [vmem:[%s23450_s7 + $0x50] ss:$8 sps:$4 sm:$0xff]  }
 0x494   : > { %6313 = vmatprep.mubr.bf16.mxu1 %v5790_v35 }
 0x495   : > { %6233 = vmatmul.mubr.bf16.gmra.mrb[76].mxu0 %v5790_v35 }
 0x496   : > { %15865 = vmatprep.mubr.msk.bf16.mxu0 %vm4577_vm4, %v19766_v33  ;;  %v5767_v52 = vpop.permute.xlu0 %5766  ;;  %v5769_v33 = vpop.permute.xlu1 %5768 }
 0x497   : > { %v5846_v20 = vsel %vm4577_vm4, %v19809_v24, %v5767_v52  ;;  %v5850_v32 = vsel %vm4577_vm4, %v19533_v9, %v5769_v33 }
 0x498   : > { %6314 = vmatmul.mubr.bf16.gmra.mrb[20].mxu1 %v5842_v59 }
 0x499   : > { %6321 = vmatprep.mubr.bf16.mxu1 %v19851_v53  ;;  %v16086_v53 = vld [vmem:[%s23450_s7 + $0x20] ss:$8 sps:$4 sm:$0xff]  }
 0x49a   : > { %v5771_v15 = vpop.permute.xlu0 %5770  ;;  %v5773_v24 = vpop.permute.xlu1 %5772 }
 0x49b   : > { %v5858_v9 = vsel %vm4577_vm4, %v19658_v42, %v5773_v24  ;;  %v16080_v42 = vld [vmem:[%s23450_s7] ss:$8 sps:$4 sm:$0xff]  }
 0x49d   : > { %15866 = vmatmul.mubr.msk.bf16.vlgmr.msra.gmra.mrb[80].mxu0 %vm4577_vm4, %v19823_v57 }
 0x49e   : > { %15869 = vmatprep.mubr.msk.bf16.mxu0 %vm4577_vm4, %v19787_v36  ;;  %v5854_v36 = vsel %vm4577_vm4, %v19574_v22, %v5771_v15  ;;  %v5779_v57 = vpop.permute.xlu0 %5778 }
 0x4a0   : > { %6322 = vmatmul.mubr.bf16.gmra.mrb[24].mxu1 %v5846_v20 }
 0x4a1   : > { %6329 = vmatprep.mubr.bf16.mxu1 %v19878_v51 }
 0x4a2   : > { %v5777_v22 = vpop.permute.xlu0 %5776 }
 0x4a5   : > { %15870 = vmatmul.mubr.msk.bf16.gmra.mrb[84].mxu0 %vm4577_vm4, %v19830_v46 }
 0x4a6   : > { %15873 = vmatprep.mubr.msk.bf16.mxu0 %vm4577_vm4, %v19803_v58  ;;  %v5869_v58 = vsel %vm4577_vm4, %v19744_v55, %v5779_v57  ;;  %v16082_v55 = vld [vmem:[%s23450_s7 + $0x4] ss:$8 sps:$4 sm:$0xff]  }
 0x4a7   : > { %8559 = vmatprep.subr.bf16.mxu1 %v16082_v55 }
 0x4a8   : > { %6330 = vmatmul.mubr.bf16.gmra.mrb[28].mxu1 %v5850_v32 }
 0x4a9   : > { %6337 = vmatprep.mubr.bf16.mxu1 %v5799_v0  ;;  %8560 = vmatpush1.bf16.msra.mxu1 %v16080_v42 }
 0x4ad   : > { %15874 = vmatmul.mubr.msk.bf16.gmra.mrb[88].mxu0 %vm4577_vm4, %v19818_v12  ;;  %v5775_v12 = vpop.permute.xlu1 %5774 }
 0x4ae   : > { %15877 = vmatprep.mubr.msk.bf16.mxu0 %vm4577_vm4, %v19839_v40  ;;  %v5862_v46 = vsel %vm4577_vm4, %v19724_v16, %v5775_v12  ;;  %v5866_v40 = vsel %vm4577_vm4, %v19791_v27, %v5777_v22  ;;  %v16083_v16 = vld [vmem:[%s23450_s7 + $0x10] ss:$8 sps:$4 sm:$0xff]   ;;  %v16088_v27 = vld [vmem:[%s23450_s7 + $0x24] ss:$8 sps:$4 sm:$0xff]  }
 0x4b0   : > { %6338 = vmatmul.mubr.bf16.gmra.mrb[32].mxu1 %v5854_v36 }
 0x4b1   : > { %6345 = vmatprep.mubr.bf16.mxu1 %v5802_v38 }
 0x4b5   : > { %15878 = vmatmul.mubr.msk.bf16.gmra.mrb[92].mxu0 %vm4577_vm4, %v19770_v19  ;;  %v16085_v19 = vld [vmem:[%s23450_s7 + $0x14] ss:$8 sps:$4 sm:$0xff]   ;;  %vm20510_vm4 = vmand %vm875_vm1, %vm7527_vm3  ;;  %vm7554_vm1 = vsmask.f32 3328  ;;  %vm7614_vm3 = vcmask 1046532  }
 0x4b6   : > { %8561 = vmatprep.subr.bf16.mxu1 %v16085_v19  ;;  %vm20562_vm15 = vmor %vm7554_vm1, %vm7555_vm13  ;;  %vm9483_vm1 = vsmask.f32 5392 }
 0x4b7   : > { %8562 = vmatpush1.bf16.msra.mxu1 %v16083_v16  ;;  %vm20571_vm12 = vmor %vm7613_vm0, %vm7614_vm3 }
 0x4b8   : > { %6346 = vmatmul.mubr.bf16.gmra.mrb[36].mxu1 %v5858_v9  ;;  %8563 = vmatprep.subr.bf16.mxu1 %v16088_v27 }
 0x4b9   : > { %6353 = vmatprep.mubr.bf16.mxu1 %v5869_v58 }
 0x4bb   : > { %8564 = vmatpush1.bf16.msra.mxu1 %v16086_v53 }
 0x4bc   : > { %8565 = vmatprep.subr.bf16.mxu1 %v16091_v30 }
 0x4bf   : > { %8566 = vmatpush1.bf16.msra.mxu1 %v16089_v63 }
 0x4c0   : > { %6354 = vmatmul.mubr.bf16.gmra.mrb[40].mxu1 %v5862_v46  ;;  %8567 = vmatprep.subr.bf16.mxu1 %v16094_v61 }
 0x4c1   : > { %6361 = vmatprep.mubr.bf16.mxu1 %v19892_v10 }
 0x4c3   : > { %8568 = vmatpush1.bf16.msra.mxu1 %v16092_v44 }
 0x4c4   : > { %8569 = vmatprep.subr.bf16.mxu1 %v16097_v7 }
 0x4c7   : > { %8570 = vmatpush1.bf16.msra.mxu1 %v16095_v43 }
 0x4c8   : > { %6362 = vmatmul.mubr.bf16.gmra.mrb[44].mxu1 %v5866_v40 }
 0x530   : > { %v15669_v56 = vpop.f32.mrb[0].mxu1 }
 0x531   : > { %v15670_v37 = vpop.f32.mrb[1].mxu1 }
 0x532   : > { %v19992_v17 = vadd.f32 %v15670_v37, %v15669_v56  ;;  %v15672_v51 = vpop.f32.mrb[2].mxu1 }
 0x533   : > { %v15673_v49 = vpop.f32.mrb[3].mxu1 }
 0x534   : > { %v19994_v48 = vadd.f32 %v15673_v49, %v15672_v51  ;;  %v16098_v51 = vld [vmem:[%s23450_s7 + $0x60] ss:$8 sps:$4 sm:$0xff]   ;;  %v16100_v49 = vld [vmem:[%s23450_s7 + $0x64] ss:$8 sps:$4 sm:$0xff]  }
 0x535   : > { %8571 = vmatprep.subr.bf16.mxu1 %v16100_v49 }
 0x536   : > { %8572 = vmatpush1.bf16.msra.mxu1 %v16098_v51 }
 0x53d   : > { %v15675_v10 = vpop.f32.mrb[4].mxu1 }
 0x53e   : > { %v15676_v8 = vpop.f32.mrb[5].mxu1 }
 0x53f   : > { %v20002_v45 = vadd.f32 %v15676_v8, %v15675_v10  ;;  %v15678_v31 = vpop.f32.mrb[6].mxu1  ;;  %v16103_v10 = vld [vmem:[%s23450_s7 + $0x74] ss:$8 sps:$4 sm:$0xff]  }
 0x540   : > { %v15679_v39 = vpop.f32.mrb[7].mxu1  ;;  %8573 = vmatprep.subr.bf16.mxu1 %v16103_v10 }
 0x541   : > { %v20004_v29 = vadd.f32 %v15679_v39, %v15678_v31  ;;  %v15645_v34 = vpop.f32.mrb[64].mxu0 }
 0x542   : > { %v15646_v6 = vpop.f32.mrb[65].mxu0 }
 0x543   : > { %v15647_v47 = vadd.f32 %v15646_v6, %v15645_v34  ;;  %v15648_v4 = vpop.f32.mrb[66].mxu0  ;;  %v16101_v34 = vld [vmem:[%s23450_s7 + $0x70] ss:$8 sps:$4 sm:$0xff]  }
 0x544   : > { %v15649_v0 = vpop.f32.mrb[67].mxu0  ;;  %8574 = vmatpush1.bf16.msra.mxu1 %v16101_v34 }
 0x545   : > { %v15650_v28 = vadd.f32 %v15649_v0, %v15648_v4  ;;  %v20047_v0 = vld [vmem:[%s23448_s5] ss:$0 sm:$0xff] }
 0x549   : > { %v15681_v23 = vpop.f32.mrb[8].mxu1 }
 0x54a   : > { %v15682_v62 = vpop.f32.mrb[9].mxu1 }
 0x54b   : > { %v20006_v13 = vadd.f32 %v15682_v62, %v15681_v23  ;;  %v15684_v2 = vpop.f32.mrb[10].mxu1 }
 0x54c   : > { %v15685_v60 = vpop.f32.mrb[11].mxu1 }
 0x54d   : > { %v20008_v25 = vadd.f32 %v15685_v60, %v15684_v2  ;;  %v20052_v2 = vld [vmem:[%s23449_s6] ss:$0 sm:$0xff] }
 0x54e   : > { %v15651_v26 = vpop.f32.mrb[68].mxu0 }
 0x54f   : > { %v15652_v1 = vpop.f32.mrb[69].mxu0 }
 0x550   : > { %v15653_v38 = vadd.f32 %v15652_v1, %v15651_v26  ;;  %v15654_v21 = vpop.f32.mrb[70].mxu0 }
 0x551   : > { %v15655_v18 = vpop.f32.mrb[71].mxu0 }
 0x552   : > { %v15656_v5 = vadd.f32 %v15655_v18, %v15654_v21 }
 0x556   : > { %v15687_v14 = vpop.f32.mrb[12].mxu1 }
 0x557   : > { %v15688_v35 = vpop.f32.mrb[13].mxu1 }
 0x558   : > { %v20022_v11 = vadd.f32 %v15688_v35, %v15687_v14  ;;  %v15690_v59 = vpop.f32.mrb[14].mxu1 }
 0x559   : > { %v15691_v52 = vpop.f32.mrb[15].mxu1 }
 0x55a   : > { %23654 = vst [vmem:[#allocation63_spill] sm:$0xff] %v20022_v11  ;;  %v20024_v20 = vadd.f32 %v15691_v52, %v15690_v59 }
 0x55c   : > { %23655 = vst [vmem:[#allocation60_spill] sm:$0xff] %v20024_v20 }
 0x560   : > { %v15657_v33 = vpop.f32.mrb[72].mxu0 }
 0x561   : > { %v15658_v32 = vpop.f32.mrb[73].mxu0 }
 0x562   : > { %v15659_v15 = vadd.f32 %v15658_v32, %v15657_v33  ;;  %v15660_v36 = vpop.f32.mrb[74].mxu0 }
 0x563   : > { %v15661_v24 = vpop.f32.mrb[75].mxu0  ;;  %v15709_v57 = vpop.f32.mrb[16].mxu1 }
 0x564   : > { %v20026_v9 = vadd.f32 %v15661_v24, %v15660_v36  ;;  %v15710_v58 = vpop.f32.mrb[17].mxu1 }
 0x565   : > { %v15711_v12 = vadd.f32 %v15710_v58, %v15709_v57  ;;  %v15712_v46 = vpop.f32.mrb[18].mxu1 }
 0x566   : > { %v15713_v22 = vpop.f32.mrb[19].mxu1 }
 0x567   : > { %v15714_v40 = vadd.f32 %v15713_v22, %v15712_v46  ;;  %v6308_v42 = vadd.f32 %v15711_v12, %v15647_v47  ;;  %v16106_v22 = vld [vmem:[%s23450_s7 + $0x84] ss:$8 sps:$4 sm:$0xff]  }
 0x568   : > { %v15663_v55 = vpop.f32.mrb[76].mxu0  ;;  %8575 = vmatprep.subr.bf16.mxu1 %v16106_v22 }
 0x569   : > { %v15664_v16 = vpop.f32.mrb[77].mxu0  ;;  %v6311_v19 = vadd.f32 %v15714_v40, %v15650_v28 }
 0x56a   : > { %v20028_v27 = vadd.f32 %v15664_v16, %v15663_v55  ;;  %v15666_v53 = vpop.f32.mrb[78].mxu0 }
 0x56b   : > { %v15667_v56 = vpop.f32.mrb[79].mxu0  ;;  %v15715_v37 = vpop.f32.mrb[20].mxu1 }
 0x56c   : > { %v20036_v63 = vadd.f32 %v15667_v56, %v15666_v53  ;;  %v15716_v30 = vpop.f32.mrb[21].mxu1 }
 0x56d   : > { %v15717_v8 = vadd.f32 %v15716_v30, %v15715_v37  ;;  %v15718_v31 = vpop.f32.mrb[22].mxu1 }
 0x56e   : > { %v15719_v39 = vpop.f32.mrb[23].mxu1 }
 0x56f   : > { %v15720_v6 = vadd.f32 %v15719_v39, %v15718_v31  ;;  %v6316_v47 = vadd.f32 %v15717_v8, %v15653_v38 }
 0x570   : > { %v15867_v4 = vpop.f32.mrb[80].mxu0 }
 0x571   : > { %v6413_v28 = vadd.f32 %v15867_v4, %v6316_v47  ;;  %v6404_v23 = vpop.f32.mrb[81].mxu0  ;;  %v6319_v62 = vadd.f32 %v15720_v6, %v15656_v5 }
 0x572   : > { %v6405_v60 = vadd.f32 %v6404_v23, %v6308_v42  ;;  %v15868_v26 = vpop.f32.mrb[82].mxu0  ;;  %v16109_v23 = vld [vmem:[%s23450_s7 + $0x94] ss:$8 sps:$4 sm:$0xff]  }
 0x573   : > { %v6476_v1 = vmul.f32 %v20047_v0, %v6413_v28  ;;  %v6416_v38 = vadd.f32 %v15868_v26, %v6319_v62  ;;  %v6407_v21 = vpop.f32.mrb[83].mxu0  ;;  %v15721_v18 = vpop.f32.mrb[24].mxu1 }
 0x574   : > { %v6474_v44 = vmul.f32 %v20047_v0, %v6405_v60  ;;  %v6408_v61 = vadd.f32 %v6407_v21, %v6311_v19  ;;  %v15722_v7 = vpop.f32.mrb[25].mxu1  ;;  %v16107_v21 = vld [vmem:[%s23450_s7 + $0x90] ss:$8 sps:$4 sm:$0xff]  }
 0x575   : > { %v6499_v14 = vadd.f32 %v20052_v2, %v6476_v1  ;;  %v6477_v5 = vmul.f32 %v20047_v0, %v6416_v38  ;;  %v15723_v43 = vadd.f32 %v15722_v7, %v15721_v18  ;;  %v15724_v35 = vpop.f32.mrb[26].mxu1 }
 0x576   : > { %v6497_v59 = vadd.f32 %v20052_v2, %v6474_v44  ;;  %v6475_v52 = vmul.f32 %v20047_v0, %v6408_v61  ;;  %v15725_v33 = vpop.f32.mrb[27].mxu1 }
 0x577   : > { %v6515_v32 = vmax.f32 %v6499_v14, 0.0  ;;  %v6500_v36 = vadd.f32 %v20052_v2, %v6477_v5  ;;  %v15726_v24 = vadd.f32 %v15725_v33, %v15724_v35  ;;  %v6324_v57 = vadd.f32 %v15723_v43, %v15659_v15  ;;  %v16104_v15 = vld [vmem:[%s23450_s7 + $0x80] ss:$8 sps:$4 sm:$0xff]  }
 0x578   : > { %v6513_v58 = vmax.f32 %v6497_v59, 0.0  ;;  %v6498_v12 = vadd.f32 %v20052_v2, %v6475_v52  ;;  %v20062_v46 = vpop.f32.mrb[84].mxu0  ;;  %8576 = vmatpush1.bf16.msra.mxu1 %v16104_v15 }
 0x579   : > { %v6579_v40 = vcombine.high %v6515_v32, %v6515_v32  ;;  %v6586_v42 = vrot.slane %v6515_v32, %v17487_v50  ;;  %v20068_v55 = vmax.f32 %v6500_v36, 0.0  ;;  %v6420_v16 = vpop.f32.mrb[85].mxu0  ;;  %v20071_v19 = vadd.f32 %v15726_v24, %v20026_v9  ;;  %8577 = vmatprep.subr.bf16.mxu1 %v16109_v23 }
 0x57a   : > { %v6545_v53 = vcombine.high %v6513_v58, %v6513_v58  ;;  %v6552_v56 = vrot.slane %v6513_v58, %v17487_v50  ;;  %v20077_v37 = vmax.f32 %v6498_v12, 0.0  ;;  %v20079_v51 = vadd.f32 %v6420_v16, %v6324_v57  ;;  %v20081_v49 = vpop.f32.mrb[86].mxu0  ;;  %v16112_v57 = vld [vmem:[%s23450_s7 + $0xa4] ss:$8 sps:$4 sm:$0xff]  }
 0x57b   : > { %v6593_v30 = vrot.slane %v6579_v40, %v17487_v50  ;;  %v6594_v10 = vcombine.high %v6586_v42, %v6586_v42  ;;  %v6938_v9 = vsel %vm6881_vm2, %v6586_v42, -inf  ;;  %v6596_v8 = vcombine.high %v20068_v55, %v20068_v55  ;;  %v20087_v31 = vpop.f32.mrb[87].mxu0  ;;  %v20089_v39 = vpop.f32.mrb[28].mxu1 }
 0x57c   : > { %v6939_v34 = vrot.slane %v6938_v9, 4  ;;  %v6559_v6 = vrot.slane %v6545_v53, %v17487_v50  ;;  %v6560_v47 = vcombine.high %v6552_v56, %v6552_v56  ;;  %v6882_v4 = vsel %vm6881_vm2, %v6552_v56, -inf  ;;  %v20093_v28 = vpop.f32.mrb[29].mxu1  ;;  %8578 = vmatpush1.bf16.msra.mxu1 %v16107_v21 }
 0x57d   : > { %v6595_v62 = vcombine.high %v6593_v30, %v6593_v30  ;;  %v6945_v60 = vsel %vm6881_vm2, %v6594_v10, -inf  ;;  %v6952_v26 = vsel %vm6881_vm2, %v6593_v30, -inf  ;;  %v6883_v1 = vrot.slane %v6882_v4, 4  ;;  %v20100_v38 = vpop.f32.mrb[30].mxu1  ;;  %v16110_v10 = vld [vmem:[%s23450_s7 + $0xa0] ss:$8 sps:$4 sm:$0xff]   ;;  %8579 = vmatprep.subr.bf16.mxu1 %v16112_v57 }
 0x57e   : > { %v6940_v18 = vmax.f32 %v6938_v9, %v6939_v34  ;;  %v6946_v44 = vrot.slane %v6945_v60, 4  ;;  %v6953_v61 = vrot.slane %v6952_v26, 4  ;;  %v6561_v7 = vcombine.high %v6559_v6, %v6559_v6  ;;  %v20105_v14 = vpop.f32.mrb[31].mxu1 }
 0x57f   : > { %v6959_v5 = vsel %vm6881_vm2, %v6595_v62, -inf  ;;  %v6884_v43 = vmax.f32 %v6882_v4, %v6883_v1  ;;  %v6889_v35 = vsel %vm6881_vm2, %v6560_v47, -inf  ;;  %v6896_v59 = vsel %vm6881_vm2, %v6559_v6, -inf }
 0x580   : > { %v6941_v52 = vrot.slane %v6940_v18, 2  ;;  %v6947_v33 = vmax.f32 %v6945_v60, %v6946_v44  ;;  %v6954_v32 = vmax.f32 %v6952_v26, %v6953_v61  ;;  %v6960_v36 = vrot.slane %v6959_v5, 4  ;;  %v20110_v24 = vpop.f32.mrb[88].mxu0  ;;  %8580 = vmatpush1.bf16.msra.mxu1 %v16110_v10 }
 0x581   : > { %v6885_v58 = vrot.slane %v6884_v43, 2  ;;  %v6890_v12 = vrot.slane %v6889_v35, 4  ;;  %v6897_v22 = vrot.slane %v6896_v59, 4  ;;  %v6903_v40 = vsel %vm6881_vm2, %v6561_v7, -inf  ;;  %v20116_v42 = vpop.f32.mrb[89].mxu0 }
 0x582   : > { %v6942_v16 = vmax.f32 %v6940_v18, %v6941_v52  ;;  %v6948_v15 = vrot.slane %v6947_v33, 2  ;;  %v6955_v53 = vrot.slane %v6954_v32, 2  ;;  %v6961_v56 = vmax.f32 %v6959_v5, %v6960_v36  ;;  %v20118_v30 = vpop.f32.mrb[90].mxu0  ;;  %v16115_v18 = vld [vmem:[%s23450_s7 + $0xb4] ss:$8 sps:$4 sm:$0xff]  }
 0x583   : > { %v6886_v9 = vmax.f32 %v6884_v43, %v6885_v58  ;;  %v6891_v34 = vmax.f32 %v6889_v35, %v6890_v12  ;;  %v6898_v6 = vmax.f32 %v6896_v59, %v6897_v22  ;;  %v6904_v47 = vrot.slane %v6903_v40, 4  ;;  %v20123_v4 = vpop.f32.mrb[91].mxu0  ;;  %v20125_v23 = vpop.f32.mrb[32].mxu1  ;;  %v16113_v35 = vld [vmem:[%s23450_s7 + $0xb0] ss:$8 sps:$4 sm:$0xff]   ;;  %8581 = vmatprep.subr.bf16.mxu1 %v16115_v18 }
 0x584   : > { %v6943_v62 = vrot.slane %v6942_v16, 1  ;;  %v6949_v60 = vmax.f32 %v6947_v33, %v6948_v15  ;;  %v6956_v26 = vmax.f32 %v6954_v32, %v6955_v53  ;;  %v6962_v1 = vrot.slane %v6961_v56, 2  ;;  %v20127_v21 = vpop.f32.mrb[33].mxu1  ;;  %8582 = vmatpush1.bf16.msra.mxu1 %v16113_v35 }
 0x585   : > { %v6887_v44 = vrot.slane %v6886_v9, 1  ;;  %v6892_v61 = vrot.slane %v6891_v34, 2  ;;  %v6899_v7 = vrot.slane %v6898_v6, 2  ;;  %v6905_v5 = vmax.f32 %v6903_v40, %v6904_v47  ;;  %v20132_v43 = vpop.f32.mrb[34].mxu1 }
 0x586   : > { %v6944_v59 = vmax.f32 %v6942_v16, %v6943_v62  ;;  %v6950_v52 = vrot.slane %v6949_v60, 1  ;;  %v6957_v33 = vrot.slane %v6956_v26, 1  ;;  %v6963_v32 = vmax.f32 %v6961_v56, %v6962_v1  ;;  %v20137_v36 = vpop.f32.mrb[35].mxu1 }
 0x587   : > { %v6888_v57 = vmax.f32 %v6886_v9, %v6887_v44  ;;  %v6893_v58 = vmax.f32 %v6891_v34, %v6892_v61  ;;  %v6900_v12 = vmax.f32 %v6898_v6, %v6899_v7  ;;  %v6906_v22 = vrot.slane %v6905_v5, 2 }
 0x588   : > { %v6951_v15 = vmax.f32 %v6949_v60, %v6950_v52  ;;  %v6958_v53 = vmax.f32 %v6956_v26, %v6957_v33  ;;  %v6964_v40 = vrot.slane %v6963_v32, 1  ;;  %v6603_v10 = vrot.slane %v20068_v55, %v17487_v50  ;;  %v20141_v47 = vpop.f32.mrb[92].mxu0 }
 0x589   : > { %23656 = vst [vmem:[#allocation64_spill] sm:$0xff] %v20141_v47  ;;  %v6894_v16 = vrot.slane %v6893_v58, 1  ;;  %v6901_v62 = vrot.slane %v6900_v12, 1  ;;  %v6907_v41 = vmax.f32 %v6905_v5, %v6906_v22  ;;  %v7330_v56 = vmax.f32 %v6888_v57, %v6944_v59  ;;  %v20143_v1 = vpop.f32.mrb[93].mxu0  ;;  %v16118_v59 = vld [vmem:[%s23450_s7 + $0xc4] ss:$8 sps:$4 sm:$0xff]  }
 0x58a   : > { %v6965_v18 = vmax.f32 %v6963_v32, %v6964_v40  ;;  %v6610_v9 = vrot.slane %v6596_v8, %v17487_v50  ;;  %v6611_v34 = vcombine.high %v6603_v10, %v6603_v10  ;;  %v6966_v6 = vsel %vm6881_vm2, %v6603_v10, -inf  ;;  %v20150_v60 = vpop.f32.mrb[94].mxu0  ;;  %v16116_v57 = vld [vmem:[%s23450_s7 + $0xc0] ss:$8 sps:$4 sm:$0xff]   ;;  %8583 = vmatprep.subr.bf16.mxu1 %v16118_v59  ;;  %v16125_v47 = vld [vmem:[%s23450_s7 + $0xf0] ss:$8 sps:$4 sm:$0xff]  }
 0x58b   : > { %23657 = vst [vmem:[#allocation61_spill] sm:$0xff] %v20150_v60  ;;  %v6895_v26 = vmax.f32 %v6893_v58, %v6894_v16  ;;  %v6902_v44 = vmax.f32 %v6900_v12, %v6901_v62  ;;  %v6908_v61 = vrot.slane %v6907_v41, 1  ;;  %v7362_v7 = vpack.c.bf16 %v7330_v56, %v7330_v56  ;;  %v20152_v35 = vpop.f32.mrb[36].mxu1  ;;  %v20154_v5 = vpop.f32.mrb[95].mxu0  ;;  %8584 = vmatpush1.bf16.msra.mxu1 %v16116_v57 }
 0x58c   : > { %23658 = vst [vmem:[#allocation80_spill] sm:$0xff] %v20154_v5  ;;  %v6612_v52 = vcombine.high %v6610_v9, %v6610_v9  ;;  %v6967_v55 = vrot.slane %v6966_v6, 4  ;;  %v6973_v8 = vsel %vm6881_vm2, %v6611_v34, -inf  ;;  %v6980_v33 = vsel %vm6881_vm2, %v6610_v9, -inf  ;;  %v20161_v32 = vpop.f32.mrb[37].mxu1 }
 0x58d   : > { %v6909_v58 = vmax.f32 %v6907_v41, %v6908_v61  ;;  %v7331_v12 = vmax.f32 %v6895_v26, %v6951_v15  ;;  %v7332_v22 = vmax.f32 %v6902_v44, %v6958_v53  ;;  %v7426_v40 = vunpack.c.l.b16 %v7362_v7  ;;  %v20166_v10 = vpop.f32.mrb[38].mxu1  ;;  %v16121_v41 = vld [vmem:[%s23450_s7 + $0xd4] ss:$8 sps:$4 sm:$0xff]   ;;  %v16119_v44 = vld [vmem:[%s23450_s7 + $0xd0] ss:$8 sps:$4 sm:$0xff]  }
 0x58e   : > { %v6968_v16 = vmax.f32 %v6966_v6, %v6967_v55  ;;  %v6974_v62 = vrot.slane %v6973_v8, 4  ;;  %v6981_v56 = vrot.slane %v6980_v33, 4  ;;  %v6987_v34 = vsel %vm6881_vm2, %v6612_v52, -inf  ;;  %v20169_v54 = vpop.f32.mrb[39].mxu1  ;;  %8585 = vmatprep.subr.bf16.mxu1 %v16121_v41 }
 0x58f   : > { %v7333_v9 = vmax.f32 %v6909_v58, %v6965_v18  ;;  %v7363_v3 = vpack.c.bf16 %v7331_v12, %v7331_v12  ;;  %v7364_v60 = vpack.c.bf16 %v7332_v22, %v7332_v22  ;;  %v6988_v20 = vrot.slane %v6987_v34, 4  ;;  %8586 = vmatpush1.bf16.msra.mxu1 %v16119_v44 }
 0x590   : > { %v6969_v15 = vrot.slane %v6968_v16, 2  ;;  %v6975_v53 = vmax.f32 %v6973_v8, %v6974_v62  ;;  %v6982_v26 = vmax.f32 %v6980_v33, %v6981_v56  ;;  %v6562_v6 = vcombine.high %v20077_v37, %v20077_v37 }
 0x591   : > { %v7365_v61 = vpack.c.bf16 %v7333_v9, %v7333_v9  ;;  %v7427_v7 = vunpack.c.l.b16 %v7363_v3  ;;  %v7428_v18 = vunpack.c.l.b16 %v7364_v60  ;;  %v6989_v59 = vmax.f32 %v6987_v34, %v6988_v20  ;;  %v16124_v3 = vld [vmem:[%s23450_s7 + $0xe4] ss:$8 sps:$4 sm:$0xff]  }
 0x592   : > { %v6970_v52 = vmax.f32 %v6968_v16, %v6969_v15  ;;  %v6976_v55 = vrot.slane %v6975_v53, 2  ;;  %v6983_v57 = vrot.slane %v6982_v26, 2  ;;  %v6569_v58 = vrot.slane %v20077_v37, %v17487_v50  ;;  %v16122_v37 = vld [vmem:[%s23450_s7 + $0xe0] ss:$8 sps:$4 sm:$0xff]   ;;  %8587 = vmatprep.subr.bf16.mxu1 %v16124_v3 }
 0x593   : > { %v7429_v8 = vunpack.c.l.b16 %v7365_v61  ;;  %v7458_v33 = vsel %vm5346_vm5, %v7427_v7, %v7426_v40  ;;  %v6990_v12 = vrot.slane %v6989_v59, 2  ;;  %v6576_v22 = vrot.slane %v6562_v6, %v17487_v50  ;;  %v20183_v62 = vpop.f32.mrb[40].mxu1  ;;  %8588 = vmatpush1.bf16.msra.mxu1 %v16122_v37 }
 0x594   : > { %v7459_v20 = vsel %vm5348_vm6, %v7428_v18, %v7458_v33  ;;  %v6971_v60 = vrot.slane %v6970_v52, 1  ;;  %v6977_v16 = vmax.f32 %v6975_v53, %v6976_v55  ;;  %v6984_v56 = vmax.f32 %v6982_v26, %v6983_v57  ;;  %v20189_v34 = vpop.f32.mrb[41].mxu1  ;;  %v16127_v57 = vld [vmem:[%s23450_s7 + $0xf4] ss:$8 sps:$4 sm:$0xff]  }
 0x595   : > { %v6991_v40 = vmax.f32 %v6989_v59, %v6990_v12  ;;  %v6577_v9 = vcombine.high %v6569_v58, %v6569_v58  ;;  %v6578_v41 = vcombine.high %v6576_v22, %v6576_v22  ;;  %v6910_v15 = vsel %vm6881_vm2, %v6569_v58, -inf  ;;  %v20195_v6 = vpop.f32.mrb[42].mxu1  ;;  %8589 = vmatprep.subr.bf16.mxu1 %v16127_v57 }
 0x596   : > { %v6978_v44 = vrot.slane %v6977_v16, 1  ;;  %v6985_v61 = vrot.slane %v6984_v56, 1  ;;  %v6911_v7 = vrot.slane %v6910_v15, 4  ;;  %v20197_v18 = vpop.f32.mrb[43].mxu1  ;;  %v6972_v53 = vmax.f32 %v6970_v52, %v6971_v60 }
 0x597   : > { %v6917_v26 = vsel %vm6881_vm2, %v6577_v9, -inf  ;;  %v6924_v55 = vsel %vm6881_vm2, %v6576_v22, -inf  ;;  %v6931_v59 = vsel %vm6881_vm2, %v6578_v41, -inf  ;;  %v6992_v33 = vrot.slane %v6991_v40, 1  ;;  %8590 = vmatpush1.bf16.msra.mxu1 %v16125_v47 }
 0x598   : > { %v6979_v58 = vmax.f32 %v6977_v16, %v6978_v44  ;;  %v6912_v12 = vmax.f32 %v6910_v15, %v6911_v7  ;;  %v6918_v3 = vrot.slane %v6917_v26, 4  ;;  %v6986_v37 = vmax.f32 %v6984_v56, %v6985_v61 }
 0x599   : > { %v6925_v52 = vrot.slane %v6924_v55, 4  ;;  %v6932_v60 = vrot.slane %v6931_v59, 4  ;;  %v20209_v9 = vsel %vm5350_vm7, %v7429_v8, %v7459_v20  ;;  %v6478_v11 = vmul.f32 %v20047_v0, %v20079_v51 }
 0x59a   : > { %v6913_v22 = vrot.slane %v6912_v12, 2  ;;  %v6919_v41 = vmax.f32 %v6917_v26, %v6918_v3  ;;  %v6424_v16 = vadd.f32 %v20087_v31, %v20071_v19  ;;  %v15729_v56 = vadd.f32 %v20093_v28, %v20089_v39 }
 0x59b   : > { %v6926_v15 = vmax.f32 %v6924_v55, %v6925_v52  ;;  %v6933_v44 = vmax.f32 %v6931_v59, %v6932_v60  ;;  %v15732_v61 = vadd.f32 %v20105_v14, %v20100_v38  ;;  %v20219_v8 = vpop.f32.mrb[44].mxu1  ;;  %v6501_v26 = vadd.f32 %v20052_v2, %v6478_v11 }
 0x59c   : > { %23659 = vst [vmem:[#allocation56_spill] sm:$0xff] %v20219_v8  ;;  %v6914_v20 = vmax.f32 %v6912_v12, %v6913_v22  ;;  %v6920_v7 = vrot.slane %v6919_v41, 2  ;;  %v6479_v51 = vmul.f32 %v20047_v0, %v6424_v16  ;;  %v20223_v57 = vpop.f32.mrb[45].mxu1  ;;  %v6332_v47 = vadd.f32 %v15729_v56, %v20028_v27 }
 0x59d   : > { %23660 = vst [vmem:[#allocation47_spill] sm:$0xff] %v20223_v57  ;;  %v6927_v19 = vrot.slane %v6926_v15, 2  ;;  %v6934_v31 = vrot.slane %v6933_v44, 2  ;;  %v6335_v55 = vadd.f32 %v15732_v61, %v20036_v63  ;;  %v20227_v39 = vpop.f32.mrb[46].mxu1  ;;  %v6517_v14 = vmax.f32 %v6501_v26, 0.0 }
 0x59e   : > { %23661 = vst [vmem:[#allocation51_spill] sm:$0xff] %v20227_v39  ;;  %v6915_v28 = vrot.slane %v6914_v20, 1  ;;  %v6921_v38 = vmax.f32 %v6919_v41, %v6920_v7  ;;  %v6502_v59 = vadd.f32 %v20052_v2, %v6479_v51  ;;  %v20230_v12 = vpop.f32.mrb[47].mxu1  ;;  %v6429_v52 = vadd.f32 %v20062_v46, %v6332_v47 }
 0x59f   : > { %23662 = vst [vmem:[#allocation45_spill] sm:$0xff] %v20230_v12  ;;  %v6928_v11 = vmax.f32 %v6926_v15, %v6927_v19  ;;  %v6935_v3 = vmax.f32 %v6933_v44, %v6934_v31  ;;  %v20234_v60 = vadd.f32 %v20081_v49, %v6335_v55  ;;  %v6613_v16 = vcombine.high %v6517_v14, %v6517_v14 }
 0x5a0   : > { %v6916_v22 = vmax.f32 %v6914_v20, %v6915_v28  ;;  %v6922_v27 = vrot.slane %v6921_v38, 1  ;;  %v6620_v63 = vrot.slane %v6517_v14, %v17487_v50  ;;  %v6993_v56 = vmax.f32 %v6991_v40, %v6992_v33 }
 0x5a1   : > { %v6929_v61 = vrot.slane %v6928_v11, 1  ;;  %v6936_v41 = vrot.slane %v6935_v3, 1  ;;  %v6518_v7 = vmax.f32 %v6502_v59, 0.0  ;;  %v6627_v12 = vrot.slane %v6613_v16, %v17487_v50 }
 0x5a2   : > { %v6923_v26 = vmax.f32 %v6921_v38, %v6922_v27  ;;  %v7334_v51 = vmax.f32 %v6916_v22, %v6972_v53  ;;  %v6628_v15 = vcombine.high %v6620_v63, %v6620_v63  ;;  %v6994_v46 = vsel %vm6881_vm2, %v6620_v63, -inf }
 0x5a3   : > { %v6930_v44 = vmax.f32 %v6928_v11, %v6929_v61  ;;  %v6937_v19 = vmax.f32 %v6935_v3, %v6936_v41  ;;  %v6480_v49 = vmul.f32 %v20047_v0, %v6429_v52  ;;  %v6629_v47 = vcombine.high %v6627_v12, %v6627_v12 }
 0x5a4   : > { %v7335_v20 = vmax.f32 %v6923_v26, %v6979_v58  ;;  %v7366_v31 = vpack.c.bf16 %v7334_v51, %v7334_v51  ;;  %v6995_v55 = vrot.slane %v6994_v46, 4  ;;  %v7001_v33 = vsel %vm6881_vm2, %v6628_v15, -inf }
 0x5a5   : > { %v7336_v28 = vmax.f32 %v6930_v44, %v6986_v37  ;;  %v20240_v40 = vmax.f32 %v6937_v19, %v6993_v56  ;;  %v7008_v53 = vsel %vm6881_vm2, %v6627_v12, -inf  ;;  %v7002_v11 = vrot.slane %v7001_v33, 4 }
 0x5a6   : > { %v7367_v38 = vpack.c.bf16 %v7335_v20, %v7335_v20  ;;  %v7430_v14 = vunpack.c.l.b16 %v7366_v31  ;;  %v6996_v59 = vmax.f32 %v6994_v46, %v6995_v55  ;;  %v7009_v22 = vrot.slane %v7008_v53, 4 }
 0x5a7   : > { %v7368_v3 = vpack.c.bf16 %v7336_v28, %v7336_v28  ;;  %v7015_v27 = vsel %vm6881_vm2, %v6629_v47, -inf  ;;  %v6630_v52 = vcombine.high %v6518_v7, %v6518_v7  ;;  %v7003_v63 = vmax.f32 %v7001_v33, %v7002_v11 }
 0x5a8   : > { %v7431_v58 = vunpack.c.l.b16 %v7367_v38  ;;  %v7461_v16 = vsel %vm5352_vm8, %v7430_v14, %v20209_v9  ;;  %v6997_v37 = vrot.slane %v6996_v59, 2  ;;  %v7010_v12 = vmax.f32 %v7008_v53, %v7009_v22 }
 0x5a9   : > { %v7432_v61 = vunpack.c.l.b16 %v7368_v3  ;;  %v7016_v41 = vrot.slane %v7015_v27, 4  ;;  %v7004_v15 = vrot.slane %v7003_v63, 2  ;;  %v6637_v44 = vrot.slane %v6518_v7, %v17487_v50 }
 0x5aa   : > { %v7462_v26 = vsel %vm5354_vm9, %v7431_v58, %v7461_v16  ;;  %v6998_v51 = vmax.f32 %v6996_v59, %v6997_v37  ;;  %v7011_v46 = vrot.slane %v7010_v12, 2  ;;  %v6644_v9 = vrot.slane %v6630_v52, %v17487_v50 }
 0x5ab   : > { %v20252_v19 = vsel %vm5356_vm10, %v7432_v61, %v7462_v26  ;;  %v7017_v20 = vmax.f32 %v7015_v27, %v7016_v41  ;;  %v7005_v47 = vmax.f32 %v7003_v63, %v7004_v15  ;;  %v6645_v55 = vcombine.high %v6637_v44, %v6637_v44 }
 0x5ac   : > { %23663 = vst [vmem:[#allocation48_spill] sm:$0xff] %v20252_v19  ;;  %v6999_v31 = vrot.slane %v6998_v51, 1  ;;  %v7022_v28 = vsel %vm6881_vm2, %v6637_v44, -inf  ;;  %v7012_v33 = vmax.f32 %v7010_v12, %v7011_v46  ;;  %v6646_v38 = vcombine.high %v6644_v9, %v6644_v9 }
 0x5ad   : > { %v7018_v53 = vrot.slane %v7017_v20, 2  ;;  %v7023_v14 = vrot.slane %v7022_v28, 4  ;;  %v7006_v11 = vrot.slane %v7005_v47, 1  ;;  %v7029_v7 = vsel %vm6881_vm2, %v6645_v55, -inf }
 0x5ae   : > { %v20256_v59 = vmax.f32 %v6998_v51, %v6999_v31  ;;  %v7036_v3 = vsel %vm6881_vm2, %v6644_v9, -inf  ;;  %v7013_v22 = vrot.slane %v7012_v33, 1  ;;  %v7030_v52 = vrot.slane %v7029_v7, 4 }
 0x5af   : > { %v7019_v27 = vmax.f32 %v7017_v20, %v7018_v53  ;;  %v7024_v58 = vmax.f32 %v7022_v28, %v7023_v14  ;;  %v20260_v16 = vmax.f32 %v7005_v47, %v7006_v11  ;;  %v7037_v37 = vrot.slane %v7036_v3, 4 }
 0x5b0   : > { %v7043_v63 = vsel %vm6881_vm2, %v6646_v38, -inf  ;;  %v6503_v61 = vadd.f32 %v20052_v2, %v6480_v49  ;;  %v20264_v12 = vmax.f32 %v7012_v33, %v7013_v22  ;;  %v7031_v51 = vmax.f32 %v7029_v7, %v7030_v52 }
 0x5b1   : > { %v7020_v41 = vrot.slane %v7019_v27, 1  ;;  %v7025_v26 = vrot.slane %v7024_v58, 2  ;;  %v7038_v15 = vmax.f32 %v7036_v3, %v7037_v37  ;;  %v7044_v44 = vrot.slane %v7043_v63, 4 }
 0x5b2   : > { %v6519_v46 = vmax.f32 %v6503_v61, 0.0  ;;  %v6481_v20 = vmul.f32 %v20047_v0, %v20234_v60  ;;  %v7032_v47 = vrot.slane %v7031_v51, 2  ;;  %v15735_v55 = vadd.f32 %v20127_v21, %v20125_v23 }
 0x5b3   : > { %v20268_v9 = vmax.f32 %v7019_v27, %v7020_v41  ;;  %v7026_v31 = vmax.f32 %v7024_v58, %v7025_v26  ;;  %v7039_v28 = vrot.slane %v7038_v15, 2  ;;  %v7045_v49 = vmax.f32 %v7043_v63, %v7044_v44  ;;  %v16130_v44 = vld [vmem:[%s23450_s7 + $0x104] ss:$8 sps:$4 sm:$0xff]  }
 0x5b4   : > { %v6647_v33 = vcombine.high %v6519_v46, %v6519_v46  ;;  %v6654_v53 = vrot.slane %v6519_v46, %v17487_v50  ;;  %v7033_v14 = vmax.f32 %v7031_v51, %v7032_v47  ;;  %v6504_v11 = vadd.f32 %v20052_v2, %v6481_v20  ;;  %8612 = vmatprep.subr.bf16.mxu1 %v16130_v44 }
 0x5b5   : > { %v7027_v38 = vrot.slane %v7026_v31, 1  ;;  %v20275_v7 = vadd.f32 %v15735_v55, %v19992_v17  ;;  %v7040_v60 = vmax.f32 %v7038_v15, %v7039_v28  ;;  %v7046_v3 = vrot.slane %v7045_v49, 2 }
 0x5b6   : > { %v6661_v22 = vrot.slane %v6647_v33, %v17487_v50  ;;  %v6662_v27 = vcombine.high %v6654_v53, %v6654_v53  ;;  %v7034_v23 = vrot.slane %v7033_v14, 1  ;;  %v7050_v21 = vsel %vm6881_vm2, %v6654_v53, -inf }
 0x5b7   : > { %v20278_v58 = vmax.f32 %v7026_v31, %v7027_v38  ;;  %v6520_v52 = vmax.f32 %v6504_v11, 0.0  ;;  %v7041_v37 = vrot.slane %v7040_v60, 1  ;;  %v7047_v63 = vmax.f32 %v7045_v49, %v7046_v3 }
 0x5b8   : > { %v6663_v61 = vcombine.high %v6661_v22, %v6661_v22  ;;  %v7051_v41 = vrot.slane %v7050_v21, 4  ;;  %v20281_v26 = vmax.f32 %v7033_v14, %v7034_v23  ;;  %v7057_v17 = vsel %vm6881_vm2, %v6662_v27, -inf }
 0x5b9   : > { %v7064_v51 = vsel %vm6881_vm2, %v6661_v22, -inf  ;;  %v6664_v15 = vcombine.high %v6520_v52, %v6520_v52  ;;  %v20288_v46 = vmax.f32 %v7040_v60, %v7041_v37  ;;  %v7048_v20 = vrot.slane %v7047_v63, 1 }
 0x5ba   : > { %v7052_v31 = vmax.f32 %v7050_v21, %v7051_v41  ;;  %v7058_v47 = vrot.slane %v7057_v17, 4  ;;  %v7065_v55 = vrot.slane %v7064_v51, 4  ;;  %v7071_v28 = vsel %vm6881_vm2, %v6663_v61, -inf }
 0x5bb   : > { %v6671_v49 = vrot.slane %v6520_v52, %v17487_v50  ;;  %v6678_v33 = vrot.slane %v6664_v15, %v17487_v50  ;;  %v20293_v53 = vmax.f32 %v7047_v63, %v7048_v20  ;;  %v7072_v11 = vrot.slane %v7071_v28, 4 }
 0x5bc   : > { %v7053_v38 = vrot.slane %v7052_v31, 2  ;;  %v7059_v14 = vmax.f32 %v7057_v17, %v7058_v47  ;;  %v7066_v3 = vmax.f32 %v7064_v51, %v7065_v55 }
 0x5bd   : > { %v6679_v22 = vcombine.high %v6671_v49, %v6671_v49  ;;  %v6680_v60 = vcombine.high %v6678_v33, %v6678_v33  ;;  %v7078_v27 = vsel %vm6881_vm2, %v6671_v49, -inf  ;;  %v7073_v37 = vmax.f32 %v7071_v28, %v7072_v11 }
 0x5be   : > { %v7054_v23 = vmax.f32 %v7052_v31, %v7053_v38  ;;  %v7060_v21 = vrot.slane %v7059_v14, 2  ;;  %v7079_v41 = vrot.slane %v7078_v27, 4  ;;  %v7067_v61 = vrot.slane %v7066_v3, 2 }
 0x5bf   : > { %v7085_v52 = vsel %vm6881_vm2, %v6679_v22, -inf  ;;  %v7092_v15 = vsel %vm6881_vm2, %v6678_v33, -inf  ;;  %v7099_v63 = vsel %vm6881_vm2, %v6680_v60, -inf  ;;  %v7074_v17 = vrot.slane %v7073_v37, 2 }
 0x5c0   : > { %v7055_v44 = vrot.slane %v7054_v23, 1  ;;  %v7061_v20 = vmax.f32 %v7059_v14, %v7060_v21  ;;  %v7080_v47 = vmax.f32 %v7078_v27, %v7079_v41  ;;  %v7068_v51 = vmax.f32 %v7066_v3, %v7067_v61 }
 0x5c1   : > { %v7086_v55 = vrot.slane %v7085_v52, 4  ;;  %v7093_v56 = vrot.slane %v7092_v15, 4  ;;  %v7100_v19 = vrot.slane %v7099_v63, 4  ;;  %v7075_v38 = vmax.f32 %v7073_v37, %v7074_v17 }
 0x5c2   : > { %v7056_v49 = vmax.f32 %v7054_v23, %v7055_v44  ;;  %v7062_v31 = vrot.slane %v7061_v20, 1  ;;  %v7081_v28 = vrot.slane %v7080_v47, 2  ;;  %v7069_v11 = vrot.slane %v7068_v51, 1 }
 0x5c3   : > { %v7087_v39 = vmax.f32 %v7085_v52, %v7086_v55  ;;  %v7094_v57 = vmax.f32 %v7092_v15, %v7093_v56  ;;  %v7101_v22 = vmax.f32 %v7099_v63, %v7100_v19  ;;  %v7076_v33 = vrot.slane %v7075_v38, 1 }
 0x5c4   : > { %v7063_v8 = vmax.f32 %v7061_v20, %v7062_v31  ;;  %v7338_v60 = vmax.f32 %v20256_v59, %v7056_v49  ;;  %v7082_v5 = vmax.f32 %v7080_v47, %v7081_v28  ;;  %v7070_v14 = vmax.f32 %v7068_v51, %v7069_v11 }
 0x5c5   : > { %v7088_v21 = vrot.slane %v7087_v39, 2  ;;  %v7095_v27 = vrot.slane %v7094_v57, 2  ;;  %v7102_v3 = vrot.slane %v7101_v22, 2  ;;  %v7077_v41 = vmax.f32 %v7075_v38, %v7076_v33 }
 0x5c6   : > { %v7339_v61 = vmax.f32 %v20260_v16, %v7063_v8  ;;  %v7370_v23 = vpack.c.bf16 %v7338_v60, %v7338_v60  ;;  %v7083_v44 = vrot.slane %v7082_v5, 1  ;;  %v7340_v37 = vmax.f32 %v20264_v12, %v7070_v14 }
 0x5c7   : > { %v7089_v17 = vmax.f32 %v7087_v39, %v7088_v21  ;;  %v7096_v52 = vmax.f32 %v7094_v57, %v7095_v27  ;;  %v7103_v56 = vmax.f32 %v7101_v22, %v7102_v3  ;;  %v7341_v19 = vmax.f32 %v20268_v9, %v7077_v41 }
 0x5c8   : > { %v7371_v15 = vpack.c.bf16 %v7339_v61, %v7339_v61  ;;  %v7434_v63 = vunpack.c.l.b16 %v7370_v23  ;;  %v7084_v59 = vmax.f32 %v7082_v5, %v7083_v44  ;;  %v7372_v20 = vpack.c.bf16 %v7340_v37, %v7340_v37 }
 0x5c9   : > { %v7090_v47 = vrot.slane %v7089_v17, 1  ;;  %v7097_v51 = vrot.slane %v7096_v52, 1  ;;  %v7104_v55 = vrot.slane %v7103_v56, 1  ;;  %v7373_v49 = vpack.c.bf16 %v7341_v19, %v7341_v19 }
 0x5ca   : > { %v7435_v31 = vunpack.c.l.b16 %v7371_v15  ;;  %v7342_v8 = vmax.f32 %v20278_v58, %v7084_v59  ;;  %v6437_v16 = vadd.f32 %v20116_v42, %v20275_v7  ;;  %v7436_v12 = vunpack.c.l.b16 %v7372_v20 }
 0x5cb   : > { %v7091_v39 = vmax.f32 %v7089_v17, %v7090_v47  ;;  %v7098_v57 = vmax.f32 %v7096_v52, %v7097_v51  ;;  %v7105_v38 = vmax.f32 %v7103_v56, %v7104_v55  ;;  %v7437_v28 = vunpack.c.l.b16 %v7373_v49 }
 0x5cc   : > { %v7465_v9 = vsel %vm5346_vm5, %v7435_v31, %v7434_v63  ;;  %v7374_v11 = vpack.c.bf16 %v7342_v8, %v7342_v8  ;;  %v6482_v5 = vmul.f32 %v20047_v0, %v6437_v16  ;;  %v15738_v21 = vadd.f32 %v20137_v36, %v20132_v43 }
 0x5cd   : > { %v7466_v22 = vsel %vm5348_vm6, %v7436_v12, %v7465_v9  ;;  %v7343_v33 = vmax.f32 %v20281_v26, %v7091_v39  ;;  %v20311_v60 = vmax.f32 %v20288_v46, %v7098_v57  ;;  %v20314_v58 = vmax.f32 %v20293_v53, %v7105_v38 }
 0x5ce   : > { %v7438_v42 = vunpack.c.l.b16 %v7374_v11  ;;  %v7467_v7 = vsel %vm5350_vm7, %v7437_v28, %v7466_v22  ;;  %v6505_v14 = vadd.f32 %v20052_v2, %v6482_v5  ;;  %v15741_v3 = vadd.f32 %v20161_v32, %v20152_v35 }
 0x5cf   : > { %v7375_v27 = vpack.c.bf16 %v7343_v33, %v7343_v33  ;;  %v6343_v46 = vadd.f32 %v15738_v21, %v19994_v48  ;;  %v15744_v53 = vadd.f32 %v20169_v54, %v20166_v10  ;;  %v23664_v61 = vpack.c.bf16 %v20240_v40, %v20240_v40 }
 0x5d0   : > { %v7468_v26 = vsel %vm5352_vm8, %v7438_v42, %v7467_v7  ;;  %v6521_v41 = vmax.f32 %v6505_v14, 0.0  ;;  %v7376_v43 = vpack.c.bf16 %v20311_v60, %v20311_v60  ;;  %v6348_v44 = vadd.f32 %v15741_v3, %v20002_v45 }
 0x5d1   : > { %v20329_v23 = vunpack.c.l.b16 %v23664_v61  ;;  %v7439_v36 = vunpack.c.l.b16 %v7375_v27  ;;  %v6440_v37 = vadd.f32 %v20123_v4, %v6343_v46  ;;  %v6351_v48 = vadd.f32 %v15744_v53, %v20004_v29 }
 0x5d2   : > { %v6681_v35 = vcombine.high %v6521_v41, %v6521_v41  ;;  %v6688_v32 = vrot.slane %v6521_v41, %v17487_v50  ;;  %v6445_v10 = vadd.f32 %v20110_v24, %v6348_v44  ;;  %v15747_v40 = vadd.f32 %v20189_v34, %v20183_v62 }
 0x5d3   : > { %v20338_v54 = vsel %vm5354_vm9, %v7439_v36, %v7468_v26  ;;  %v20345_v17 = vadd.f32 %v20197_v18, %v20195_v6  ;;  %v6483_v4 = vmul.f32 %v20047_v0, %v6440_v37  ;;  %v6448_v15 = vadd.f32 %v20118_v30, %v6351_v48 }
 0x5d4   : > { %v6695_v45 = vrot.slane %v6681_v35, %v17487_v50  ;;  %v6696_v52 = vcombine.high %v6688_v32, %v6688_v32  ;;  %v7106_v56 = vsel %vm6881_vm2, %v6688_v32, -inf  ;;  %v6484_v19 = vmul.f32 %v20047_v0, %v6445_v10 }
 0x5d5   : > { %v7107_v29 = vrot.slane %v7106_v56, 4  ;;  %v6356_v24 = vadd.f32 %v15747_v40, %v20006_v13  ;;  %v6506_v6 = vadd.f32 %v20052_v2, %v6483_v4  ;;  %v6485_v49 = vmul.f32 %v20047_v0, %v6448_v15 }
 0x5d6   : > { %v6697_v63 = vcombine.high %v6695_v45, %v6695_v45  ;;  %v7113_v62 = vsel %vm6881_vm2, %v6696_v52, -inf  ;;  %v7120_v34 = vsel %vm6881_vm2, %v6695_v45, -inf  ;;  %v6507_v47 = vadd.f32 %v20052_v2, %v6484_v19 }
 0x5d7   : > { %v7108_v18 = vmax.f32 %v7106_v56, %v7107_v29  ;;  %v7114_v59 = vrot.slane %v7113_v62, 4  ;;  %v7121_v20 = vrot.slane %v7120_v34, 4  ;;  %v6522_v55 = vmax.f32 %v6506_v6, 0.0 }
 0x5d8   : > { %v7127_v51 = vsel %vm6881_vm2, %v6697_v63, -inf  ;;  %v20360_v30 = vadd.f32 %v20143_v1, %v6356_v24  ;;  %v6523_v57 = vmax.f32 %v6507_v47, 0.0  ;;  %v6508_v38 = vadd.f32 %v20052_v2, %v6485_v49 }
 0x5d9   : > { %v7109_v13 = vrot.slane %v7108_v18, 2  ;;  %v7115_v31 = vmax.f32 %v7113_v62, %v7114_v59  ;;  %v7122_v8 = vmax.f32 %v7120_v34, %v7121_v20  ;;  %v7128_v16 = vrot.slane %v7127_v51, 4 }
 0x5da   : > { %v6698_v12 = vcombine.high %v6522_v55, %v6522_v55  ;;  %v6705_v39 = vrot.slane %v6522_v55, %v17487_v50  ;;  %v6715_v33 = vcombine.high %v6523_v57, %v6523_v57  ;;  %v6722_v4 = vrot.slane %v6523_v57, %v17487_v50 }
 0x5db   : > { %v7110_v28 = vmax.f32 %v7108_v18, %v7109_v13  ;;  %v7116_v9 = vrot.slane %v7115_v31, 2  ;;  %v7123_v11 = vrot.slane %v7122_v8, 2  ;;  %v7129_v5 = vmax.f32 %v7127_v51, %v7128_v16 }
 0x5dc   : > { %v6712_v22 = vrot.slane %v6698_v12, %v17487_v50  ;;  %v6713_v0 = vcombine.high %v6705_v39, %v6705_v39  ;;  %v7134_v1 = vsel %vm6881_vm2, %v6705_v39, -inf  ;;  %v6729_v15 = vrot.slane %v6715_v33, %v17487_v50 }
 0x5dd   : > { %v7111_v42 = vrot.slane %v7110_v28, 1  ;;  %v7117_v7 = vmax.f32 %v7115_v31, %v7116_v9  ;;  %v7124_v14 = vmax.f32 %v7122_v8, %v7123_v11  ;;  %v7130_v21 = vrot.slane %v7129_v5, 2 }
 0x5de   : > { %v6714_v27 = vcombine.high %v6712_v22, %v6712_v22  ;;  %v7135_v3 = vrot.slane %v7134_v1, 4  ;;  %v7141_v26 = vsel %vm6881_vm2, %v6713_v0, -inf  ;;  %v7148_v2 = vsel %vm6881_vm2, %v6712_v22, -inf }
 0x5df   : > { %v20368_v41 = vmax.f32 %v7110_v28, %v7111_v42  ;;  %v7118_v46 = vrot.slane %v7117_v7, 1  ;;  %v7125_v53 = vrot.slane %v7124_v14, 1  ;;  %v7131_v61 = vmax.f32 %v7129_v5, %v7130_v21 }
 0x5e0   : > { %v7136_v36 = vmax.f32 %v7134_v1, %v7135_v3  ;;  %v7142_v44 = vrot.slane %v7141_v26, 4  ;;  %v7149_v35 = vrot.slane %v7148_v2, 4  ;;  %v7155_v32 = vsel %vm6881_vm2, %v6714_v27, -inf }
 0x5e1   : > { %v20371_v37 = vmax.f32 %v7117_v7, %v7118_v46  ;;  %v20373_v48 = vmax.f32 %v7124_v14, %v7125_v53  ;;  %v7132_v10 = vrot.slane %v7131_v61, 1  ;;  %v7156_v40 = vrot.slane %v7155_v32, 4  ;;  %v20396_v46 = vld [vmem:[%s23448_s5] ss:$0 sm:$0xff] }
 0x5e2   : > { %v7137_v45 = vrot.slane %v7136_v36, 2  ;;  %v7143_v52 = vmax.f32 %v7141_v26, %v7142_v44  ;;  %v7150_v56 = vmax.f32 %v7148_v2, %v7149_v35  ;;  %v6524_v24 = vmax.f32 %v6508_v38, 0.0 }
 0x5e3   : > { %v20376_v29 = vmax.f32 %v7131_v61, %v7132_v10  ;;  %v7157_v19 = vmax.f32 %v7155_v32, %v7156_v40  ;;  %v6730_v6 = vcombine.high %v6722_v4, %v6722_v4  ;;  %v6731_v59 = vcombine.high %v6729_v15, %v6729_v15 }
 0x5e4   : > { %v7138_v63 = vmax.f32 %v7136_v36, %v7137_v45  ;;  %v7144_v62 = vrot.slane %v7143_v52, 2  ;;  %v7151_v34 = vrot.slane %v7150_v56, 2  ;;  %v7162_v20 = vsel %vm6881_vm2, %v6722_v4, -inf }
 0x5e5   : > { %v7158_v18 = vrot.slane %v7157_v19, 2  ;;  %v7176_v47 = vsel %vm6881_vm2, %v6729_v15, -inf  ;;  %v7163_v13 = vrot.slane %v7162_v20, 4  ;;  %v7169_v8 = vsel %vm6881_vm2, %v6730_v6, -inf }
 0x5e6   : > { %v7139_v51 = vrot.slane %v7138_v63, 1  ;;  %v7145_v55 = vmax.f32 %v7143_v52, %v7144_v62  ;;  %v7152_v49 = vmax.f32 %v7150_v56, %v7151_v34  ;;  %v7177_v16 = vrot.slane %v7176_v47, 4 }
 0x5e7   : > { %v7159_v31 = vmax.f32 %v7157_v19, %v7158_v18  ;;  %v7183_v12 = vsel %vm6881_vm2, %v6731_v59, -inf  ;;  %v7164_v28 = vmax.f32 %v7162_v20, %v7163_v13  ;;  %v7170_v11 = vrot.slane %v7169_v8, 4 }
 0x5e8   : > { %v20383_v39 = vmax.f32 %v7138_v63, %v7139_v51  ;;  %v7146_v57 = vrot.slane %v7145_v55, 1  ;;  %v7153_v38 = vrot.slane %v7152_v49, 1  ;;  %v7178_v5 = vmax.f32 %v7176_v47, %v7177_v16 }
 0x5e9   : > { %v7160_v9 = vrot.slane %v7159_v31, 1  ;;  %v7184_v22 = vrot.slane %v7183_v12, 4  ;;  %v7165_v33 = vrot.slane %v7164_v28, 2  ;;  %v6732_v42 = vcombine.high %v6524_v24, %v6524_v24 }
 0x5ea   : > { %v20385_v0 = vmax.f32 %v7145_v55, %v7146_v57  ;;  %v20387_v1 = vmax.f32 %v7152_v49, %v7153_v38  ;;  %v7171_v14 = vmax.f32 %v7169_v8, %v7170_v11  ;;  %v7179_v21 = vrot.slane %v7178_v5, 2 }
 0x5eb   : > { %v20389_v7 = vmax.f32 %v7159_v31, %v7160_v9  ;;  %v7185_v27 = vmax.f32 %v7183_v12, %v7184_v22  ;;  %v7166_v3 = vmax.f32 %v7164_v28, %v7165_v33  ;;  %v6739_v26 = vrot.slane %v6524_v24, %v17487_v50 }
 0x5ec   : > { %v6746_v2 = vrot.slane %v6732_v42, %v17487_v50  ;;  %v6486_v53 = vmul.f32 %v20396_v46, %v20360_v30  ;;  %v7172_v61 = vrot.slane %v7171_v14, 2  ;;  %v7180_v36 = vmax.f32 %v7178_v5, %v7179_v21 }
 0x5ed   : > { %v7186_v44 = vrot.slane %v7185_v27, 2  ;;  %v6359_v35 = vadd.f32 %v20345_v17, %v20008_v25  ;;  %v7167_v32 = vrot.slane %v7166_v3, 1  ;;  %v6747_v10 = vcombine.high %v6739_v26, %v6739_v26 }
 0x5ee   : > { %v6748_v40 = vcombine.high %v6746_v2, %v6746_v2  ;;  %v7190_v45 = vsel %vm6881_vm2, %v6739_v26, -inf  ;;  %v7173_v52 = vmax.f32 %v7171_v14, %v7172_v61  ;;  %v7181_v56 = vrot.slane %v7180_v36, 1  ;;  %v23665_v61 = vld [vmem:[#allocation80_spill] sm:$0xff] }
 0x5ef   : > { %v7187_v4 = vmax.f32 %v7185_v27, %v7186_v44  ;;  %v7191_v19 = vrot.slane %v7190_v45, 4  ;;  %v7168_v15 = vmax.f32 %v7166_v3, %v7167_v32  ;;  %v7197_v24 = vsel %vm6881_vm2, %v6747_v10, -inf  ;;  %v20413_v3 = vld [vmem:[%s23449_s6] ss:$0 sm:$0xff] }
 0x5f0   : > { %v7204_v30 = vsel %vm6881_vm2, %v6746_v2, -inf  ;;  %v7211_v63 = vsel %vm6881_vm2, %v6748_v40, -inf  ;;  %v7174_v62 = vrot.slane %v7173_v52, 1  ;;  %v7182_v34 = vmax.f32 %v7180_v36, %v7181_v56 }
 0x5f1   : > { %v7188_v6 = vrot.slane %v7187_v4, 1  ;;  %v7192_v25 = vmax.f32 %v7190_v45, %v7191_v19  ;;  %v7346_v17 = vmax.f32 %v20368_v41, %v7168_v15  ;;  %v7198_v18 = vrot.slane %v7197_v24, 4  ;;  %v23667_v19 = vld [vmem:[#allocation47_spill] sm:$0xff] }
 0x5f2   : > { %v7205_v59 = vrot.slane %v7204_v30, 4  ;;  %v7212_v20 = vrot.slane %v7211_v63, 4  ;;  %v7175_v47 = vmax.f32 %v7173_v52, %v7174_v62  ;;  %v7348_v55 = vmax.f32 %v20373_v48, %v7182_v34 }
 0x5f3   : > { %v7189_v51 = vmax.f32 %v7187_v4, %v7188_v6  ;;  %v7193_v49 = vrot.slane %v7192_v25, 2  ;;  %v7378_v13 = vpack.c.bf16 %v7346_v17, %v7346_v17  ;;  %v7199_v31 = vmax.f32 %v7197_v24, %v7198_v18  ;;  %v23666_v4 = vld [vmem:[#allocation56_spill] sm:$0xff] }
 0x5f4   : > { %v7206_v8 = vmax.f32 %v7204_v30, %v7205_v59  ;;  %v7213_v16 = vmax.f32 %v7211_v63, %v7212_v20  ;;  %v7347_v12 = vmax.f32 %v20371_v37, %v7175_v47  ;;  %v7380_v38 = vpack.c.bf16 %v7348_v55, %v7348_v55 }
 0x5f5   : > { %v7349_v57 = vmax.f32 %v20376_v29, %v7189_v51  ;;  %v7194_v28 = vmax.f32 %v7192_v25, %v7193_v49  ;;  %v7442_v9 = vunpack.c.l.b16 %v7378_v13  ;;  %v7200_v41 = vrot.slane %v7199_v31, 2 }
 0x5f6   : > { %v7207_v11 = vrot.slane %v7206_v8, 2  ;;  %v7214_v5 = vrot.slane %v7213_v16, 2  ;;  %v7379_v22 = vpack.c.bf16 %v7347_v12, %v7347_v12  ;;  %v7444_v42 = vunpack.c.l.b16 %v7380_v38 }
 0x5f7   : > { %v7381_v33 = vpack.c.bf16 %v7349_v57, %v7349_v57  ;;  %v7195_v14 = vrot.slane %v7194_v28, 1  ;;  %v7201_v48 = vmax.f32 %v7199_v31, %v7200_v41  ;;  %v6509_v37 = vadd.f32 %v20413_v3, %v6486_v53 }
 0x5f8   : > { %v7208_v21 = vmax.f32 %v7206_v8, %v7207_v11  ;;  %v7215_v27 = vmax.f32 %v7213_v16, %v7214_v5  ;;  %v7443_v29 = vunpack.c.l.b16 %v7379_v22  ;;  %v6456_v36 = vadd.f32 %v23665_v61, %v6359_v35  ;;  %v23668_v5 = vld [vmem:[#allocation63_spill] sm:$0xff] }
 0x5f9   : > { %v7445_v26 = vunpack.c.l.b16 %v7381_v33  ;;  %v7196_v2 = vmax.f32 %v7194_v28, %v7195_v14  ;;  %v7202_v44 = vrot.slane %v7201_v48, 1  ;;  %v6525_v40 = vmax.f32 %v6509_v37, 0.0  ;;  %v23669_v37 = vld [vmem:[#allocation64_spill] sm:$0xff] }
 0x5fa   : > { %v7209_v32 = vrot.slane %v7208_v21, 1  ;;  %v7216_v10 = vrot.slane %v7215_v27, 1  ;;  %v7472_v45 = vsel %vm5346_vm5, %v7443_v29, %v7442_v9  ;;  %v6487_v56 = vmul.f32 %v20396_v46, %v6456_v36 }
 0x5fb   : > { %v7350_v52 = vmax.f32 %v20383_v39, %v7196_v2  ;;  %v15753_v15 = vadd.f32 %v23667_v19, %v23666_v4  ;;  %v7473_v53 = vsel %vm5348_vm6, %v7444_v42, %v7472_v45  ;;  %v7203_v24 = vmax.f32 %v7201_v48, %v7202_v44  ;;  %v23671_v2 = vld [vmem:[#allocation45_spill] sm:$0xff] }
 0x5fc   : > { %v7210_v30 = vmax.f32 %v7208_v21, %v7209_v32  ;;  %v7217_v63 = vmax.f32 %v7215_v27, %v7216_v10  ;;  %v7474_v35 = vsel %vm5350_vm7, %v7445_v26, %v7473_v53  ;;  %v6749_v34 = vcombine.high %v6525_v40, %v6525_v40  ;;  %v23670_v26 = vld [vmem:[#allocation51_spill] sm:$0xff] }
 0x5fd   : > { %v7382_v62 = vpack.c.bf16 %v7350_v52, %v7350_v52  ;;  %v6756_v6 = vrot.slane %v6525_v40, %v17487_v50  ;;  %v7351_v25 = vmax.f32 %v20385_v0, %v7203_v24  ;;  %v6510_v18 = vadd.f32 %v20413_v3, %v6487_v56 }
 0x5fe   : > { %v7352_v39 = vmax.f32 %v20387_v1, %v7210_v30  ;;  %v7353_v17 = vmax.f32 %v20389_v7, %v7217_v63  ;;  %v6763_v20 = vrot.slane %v6749_v34, %v17487_v50  ;;  %v7377_v55 = vpack.c.bf16 %v20314_v58, %v20314_v58 }
 0x5ff   : > { %v7446_v59 = vunpack.c.l.b16 %v7382_v62  ;;  %v6764_v47 = vcombine.high %v6756_v6, %v6756_v6  ;;  %v7218_v51 = vsel %vm6881_vm2, %v6756_v6, -inf  ;;  %v20436_v49 = vunpack.c.l.b16 %v7376_v43 }
 0x600   : > { %v7383_v0 = vpack.c.bf16 %v7351_v25, %v7351_v25  ;;  %v7219_v1 = vrot.slane %v7218_v51, 4  ;;  %v6765_v13 = vcombine.high %v6763_v20, %v6763_v20  ;;  %v7232_v8 = vsel %vm6881_vm2, %v6763_v20, -inf }
 0x601   : > { %v7475_v7 = vsel %vm5352_vm8, %v7446_v59, %v7474_v35  ;;  %v7225_v31 = vsel %vm6881_vm2, %v6764_v47, -inf  ;;  %v7384_v16 = vpack.c.bf16 %v7352_v39, %v7352_v39  ;;  %v7385_v12 = vpack.c.bf16 %v7353_v17, %v7353_v17 }
 0x602   : > { %v7447_v57 = vunpack.c.l.b16 %v7383_v0  ;;  %v7220_v38 = vmax.f32 %v7218_v51, %v7219_v1  ;;  %v7226_v28 = vrot.slane %v7225_v31, 4  ;;  %v7233_v58 = vrot.slane %v7232_v8, 4 }
 0x603   : > { %v7239_v9 = vsel %vm6881_vm2, %v6765_v13, -inf  ;;  %v6526_v60 = vmax.f32 %v6510_v18, 0.0  ;;  %v6364_v22 = vadd.f32 %v15753_v15, %v23668_v5  ;;  %v15756_v61 = vadd.f32 %v23671_v2, %v23670_v26 }
 0x604   : > { %v20443_v43 = vsel %vm5354_vm9, %v7447_v57, %v7475_v7  ;;  %v7221_v41 = vrot.slane %v7220_v38, 2  ;;  %v7240_v11 = vrot.slane %v7239_v9, 4  ;;  %v7227_v33 = vmax.f32 %v7225_v31, %v7226_v28  ;;  %v23673_v57 = vld [vmem:[#allocation48_spill] sm:$0xff] }
 0x605   : > { %v7234_v42 = vmax.f32 %v7232_v8, %v7233_v58  ;;  %v6766_v14 = vcombine.high %v6526_v60, %v6526_v60  ;;  %v6773_v48 = vrot.slane %v6526_v60, %v17487_v50  ;;  %v6461_v29 = vadd.f32 %v23669_v37, %v6364_v22  ;;  %v23674_v22 = vld [vmem:[#allocation61_spill] sm:$0xff] }
 0x606   : > { %v7222_v21 = vmax.f32 %v7220_v38, %v7221_v41  ;;  %v7241_v27 = vmax.f32 %v7239_v9, %v7240_v11  ;;  %v7228_v36 = vrot.slane %v7227_v33, 2  ;;  %v20453_v24 = vunpack.c.l.b16 %v7377_v55 }
 0x607   : > { %v7235_v44 = vrot.slane %v7234_v42, 2  ;;  %v6780_v32 = vrot.slane %v6766_v14, %v17487_v50  ;;  %v6781_v10 = vcombine.high %v6773_v48, %v6773_v48  ;;  %v7246_v52 = vsel %vm6881_vm2, %v6773_v48, -inf }
 0x608   : > { %v7223_v40 = vrot.slane %v7222_v21, 1  ;;  %v7242_v45 = vrot.slane %v7241_v27, 2  ;;  %v6488_v56 = vmul.f32 %v20396_v46, %v6461_v29  ;;  %v7229_v4 = vmax.f32 %v7227_v33, %v7228_v36 }
 0x609   : > { %v7236_v19 = vmax.f32 %v7234_v42, %v7235_v44  ;;  %v6782_v15 = vcombine.high %v6780_v32, %v6780_v32  ;;  %v7247_v53 = vrot.slane %v7246_v52, 4  ;;  %v7253_v63 = vsel %vm6881_vm2, %v6781_v10, -inf }
 0x60a   : > { %v7243_v30 = vmax.f32 %v7241_v27, %v7242_v45  ;;  %v7260_v62 = vsel %vm6881_vm2, %v6780_v32, -inf  ;;  %v20457_v35 = vunpack.c.l.b16 %v7384_v16  ;;  %v20459_v34 = vunpack.c.l.b16 %v7385_v12  ;;  %v23672_v16 = vld [vmem:[#allocation60_spill] sm:$0xff] }
 0x60b   : > { %v7248_v6 = vmax.f32 %v7246_v52, %v7247_v53  ;;  %v7254_v25 = vrot.slane %v7253_v63, 4  ;;  %v20461_v39 = vmax.f32 %v7222_v21, %v7223_v40  ;;  %v7261_v17 = vrot.slane %v7260_v62, 4 }
 0x60c   : > { %v7267_v18 = vsel %vm6881_vm2, %v6782_v15, -inf  ;;  %v6511_v59 = vadd.f32 %v20413_v3, %v6488_v56  ;;  %v7230_v20 = vrot.slane %v7229_v4, 1  ;;  %v7237_v47 = vrot.slane %v7236_v19, 1 }
 0x60d   : > { %v7249_v51 = vrot.slane %v7248_v6, 2  ;;  %v7255_v55 = vmax.f32 %v7253_v63, %v7254_v25  ;;  %v7244_v0 = vrot.slane %v7243_v30, 1  ;;  %v7262_v1 = vmax.f32 %v7260_v62, %v7261_v17 }
 0x60e   : > { %v7268_v7 = vrot.slane %v7267_v18, 4  ;;  %v6527_v13 = vmax.f32 %v6511_v59, 0.0  ;;  %v6367_v12 = vadd.f32 %v15756_v61, %v23672_v16  ;;  %v7464_v38 = vsel %vm5358_vm11, %v20329_v23, %v23673_v57 }
 0x60f   : > { %v7250_v31 = vmax.f32 %v7248_v6, %v7249_v51  ;;  %v7256_v8 = vrot.slane %v7255_v55, 2  ;;  %v7263_v28 = vrot.slane %v7262_v1, 2  ;;  %v20470_v41 = vmax.f32 %v7229_v4, %v7230_v20 }
 0x610   : > { %v7269_v58 = vmax.f32 %v7267_v18, %v7268_v7  ;;  %v6783_v9 = vcombine.high %v6527_v13, %v6527_v13  ;;  %v6790_v60 = vrot.slane %v6527_v13, %v17487_v50  ;;  %v6464_v33 = vadd.f32 %v23674_v22, %v6367_v12 }
 0x611   : > { %v7251_v11 = vrot.slane %v7250_v31, 1  ;;  %v7257_v5 = vmax.f32 %v7255_v55, %v7256_v8  ;;  %v20473_v42 = vmax.f32 %v7262_v1, %v7263_v28  ;;  %v20476_v27 = vmax.f32 %v7236_v19, %v7237_v47 }
 0x612   : > { %v7270_v14 = vrot.slane %v7269_v58, 2  ;;  %v6797_v48 = vrot.slane %v6783_v9, %v17487_v50  ;;  %v6798_v21 = vcombine.high %v6790_v60, %v6790_v60  ;;  %v7274_v23 = vsel %vm6881_vm2, %v6790_v60, -inf }
 0x613   : > { %v6489_v37 = vmul.f32 %v20396_v46, %v6464_v33  ;;  %v20480_v29 = vpack.c.b16 %v7464_v38, %v7464_v38  ;;  %v20482_v26 = vmax.f32 %v7243_v30, %v7244_v0  ;;  %v7258_v2 = vrot.slane %v7257_v5, 1 }
 0x614   : > { %v6799_v61 = vcombine.high %v6797_v48, %v6797_v48  ;;  %v7275_v36 = vrot.slane %v7274_v23, 4  ;;  %v20484_v44 = vmax.f32 %v7269_v58, %v7270_v14  ;;  %v7281_v32 = vsel %vm6881_vm2, %v6798_v21, -inf }
 0x615   : > { %v7288_v10 = vsel %vm6881_vm2, %v6797_v48, -inf  ;;  %v6512_v40 = vadd.f32 %v20413_v3, %v6489_v37  ;;  %v20489_v45 = vmax.f32 %v7250_v31, %v7251_v11  ;;  %v7265_v52 = vrot.slane %v20473_v42, 1 }
 0x616   : > { %v7276_v46 = vmax.f32 %v7274_v23, %v7275_v36  ;;  %v7282_v56 = vrot.slane %v7281_v32, 4  ;;  %v7289_v4 = vrot.slane %v7288_v10, 4  ;;  %v7295_v19 = vsel %vm6881_vm2, %v6799_v61, -inf }
 0x617   : > { %v6528_v15 = vmax.f32 %v6512_v40, 0.0  ;;  %v7491_v53 = vshrl.u32 %v20480_v29, 16  ;;  %v20494_v30 = vmax.f32 %v7257_v5, %v7258_v2  ;;  %v7296_v6 = vrot.slane %v7295_v19, 4 }
 0x618   : > { %v7277_v63 = vrot.slane %v7276_v46, 2  ;;  %v7283_v62 = vmax.f32 %v7281_v32, %v7282_v56  ;;  %v7272_v25 = vrot.slane %v20484_v44, 1  ;;  %v7290_v3 = vmax.f32 %v7288_v10, %v7289_v4 }
 0x619   : > { %v6800_v17 = vcombine.high %v6528_v15, %v6528_v15  ;;  %v6807_v18 = vrot.slane %v6528_v15, %v17487_v50  ;;  %v7297_v47 = vmax.f32 %v7295_v19, %v7296_v6  ;;  %v7493_v51 = vrot.slane %v7491_v53, 7 }
 0x61a   : > { %v7278_v59 = vmax.f32 %v7276_v46, %v7277_v63  ;;  %v7284_v20 = vrot.slane %v7283_v62, 2  ;;  %v7291_v55 = vrot.slane %v7290_v3, 2 }
 0x61b   : > { %v6814_v0 = vrot.slane %v6800_v17, %v17487_v50  ;;  %v6815_v1 = vcombine.high %v6807_v18, %v6807_v18  ;;  %v7302_v7 = vsel %vm6881_vm2, %v6807_v18, -inf  ;;  %v7298_v8 = vrot.slane %v7297_v47, 2 }
 0x61c   : > { %v7279_v13 = vrot.slane %v7278_v59, 1  ;;  %v7285_v31 = vmax.f32 %v7283_v62, %v7284_v20  ;;  %v7303_v16 = vrot.slane %v7302_v7, 4  ;;  %v7292_v12 = vmax.f32 %v7290_v3, %v7291_v55 }
 0x61d   : > { %v6816_v57 = vcombine.high %v6814_v0, %v6814_v0  ;;  %v7309_v38 = vsel %vm6881_vm2, %v6815_v1, -inf  ;;  %v7316_v28 = vsel %vm6881_vm2, %v6814_v0, -inf  ;;  %v7299_v60 = vmax.f32 %v7297_v47, %v7298_v8  ;;  %v16413_v8 = vld [vmem:[%s23453_s10 + $0x268] ss:$16 sps:$4 sm:$0xff]  }
 0x61e   : > { %v7280_v58 = vmax.f32 %v7278_v59, %v7279_v13  ;;  %v7286_v9 = vrot.slane %v7285_v31, 1  ;;  %v7304_v11 = vmax.f32 %v7302_v7, %v7303_v16  ;;  %v7293_v5 = vrot.slane %v7292_v12, 1 }
 0x61f   : > { %v7310_v22 = vrot.slane %v7309_v38, 4  ;;  %v7317_v33 = vrot.slane %v7316_v28, 4  ;;  %v7323_v14 = vsel %vm6881_vm2, %v6816_v57, -inf  ;;  %v7300_v21 = vrot.slane %v7299_v60, 1 }
 0x620   : > { %v7287_v48 = vmax.f32 %v7285_v31, %v7286_v9  ;;  %v7354_v23 = vmax.f32 %v20461_v39, %v7280_v58  ;;  %v7305_v37 = vrot.slane %v7304_v11, 2  ;;  %v7294_v2 = vmax.f32 %v7292_v12, %v7293_v5 }
 0x621   : > { %v7311_v61 = vmax.f32 %v7309_v38, %v7310_v22  ;;  %v7318_v36 = vmax.f32 %v7316_v28, %v7317_v33  ;;  %v7324_v32 = vrot.slane %v7323_v14, 4  ;;  %v7301_v10 = vmax.f32 %v7299_v60, %v7300_v21  ;;  %v23678_v38 = vld [vmem:[#allocation59_spill] sm:$0xff] }
 0x622   : > { %v7355_v40 = vmax.f32 %v20470_v41, %v7287_v48  ;;  %v7386_v46 = vpack.c.bf16 %v7354_v23, %v7354_v23  ;;  %v7306_v56 = vmax.f32 %v7304_v11, %v7305_v37  ;;  %v7356_v4 = vmax.f32 %v20476_v27, %v7294_v2  ;;  %v16148_v41 = vld [vmem:[%s23450_s7 + $0x164] ss:$8 sps:$4 sm:$0xff]  }
 0x623   : > { %v7312_v19 = vrot.slane %v7311_v61, 2  ;;  %v7319_v15 = vrot.slane %v7318_v36, 2  ;;  %v7325_v53 = vmax.f32 %v7323_v14, %v7324_v32  ;;  %v7357_v63 = vmax.f32 %v20482_v26, %v7301_v10 }
 0x624   : > { %v7387_v62 = vpack.c.bf16 %v7355_v40, %v7355_v40  ;;  %v7307_v6 = vrot.slane %v7306_v56, 1  ;;  %v7494_v39 = vshll.u32 %v20480_v29, 16  ;;  %v7450_v3 = vunpack.c.l.b16 %v7386_v46 }
 0x625   : > { %v7313_v17 = vmax.f32 %v7311_v61, %v7312_v19  ;;  %v7320_v18 = vmax.f32 %v7318_v36, %v7319_v15  ;;  %v7326_v59 = vrot.slane %v7325_v53, 2  ;;  %v7388_v27 = vpack.c.bf16 %v7356_v4, %v7356_v4 }
 0x626   : > { %v7451_v20 = vunpack.c.l.b16 %v7387_v62  ;;  %v7308_v47 = vmax.f32 %v7306_v56, %v7307_v6  ;;  %v7496_v55 = vor.u32 %v7494_v39, %v7493_v51  ;;  %v7266_v26 = vmax.f32 %v20473_v42, %v7265_v52 }
 0x627   : > { %v7314_v0 = vrot.slane %v7313_v17, 1  ;;  %v7321_v29 = vrot.slane %v7320_v18, 1  ;;  %v7327_v1 = vmax.f32 %v7325_v53, %v7326_v59  ;;  %v7389_v7 = vpack.c.bf16 %v7357_v63, %v7357_v63  ;;  %v16155_v63 = vld [vmem:[%s23450_s7 + $0x190] ss:$8 sps:$4 sm:$0xff]  }
 0x628   : > { %v20518_v13 = vsel %vm5346_vm5, %v7451_v20, %v7450_v3  ;;  %v20521_v31 = vmax.f32 %v20489_v45, %v7308_v47  ;;  %v7522_v16 = vsel %vm19306_vm14, 0, %v7496_v55  ;;  %v20528_v42 = vsel %vm20510_vm4, %v23678_v38, 0 }
 0x629   : > { %v7315_v12 = vmax.f32 %v7313_v17, %v7314_v0  ;;  %v7322_v57 = vmax.f32 %v7320_v18, %v7321_v29  ;;  %v7328_v51 = vrot.slane %v7327_v1, 1  ;;  %v7273_v52 = vmax.f32 %v20484_v44, %v7272_v25 }
 0x62a   : > { %v20533_v28 = vunpack.c.l.b16 %v7388_v27  ;;  %v20537_v45 = vsel %vm20510_vm4, %v7522_v16, 0  ;;  %v14760_v58 = vcombine.low %v20528_v42, %v20528_v42  ;;  %v14761_v11 = vcombine.high %v20528_v42, %v20528_v42 }
 0x62b   : > { %v7359_v9 = vmax.f32 %v20494_v30, %v7315_v12  ;;  %v20542_v60 = vmax.f32 %v7266_v26, %v7322_v57  ;;  %v14762_v5 = vcombine.low %v20537_v45, %v20537_v45  ;;  %v7453_v44 = vunpack.c.l.b16 %v7389_v7  ;;  %v16133_v57 = vld [vmem:[%s23450_s7 + $0x114] ss:$8 sps:$4 sm:$0xff]  }
 0x62c   : > { %v7329_v25 = vmax.f32 %v7327_v1, %v7328_v51  ;;  %v7390_v22 = vpack.c.bf16 %v20521_v31, %v20521_v31  ;;  %v14763_v33 = vcombine.high %v20537_v45, %v20537_v45  ;;  %v7558_v14 = vshrl.u32 %v14760_v58, 16  ;;  %v16128_v1 = vld [vmem:[%s23450_s7 + $0x100] ss:$8 sps:$4 sm:$0xff]  }
 0x62d   : > { %v7561_v48 = vshll.u32 %v14760_v58, 16  ;;  %v7567_v30 = vshll.u32 %v14761_v11, 16  ;;  %v7391_v21 = vpack.c.bf16 %v7359_v9, %v7359_v9  ;;  %v7572_v23 = vshrl.u32 %v14762_v5, 16 }
 0x62e   : > { %v7575_v37 = vshll.u32 %v14762_v5, 16  ;;  %v7560_v2 = vrot.slane %v7558_v14, 4  ;;  %v7581_v36 = vshll.u32 %v14763_v33, 16  ;;  %v7618_v32 = vrot.slane %v14761_v11, 5 }
 0x62f   : > { %v7563_v61 = vrot.slane %v7561_v48, 5  ;;  %v7569_v10 = vrot.slane %v7567_v30, 5  ;;  %v7574_v40 = vrot.slane %v7572_v23, 4  ;;  %v7622_v56 = vrot.slane %v14763_v33, 5 }
 0x630   : > { %v7577_v46 = vrot.slane %v7575_v37, 5  ;;  %v14775_v19 = vcombine.low %v20528_v42, %v20537_v45  ;;  %v7470_v15 = vsel %vm5356_vm10, %v20436_v49, %v20338_v54  ;;  %v7477_v53 = vsel %vm5356_vm10, %v20457_v35, %v20443_v43  ;;  %v16151_v35 = vld [vmem:[%s23450_s7 + $0x174] ss:$8 sps:$4 sm:$0xff]  }
 0x631   : > { %v7564_v4 = vor.u32 %v7563_v61, %v7560_v2  ;;  %v7471_v6 = vsel %vm5358_vm11, %v20453_v24, %v7470_v15  ;;  %v7478_v39 = vsel %vm5358_vm11, %v20459_v34, %v7477_v53  ;;  %v7583_v43 = vrot.slane %v7581_v36, 5  ;;  %v16139_v53 = vld [vmem:[%s23450_s7 + $0x134] ss:$8 sps:$4 sm:$0xff]  }
 0x632   : > { %v7578_v62 = vor.u32 %v7577_v46, %v7574_v40  ;;  %v7487_v54 = vpack.c.b16 %v7471_v6, %v7471_v6  ;;  %v7488_v49 = vpack.c.b16 %v7478_v39, %v7478_v39  ;;  %v14768_v18 = vrot.slane %v14760_v58, 9 }
 0x633   : > { %v7565_v3 = vrot.slane %v7564_v4, 4  ;;  %v14769_v59 = vrot.slane %v14762_v5, 9  ;;  %v7454_v12 = vunpack.c.l.b16 %v7390_v22  ;;  %v7361_v51 = vmax.f32 %v7273_v52, %v7329_v25  ;;  %v16131_v52 = vld [vmem:[%s23450_s7 + $0x110] ss:$8 sps:$4 sm:$0xff]  }
 0x634   : > { %v7579_v17 = vrot.slane %v7578_v62, 4  ;;  %v7498_v27 = vshrl.u32 %v7487_v54, 16  ;;  %v7501_v34 = vshll.u32 %v7487_v54, 16  ;;  %v7505_v20 = vshrl.u32 %v7488_v49, 16 }
 0x635   : > { %v20577_v24 = vsel %vm20562_vm15, %v7565_v3, %v7569_v10  ;;  %v7508_v55 = vshll.u32 %v7488_v49, 16  ;;  %v20585_v26 = vsel %vm20571_vm12, %v14768_v18, %v7618_v32  ;;  %v20589_v0 = vsel %vm20571_vm12, %v14769_v59, %v7622_v56  ;;  %v16134_v56 = vld [vmem:[%s23450_s7 + $0x120] ss:$8 sps:$4 sm:$0xff]   ;;  %v16137_v59 = vld [vmem:[%s23450_s7 + $0x130] ss:$8 sps:$4 sm:$0xff]  }
 0x636   : > { %v20581_v47 = vsel %vm20562_vm15, %v7579_v17, %v7583_v43  ;;  %v7500_v7 = vrot.slane %v7498_v27, 7  ;;  %v7507_v31 = vrot.slane %v7505_v20, 7  ;;  %v14779_v16 = vcombine.low %v20585_v26, %v20589_v0 }
 0x637   : > { %v14777_v29 = vcombine.low %v20577_v24, %v20581_v47  ;;  %v7392_v58 = vpack.c.bf16 %v20542_v60, %v20542_v60  ;;  %v7480_v9 = vsel %vm5348_vm6, %v20533_v28, %v20518_v13  ;;  %v7455_v11 = vunpack.c.l.b16 %v7391_v21 }
 0x638   : > { %v7503_v5 = vor.u32 %v7501_v34, %v7500_v7  ;;  %v7510_v33 = vor.u32 %v7508_v55, %v7507_v31  ;;  %v7481_v14 = vsel %vm5350_vm7, %v7453_v44, %v7480_v9  ;;  %v7393_v22 = vpack.c.bf16 %v7361_v51, %v7361_v51  ;;  %v16136_v44 = vld [vmem:[%s23450_s7 + $0x124] ss:$8 sps:$4 sm:$0xff]  }
 0x639   : > { %8591 = vmatprep.mubr.bf16.mxu1 %v14777_v29  ;;  %v7456_v48 = vunpack.c.l.b16 %v7392_v58  ;;  %v7482_v30 = vsel %vm5352_vm8, %v7454_v12, %v7481_v14  ;;  %v16142_v29 = vld [vmem:[%s23450_s7 + $0x144] ss:$8 sps:$4 sm:$0xff]  }
 0x63a   : > { %8592 = vmatmul.mubr.bf16.vlgmr.msra.gmra.mrb[48].mxu1 %v14775_v19  ;;  %v7523_v60 = vsel %vm19306_vm14, 0, %v7503_v5  ;;  %v7524_v13 = vsel %vm19306_vm14, 0, %v7510_v33  ;;  %v7483_v28 = vsel %vm5354_vm9, %v7455_v11, %v7482_v30  ;;  %v7457_v23 = vunpack.c.l.b16 %v7393_v22  ;;  %v16140_v22 = vld [vmem:[%s23450_s7 + $0x140] ss:$8 sps:$4 sm:$0xff]   ;;  %v16145_v30 = vld [vmem:[%s23450_s7 + $0x154] ss:$8 sps:$4 sm:$0xff]  }
 0x63b   : > { %8613 = vmatpush1.bf16.msra.mxu1 %v16128_v1  ;;  %v20621_v25 = vsel %vm20510_vm4, %v7523_v60, 0  ;;  %v20625_v21 = vsel %vm20510_vm4, %v7524_v13, 0  ;;  %v7484_v37 = vsel %vm5356_vm10, %v7456_v48, %v7483_v28  ;;  %vm9452_vm9 = vsmask.f32 2304 }
 0x63c   : > { %8614 = vmatprep.subr.bf16.mxu1 %v16133_v57  ;;  %v14764_v2 = vcombine.low %v20621_v25, %v20621_v25  ;;  %v14765_v61 = vcombine.high %v20621_v25, %v20621_v25  ;;  %v14766_v36 = vcombine.low %v20625_v21, %v20625_v21  ;;  %v14767_v32 = vcombine.high %v20625_v21, %v20625_v21 }
 0x63d   : > { %v20638_v10 = vcombine.low %v20621_v25, %v20625_v21  ;;  %v14781_v40 = vcombine.low %v20537_v45, %v20621_v25  ;;  %v7485_v46 = vsel %vm5358_vm11, %v7457_v23, %v7484_v37  ;;  %vm21256_vm11 = vmand %vm7613_vm0, %vm9452_vm9 }
 0x63e   : > { %v7586_v4 = vshrl.u32 %v14764_v2, 16  ;;  %v7589_v19 = vshll.u32 %v14764_v2, 16  ;;  %v7600_v15 = vshrl.u32 %v14766_v36, 16  ;;  %v7595_v62 = vshll.u32 %v14765_v61, 16 }
 0x63f   : > { %8615 = vmatpush1.bf16.msra.mxu1 %v16131_v52  ;;  %v7603_v6 = vshll.u32 %v14766_v36, 16  ;;  %v7609_v39 = vshll.u32 %v14767_v32, 16  ;;  %v7489_v3 = vpack.c.b16 %v7485_v46, %v7485_v46  ;;  %v14770_v17 = vrot.slane %v14764_v2, 9 }
 0x640   : > { %8616 = vmatprep.subr.bf16.mxu1 %v16136_v44  ;;  %v7588_v45 = vrot.slane %v7586_v4, 4  ;;  %v7591_v54 = vrot.slane %v7589_v19, 5  ;;  %v7602_v49 = vrot.slane %v7600_v15, 4  ;;  %v7626_v34 = vrot.slane %v14765_v61, 5  ;;  %v16143_v61 = vld [vmem:[%s23450_s7 + $0x150] ss:$8 sps:$4 sm:$0xff]  }
 0x641   : > { %v7605_v43 = vrot.slane %v7603_v6, 5  ;;  %v7512_v18 = vshrl.u32 %v7489_v3, 16  ;;  %v14771_v20 = vrot.slane %v14766_v36, 9  ;;  %v7630_v55 = vrot.slane %v14767_v32, 5 }
 0x642   : > { %v7592_v27 = vor.u32 %v7591_v54, %v7588_v45  ;;  %v7597_v1 = vrot.slane %v7595_v62, 5  ;;  %v7515_v12 = vshll.u32 %v7489_v3, 16  ;;  %v7611_v51 = vrot.slane %v7609_v39, 5  ;;  %v16146_v62 = vld [vmem:[%s23450_s7 + $0x160] ss:$8 sps:$4 sm:$0xff]  }
 0x643   : > { %8617 = vmatpush1.bf16.msra.mxu1 %v16134_v56  ;;  %v7606_v7 = vor.u32 %v7605_v43, %v7602_v49  ;;  %v7514_v31 = vrot.slane %v7512_v18, 7  ;;  %v20657_v58 = vsel %vm20571_vm12, %v14770_v17, %v7626_v34  ;;  %v20661_v9 = vsel %vm20571_vm12, %v14771_v20, %v7630_v55  ;;  %v16149_v54 = vld [vmem:[%s23450_s7 + $0x170] ss:$8 sps:$4 sm:$0xff]   ;;  %v16154_v49 = vld [vmem:[%s23450_s7 + $0x184] ss:$8 sps:$4 sm:$0xff]  }
 0x644   : > { %8618 = vmatprep.subr.bf16.mxu1 %v16139_v53  ;;  %v7593_v57 = vrot.slane %v7592_v27, 4  ;;  %v20665_v33 = vcombine.low %v20657_v58, %v20661_v9  ;;  %v14785_v14 = vcombine.low %v20589_v0, %v20657_v58  ;;  %v16157_v27 = vld [vmem:[%s23450_s7 + $0x194] ss:$8 sps:$4 sm:$0xff]   ;;  %v16160_v34 = vld [vmem:[%s23450_s7 + $0x1a4] ss:$8 sps:$4 sm:$0xff]  }
 0x645   : > { %v7607_v11 = vrot.slane %v7606_v7, 4  ;;  %v7517_v5 = vor.u32 %v7515_v12, %v7514_v31  ;;  %v16158_v20 = vld [vmem:[%s23450_s7 + $0x1a0] ss:$8 sps:$4 sm:$0xff]   ;;  %v16163_v55 = vld [vmem:[%s23450_s7 + $0x1b4] ss:$8 sps:$4 sm:$0xff]  }
 0x646   : > { %v20674_v48 = vsel %vm20562_vm15, %v7593_v57, %v7597_v1  ;;  %v16166_v1 = vld [vmem:[%s23450_s7 + $0x1c4] ss:$8 sps:$4 sm:$0xff]   ;;  %v16164_v7 = vld [vmem:[%s23450_s7 + $0x1c0] ss:$8 sps:$4 sm:$0xff]   ;;  %v16169_v31 = vld [vmem:[%s23450_s7 + $0x1d4] ss:$8 sps:$4 sm:$0xff]  }
 0x647   : > { %8619 = vmatpush1.bf16.msra.mxu1 %v16137_v59  ;;  %v20681_v52 = vsel %vm20562_vm15, %v7607_v11, %v7611_v51  ;;  %v14783_v60 = vcombine.low %v20581_v47, %v20674_v48  ;;  %v7525_v13 = vsel %vm19306_vm14, 0, %v7517_v5  ;;  %v16152_v59 = vld [vmem:[%s23450_s7 + $0x180] ss:$8 sps:$4 sm:$0xff]   ;;  %v16167_v12 = vld [vmem:[%s23450_s7 + $0x1d0] ss:$8 sps:$4 sm:$0xff]  }
 0x648   : > { %8620 = vmatprep.subr.bf16.mxu1 %v16142_v29  ;;  %v20689_v28 = vcombine.low %v20674_v48, %v20681_v52  ;;  %v20693_v44 = vsel %vm20510_vm4, %v7525_v13, 0  ;;  %v16161_v29 = vld [vmem:[%s23450_s7 + $0x1b0] ss:$8 sps:$4 sm:$0xff]   ;;  %v16172_v57 = vld [vmem:[%s23450_s7 + $0x1e4] ss:$8 sps:$4 sm:$0xff]  }
 0x649   : > { %v14772_v25 = vcombine.low %v20693_v44, %v20693_v44  ;;  %v14782_v23 = vcombine.low %v20625_v21, %v20693_v44  ;;  %v14773_v37 = vcombine.high %v20693_v44, %v20693_v44  ;;  %v14787_v2 = vcombine.low %v20693_v44, %v20528_v42  ;;  %v16170_v51 = vld [vmem:[%s23450_s7 + $0x1e0] ss:$8 sps:$4 sm:$0xff]   ;;  %v16175_v11 = vld [vmem:[%s23450_s7 + $0x1f4] ss:$8 sps:$4 sm:$0xff]   ;;  %v16173_v5 = vld [vmem:[%s23450_s7 + $0x1f0] ss:$8 sps:$4 sm:$0xff]  }
 0x64a   : > { %8601 = vmatprep.mubr.bf16.mxu1 %v20689_v28  ;;  %v16181_v13 = vld [vmem:[%s23450_s7 + $0x214] ss:$8 sps:$4 sm:$0xff]   ;;  %v16185_v21 = vld [vmem:[%s23450_s7 + $0x230] ss:$8 sps:$4 sm:$0xff]   ;;  %v16230_v47 = vld [vmem:[%s23450_s7 + $0x320] ss:$8 sps:$4 sm:$0xff]  }
 0x64b   : > { %8621 = vmatpush1.bf16.msra.mxu1 %v16140_v22  ;;  %v14774_v36 = vrot.slane %v14772_v25, 9  ;;  %v7653_v32 = vrot.slane %v14773_v37, 5  ;;  %v7638_v46 = vshrl.u32 %v14772_v25, 16  ;;  %v7641_v56 = vshll.u32 %v14772_v25, 16  ;;  %v16178_v22 = vld [vmem:[%s23450_s7 + $0x204] ss:$8 sps:$4 sm:$0xff]  }
 0x64c   : > { %8622 = vmatprep.subr.bf16.mxu1 %v16145_v30  ;;  %8602 = vmatmul.mubr.bf16.gmra.mrb[52].mxu1 %v20638_v10  ;;  %v7647_v53 = vshll.u32 %v14773_v37, 16  ;;  %v16176_v30 = vld [vmem:[%s23450_s7 + $0x200] ss:$8 sps:$4 sm:$0xff]   ;;  %v16179_v25 = vld [vmem:[%s23450_s7 + $0x210] ss:$8 sps:$4 sm:$0xff]  }
 0x64d   : > { %8644 = vmatprep.mubr.bf16.mxu1 %v14781_v40  ;;  %v20713_v4 = vsel %vm20571_vm12, %v14774_v36, %v7653_v32  ;;  %v7640_v19 = vrot.slane %v7638_v46, 4  ;;  %v7643_v15 = vrot.slane %v7641_v56, 5  ;;  %v16184_v37 = vld [vmem:[%s23450_s7 + $0x224] ss:$8 sps:$4 sm:$0xff]   ;;  %v16193_v0 = vld [vmem:[%s23450_s7 + $0x254] ss:$8 sps:$4 sm:$0xff]  }
 0x64e   : > { %v14786_v6 = vcombine.low %v20661_v9, %v20713_v4  ;;  %v14789_v39 = vcombine.low %v20713_v4, %v20585_v26  ;;  %v7649_v45 = vrot.slane %v7647_v53, 5  ;;  %v16191_v58 = vld [vmem:[%s23450_s7 + $0x250] ss:$8 sps:$4 sm:$0xff]   ;;  %v16194_v36 = vld [vmem:[%s23450_s7 + $0x260] ss:$8 sps:$4 sm:$0xff]  }
 0x64f   : > { %8623 = vmatpush1.bf16.msra.mxu1 %v16143_v61  ;;  %v7644_v40 = vor.u32 %v7643_v15, %v7640_v19  ;;  %v16182_v61 = vld [vmem:[%s23450_s7 + $0x220] ss:$8 sps:$4 sm:$0xff]   ;;  %v16199_v32 = vld [vmem:[%s23450_s7 + $0x274] ss:$8 sps:$4 sm:$0xff]   ;;  %v16197_v46 = vld [vmem:[%s23450_s7 + $0x270] ss:$8 sps:$4 sm:$0xff]  }
 0x650   : > { %8624 = vmatprep.subr.bf16.mxu1 %v16148_v41  ;;  %v16188_v41 = vld [vmem:[%s23450_s7 + $0x240] ss:$8 sps:$4 sm:$0xff]   ;;  %v16202_v56 = vld [vmem:[%s23450_s7 + $0x284] ss:$8 sps:$4 sm:$0xff]   ;;  %v16205_v15 = vld [vmem:[%s23450_s7 + $0x294] ss:$8 sps:$4 sm:$0xff]  }
 0x651   : > { %v7645_v3 = vrot.slane %v7644_v40, 4  ;;  %v16200_v19 = vld [vmem:[%s23450_s7 + $0x280] ss:$8 sps:$4 sm:$0xff]   ;;  %v16203_v53 = vld [vmem:[%s23450_s7 + $0x290] ss:$8 sps:$4 sm:$0xff]  }
 0x652   : > { %v16211_v40 = vld [vmem:[%s23450_s7 + $0x2b4] ss:$8 sps:$4 sm:$0xff]   ;;  %v16233_v48 = vld [vmem:[%s23450_s7 + $0x330] ss:$8 sps:$4 sm:$0xff]   ;;  %vm9480_vm12 = vsmask.f32 1280 }
 0x653   : > { %8625 = vmatpush1.bf16.msra.mxu1 %v16146_v62  ;;  %v20733_v17 = vsel %vm20562_vm15, %v7645_v3, %v7649_v45  ;;  %v16208_v62 = vld [vmem:[%s23450_s7 + $0x2a4] ss:$8 sps:$4 sm:$0xff]   ;;  %v16296_v3 = vld [vmem:[%s23453_s10] ss:$16 sps:$4 sm:$0xff]   ;;  %v16235_v9 = vld [vmem:[%s23450_s7 + $0x334] ss:$8 sps:$4 sm:$0xff]  }
 0x654   : > { %8626 = vmatprep.subr.bf16.mxu1 %v16151_v35  ;;  %v14784_v43 = vcombine.low %v20681_v52, %v20733_v17  ;;  %v14788_v18 = vcombine.low %v20733_v17, %v20577_v24  ;;  %v16206_v35 = vld [vmem:[%s23450_s7 + $0x2a0] ss:$8 sps:$4 sm:$0xff]   ;;  %v16298_v45 = vld [vmem:[%s23453_s10 + $0x4] ss:$16 sps:$4 sm:$0xff]   ;;  %v23683_v17 = vmov 0   ;;  %vm23687_vm15 = vcmask 1040384  }
 0x655   : > { %13113 = vmatprep.subr.bf16.mxu0 %v16298_v45  ;;  %v16241_v52 = vld [vmem:[%s23450_s7 + $0x354] ss:$8 sps:$4 sm:$0xff]   ;;  %v16287_v44 = vld [vmem:[%s23450_s7 + $0x450] ss:$8 sps:$4 sm:$0xff]   ;;  %vm9481_vm4 = vsmask.f32 3336  ;;  %vm9516_vm0 = vmor %vm23687_vm15, %vm5348_vm6 }
 0x656   : > { %13114 = vmatpush1.bf16.msra.mxu0 %v16296_v3  ;;  %v16283_v24 = vld [vmem:[%s23450_s7 + $0x434] ss:$8 sps:$4 sm:$0xff]   ;;  %v16290_v3 = vld [vmem:[%s23450_s7 + $0x460] ss:$8 sps:$4 sm:$0xff]   ;;  %vm9482_vm13 = vmor %vm9480_vm12, %vm9481_vm4 }
 0x657   : > { %8627 = vmatpush1.bf16.msra.mxu1 %v16149_v54  ;;  %v16209_v54 = vld [vmem:[%s23450_s7 + $0x2b0] ss:$8 sps:$4 sm:$0xff]   ;;  %v16289_v42 = vld [vmem:[%s23450_s7 + $0x454] ss:$8 sps:$4 sm:$0xff]   ;;  %vm9484_vm3 = vmor %vm9482_vm13, %vm9483_vm1 }
 0x658   : > { %8628 = vmatprep.subr.bf16.mxu1 %v16154_v49  ;;  %v16214_v49 = vld [vmem:[%s23450_s7 + $0x2c4] ss:$8 sps:$4 sm:$0xff]   ;;  %v16295_v45 = vld [vmem:[%s23450_s7 + $0x474] ss:$8 sps:$4 sm:$0xff]   ;;  %vm9518_vm9 = vmor %vm9516_vm0, %vm5352_vm8 }
 0x659   : > { %v16310_v26 = vld [vmem:[%s23453_s10 + $0x44] ss:$16 sps:$4 sm:$0xff]   ;;  %v16313_v4 = vld [vmem:[%s23453_s10 + $0x4c] ss:$16 sps:$4 sm:$0xff]  }
 0x65b   : > { %8629 = vmatpush1.bf16.msra.mxu1 %v16152_v59  ;;  %v16212_v59 = vld [vmem:[%s23450_s7 + $0x2c0] ss:$8 sps:$4 sm:$0xff]  }
 0x65c   : > { %8630 = vmatprep.subr.bf16.mxu1 %v16157_v27  ;;  %v16217_v27 = vld [vmem:[%s23450_s7 + $0x2d4] ss:$8 sps:$4 sm:$0xff]  }
 0x65f   : > { %8631 = vmatpush1.bf16.msra.mxu1 %v16155_v63  ;;  %v16215_v63 = vld [vmem:[%s23450_s7 + $0x2d0] ss:$8 sps:$4 sm:$0xff]  }
 0x660   : > { %8632 = vmatprep.subr.bf16.mxu1 %v16160_v34  ;;  %v16220_v34 = vld [vmem:[%s23450_s7 + $0x2e4] ss:$8 sps:$4 sm:$0xff]  }
 0x663   : > { %8633 = vmatpush1.bf16.msra.mxu1 %v16158_v20  ;;  %v16218_v20 = vld [vmem:[%s23450_s7 + $0x2e0] ss:$8 sps:$4 sm:$0xff]  }
 0x664   : > { %8634 = vmatprep.subr.bf16.mxu1 %v16163_v55  ;;  %v16223_v55 = vld [vmem:[%s23450_s7 + $0x2f4] ss:$8 sps:$4 sm:$0xff]  }
 0x667   : > { %8635 = vmatpush1.bf16.msra.mxu1 %v16161_v29  ;;  %v16221_v29 = vld [vmem:[%s23450_s7 + $0x2f0] ss:$8 sps:$4 sm:$0xff]  }
 0x668   : > { %8636 = vmatprep.subr.bf16.mxu1 %v16166_v1  ;;  %v16226_v1 = vld [vmem:[%s23450_s7 + $0x304] ss:$8 sps:$4 sm:$0xff]  }
 0x66b   : > { %8637 = vmatpush1.bf16.msra.mxu1 %v16164_v7  ;;  %v16224_v7 = vld [vmem:[%s23450_s7 + $0x300] ss:$8 sps:$4 sm:$0xff]  }
 0x66c   : > { %8638 = vmatprep.subr.bf16.mxu1 %v16169_v31  ;;  %v16229_v31 = vld [vmem:[%s23450_s7 + $0x314] ss:$8 sps:$4 sm:$0xff]  }
 0x66f   : > { %8639 = vmatpush1.bf16.msra.mxu1 %v16167_v12  ;;  %v16227_v12 = vld [vmem:[%s23450_s7 + $0x310] ss:$8 sps:$4 sm:$0xff]  }
 0x670   : > { %8640 = vmatprep.subr.bf16.mxu1 %v16172_v57  ;;  %v16232_v57 = vld [vmem:[%s23450_s7 + $0x324] ss:$8 sps:$4 sm:$0xff]  }
 0x673   : > { %8641 = vmatpush1.bf16.msra.mxu1 %v16170_v51  ;;  %v16242_v51 = vld [vmem:[%s23450_s7 + $0x360] ss:$8 sps:$4 sm:$0xff]  }
 0x674   : > { %8642 = vmatprep.subr.bf16.mxu1 %v16175_v11  ;;  %v16247_v11 = vld [vmem:[%s23450_s7 + $0x374] ss:$8 sps:$4 sm:$0xff]  }
 0x677   : > { %8643 = vmatpush1.bf16.msra.mxu1 %v16173_v5  ;;  %v16245_v5 = vld [vmem:[%s23450_s7 + $0x370] ss:$8 sps:$4 sm:$0xff]  }
 0x678   : > { %8665 = vmatprep.subr.bf16.mxu1 %v16178_v22  ;;  %v16250_v22 = vld [vmem:[%s23450_s7 + $0x384] ss:$8 sps:$4 sm:$0xff]  }
 0x67a   : > { %8645 = vmatmul.mubr.bf16.vlgmr.msra.gmra.mrb[48].mxu1 %v14779_v16  ;;  %v16187_v16 = vld [vmem:[%s23450_s7 + $0x234] ss:$8 sps:$4 sm:$0xff]  }
 0x67b   : > { %8654 = vmatprep.mubr.bf16.mxu1 %v14782_v23  ;;  %8666 = vmatpush1.bf16.msra.mxu1 %v16176_v30  ;;  %v16190_v23 = vld [vmem:[%s23450_s7 + $0x244] ss:$8 sps:$4 sm:$0xff]   ;;  %v16248_v30 = vld [vmem:[%s23450_s7 + $0x380] ss:$8 sps:$4 sm:$0xff]  }
 0x67c   : > { %8667 = vmatprep.subr.bf16.mxu1 %v16181_v13  ;;  %v16253_v13 = vld [vmem:[%s23450_s7 + $0x394] ss:$8 sps:$4 sm:$0xff]  }
 0x67f   : > { %8668 = vmatpush1.bf16.msra.mxu1 %v16179_v25  ;;  %v16251_v25 = vld [vmem:[%s23450_s7 + $0x390] ss:$8 sps:$4 sm:$0xff]  }
 0x680   : > { %8669 = vmatprep.subr.bf16.mxu1 %v16184_v37  ;;  %v16256_v37 = vld [vmem:[%s23450_s7 + $0x3a4] ss:$8 sps:$4 sm:$0xff]  }
 0x682   : > { %8655 = vmatmul.mubr.bf16.gmra.mrb[52].mxu1 %v20665_v33 }
 0x683   : > { %8670 = vmatpush1.bf16.msra.mxu1 %v16182_v61  ;;  %8697 = vmatprep.mubr.bf16.mxu1 %v14785_v14  ;;  %v16196_v14 = vld [vmem:[%s23450_s7 + $0x264] ss:$8 sps:$4 sm:$0xff]   ;;  %v16254_v61 = vld [vmem:[%s23450_s7 + $0x3a0] ss:$8 sps:$4 sm:$0xff]  }
 0x684   : > { %8671 = vmatprep.subr.bf16.mxu1 %v16187_v16  ;;  %v16259_v16 = vld [vmem:[%s23450_s7 + $0x3b4] ss:$8 sps:$4 sm:$0xff]  }
 0x687   : > { %8672 = vmatpush1.bf16.msra.mxu1 %v16185_v21  ;;  %v16257_v21 = vld [vmem:[%s23450_s7 + $0x3b0] ss:$8 sps:$4 sm:$0xff]  }
 0x688   : > { %8673 = vmatprep.subr.bf16.mxu1 %v16190_v23  ;;  %v16262_v23 = vld [vmem:[%s23450_s7 + $0x3c4] ss:$8 sps:$4 sm:$0xff]  }
 0x68b   : > { %8674 = vmatpush1.bf16.msra.mxu1 %v16188_v41  ;;  %v16260_v41 = vld [vmem:[%s23450_s7 + $0x3c0] ss:$8 sps:$4 sm:$0xff]  }
 0x68c   : > { %8675 = vmatprep.subr.bf16.mxu1 %v16193_v0  ;;  %v16265_v0 = vld [vmem:[%s23450_s7 + $0x3d4] ss:$8 sps:$4 sm:$0xff]  }
 0x68f   : > { %8676 = vmatpush1.bf16.msra.mxu1 %v16191_v58  ;;  %v16263_v58 = vld [vmem:[%s23450_s7 + $0x3d0] ss:$8 sps:$4 sm:$0xff]  }
 0x690   : > { %8677 = vmatprep.subr.bf16.mxu1 %v16196_v14  ;;  %v16268_v14 = vld [vmem:[%s23450_s7 + $0x3e4] ss:$8 sps:$4 sm:$0xff]  }
 0x693   : > { %8678 = vmatpush1.bf16.msra.mxu1 %v16194_v36  ;;  %v16266_v36 = vld [vmem:[%s23450_s7 + $0x3e0] ss:$8 sps:$4 sm:$0xff]  }
 0x694   : > { %8679 = vmatprep.subr.bf16.mxu1 %v16199_v32  ;;  %v16271_v32 = vld [vmem:[%s23450_s7 + $0x3f4] ss:$8 sps:$4 sm:$0xff]  }
 0x697   : > { %8680 = vmatpush1.bf16.msra.mxu1 %v16197_v46  ;;  %v16269_v46 = vld [vmem:[%s23450_s7 + $0x3f0] ss:$8 sps:$4 sm:$0xff]  }
 0x698   : > { %8681 = vmatprep.subr.bf16.mxu1 %v16202_v56  ;;  %v16274_v56 = vld [vmem:[%s23450_s7 + $0x404] ss:$8 sps:$4 sm:$0xff]  }
 0x69b   : > { %8682 = vmatpush1.bf16.msra.mxu1 %v16200_v19  ;;  %v16272_v19 = vld [vmem:[%s23450_s7 + $0x400] ss:$8 sps:$4 sm:$0xff]  }
 0x69c   : > { %8683 = vmatprep.subr.bf16.mxu1 %v16205_v15  ;;  %v16277_v15 = vld [vmem:[%s23450_s7 + $0x414] ss:$8 sps:$4 sm:$0xff]  }
 0x69f   : > { %8684 = vmatpush1.bf16.msra.mxu1 %v16203_v53  ;;  %v16275_v53 = vld [vmem:[%s23450_s7 + $0x410] ss:$8 sps:$4 sm:$0xff]  }
 0x6a0   : > { %8685 = vmatprep.subr.bf16.mxu1 %v16208_v62  ;;  %v16280_v62 = vld [vmem:[%s23450_s7 + $0x424] ss:$8 sps:$4 sm:$0xff]  }
 0x6a3   : > { %8686 = vmatpush1.bf16.msra.mxu1 %v16206_v35  ;;  %v16278_v35 = vld [vmem:[%s23450_s7 + $0x420] ss:$8 sps:$4 sm:$0xff]  }
 0x6a4   : > { %8687 = vmatprep.subr.bf16.mxu1 %v16211_v40  ;;  %v16284_v40 = vld [vmem:[%s23450_s7 + $0x440] ss:$8 sps:$4 sm:$0xff]  }
 0x6a7   : > { %8688 = vmatpush1.bf16.msra.mxu1 %v16209_v54  ;;  %v16293_v54 = vld [vmem:[%s23450_s7 + $0x470] ss:$8 sps:$4 sm:$0xff]  }
 0x6a8   : > { %8689 = vmatprep.subr.bf16.mxu1 %v16214_v49  ;;  %v16301_v49 = vld [vmem:[%s23453_s10 + $0xc] ss:$16 sps:$4 sm:$0xff]  }
 0x6ab   : > { %8690 = vmatpush1.bf16.msra.mxu1 %v16212_v59  ;;  %v16299_v59 = vld [vmem:[%s23453_s10 + $0x8] ss:$16 sps:$4 sm:$0xff]  }
 0x6ac   : > { %8691 = vmatprep.subr.bf16.mxu1 %v16217_v27  ;;  %v16304_v27 = vld [vmem:[%s23453_s10 + $0x24] ss:$16 sps:$4 sm:$0xff]  }
 0x6ad   : > { %13115 = vmatprep.subr.bf16.mxu0 %v16304_v27  ;;  %v16397_v27 = vld [vmem:[%s23453_s10 + $0x20c] ss:$16 sps:$4 sm:$0xff]  }
 0x6af   : > { %8692 = vmatpush1.bf16.msra.mxu1 %v16215_v63  ;;  %v16307_v63 = vld [vmem:[%s23453_s10 + $0x2c] ss:$16 sps:$4 sm:$0xff]  }
 0x6b0   : > { %8693 = vmatprep.subr.bf16.mxu1 %v16220_v34  ;;  %v16302_v34 = vld [vmem:[%s23453_s10 + $0x20] ss:$16 sps:$4 sm:$0xff]  }
 0x6b1   : > { %13116 = vmatpush1.bf16.msra.mxu0 %v16302_v34  ;;  %v23686_v34 = vld [vmem:[#allocation2_spill] sm:$0xff] }
 0x6b2   : > { %13117 = vmatprep.subr.bf16.mxu0 %v16310_v26  ;;  %v9454_v26 = vsel %vm21256_vm11, %v23678_v38, 0 }
 0x6b3   : > { %8694 = vmatpush1.bf16.msra.mxu1 %v16218_v20  ;;  %v16311_v20 = vld [vmem:[%s23453_s10 + $0x48] ss:$16 sps:$4 sm:$0xff]  }
 0x6b4   : > { %8695 = vmatprep.subr.bf16.mxu1 %v16223_v55  ;;  %v16316_v55 = vld [vmem:[%s23453_s10 + $0x64] ss:$16 sps:$4 sm:$0xff]  }
 0x6b7   : > { %8696 = vmatpush1.bf16.msra.mxu1 %v16221_v29  ;;  %v16319_v29 = vld [vmem:[%s23453_s10 + $0x6c] ss:$16 sps:$4 sm:$0xff]  }
 0x6b8   : > { %8718 = vmatprep.subr.bf16.mxu1 %v16226_v1  ;;  %v16314_v1 = vld [vmem:[%s23453_s10 + $0x60] ss:$16 sps:$4 sm:$0xff]  }
 0x6ba   : > { %8698 = vmatmul.mubr.bf16.vlgmr.msra.gmra.mrb[48].mxu1 %v14783_v60  ;;  %v16238_v60 = vld [vmem:[%s23450_s7 + $0x344] ss:$8 sps:$4 sm:$0xff]  }
 0x6bb   : > { %8707 = vmatprep.mubr.bf16.mxu1 %v14786_v6  ;;  %8719 = vmatpush1.bf16.msra.mxu1 %v16224_v7  ;;  %v16236_v6 = vld [vmem:[%s23450_s7 + $0x340] ss:$8 sps:$4 sm:$0xff]  }
 0x6bc   : > { %8720 = vmatprep.subr.bf16.mxu1 %v16229_v31  ;;  %v16317_v7 = vld [vmem:[%s23453_s10 + $0x68] ss:$16 sps:$4 sm:$0xff]   ;;  %v16322_v31 = vld [vmem:[%s23453_s10 + $0x84] ss:$16 sps:$4 sm:$0xff]  }
 0x6bf   : > { %8721 = vmatpush1.bf16.msra.mxu1 %v16227_v12  ;;  %v16325_v12 = vld [vmem:[%s23453_s10 + $0x8c] ss:$16 sps:$4 sm:$0xff]  }
 0x6c0   : > { %8722 = vmatprep.subr.bf16.mxu1 %v16232_v57  ;;  %v16320_v57 = vld [vmem:[%s23453_s10 + $0x80] ss:$16 sps:$4 sm:$0xff]  }
 0x6c2   : > { %8708 = vmatmul.mubr.bf16.gmra.mrb[52].mxu1 %v14784_v43  ;;  %v16244_v43 = vld [vmem:[%s23450_s7 + $0x364] ss:$8 sps:$4 sm:$0xff]  }
 0x6c3   : > { %8723 = vmatpush1.bf16.msra.mxu1 %v16230_v47  ;;  %8750 = vmatprep.mubr.bf16.mxu1 %v20689_v28  ;;  %v16239_v28 = vld [vmem:[%s23450_s7 + $0x350] ss:$8 sps:$4 sm:$0xff]  }
 0x6c4   : > { %8724 = vmatprep.subr.bf16.mxu1 %v16235_v9  ;;  %v16323_v47 = vld [vmem:[%s23453_s10 + $0x88] ss:$16 sps:$4 sm:$0xff]   ;;  %v16328_v9 = vld [vmem:[%s23453_s10 + $0xa4] ss:$16 sps:$4 sm:$0xff]  }
 0x6c7   : > { %8725 = vmatpush1.bf16.msra.mxu1 %v16233_v48  ;;  %v16331_v48 = vld [vmem:[%s23453_s10 + $0xac] ss:$16 sps:$4 sm:$0xff]  }
 0x6c8   : > { %8726 = vmatprep.subr.bf16.mxu1 %v16238_v60  ;;  %v16326_v60 = vld [vmem:[%s23453_s10 + $0xa0] ss:$16 sps:$4 sm:$0xff]  }
 0x6cb   : > { %8727 = vmatpush1.bf16.msra.mxu1 %v16236_v6  ;;  %v16329_v6 = vld [vmem:[%s23453_s10 + $0xa8] ss:$16 sps:$4 sm:$0xff]  }
 0x6cc   : > { %8728 = vmatprep.subr.bf16.mxu1 %v16241_v52  ;;  %v16334_v52 = vld [vmem:[%s23453_s10 + $0xc4] ss:$16 sps:$4 sm:$0xff]  }
 0x6cf   : > { %8729 = vmatpush1.bf16.msra.mxu1 %v16239_v28  ;;  %v16337_v28 = vld [vmem:[%s23453_s10 + $0xcc] ss:$16 sps:$4 sm:$0xff]  }
 0x6d0   : > { %8730 = vmatprep.subr.bf16.mxu1 %v16244_v43  ;;  %v16332_v43 = vld [vmem:[%s23453_s10 + $0xc0] ss:$16 sps:$4 sm:$0xff]  }
 0x6d3   : > { %8731 = vmatpush1.bf16.msra.mxu1 %v16242_v51  ;;  %v16335_v51 = vld [vmem:[%s23453_s10 + $0xc8] ss:$16 sps:$4 sm:$0xff]  }
 0x6d4   : > { %8732 = vmatprep.subr.bf16.mxu1 %v16247_v11  ;;  %v16340_v11 = vld [vmem:[%s23453_s10 + $0xe4] ss:$16 sps:$4 sm:$0xff]  }
 0x6d7   : > { %8733 = vmatpush1.bf16.msra.mxu1 %v16245_v5  ;;  %v16343_v5 = vld [vmem:[%s23453_s10 + $0xec] ss:$16 sps:$4 sm:$0xff]  }
 0x6d8   : > { %8734 = vmatprep.subr.bf16.mxu1 %v16250_v22  ;;  %v16338_v22 = vld [vmem:[%s23453_s10 + $0xe0] ss:$16 sps:$4 sm:$0xff]  }
 0x6db   : > { %8735 = vmatpush1.bf16.msra.mxu1 %v16248_v30  ;;  %v16341_v30 = vld [vmem:[%s23453_s10 + $0xe8] ss:$16 sps:$4 sm:$0xff]  }
 0x6dc   : > { %8736 = vmatprep.subr.bf16.mxu1 %v16253_v13  ;;  %v16346_v13 = vld [vmem:[%s23453_s10 + $0x104] ss:$16 sps:$4 sm:$0xff]  }
 0x6df   : > { %8737 = vmatpush1.bf16.msra.mxu1 %v16251_v25  ;;  %v16349_v25 = vld [vmem:[%s23453_s10 + $0x10c] ss:$16 sps:$4 sm:$0xff]  }
 0x6e0   : > { %8738 = vmatprep.subr.bf16.mxu1 %v16256_v37  ;;  %v16344_v37 = vld [vmem:[%s23453_s10 + $0x100] ss:$16 sps:$4 sm:$0xff]  }
 0x6e3   : > { %8739 = vmatpush1.bf16.msra.mxu1 %v16254_v61  ;;  %v16347_v61 = vld [vmem:[%s23453_s10 + $0x108] ss:$16 sps:$4 sm:$0xff]  }
 0x6e4   : > { %8740 = vmatprep.subr.bf16.mxu1 %v16259_v16  ;;  %v16352_v16 = vld [vmem:[%s23453_s10 + $0x124] ss:$16 sps:$4 sm:$0xff]  }
 0x6e7   : > { %8741 = vmatpush1.bf16.msra.mxu1 %v16257_v21  ;;  %v16355_v21 = vld [vmem:[%s23453_s10 + $0x12c] ss:$16 sps:$4 sm:$0xff]  }
 0x6e8   : > { %8742 = vmatprep.subr.bf16.mxu1 %v16262_v23  ;;  %v16350_v23 = vld [vmem:[%s23453_s10 + $0x120] ss:$16 sps:$4 sm:$0xff]  }
 0x6eb   : > { %8743 = vmatpush1.bf16.msra.mxu1 %v16260_v41  ;;  %v16353_v41 = vld [vmem:[%s23453_s10 + $0x128] ss:$16 sps:$4 sm:$0xff]  }
 0x6ec   : > { %8744 = vmatprep.subr.bf16.mxu1 %v16265_v0  ;;  %v16358_v0 = vld [vmem:[%s23453_s10 + $0x144] ss:$16 sps:$4 sm:$0xff]  }
 0x6ef   : > { %8745 = vmatpush1.bf16.msra.mxu1 %v16263_v58  ;;  %v16361_v58 = vld [vmem:[%s23453_s10 + $0x14c] ss:$16 sps:$4 sm:$0xff]  }
 0x6f0   : > { %8746 = vmatprep.subr.bf16.mxu1 %v16268_v14  ;;  %v16356_v14 = vld [vmem:[%s23453_s10 + $0x140] ss:$16 sps:$4 sm:$0xff]  }
 0x6f3   : > { %8747 = vmatpush1.bf16.msra.mxu1 %v16266_v36  ;;  %v16359_v36 = vld [vmem:[%s23453_s10 + $0x148] ss:$16 sps:$4 sm:$0xff]  }
 0x6f4   : > { %8748 = vmatprep.subr.bf16.mxu1 %v16271_v32  ;;  %v16364_v32 = vld [vmem:[%s23453_s10 + $0x164] ss:$16 sps:$4 sm:$0xff]  }
 0x6f7   : > { %8749 = vmatpush1.bf16.msra.mxu1 %v16269_v46  ;;  %v16367_v46 = vld [vmem:[%s23453_s10 + $0x16c] ss:$16 sps:$4 sm:$0xff]  }
 0x6f8   : > { %8771 = vmatprep.subr.bf16.mxu1 %v16274_v56  ;;  %v16362_v56 = vld [vmem:[%s23453_s10 + $0x160] ss:$16 sps:$4 sm:$0xff]  }
 0x6fa   : > { %8751 = vmatmul.mubr.bf16.vlgmr.msra.gmra.mrb[48].mxu1 %v20638_v10  ;;  %v16281_v10 = vld [vmem:[%s23450_s7 + $0x430] ss:$8 sps:$4 sm:$0xff]  }
 0x6fb   : > { %8760 = vmatprep.mubr.bf16.mxu1 %v14788_v18  ;;  %8772 = vmatpush1.bf16.msra.mxu1 %v16272_v19  ;;  %v16286_v18 = vld [vmem:[%s23450_s7 + $0x444] ss:$8 sps:$4 sm:$0xff]   ;;  %v16365_v19 = vld [vmem:[%s23453_s10 + $0x168] ss:$16 sps:$4 sm:$0xff]  }
 0x6fc   : > { %8773 = vmatprep.subr.bf16.mxu1 %v16277_v15  ;;  %v16370_v15 = vld [vmem:[%s23453_s10 + $0x184] ss:$16 sps:$4 sm:$0xff]  }
 0x6ff   : > { %8774 = vmatpush1.bf16.msra.mxu1 %v16275_v53  ;;  %v16373_v53 = vld [vmem:[%s23453_s10 + $0x18c] ss:$16 sps:$4 sm:$0xff]  }
 0x700   : > { %8775 = vmatprep.subr.bf16.mxu1 %v16280_v62  ;;  %v16368_v62 = vld [vmem:[%s23453_s10 + $0x180] ss:$16 sps:$4 sm:$0xff]  }
 0x702   : > { %8761 = vmatmul.mubr.bf16.gmra.mrb[52].mxu1 %v14787_v2  ;;  %v16292_v2 = vld [vmem:[%s23450_s7 + $0x464] ss:$8 sps:$4 sm:$0xff]  }
 0x703   : > { %8776 = vmatpush1.bf16.msra.mxu1 %v16278_v35  ;;  %8803 = vmatprep.mubr.bf16.mxu1 %v23683_v17  ;;  %v16371_v35 = vld [vmem:[%s23453_s10 + $0x188] ss:$16 sps:$4 sm:$0xff]  }
 0x704   : > { %8777 = vmatprep.subr.bf16.mxu1 %v16283_v24  ;;  %v16376_v24 = vld [vmem:[%s23453_s10 + $0x1a4] ss:$16 sps:$4 sm:$0xff]  }
 0x707   : > { %8778 = vmatpush1.bf16.msra.mxu1 %v16281_v10  ;;  %v16379_v10 = vld [vmem:[%s23453_s10 + $0x1ac] ss:$16 sps:$4 sm:$0xff]  }
 0x708   : > { %8779 = vmatprep.subr.bf16.mxu1 %v16286_v18  ;;  %v16377_v18 = vld [vmem:[%s23453_s10 + $0x1a8] ss:$16 sps:$4 sm:$0xff]  }
 0x70b   : > { %8780 = vmatpush1.bf16.msra.mxu1 %v16284_v40  ;;  %v16382_v40 = vld [vmem:[%s23453_s10 + $0x1c4] ss:$16 sps:$4 sm:$0xff]  }
 0x70c   : > { %8781 = vmatprep.subr.bf16.mxu1 %v16289_v42  ;;  %v16385_v42 = vld [vmem:[%s23453_s10 + $0x1cc] ss:$16 sps:$4 sm:$0xff]  }
 0x70f   : > { %8782 = vmatpush1.bf16.msra.mxu1 %v16287_v44  ;;  %v16380_v44 = vld [vmem:[%s23453_s10 + $0x1c0] ss:$16 sps:$4 sm:$0xff]  }
 0x710   : > { %8783 = vmatprep.subr.bf16.mxu1 %v16292_v2  ;;  %v16383_v2 = vld [vmem:[%s23453_s10 + $0x1c8] ss:$16 sps:$4 sm:$0xff]  }
 0x713   : > { %8784 = vmatpush1.bf16.msra.mxu1 %v16290_v3  ;;  %v16388_v3 = vld [vmem:[%s23453_s10 + $0x1e4] ss:$16 sps:$4 sm:$0xff]  }
 0x714   : > { %8785 = vmatprep.subr.bf16.mxu1 %v16295_v45  ;;  %v16386_v45 = vld [vmem:[%s23453_s10 + $0x1e0] ss:$16 sps:$4 sm:$0xff]  }
 0x717   : > { %8786 = vmatpush1.bf16.msra.mxu1 %v16293_v54  ;;  %v16389_v54 = vld [vmem:[%s23453_s10 + $0x1e8] ss:$16 sps:$4 sm:$0xff]  }
 0x718   : > { %13482 = vmatprep.subr.bf16.mxu1 %v16301_v49  ;;  %v16391_v49 = vld [vmem:[%s23453_s10 + $0x1ec] ss:$16 sps:$4 sm:$0xff]  }
 0x71a   : > { %8804 = vmatmul.mubr.bf16.vlgmr.msra.gmra.mrb[48].mxu1 %v20665_v33  ;;  %v16305_v33 = vld [vmem:[%s23453_s10 + $0x28] ss:$16 sps:$4 sm:$0xff]  }
 0x71b   : > { %8813 = vmatprep.mubr.bf16.mxu1 %v23683_v17  ;;  %13483 = vmatpush1.bf16.msra.mxu1 %v16299_v59  ;;  %v16374_v17 = vld [vmem:[%s23453_s10 + $0x1a0] ss:$16 sps:$4 sm:$0xff]   ;;  %v16394_v59 = vld [vmem:[%s23453_s10 + $0x204] ss:$16 sps:$4 sm:$0xff]  }
 0x71c   : > { %13484 = vmatprep.subr.bf16.mxu1 %v16307_v63  ;;  %v16421_v63 = vld [vmem:[%s23453_s10 + $0x28c] ss:$16 sps:$4 sm:$0xff]  }
 0x71f   : > { %13485 = vmatpush1.bf16.msra.mxu1 %v16305_v33  ;;  %v21261_v33 = vsub.s32 0, %v23686_v34 }
 0x720   : > { %13486 = vmatprep.subr.bf16.mxu1 %v16313_v4  ;;  %v8824_v4 = vld [vmem:[%s23451_s8] sm:$0x3] }
 0x722   : > { %8814 = vmatmul.mubr.bf16.gmra.mrb[52].mxu1 %v14789_v39  ;;  %v16308_v39 = vld [vmem:[%s23453_s10 + $0x40] ss:$16 sps:$4 sm:$0xff]  }
 0x723   : > { %13118 = vmatpush1.bf16.msra.mxu0 %v16308_v39  ;;  %13487 = vmatpush1.bf16.msra.mxu1 %v16311_v20  ;;  %v21270_v39 = vsub.s32 1, %v23686_v34  ;;  %v8844_v20 = vld [vmem:[%s23452_s9] sm:$0x3] }
 0x724   : > { %13119 = vmatprep.subr.bf16.mxu0 %v16316_v55  ;;  %13488 = vmatprep.subr.bf16.mxu1 %v16319_v29  ;;  %v9462_v55 = vcombine.low %v9454_v26, %v9454_v26  ;;  %v8829_v29 = vrot.slane %v8824_v4, %v21261_v33 }
 0x727   : > { %13120 = vmatpush1.bf16.msra.mxu0 %v16314_v1  ;;  %13489 = vmatpush1.bf16.msra.mxu1 %v16317_v7  ;;  %v21277_v1 = vrot.slane %v8824_v4, %v21270_v39  ;;  %v21280_v7 = vrot.slane %v8844_v20, %v21261_v33 }
 0x728   : > { %13121 = vmatprep.subr.bf16.mxu0 %v16322_v31  ;;  %13490 = vmatprep.subr.bf16.mxu1 %v16325_v12  ;;  %v21283_v31 = vrot.slane %v8844_v20, %v21270_v39 }
 0x72b   : > { %13122 = vmatpush1.bf16.msra.mxu0 %v16320_v57  ;;  %13491 = vmatpush1.bf16.msra.mxu1 %v16323_v47  ;;  %v21286_v47 = vrot.slane %v9462_v55, %v17487_v50 }
 0x72c   : > { %13123 = vmatprep.subr.bf16.mxu0 %v16328_v9  ;;  %13492 = vmatprep.subr.bf16.mxu1 %v16331_v48 }
 0x72f   : > { %13124 = vmatpush1.bf16.msra.mxu0 %v16326_v60  ;;  %13493 = vmatpush1.bf16.msra.mxu1 %v16329_v6 }
 0x730   : > { %13125 = vmatprep.subr.bf16.mxu0 %v16334_v52  ;;  %13494 = vmatprep.subr.bf16.mxu1 %v16337_v28 }
 0x733   : > { %13126 = vmatpush1.bf16.msra.mxu0 %v16332_v43  ;;  %13495 = vmatpush1.bf16.msra.mxu1 %v16335_v51 }
 0x734   : > { %13127 = vmatprep.subr.bf16.mxu0 %v16340_v11  ;;  %13496 = vmatprep.subr.bf16.mxu1 %v16343_v5  ;;  %v9488_v5 = vshrl.u32 %v21286_v47, 16 }
 0x737   : > { %13128 = vmatpush1.bf16.msra.mxu0 %v16338_v22  ;;  %13497 = vmatpush1.bf16.msra.mxu1 %v16341_v30 }
 0x738   : > { %13129 = vmatprep.subr.bf16.mxu0 %v16346_v13  ;;  %13498 = vmatprep.subr.bf16.mxu1 %v16349_v25  ;;  %v9491_v25 = vshll.u32 %v21286_v47, 16 }
 0x73b   : > { %13130 = vmatpush1.bf16.msra.mxu0 %v16344_v37  ;;  %13499 = vmatpush1.bf16.msra.mxu1 %v16347_v61 }
 0x73c   : > { %13131 = vmatprep.subr.bf16.mxu0 %v16352_v16  ;;  %13500 = vmatprep.subr.bf16.mxu1 %v16355_v21 }
 0x73f   : > { %13132 = vmatpush1.bf16.msra.mxu0 %v16350_v23  ;;  %13501 = vmatpush1.bf16.msra.mxu1 %v16353_v41 }
 0x740   : > { %13133 = vmatprep.subr.bf16.mxu0 %v16358_v0  ;;  %13502 = vmatprep.subr.bf16.mxu1 %v16361_v58  ;;  %v21298_v0 = vcombine.high %v21286_v47, %v21286_v47  ;;  %v21300_v58 = vrot.slane %v9488_v5, 6 }
 0x743   : > { %13134 = vmatpush1.bf16.msra.mxu0 %v16356_v14  ;;  %13503 = vmatpush1.bf16.msra.mxu1 %v16359_v36 }
 0x744   : > { %13135 = vmatprep.subr.bf16.mxu0 %v16364_v32  ;;  %13504 = vmatprep.subr.bf16.mxu1 %v16367_v46 }
 0x747   : > { %13136 = vmatpush1.bf16.msra.mxu0 %v16362_v56  ;;  %13505 = vmatpush1.bf16.msra.mxu1 %v16365_v19 }
 0x748   : > { %13137 = vmatprep.subr.bf16.mxu0 %v16370_v15  ;;  %13506 = vmatprep.subr.bf16.mxu1 %v16373_v53 }
 0x74b   : > { %13138 = vmatpush1.bf16.msra.mxu0 %v16368_v62  ;;  %13507 = vmatpush1.bf16.msra.mxu1 %v16371_v35  ;;  %v21312_v35 = vrot.slane %v9491_v25, 7 }
 0x74c   : > { %13139 = vmatprep.subr.bf16.mxu0 %v16376_v24  ;;  %13508 = vmatprep.subr.bf16.mxu1 %v16379_v10 }
 0x74f   : > { %13140 = vmatpush1.bf16.msra.mxu0 %v16374_v17  ;;  %13509 = vmatpush1.bf16.msra.mxu1 %v16377_v18 }
 0x750   : > { %13141 = vmatprep.subr.bf16.mxu0 %v16382_v40  ;;  %13510 = vmatprep.subr.bf16.mxu1 %v16385_v42 }
 0x753   : > { %13142 = vmatpush1.bf16.msra.mxu0 %v16380_v44  ;;  %13511 = vmatpush1.bf16.msra.mxu1 %v16383_v2 }
 0x754   : > { %13143 = vmatprep.subr.bf16.mxu0 %v16388_v3  ;;  %13512 = vmatprep.subr.bf16.mxu1 %v16391_v49 }
 0x757   : > { %13144 = vmatpush1.bf16.msra.mxu0 %v16386_v45  ;;  %13513 = vmatpush1.bf16.msra.mxu1 %v16389_v54 }
 0x758   : > { %13154 = vmatprep.subr.bf16.mxu0 %v16394_v59  ;;  %13523 = vmatprep.subr.bf16.mxu1 %v16397_v27 }
 0x7ed   : > { %v8805_v38 = vpop.f32.mrb[48].mxu1 }
 0x7ee   : > { %v8836_v12 = vmul.f32 %v8829_v29, %v8805_v38  ;;  %v8807_v57 = vpop.f32.mrb[49].mxu1 }
 0x7ef   : > { %v8837_v9 = vmul.f32 %v21277_v1, %v8807_v57  ;;  %v8809_v48 = vpop.f32.mrb[50].mxu1 }
 0x7f0   : > { %v8856_v60 = vadd.f32 %v21280_v7, %v8836_v12  ;;  %v8838_v6 = vmul.f32 %v8829_v29, %v8809_v48  ;;  %v8811_v52 = vpop.f32.mrb[51].mxu1 }
 0x7f1   : > { %v8857_v28 = vadd.f32 %v21283_v31, %v8837_v9  ;;  %v8839_v43 = vmul.f32 %v21277_v1, %v8811_v52 }
 0x7f2   : > { %v8864_v51 = vmax.f32 %v8856_v60, 0.0  ;;  %v8858_v11 = vadd.f32 %v21280_v7, %v8838_v6 }
 0x7f3   : > { %v8865_v22 = vmax.f32 %v8857_v28, 0.0  ;;  %v8859_v30 = vadd.f32 %v21283_v31, %v8839_v43 }
 0x7f4   : > { %v8866_v13 = vmax.f32 %v8858_v11, 0.0 }
 0x7f5   : > { %v8880_v37 = vcombine.low %v8864_v51, %v8865_v22  ;;  %v8881_v61 = vcombine.high %v8864_v51, %v8865_v22  ;;  %v8867_v16 = vmax.f32 %v8859_v30, 0.0  ;;  %v8815_v21 = vpop.f32.mrb[52].mxu1 }
 0x7f6   : > { %v8840_v23 = vmul.f32 %v8829_v29, %v8815_v21  ;;  %v8817_v41 = vpop.f32.mrb[53].mxu1 }
 0x7f7   : > { %v8888_v14 = vrot.slane %v8880_v37, %v17487_v50  ;;  %v8895_v36 = vrot.slane %v8881_v61, %v17487_v50  ;;  %v8898_v32 = vcombine.low %v8866_v13, %v8867_v16  ;;  %v8899_v46 = vcombine.high %v8866_v13, %v8867_v16  ;;  %v8819_v56 = vpop.f32.mrb[54].mxu1 }
 0x7f8   : > { %v21305_v19 = vadd.f32 %v21280_v7, %v8840_v23  ;;  %v8841_v15 = vmul.f32 %v21277_v1, %v8817_v41  ;;  %v21308_v53 = vmul.f32 %v8829_v29, %v8819_v56  ;;  %v21310_v62 = vpop.f32.mrb[55].mxu1 }
 0x7f9   : > { %v8896_v24 = vcombine.high %v8888_v14, %v8888_v14  ;;  %v8897_v10 = vcombine.high %v8895_v36, %v8895_v36  ;;  %v8958_v17 = vrot.slane %v8888_v14, %v17487_v50  ;;  %v8974_v18 = vrot.slane %v8895_v36, %v17487_v50 }
 0x7fa   : > { %v21317_v40 = vrot.slane %v8898_v32, %v17487_v50  ;;  %v21320_v42 = vrot.slane %v8899_v46, %v17487_v50  ;;  %v8868_v44 = vmax.f32 %v21305_v19, 0.0  ;;  %v21324_v2 = vadd.f32 %v21283_v31, %v8841_v15 }
 0x7fb   : > { %v8959_v3 = vcombine.high %v8958_v17, %v8958_v17  ;;  %v8966_v45 = vrot.slane %v8896_v24, %v17487_v50  ;;  %v8975_v54 = vcombine.high %v8974_v18, %v8974_v18  ;;  %v8982_v49 = vrot.slane %v8897_v10, %v17487_v50 }
 0x7fc   : > { %v9112_v59 = vsel %vm6881_vm2, %v8958_v17, -inf  ;;  %v9140_v27 = vsel %vm6881_vm2, %v8974_v18, -inf  ;;  %v8914_v26 = vcombine.high %v21317_v40, %v21317_v40  ;;  %v8915_v4 = vcombine.high %v21320_v42, %v21320_v42 }
 0x7fd   : > { %v8967_v20 = vcombine.high %v8966_v45, %v8966_v45  ;;  %v8983_v55 = vcombine.high %v8982_v49, %v8982_v49  ;;  %v9113_v29 = vrot.slane %v9112_v59, 4  ;;  %v9119_v38 = vsel %vm6881_vm2, %v8959_v3, -inf }
 0x7fe   : > { %v9120_v12 = vrot.slane %v9119_v38, 4  ;;  %v9126_v57 = vsel %vm6881_vm2, %v8966_v45, -inf  ;;  %v9141_v9 = vrot.slane %v9140_v27, 4  ;;  %v9147_v48 = vsel %vm6881_vm2, %v8975_v54, -inf }
 0x7ff   : > { %v9114_v60 = vmax.f32 %v9112_v59, %v9113_v29  ;;  %v9127_v6 = vrot.slane %v9126_v57, 4  ;;  %v9133_v52 = vsel %vm6881_vm2, %v8967_v20, -inf  ;;  %v9148_v28 = vrot.slane %v9147_v48, 4 }
 0x800   : > { %v9121_v43 = vmax.f32 %v9119_v38, %v9120_v12  ;;  %v9134_v51 = vrot.slane %v9133_v52, 4  ;;  %v9142_v11 = vmax.f32 %v9140_v27, %v9141_v9  ;;  %v9154_v5 = vsel %vm6881_vm2, %v8982_v49, -inf }
 0x801   : > { %v9115_v22 = vrot.slane %v9114_v60, 2  ;;  %v9128_v30 = vmax.f32 %v9126_v57, %v9127_v6  ;;  %v9149_v13 = vmax.f32 %v9147_v48, %v9148_v28  ;;  %v9155_v25 = vrot.slane %v9154_v5, 4 }
 0x802   : > { %v9122_v37 = vrot.slane %v9121_v43, 2  ;;  %v9135_v61 = vmax.f32 %v9133_v52, %v9134_v51  ;;  %v9143_v16 = vrot.slane %v9142_v11, 2  ;;  %v9161_v21 = vsel %vm6881_vm2, %v8983_v55, -inf }
 0x803   : > { %v9116_v23 = vmax.f32 %v9114_v60, %v9115_v22  ;;  %v9129_v41 = vrot.slane %v9128_v30, 2  ;;  %v9150_v14 = vrot.slane %v9149_v13, 2  ;;  %v9156_v36 = vmax.f32 %v9154_v5, %v9155_v25 }
 0x804   : > { %v9123_v32 = vmax.f32 %v9121_v43, %v9122_v37  ;;  %v9136_v46 = vrot.slane %v9135_v61, 2  ;;  %v9144_v56 = vmax.f32 %v9142_v11, %v9143_v16  ;;  %v9162_v15 = vrot.slane %v9161_v21, 4 }
 0x805   : > { %v9117_v24 = vrot.slane %v9116_v23, 1  ;;  %v9130_v10 = vmax.f32 %v9128_v30, %v9129_v41  ;;  %v9151_v17 = vmax.f32 %v9149_v13, %v9150_v14  ;;  %v9157_v18 = vrot.slane %v9156_v36, 2 }
 0x806   : > { %v9124_v3 = vrot.slane %v9123_v32, 1  ;;  %v9137_v45 = vmax.f32 %v9135_v61, %v9136_v46  ;;  %v9145_v54 = vrot.slane %v9144_v56, 1  ;;  %v9163_v49 = vmax.f32 %v9161_v21, %v9162_v15 }
 0x807   : > { %v21340_v59 = vmax.f32 %v9116_v23, %v9117_v24  ;;  %v9131_v27 = vrot.slane %v9130_v10, 1  ;;  %v9152_v20 = vrot.slane %v9151_v17, 1  ;;  %v9158_v55 = vmax.f32 %v9156_v36, %v9157_v18 }
 0x808   : > { %v21342_v29 = vmax.f32 %v9123_v32, %v9124_v3  ;;  %v9138_v38 = vrot.slane %v9137_v45, 1  ;;  %v21344_v12 = vmax.f32 %v9144_v56, %v9145_v54  ;;  %v9164_v57 = vrot.slane %v9163_v49, 2 }
 0x809   : > { %v21346_v9 = vmax.f32 %v9130_v10, %v9131_v27  ;;  %v21348_v48 = vmax.f32 %v9151_v17, %v9152_v20  ;;  %v9159_v60 = vrot.slane %v9158_v55, 1  ;;  %v8990_v6 = vrot.slane %v21317_v40, %v17487_v50 }
 0x80a   : > { %v21352_v52 = vmax.f32 %v9137_v45, %v9138_v38  ;;  %v9165_v28 = vmax.f32 %v9163_v49, %v9164_v57  ;;  %v8998_v43 = vrot.slane %v8914_v26, %v17487_v50  ;;  %v9006_v51 = vrot.slane %v21320_v42, %v17487_v50 }
 0x80b   : > { %v21357_v11 = vmax.f32 %v9158_v55, %v9159_v60  ;;  %v8991_v5 = vcombine.high %v8990_v6, %v8990_v6  ;;  %v9014_v22 = vrot.slane %v8915_v4, %v17487_v50  ;;  %v9168_v30 = vsel %vm6881_vm2, %v8990_v6, -inf }
 0x80c   : > { %v9166_v13 = vrot.slane %v9165_v28, 1  ;;  %v8999_v25 = vcombine.high %v8998_v43, %v8998_v43  ;;  %v9007_v37 = vcombine.high %v9006_v51, %v9006_v51  ;;  %v9169_v61 = vrot.slane %v9168_v30, 4 }
 0x80d   : > { %v9015_v40 = vcombine.high %v9014_v22, %v9014_v22  ;;  %v9175_v16 = vsel %vm6881_vm2, %v8991_v5, -inf  ;;  %v9182_v21 = vsel %vm6881_vm2, %v8998_v43, -inf  ;;  %v9196_v26 = vsel %vm6881_vm2, %v9006_v51, -inf }
 0x80e   : > { %v21364_v23 = vmax.f32 %v9165_v28, %v9166_v13  ;;  %v9170_v42 = vmax.f32 %v9168_v30, %v9169_v61  ;;  %v9176_v41 = vrot.slane %v9175_v16, 4  ;;  %v9183_v14 = vrot.slane %v9182_v21, 4 }
 0x80f   : > { %v9189_v4 = vsel %vm6881_vm2, %v8999_v25, -inf  ;;  %v9197_v36 = vrot.slane %v9196_v26, 4  ;;  %v9203_v32 = vsel %vm6881_vm2, %v9007_v37, -inf  ;;  %v9210_v46 = vsel %vm6881_vm2, %v9014_v22, -inf }
 0x810   : > { %v9171_v56 = vrot.slane %v9170_v42, 2  ;;  %v9177_v15 = vmax.f32 %v9175_v16, %v9176_v41  ;;  %v9184_v24 = vmax.f32 %v9182_v21, %v9183_v14  ;;  %v9190_v10 = vrot.slane %v9189_v4, 4 }
 0x811   : > { %v9198_v17 = vmax.f32 %v9196_v26, %v9197_v36  ;;  %v9204_v18 = vrot.slane %v9203_v32, 4  ;;  %v9211_v3 = vrot.slane %v9210_v46, 4  ;;  %v9217_v45 = vsel %vm6881_vm2, %v9015_v40, -inf }
 0x812   : > { %v9172_v54 = vmax.f32 %v9170_v42, %v9171_v56  ;;  %v9178_v49 = vrot.slane %v9177_v15, 2  ;;  %v9185_v27 = vrot.slane %v9184_v24, 2  ;;  %v9191_v20 = vmax.f32 %v9189_v4, %v9190_v10 }
 0x813   : > { %v9199_v55 = vrot.slane %v9198_v17, 2  ;;  %v9205_v38 = vmax.f32 %v9203_v32, %v9204_v18  ;;  %v9212_v57 = vmax.f32 %v9210_v46, %v9211_v3  ;;  %v9218_v60 = vrot.slane %v9217_v45, 4 }
 0x814   : > { %v9173_v6 = vrot.slane %v9172_v54, 1  ;;  %v9179_v28 = vmax.f32 %v9177_v15, %v9178_v49  ;;  %v9186_v43 = vmax.f32 %v9184_v24, %v9185_v27  ;;  %v9192_v51 = vrot.slane %v9191_v20, 2 }
 0x815   : > { %v9200_v5 = vmax.f32 %v9198_v17, %v9199_v55  ;;  %v9206_v22 = vrot.slane %v9205_v38, 2  ;;  %v9213_v30 = vrot.slane %v9212_v57, 2  ;;  %v9219_v13 = vmax.f32 %v9217_v45, %v9218_v60 }
 0x816   : > { %v9174_v25 = vmax.f32 %v9172_v54, %v9173_v6  ;;  %v9180_v37 = vrot.slane %v9179_v28, 1  ;;  %v9187_v61 = vrot.slane %v9186_v43, 1  ;;  %v9193_v40 = vmax.f32 %v9191_v20, %v9192_v51 }
 0x817   : > { %v9201_v16 = vrot.slane %v9200_v5, 1  ;;  %v9207_v21 = vmax.f32 %v9205_v38, %v9206_v22  ;;  %v9214_v26 = vmax.f32 %v9212_v57, %v9213_v30  ;;  %v9220_v42 = vrot.slane %v9219_v13, 2 }
 0x818   : > { %v9181_v41 = vmax.f32 %v9179_v28, %v9180_v37  ;;  %v9188_v14 = vmax.f32 %v9186_v43, %v9187_v61  ;;  %v9194_v4 = vrot.slane %v9193_v40, 1  ;;  %v9336_v36 = vmax.f32 %v21340_v59, %v9174_v25 }
 0x819   : > { %v9202_v32 = vmax.f32 %v9200_v5, %v9201_v16  ;;  %v9208_v46 = vrot.slane %v9207_v21, 1  ;;  %v9215_v56 = vrot.slane %v9214_v26, 1  ;;  %v9221_v15 = vmax.f32 %v9219_v13, %v9220_v42 }
 0x81a   : > { %v9195_v24 = vmax.f32 %v9193_v40, %v9194_v4  ;;  %v9337_v10 = vmax.f32 %v21342_v29, %v9181_v41  ;;  %v9338_v17 = vmax.f32 %v21346_v9, %v9188_v14  ;;  %v9352_v18 = vpack.c.bf16 %v9336_v36, %v9336_v36 }
 0x81b   : > { %v9209_v3 = vmax.f32 %v9207_v21, %v9208_v46  ;;  %v9216_v45 = vmax.f32 %v9214_v26, %v9215_v56  ;;  %v9222_v54 = vrot.slane %v9221_v15, 1  ;;  %v9340_v49 = vmax.f32 %v21344_v12, %v9202_v32 }
 0x81c   : > { %v9339_v27 = vmax.f32 %v21352_v52, %v9195_v24  ;;  %v9353_v20 = vpack.c.bf16 %v9337_v10, %v9337_v10  ;;  %v9354_v55 = vpack.c.bf16 %v9338_v17, %v9338_v17  ;;  %v9384_v59 = vunpack.c.l.b16 %v9352_v18 }
 0x81d   : > { %v9223_v38 = vmax.f32 %v9221_v15, %v9222_v54  ;;  %v9341_v57 = vmax.f32 %v21348_v48, %v9209_v3  ;;  %v9342_v60 = vmax.f32 %v21357_v11, %v9216_v45  ;;  %v9356_v6 = vpack.c.bf16 %v9340_v49, %v9340_v49 }
 0x81e   : > { %v9355_v29 = vpack.c.bf16 %v9339_v27, %v9339_v27  ;;  %v9385_v28 = vunpack.c.l.b16 %v9353_v20  ;;  %v9386_v9 = vunpack.c.l.b16 %v9354_v55  ;;  %v8869_v43 = vmax.f32 %v21324_v2, 0.0 }
 0x81f   : > { %v9343_v51 = vmax.f32 %v21364_v23, %v9223_v38  ;;  %v9357_v5 = vpack.c.bf16 %v9341_v57, %v9341_v57  ;;  %v9358_v12 = vpack.c.bf16 %v9342_v60, %v9342_v60  ;;  %v9388_v22 = vunpack.c.l.b16 %v9356_v6 }
 0x820   : > { %v9387_v52 = vunpack.c.l.b16 %v9355_v29  ;;  %v9400_v30 = vsel %vm5346_vm5, %v9386_v9, %v9384_v59  ;;  %v8916_v13 = vcombine.low %v8868_v44, %v8869_v43  ;;  %v8917_v48 = vcombine.high %v8868_v44, %v8869_v43 }
 0x821   : > { %v9359_v11 = vpack.c.bf16 %v9343_v51, %v9343_v51  ;;  %v9389_v25 = vunpack.c.l.b16 %v9357_v5  ;;  %v9390_v37 = vunpack.c.l.b16 %v9358_v12  ;;  %v9401_v61 = vsel %vm5348_vm6, %v9388_v22, %v9400_v30 }
 0x822   : > { %v9403_v2 = vsel %vm5346_vm5, %v9387_v52, %v9385_v28  ;;  %v8924_v23 = vrot.slane %v8916_v13, %v17487_v50  ;;  %v8931_v40 = vrot.slane %v8917_v48, %v17487_v50  ;;  %v21390_v16 = vadd.f32 %v21280_v7, %v21308_v53 }
 0x823   : > { %v9391_v21 = vunpack.c.l.b16 %v9359_v11  ;;  %v9402_v26 = vsel %vm5350_vm7, %v9390_v37, %v9401_v61  ;;  %v9404_v19 = vsel %vm5348_vm6, %v9389_v25, %v9403_v2  ;;  %v8843_v44 = vmul.f32 %v21277_v1, %v21310_v62 }
 0x824   : > { %v9412_v42 = vpack.c.b16 %v9402_v26, %v9402_v26  ;;  %v8932_v41 = vcombine.high %v8924_v23, %v8924_v23  ;;  %v8933_v14 = vcombine.high %v8931_v40, %v8931_v40  ;;  %v9022_v4 = vrot.slane %v8924_v23, %v17487_v50 }
 0x825   : > { %v9405_v36 = vsel %vm5350_vm7, %v9391_v21, %v9404_v19  ;;  %v9038_v32 = vrot.slane %v8931_v40, %v17487_v50  ;;  %v21400_v7 = vadd.f32 %v21283_v31, %v8843_v44  ;;  %v9497_v56 = vshll.u32 %v21298_v0, 16 }
 0x826   : > { %v9413_v53 = vpack.c.b16 %v9405_v36, %v9405_v36  ;;  %v9023_v46 = vcombine.high %v9022_v4, %v9022_v4  ;;  %v9030_v15 = vrot.slane %v8932_v41, %v17487_v50  ;;  %v9046_v1 = vrot.slane %v8933_v14, %v17487_v50 }
 0x827   : > { %v9039_v24 = vcombine.high %v9038_v32, %v9038_v32  ;;  %v9224_v62 = vsel %vm6881_vm2, %v9022_v4, -inf  ;;  %v9417_v10 = vshrl.u32 %v9412_v42, 16  ;;  %v9494_v3 = vor.u32 %v21312_v35, %v21300_v58 }
 0x828   : > { %v9424_v17 = vshrl.u32 %v9413_v53, 16  ;;  %v9225_v18 = vrot.slane %v9224_v62, 4  ;;  %v9031_v45 = vcombine.high %v9030_v15, %v9030_v15  ;;  %v9231_v31 = vsel %vm6881_vm2, %v9023_v46, -inf }
 0x829   : > { %v9238_v54 = vsel %vm6881_vm2, %v9030_v15, -inf  ;;  %v8870_v49 = vmax.f32 %v21390_v16, 0.0  ;;  %v9420_v27 = vshll.u32 %v9412_v42, 16  ;;  %v9047_v20 = vcombine.high %v9046_v1, %v9046_v1 }
 0x82a   : > { %v9226_v55 = vmax.f32 %v9224_v62, %v9225_v18  ;;  %v9232_v59 = vrot.slane %v9231_v31, 4  ;;  %v9239_v38 = vrot.slane %v9238_v54, 4  ;;  %v9245_v57 = vsel %vm6881_vm2, %v9031_v45, -inf }
 0x82b   : > { %v9252_v60 = vsel %vm6881_vm2, %v9038_v32, -inf  ;;  %v9259_v6 = vsel %vm6881_vm2, %v9039_v24, -inf  ;;  %v9419_v29 = vrot.slane %v9417_v10, 7  ;;  %v9426_v58 = vrot.slane %v9424_v17, 7 }
 0x82c   : > { %v9227_v35 = vrot.slane %v9226_v55, 2  ;;  %v9233_v28 = vmax.f32 %v9231_v31, %v9232_v59  ;;  %v9240_v9 = vmax.f32 %v9238_v54, %v9239_v38  ;;  %v9246_v43 = vrot.slane %v9245_v57, 4 }
 0x82d   : > { %v9253_v51 = vrot.slane %v9252_v60, 4  ;;  %v9260_v5 = vrot.slane %v9259_v6, 4  ;;  %v9266_v52 = vsel %vm6881_vm2, %v9046_v1, -inf  ;;  %v9273_v30 = vsel %vm6881_vm2, %v9047_v20, -inf }
 0x82e   : > { %v9228_v12 = vmax.f32 %v9226_v55, %v9227_v35  ;;  %v9234_v22 = vrot.slane %v9233_v28, 2  ;;  %v9241_v13 = vrot.slane %v9240_v9, 2  ;;  %v9247_v48 = vmax.f32 %v9245_v57, %v9246_v43 }
 0x82f   : > { %v9254_v11 = vmax.f32 %v9252_v60, %v9253_v51  ;;  %v9261_v25 = vmax.f32 %v9259_v6, %v9260_v5  ;;  %v9427_v37 = vshll.u32 %v9413_v53, 16  ;;  %v9267_v2 = vrot.slane %v9266_v52, 4 }
 0x830   : > { %v9235_v61 = vmax.f32 %v9233_v28, %v9234_v22  ;;  %v9274_v23 = vrot.slane %v9273_v30, 4  ;;  %v9242_v40 = vmax.f32 %v9240_v9, %v9241_v13  ;;  %v9248_v16 = vrot.slane %v9247_v48, 2 }
 0x831   : > { %v9255_v21 = vrot.slane %v9254_v11, 2  ;;  %v9262_v26 = vrot.slane %v9261_v25, 2  ;;  %v9422_v19 = vor.u32 %v9420_v27, %v9419_v29  ;;  %v9429_v44 = vor.u32 %v9427_v37, %v9426_v58 }
 0x832   : > { %v9268_v42 = vmax.f32 %v9266_v52, %v9267_v2  ;;  %v9275_v41 = vmax.f32 %v9273_v30, %v9274_v23  ;;  %v9229_v14 = vrot.slane %v9228_v12, 1  ;;  %v9249_v4 = vmax.f32 %v9247_v48, %v9248_v16 }
 0x833   : > { %v9256_v36 = vmax.f32 %v9254_v11, %v9255_v21  ;;  %v9263_v32 = vmax.f32 %v9261_v25, %v9262_v26  ;;  %v8871_v24 = vmax.f32 %v21400_v7, 0.0  ;;  %v21417_v53 = vrot.slane %v9497_v56, 7 }
 0x834   : > { %v9269_v46 = vrot.slane %v9268_v42, 2  ;;  %v9276_v15 = vrot.slane %v9275_v41, 2  ;;  %v9236_v1 = vrot.slane %v9235_v61, 1  ;;  %v9243_v62 = vrot.slane %v9242_v40, 1 }
 0x835   : > { %v9250_v10 = vrot.slane %v9249_v4, 1  ;;  %v21419_v17 = vrot.slane %v9494_v3, 2  ;;  %v9257_v18 = vrot.slane %v9256_v36, 1  ;;  %v8934_v31 = vcombine.low %v8870_v49, %v8871_v24 }
 0x836   : > { %v9270_v45 = vmax.f32 %v9268_v42, %v9269_v46  ;;  %v8935_v54 = vcombine.high %v8870_v49, %v8871_v24  ;;  %v9448_v27 = vsel %vm19306_vm14, 0, %v9422_v19  ;;  %v21423_v20 = vmax.f32 %v9228_v12, %v9229_v14 }
 0x837   : > { %v9264_v55 = vrot.slane %v9263_v32, 1  ;;  %v9449_v7 = vsel %vm19306_vm14, 0, %v9429_v44  ;;  %v21427_v59 = vmax.f32 %v9275_v41, %v9276_v15  ;;  %v8942_v38 = vrot.slane %v8934_v31, %v17487_v50 }
 0x838   : > { %v9271_v56 = vrot.slane %v9270_v45, 1  ;;  %v8949_v3 = vrot.slane %v8935_v54, %v17487_v50  ;;  %v21431_v57 = vmax.f32 %v9235_v61, %v9236_v1  ;;  %v21433_v60 = vmax.f32 %v9242_v40, %v9243_v62 }
 0x839   : > { %v21435_v49 = vmax.f32 %v9249_v4, %v9250_v10  ;;  %v21439_v6 = vsel %vm21256_vm11, %v9449_v7, 0  ;;  %v21441_v29 = vmax.f32 %v9256_v36, %v9257_v18  ;;  %v8950_v58 = vcombine.high %v8942_v38, %v8942_v38 }
 0x83a   : > { %v8951_v35 = vcombine.high %v8949_v3, %v8949_v3  ;;  %v21445_v28 = vsel %vm21256_vm11, %v9448_v27, 0  ;;  %v21447_v9 = vmax.f32 %v9263_v32, %v9264_v55  ;;  %v9054_v43 = vrot.slane %v8942_v38, %v17487_v50 }
 0x83b   : > { %v9070_v51 = vrot.slane %v8949_v3, %v17487_v50  ;;  %v9470_v5 = vcombine.low %v21445_v28, %v21439_v6  ;;  %v21453_v12 = vmax.f32 %v9270_v45, %v9271_v56  ;;  %v9278_v22 = vrot.slane %v21427_v59, 1 }
 0x83c   : > { %v9062_v52 = vrot.slane %v8950_v58, %v17487_v50  ;;  %v9078_v30 = vrot.slane %v8951_v35, %v17487_v50  ;;  %v9055_v13 = vcombine.high %v9054_v43, %v9054_v43  ;;  %v9280_v11 = vsel %vm6881_vm2, %v9054_v43, -inf }
 0x83d   : > { %v9071_v48 = vcombine.high %v9070_v51, %v9070_v51  ;;  %v9308_v25 = vsel %vm6881_vm2, %v9070_v51, -inf  ;;  %v9281_v2 = vrot.slane %v9280_v11, 4 }
 0x83e   : > { %v9063_v37 = vcombine.high %v9062_v52, %v9062_v52  ;;  %v9079_v61 = vcombine.high %v9078_v30, %v9078_v30  ;;  %v9294_v23 = vsel %vm6881_vm2, %v9062_v52, -inf  ;;  %v9287_v40 = vsel %vm6881_vm2, %v9055_v13, -inf }
 0x83f   : > { %v9295_v16 = vrot.slane %v9294_v23, 4  ;;  %v9309_v21 = vrot.slane %v9308_v25, 4  ;;  %v9315_v26 = vsel %vm6881_vm2, %v9071_v48, -inf  ;;  %v9282_v19 = vmax.f32 %v9280_v11, %v9281_v2 }
 0x840   : > { %v9288_v44 = vrot.slane %v9287_v40, 4  ;;  %v9301_v42 = vsel %vm6881_vm2, %v9063_v37, -inf  ;;  %v9316_v41 = vrot.slane %v9315_v26, 4  ;;  %v9322_v32 = vsel %vm6881_vm2, %v9078_v30, -inf }
 0x841   : > { %v9296_v14 = vmax.f32 %v9294_v23, %v9295_v16  ;;  %v9302_v4 = vrot.slane %v9301_v42, 4  ;;  %v9310_v36 = vmax.f32 %v9308_v25, %v9309_v21  ;;  %v9283_v46 = vrot.slane %v9282_v19, 2 }
 0x842   : > { %v9289_v15 = vmax.f32 %v9287_v40, %v9288_v44  ;;  %v9317_v24 = vmax.f32 %v9315_v26, %v9316_v41  ;;  %v9323_v1 = vrot.slane %v9322_v32, 4  ;;  %v9329_v45 = vsel %vm6881_vm2, %v9079_v61, -inf }
 0x843   : > { %v9297_v62 = vrot.slane %v9296_v14, 2  ;;  %v9303_v10 = vmax.f32 %v9301_v42, %v9302_v4  ;;  %v9311_v18 = vrot.slane %v9310_v36, 2  ;;  %v9284_v31 = vmax.f32 %v9282_v19, %v9283_v46 }
 0x844   : > { %v9290_v54 = vrot.slane %v9289_v15, 2  ;;  %v9318_v27 = vrot.slane %v9317_v24, 2  ;;  %v9324_v55 = vmax.f32 %v9322_v32, %v9323_v1  ;;  %v9330_v3 = vrot.slane %v9329_v45, 4 }
 0x845   : > { %v9298_v7 = vmax.f32 %v9296_v14, %v9297_v62  ;;  %v9304_v56 = vrot.slane %v9303_v10, 2  ;;  %v9312_v38 = vmax.f32 %v9310_v36, %v9311_v18  ;;  %v9285_v58 = vrot.slane %v9284_v31, 1 }
 0x846   : > { %v9291_v35 = vmax.f32 %v9289_v15, %v9290_v54  ;;  %v9319_v43 = vmax.f32 %v9317_v24, %v9318_v27  ;;  %v9325_v51 = vrot.slane %v9324_v55, 2  ;;  %v9331_v48 = vmax.f32 %v9329_v45, %v9330_v3 }
 0x847   : > { %v9299_v52 = vrot.slane %v9298_v7, 1  ;;  %v9305_v30 = vmax.f32 %v9303_v10, %v9304_v56  ;;  %v9313_v13 = vrot.slane %v9312_v38, 1  ;;  %v9286_v11 = vmax.f32 %v9284_v31, %v9285_v58 }
 0x848   : > { %v9292_v25 = vrot.slane %v9291_v35, 1  ;;  %v9320_v37 = vrot.slane %v9319_v43, 1  ;;  %v9326_v61 = vmax.f32 %v9324_v55, %v9325_v51  ;;  %v9332_v16 = vrot.slane %v9331_v48, 2 }
 0x849   : > { %v9300_v2 = vmax.f32 %v9298_v7, %v9299_v52  ;;  %v9306_v23 = vrot.slane %v9305_v30, 1  ;;  %v9314_v40 = vmax.f32 %v9312_v38, %v9313_v13  ;;  %vm9485_vm2 = vsmask.f32 7448 }
 0x84a   : > { %v9293_v21 = vmax.f32 %v9291_v35, %v9292_v25  ;;  %v9321_v26 = vmax.f32 %v9319_v43, %v9320_v37  ;;  %v9327_v19 = vrot.slane %v9326_v61, 1  ;;  %v9344_v44 = vmax.f32 %v21423_v20, %v9286_v11  ;;  %vm21501_vm12 = vmor %vm9484_vm3, %vm9485_vm2 }
 0x84b   : > { %v9307_v42 = vmax.f32 %v9305_v30, %v9306_v23  ;;  %v9333_v41 = vmax.f32 %v9331_v48, %v9332_v16  ;;  %v9346_v14 = vmax.f32 %v21433_v60, %v9300_v2  ;;  %v9348_v4 = vmax.f32 %v21441_v29, %v9314_v40  ;;  %v16392_v23 = vld [vmem:[%s23453_s10 + $0x200] ss:$16 sps:$4 sm:$0xff]   ;;  %v16395_v40 = vld [vmem:[%s23453_s10 + $0x208] ss:$16 sps:$4 sm:$0xff]   ;;  %v16439_v30 = vld [vmem:[%s23453_s10 + $0x2ec] ss:$16 sps:$4 sm:$0xff]  }
 0x84c   : > { %v9328_v36 = vmax.f32 %v9326_v61, %v9327_v19  ;;  %v9345_v32 = vmax.f32 %v21431_v57, %v9293_v21  ;;  %v9349_v46 = vmax.f32 %v21447_v9, %v9321_v26  ;;  %v9360_v15 = vpack.c.bf16 %v9344_v44, %v9344_v44  ;;  %v16400_v44 = vld [vmem:[%s23453_s10 + $0x224] ss:$16 sps:$4 sm:$0xff]   ;;  %v16428_v61 = vld [vmem:[%s23453_s10 + $0x2c0] ss:$16 sps:$4 sm:$0xff]  }
 0x84d   : > { %v9334_v24 = vrot.slane %v9333_v41, 1  ;;  %v9347_v1 = vmax.f32 %v21435_v49, %v9307_v42  ;;  %v9362_v62 = vpack.c.bf16 %v9346_v14, %v9346_v14  ;;  %v9364_v10 = vpack.c.bf16 %v9348_v4, %v9348_v4  ;;  %v16403_v42 = vld [vmem:[%s23453_s10 + $0x22c] ss:$16 sps:$4 sm:$0xff]  }
 0x84e   : > { %v9279_v20 = vmax.f32 %v21427_v59, %v9278_v22  ;;  %v9350_v18 = vmax.f32 %v21453_v12, %v9328_v36  ;;  %v9361_v60 = vpack.c.bf16 %v9345_v32, %v9345_v32  ;;  %v9365_v45 = vpack.c.bf16 %v9349_v46, %v9349_v46 }
 0x84f   : > { %v9335_v57 = vmax.f32 %v9333_v41, %v9334_v24  ;;  %v9363_v29 = vpack.c.bf16 %v9347_v1, %v9347_v1  ;;  %v9392_v9 = vunpack.c.l.b16 %v9360_v15  ;;  %v9394_v31 = vunpack.c.l.b16 %v9362_v62  ;;  %v16398_v62 = vld [vmem:[%s23453_s10 + $0x220] ss:$16 sps:$4 sm:$0xff]  }
 0x850   : > { %v9366_v49 = vpack.c.bf16 %v9350_v18, %v9350_v18  ;;  %v9393_v54 = vunpack.c.l.b16 %v9361_v60  ;;  %v9396_v27 = vunpack.c.l.b16 %v9364_v10  ;;  %v21484_v59 = vrot.slane %v9470_v5, %v17487_v50  ;;  %v16406_v10 = vld [vmem:[%s23453_s10 + $0x244] ss:$16 sps:$4 sm:$0xff]  }
 0x851   : > { %v9351_v12 = vmax.f32 %v9279_v20, %v9335_v57  ;;  %v9395_v22 = vunpack.c.l.b16 %v9363_v29  ;;  %v9397_v55 = vunpack.c.l.b16 %v9365_v45  ;;  %v9406_v7 = vsel %vm5346_vm5, %v9394_v31, %v9392_v9  ;;  %v16409_v20 = vld [vmem:[%s23453_s10 + $0x24c] ss:$16 sps:$4 sm:$0xff]   ;;  %v16404_v31 = vld [vmem:[%s23453_s10 + $0x240] ss:$16 sps:$4 sm:$0xff]  }
 0x852   : > { %v9398_v56 = vunpack.c.l.b16 %v9366_v49  ;;  %v9407_v38 = vsel %vm5348_vm6, %v9396_v27, %v9406_v7  ;;  %v9558_v3 = vcombine.low %v21286_v47, %v21484_v59  ;;  %v9479_v58 = vcombine.high %v21484_v59, %v21484_v59 }
 0x853   : > { %v9367_v6 = vpack.c.bf16 %v9351_v12, %v9351_v12  ;;  %v9409_v28 = vsel %vm5346_vm5, %v9395_v22, %v9393_v54  ;;  %v9502_v5 = vshrl.u32 %v21484_v59, 16  ;;  %v9505_v35 = vshll.u32 %v21484_v59, 16  ;;  %vm21506_vm5 = vmor %vm9518_vm9, %vm5356_vm10  ;;  %v16407_v54 = vld [vmem:[%s23453_s10 + $0x248] ss:$16 sps:$4 sm:$0xff]   ;;  %v16412_v12 = vld [vmem:[%s23453_s10 + $0x264] ss:$16 sps:$4 sm:$0xff]  }
 0x854   : > { %v9408_v43 = vsel %vm5350_vm7, %v9398_v56, %v9407_v38  ;;  %v9410_v51 = vsel %vm5348_vm6, %v9397_v55, %v9409_v28  ;;  %v9565_v52 = vrot.slane %v9558_v3, %v17487_v50  ;;  %v9511_v13 = vshll.u32 %v9479_v58, 16  ;;  %v16415_v22 = vld [vmem:[%s23453_s10 + $0x26c] ss:$16 sps:$4 sm:$0xff]   ;;  %v16410_v38 = vld [vmem:[%s23453_s10 + $0x260] ss:$16 sps:$4 sm:$0xff]  }
 0x855   : > { %v9399_v48 = vunpack.c.l.b16 %v9367_v6  ;;  %v9414_v11 = vpack.c.b16 %v9408_v43, %v9408_v43  ;;  %v9504_v25 = vrot.slane %v9502_v5, 6  ;;  %v9507_v37 = vrot.slane %v9505_v35, 7  ;;  %v16416_v28 = vld [vmem:[%s23453_s10 + $0x280] ss:$16 sps:$4 sm:$0xff]  }
 0x856   : > { %v9566_v2 = vcombine.high %v9565_v52, %v9565_v52  ;;  %v14935_v16 = vrot.slane %v21484_v59, 9  ;;  %v9527_v21 = vrot.slane %v9479_v58, 7  ;;  %v21528_v4 = vsel %vm21501_vm12, %v21419_v17, %v21417_v53  ;;  %v16401_v53 = vld [vmem:[%s23453_s10 + $0x228] ss:$16 sps:$4 sm:$0xff]   ;;  %v16418_v58 = vld [vmem:[%s23453_s10 + $0x284] ss:$16 sps:$4 sm:$0xff]  }
 0x857   : > { %v9411_v26 = vsel %vm5350_vm7, %v9399_v48, %v9410_v51  ;;  %v9431_v19 = vshrl.u32 %v9414_v11, 16  ;;  %v9508_v41 = vor.u32 %v9507_v37, %v9504_v25  ;;  %v9434_v46 = vshll.u32 %v9414_v11, 16  ;;  %v16427_v25 = vld [vmem:[%s23453_s10 + $0x2ac] ss:$16 sps:$4 sm:$0xff]  }
 0x858   : > { %v9415_v14 = vpack.c.b16 %v9411_v26, %v9411_v26  ;;  %13145 = vmatprep.mubr.bf16.mxu0 %v9566_v2  ;;  %13514 = vmatprep.mubr.bf16.mxu1 %v9566_v2  ;;  %v21532_v36 = vsel %vm21506_vm5, %v14935_v16, %v9527_v21  ;;  %v9513_v24 = vrot.slane %v9511_v13, 7  ;;  %v16424_v13 = vld [vmem:[%s23453_s10 + $0x2a4] ss:$16 sps:$4 sm:$0xff]   ;;  %v14934_v48 = vrot.slane %v21286_v47, 9  ;;  %v16422_v21 = vld [vmem:[%s23453_s10 + $0x2a0] ss:$16 sps:$4 sm:$0xff]  }
 0x859   : > { %v9433_v32 = vrot.slane %v9431_v19, 7  ;;  %13146 = vmatmul.mubr.bf16.vlgmr.msra.gmra.mrb[96].mxu0 %v9565_v52  ;;  %13515 = vmatmul.mubr.bf16.vlgmr.msra.gmra.mrb[56].mxu1 %v9565_v52  ;;  %v9509_v15 = vrot.slane %v9508_v41, 2  ;;  %v16419_v52 = vld [vmem:[%s23453_s10 + $0x288] ss:$16 sps:$4 sm:$0xff]   ;;  %v9523_v11 = vrot.slane %v21298_v0, 7  ;;  %vm14591_vm6 = vcmask 319488  }
 0x85a   : > { %v9438_v1 = vshrl.u32 %v9415_v14, 16  ;;  %13155 = vmatpush1.bf16.msra.mxu0 %v16392_v23  ;;  %13524 = vmatpush1.bf16.msra.mxu1 %v16395_v40  ;;  %v9441_v45 = vshll.u32 %v9415_v14, 16  ;;  %v16425_v0 = vld [vmem:[%s23453_s10 + $0x2a8] ss:$16 sps:$4 sm:$0xff]   ;;  %v16430_v19 = vld [vmem:[%s23453_s10 + $0x2c4] ss:$16 sps:$4 sm:$0xff]  }
 0x85b   : > { %v9436_v17 = vor.u32 %v9434_v46, %v9433_v32  ;;  %13156 = vmatprep.subr.bf16.mxu0 %v16400_v44  ;;  %13525 = vmatprep.subr.bf16.mxu1 %v16403_v42  ;;  %v21548_v18 = vsel %vm21501_vm12, %v9509_v15, %v9513_v24  ;;  %v21624_v44 = vsel %vm21506_vm5, %v14934_v48, %v9523_v11  ;;  %v16433_v41 = vld [vmem:[%s23453_s10 + $0x2cc] ss:$16 sps:$4 sm:$0xff]   ;;  %v16478_v48 = vld [vmem:[%s23453_s10 + $0x3c4] ss:$16 sps:$4 sm:$0xff]  }
 0x85c   : > { %v9440_v60 = vrot.slane %v9438_v1, 7  ;;  %v9569_v57 = vcombine.low %v21528_v4, %v21548_v18  ;;  %v16431_v1 = vld [vmem:[%s23453_s10 + $0x2c8] ss:$16 sps:$4 sm:$0xff]   ;;  %v16481_v11 = vld [vmem:[%s23453_s10 + $0x3cc] ss:$16 sps:$4 sm:$0xff]  }
 0x85d   : > { %v9450_v9 = vsel %vm19306_vm14, 0, %v9436_v17 }
 0x85e   : > { %v9443_v29 = vor.u32 %v9441_v45, %v9440_v60  ;;  %13157 = vmatpush1.bf16.msra.mxu0 %v16398_v62  ;;  %13526 = vmatpush1.bf16.msra.mxu1 %v16401_v53  ;;  %v21558_v49 = vrot.slane %v9569_v57, %v17487_v50  ;;  %v9457_v7 = vsel %vm21256_vm11, %v9450_v9, 0  ;;  %v16436_v62 = vld [vmem:[%s23453_s10 + $0x2e4] ss:$16 sps:$4 sm:$0xff]   ;;  %v16445_v45 = vld [vmem:[%s23453_s10 + $0x30c] ss:$16 sps:$4 sm:$0xff]  }
 0x85f   : > { %13158 = vmatprep.subr.bf16.mxu0 %v16406_v10  ;;  %13527 = vmatprep.subr.bf16.mxu1 %v16409_v20  ;;  %v16434_v10 = vld [vmem:[%s23453_s10 + $0x2e0] ss:$16 sps:$4 sm:$0xff]   ;;  %v16437_v20 = vld [vmem:[%s23453_s10 + $0x2e8] ss:$16 sps:$4 sm:$0xff]   ;;  %v16442_v60 = vld [vmem:[%s23453_s10 + $0x304] ss:$16 sps:$4 sm:$0xff]  }
 0x860   : > { %v9577_v27 = vcombine.high %v21558_v49, %v21558_v49  ;;  %v9451_v55 = vsel %vm19306_vm14, 0, %v9443_v29  ;;  %v16440_v57 = vld [vmem:[%s23453_s10 + $0x300] ss:$16 sps:$4 sm:$0xff]   ;;  %v16443_v29 = vld [vmem:[%s23453_s10 + $0x308] ss:$16 sps:$4 sm:$0xff]  }
 0x861   : > { %v9458_v56 = vsel %vm21256_vm11, %v9451_v55, 0  ;;  %v16448_v9 = vld [vmem:[%s23453_s10 + $0x324] ss:$16 sps:$4 sm:$0xff]   ;;  %v16452_v55 = vld [vmem:[%s23453_s10 + $0x340] ss:$16 sps:$4 sm:$0xff]  }
 0x862   : > { %13159 = vmatpush1.bf16.msra.mxu0 %v16404_v31  ;;  %13186 = vmatprep.mubr.bf16.mxu0 %v9577_v27  ;;  %v9531_v3 = vcombine.low %v9457_v7, %v9458_v56  ;;  %v16451_v31 = vld [vmem:[%s23453_s10 + $0x32c] ss:$16 sps:$4 sm:$0xff]   ;;  %v16455_v7 = vld [vmem:[%s23453_s10 + $0x348] ss:$16 sps:$4 sm:$0xff]   ;;  %v16460_v56 = vld [vmem:[%s23453_s10 + $0x364] ss:$16 sps:$4 sm:$0xff]  }
 0x863   : > { %13528 = vmatpush1.bf16.msra.mxu1 %v16407_v54  ;;  %13555 = vmatprep.mubr.bf16.mxu1 %v9577_v27  ;;  %v16446_v54 = vld [vmem:[%s23453_s10 + $0x320] ss:$16 sps:$4 sm:$0xff]   ;;  %v16449_v27 = vld [vmem:[%s23453_s10 + $0x328] ss:$16 sps:$4 sm:$0xff]  }
 0x864   : > { %13160 = vmatprep.subr.bf16.mxu0 %v16412_v12  ;;  %13529 = vmatprep.subr.bf16.mxu1 %v16415_v22  ;;  %v21590_v6 = vrot.slane %v9531_v3, %v17487_v50  ;;  %v16454_v12 = vld [vmem:[%s23453_s10 + $0x344] ss:$16 sps:$4 sm:$0xff]   ;;  %v16457_v22 = vld [vmem:[%s23453_s10 + $0x34c] ss:$16 sps:$4 sm:$0xff]   ;;  %v16458_v3 = vld [vmem:[%s23453_s10 + $0x360] ss:$16 sps:$4 sm:$0xff]  }
 0x866   : > { %13161 = vmatpush1.bf16.msra.mxu0 %v16410_v38  ;;  %v9591_v5 = vcombine.low %v21484_v59, %v21590_v6  ;;  %v9539_v35 = vcombine.high %v21590_v6, %v21590_v6  ;;  %v9541_v43 = vshrl.u32 %v21590_v6, 16  ;;  %v9544_v51 = vshll.u32 %v21590_v6, 16  ;;  %v16463_v38 = vld [vmem:[%s23453_s10 + $0x36c] ss:$16 sps:$4 sm:$0xff]  }
 0x867   : > { %13530 = vmatpush1.bf16.msra.mxu1 %v16413_v8  ;;  %13162 = vmatprep.subr.bf16.mxu0 %v16418_v58  ;;  %v14936_v40 = vrot.slane %v21590_v6, 9  ;;  %v16461_v8 = vld [vmem:[%s23453_s10 + $0x368] ss:$16 sps:$4 sm:$0xff]   ;;  %v16466_v58 = vld [vmem:[%s23453_s10 + $0x384] ss:$16 sps:$4 sm:$0xff]  }
 0x868   : > { %13531 = vmatprep.subr.bf16.mxu1 %v16421_v63  ;;  %v9543_v37 = vrot.slane %v9541_v43, 6  ;;  %v9546_v2 = vrot.slane %v9544_v51, 7  ;;  %v9550_v23 = vshll.u32 %v9539_v35, 16  ;;  %v9556_v16 = vrot.slane %v9539_v35, 7  ;;  %v16469_v63 = vld [vmem:[%s23453_s10 + $0x38c] ss:$16 sps:$4 sm:$0xff]  }
 0x869   : > { %v16467_v35 = vld [vmem:[%s23453_s10 + $0x388] ss:$16 sps:$4 sm:$0xff]   ;;  %v16472_v43 = vld [vmem:[%s23453_s10 + $0x3a4] ss:$16 sps:$4 sm:$0xff]   ;;  %v16475_v51 = vld [vmem:[%s23453_s10 + $0x3ac] ss:$16 sps:$4 sm:$0xff]  }
 0x86a   : > { %13163 = vmatpush1.bf16.msra.mxu0 %v16416_v28  ;;  %v9547_v26 = vor.u32 %v9546_v2, %v9543_v37  ;;  %v21628_v42 = vsel %vm21506_vm5, %v14936_v40, %v9556_v16  ;;  %v9552_v32 = vrot.slane %v9550_v23, 7  ;;  %v16464_v28 = vld [vmem:[%s23453_s10 + $0x380] ss:$16 sps:$4 sm:$0xff]   ;;  %v16479_v37 = vld [vmem:[%s23453_s10 + $0x3c8] ss:$16 sps:$4 sm:$0xff]   ;;  %v9580_v40 = vcombine.low %v21624_v44, %v21532_v36 }
 0x86b   : > { %13532 = vmatpush1.bf16.msra.mxu1 %v16419_v52  ;;  %13164 = vmatprep.subr.bf16.mxu0 %v16424_v13  ;;  %v9613_v46 = vcombine.low %v21532_v36, %v21628_v42  ;;  %v9646_v15 = vcombine.low %v21628_v42, %v21624_v44  ;;  %v16470_v52 = vld [vmem:[%s23453_s10 + $0x3a0] ss:$16 sps:$4 sm:$0xff]   ;;  %v16473_v13 = vld [vmem:[%s23453_s10 + $0x3a8] ss:$16 sps:$4 sm:$0xff]   ;;  %v16484_v2 = vld [vmem:[%s23453_s10 + $0x3e4] ss:$16 sps:$4 sm:$0xff]  }
 0x86c   : > { %13533 = vmatprep.subr.bf16.mxu1 %v16427_v25  ;;  %v9548_v14 = vrot.slane %v9547_v26, 2  ;;  %v16476_v25 = vld [vmem:[%s23453_s10 + $0x3c0] ss:$16 sps:$4 sm:$0xff]   ;;  %v16487_v23 = vld [vmem:[%s23453_s10 + $0x3ec] ss:$16 sps:$4 sm:$0xff]  }
 0x86d   : > { %v16482_v16 = vld [vmem:[%s23453_s10 + $0x3e0] ss:$16 sps:$4 sm:$0xff]   ;;  %v16490_v26 = vld [vmem:[%s23453_s10 + $0x404] ss:$16 sps:$4 sm:$0xff]   ;;  %v17075_v44 = vld [vmem:[%s23453_s10 + $0x102c] ss:$16 sps:$4 sm:$0xff]  }
 0x86e   : > { %13165 = vmatpush1.bf16.msra.mxu0 %v16422_v21  ;;  %v21642_v24 = vsel %vm21501_vm12, %v9548_v14, %v9552_v32  ;;  %v16485_v21 = vld [vmem:[%s23453_s10 + $0x3e8] ss:$16 sps:$4 sm:$0xff]   ;;  %v16496_v32 = vld [vmem:[%s23453_s10 + $0x424] ss:$16 sps:$4 sm:$0xff]   ;;  %v17070_v42 = vld [vmem:[%s23453_s10 + $0x1020] ss:$16 sps:$4 sm:$0xff]  }
 0x86f   : > { %13534 = vmatpush1.bf16.msra.mxu1 %v16425_v0  ;;  %13166 = vmatprep.subr.bf16.mxu0 %v16430_v19  ;;  %v9602_v53 = vcombine.low %v21548_v18, %v21642_v24  ;;  %v9635_v17 = vcombine.low %v21642_v24, %v21528_v4  ;;  %v16493_v0 = vld [vmem:[%s23453_s10 + $0x40c] ss:$16 sps:$4 sm:$0xff]   ;;  %v21768_v19 = vrot.slane %v9580_v40, %v17487_v50  ;;  %v16491_v14 = vld [vmem:[%s23453_s10 + $0x408] ss:$16 sps:$4 sm:$0xff]  }
 0x870   : > { %13535 = vmatprep.subr.bf16.mxu1 %v16433_v41  ;;  %v16488_v41 = vld [vmem:[%s23453_s10 + $0x400] ss:$16 sps:$4 sm:$0xff]   ;;  %v16553_v40 = vld [vmem:[%s23453_s10 + $0x54c] ss:$16 sps:$4 sm:$0xff]  }
 0x871   : > { %v16979_v24 = vld [vmem:[%s23453_s10 + $0xe2c] ss:$16 sps:$4 sm:$0xff]  }
 0x872   : > { %13167 = vmatpush1.bf16.msra.mxu0 %v16428_v61  ;;  %v9588_v61 = vcombine.high %v21768_v19, %v21768_v19 }
 0x873   : > { %13536 = vmatpush1.bf16.msra.mxu1 %v16431_v1  ;;  %13168 = vmatprep.subr.bf16.mxu0 %v16436_v62  ;;  %v16499_v1 = vld [vmem:[%s23453_s10 + $0x42c] ss:$16 sps:$4 sm:$0xff]   ;;  %v16494_v62 = vld [vmem:[%s23453_s10 + $0x420] ss:$16 sps:$4 sm:$0xff]  }
 0x874   : > { %13537 = vmatprep.subr.bf16.mxu1 %v16439_v30  ;;  %v16497_v30 = vld [vmem:[%s23453_s10 + $0x428] ss:$16 sps:$4 sm:$0xff]  }
 0x876   : > { %13169 = vmatpush1.bf16.msra.mxu0 %v16434_v10  ;;  %v16502_v10 = vld [vmem:[%s23453_s10 + $0x444] ss:$16 sps:$4 sm:$0xff]  }
 0x877   : > { %13538 = vmatpush1.bf16.msra.mxu1 %v16437_v20  ;;  %13170 = vmatprep.subr.bf16.mxu0 %v16442_v60  ;;  %v16500_v20 = vld [vmem:[%s23453_s10 + $0x440] ss:$16 sps:$4 sm:$0xff]   ;;  %v16503_v60 = vld [vmem:[%s23453_s10 + $0x448] ss:$16 sps:$4 sm:$0xff]  }
 0x878   : > { %13539 = vmatprep.subr.bf16.mxu1 %v16445_v45  ;;  %v16508_v45 = vld [vmem:[%s23453_s10 + $0x464] ss:$16 sps:$4 sm:$0xff]  }
 0x87a   : > { %13171 = vmatpush1.bf16.msra.mxu0 %v16440_v57  ;;  %v16511_v57 = vld [vmem:[%s23453_s10 + $0x46c] ss:$16 sps:$4 sm:$0xff]  }
 0x87b   : > { %13540 = vmatpush1.bf16.msra.mxu1 %v16443_v29  ;;  %13172 = vmatprep.subr.bf16.mxu0 %v16448_v9  ;;  %v16506_v29 = vld [vmem:[%s23453_s10 + $0x460] ss:$16 sps:$4 sm:$0xff]   ;;  %v16509_v9 = vld [vmem:[%s23453_s10 + $0x468] ss:$16 sps:$4 sm:$0xff]  }
 0x87c   : > { %13541 = vmatprep.subr.bf16.mxu1 %v16451_v31  ;;  %v16514_v31 = vld [vmem:[%s23453_s10 + $0x484] ss:$16 sps:$4 sm:$0xff]  }
 0x87e   : > { %13173 = vmatpush1.bf16.msra.mxu0 %v16446_v54  ;;  %v16517_v54 = vld [vmem:[%s23453_s10 + $0x48c] ss:$16 sps:$4 sm:$0xff]  }
 0x87f   : > { %13542 = vmatpush1.bf16.msra.mxu1 %v16449_v27  ;;  %13174 = vmatprep.subr.bf16.mxu0 %v16454_v12  ;;  %v16512_v27 = vld [vmem:[%s23453_s10 + $0x480] ss:$16 sps:$4 sm:$0xff]   ;;  %v16515_v12 = vld [vmem:[%s23453_s10 + $0x488] ss:$16 sps:$4 sm:$0xff]  }
 0x880   : > { %13543 = vmatprep.subr.bf16.mxu1 %v16457_v22  ;;  %v16520_v22 = vld [vmem:[%s23453_s10 + $0x4a4] ss:$16 sps:$4 sm:$0xff]  }
 0x882   : > { %13175 = vmatpush1.bf16.msra.mxu0 %v16452_v55  ;;  %v16523_v55 = vld [vmem:[%s23453_s10 + $0x4ac] ss:$16 sps:$4 sm:$0xff]  }
 0x883   : > { %13544 = vmatpush1.bf16.msra.mxu1 %v16455_v7  ;;  %13176 = vmatprep.subr.bf16.mxu0 %v16460_v56  ;;  %v16518_v7 = vld [vmem:[%s23453_s10 + $0x4a0] ss:$16 sps:$4 sm:$0xff]   ;;  %v16521_v56 = vld [vmem:[%s23453_s10 + $0x4a8] ss:$16 sps:$4 sm:$0xff]  }
 0x884   : > { %13545 = vmatprep.subr.bf16.mxu1 %v16463_v38  ;;  %v16526_v38 = vld [vmem:[%s23453_s10 + $0x4c4] ss:$16 sps:$4 sm:$0xff]  }
 0x886   : > { %13177 = vmatpush1.bf16.msra.mxu0 %v16458_v3  ;;  %v16529_v3 = vld [vmem:[%s23453_s10 + $0x4cc] ss:$16 sps:$4 sm:$0xff]  }
 0x887   : > { %13546 = vmatpush1.bf16.msra.mxu1 %v16461_v8  ;;  %13178 = vmatprep.subr.bf16.mxu0 %v16466_v58  ;;  %v16524_v8 = vld [vmem:[%s23453_s10 + $0x4c0] ss:$16 sps:$4 sm:$0xff]   ;;  %v16527_v58 = vld [vmem:[%s23453_s10 + $0x4c8] ss:$16 sps:$4 sm:$0xff]  }
 0x888   : > { %13547 = vmatprep.subr.bf16.mxu1 %v16469_v63  ;;  %v16532_v63 = vld [vmem:[%s23453_s10 + $0x4e4] ss:$16 sps:$4 sm:$0xff]  }
 0x88a   : > { %13179 = vmatpush1.bf16.msra.mxu0 %v16464_v28  ;;  %v16535_v28 = vld [vmem:[%s23453_s10 + $0x4ec] ss:$16 sps:$4 sm:$0xff]  }
 0x88b   : > { %13548 = vmatpush1.bf16.msra.mxu1 %v16467_v35  ;;  %13180 = vmatprep.subr.bf16.mxu0 %v16472_v43  ;;  %v16530_v35 = vld [vmem:[%s23453_s10 + $0x4e0] ss:$16 sps:$4 sm:$0xff]   ;;  %v16533_v43 = vld [vmem:[%s23453_s10 + $0x4e8] ss:$16 sps:$4 sm:$0xff]  }
 0x88c   : > { %13549 = vmatprep.subr.bf16.mxu1 %v16475_v51  ;;  %v16538_v51 = vld [vmem:[%s23453_s10 + $0x504] ss:$16 sps:$4 sm:$0xff]  }
 0x88e   : > { %13181 = vmatpush1.bf16.msra.mxu0 %v16470_v52  ;;  %v16541_v52 = vld [vmem:[%s23453_s10 + $0x50c] ss:$16 sps:$4 sm:$0xff]  }
 0x88f   : > { %13550 = vmatpush1.bf16.msra.mxu1 %v16473_v13  ;;  %13182 = vmatprep.subr.bf16.mxu0 %v16478_v48  ;;  %v16536_v13 = vld [vmem:[%s23453_s10 + $0x500] ss:$16 sps:$4 sm:$0xff]   ;;  %v16539_v48 = vld [vmem:[%s23453_s10 + $0x508] ss:$16 sps:$4 sm:$0xff]  }
 0x890   : > { %13551 = vmatprep.subr.bf16.mxu1 %v16481_v11  ;;  %v16544_v11 = vld [vmem:[%s23453_s10 + $0x524] ss:$16 sps:$4 sm:$0xff]  }
 0x892   : > { %13183 = vmatpush1.bf16.msra.mxu0 %v16476_v25  ;;  %v16547_v25 = vld [vmem:[%s23453_s10 + $0x52c] ss:$16 sps:$4 sm:$0xff]  }
 0x893   : > { %13552 = vmatpush1.bf16.msra.mxu1 %v16479_v37  ;;  %13184 = vmatprep.subr.bf16.mxu0 %v16484_v2  ;;  %v16542_v37 = vld [vmem:[%s23453_s10 + $0x520] ss:$16 sps:$4 sm:$0xff]   ;;  %v16545_v2 = vld [vmem:[%s23453_s10 + $0x528] ss:$16 sps:$4 sm:$0xff]  }
 0x894   : > { %13553 = vmatprep.subr.bf16.mxu1 %v16487_v23  ;;  %v16550_v23 = vld [vmem:[%s23453_s10 + $0x544] ss:$16 sps:$4 sm:$0xff]  }
 0x896   : > { %13185 = vmatpush1.bf16.msra.mxu0 %v16482_v16  ;;  %v16548_v16 = vld [vmem:[%s23453_s10 + $0x540] ss:$16 sps:$4 sm:$0xff]  }
 0x897   : > { %13554 = vmatpush1.bf16.msra.mxu1 %v16485_v21  ;;  %13195 = vmatprep.subr.bf16.mxu0 %v16490_v26  ;;  %v16551_v21 = vld [vmem:[%s23453_s10 + $0x548] ss:$16 sps:$4 sm:$0xff]   ;;  %v16556_v26 = vld [vmem:[%s23453_s10 + $0x564] ss:$16 sps:$4 sm:$0xff]  }
 0x898   : > { %13564 = vmatprep.subr.bf16.mxu1 %v16493_v0  ;;  %v16559_v0 = vld [vmem:[%s23453_s10 + $0x56c] ss:$16 sps:$4 sm:$0xff]  }
 0x899   : > { %13187 = vmatmul.mubr.bf16.vlgmr.msra.gmra.mrb[96].mxu0 %v21558_v49 }
 0x89a   : > { %13556 = vmatmul.mubr.bf16.vlgmr.msra.gmra.mrb[56].mxu1 %v21558_v49  ;;  %13196 = vmatpush1.bf16.msra.mxu0 %v16488_v41  ;;  %v16505_v49 = vld [vmem:[%s23453_s10 + $0x44c] ss:$16 sps:$4 sm:$0xff]   ;;  %v16554_v41 = vld [vmem:[%s23453_s10 + $0x560] ss:$16 sps:$4 sm:$0xff]  }
 0x89b   : > { %13227 = vmatprep.mubr.bf16.mxu0 %v9588_v61  ;;  %13565 = vmatpush1.bf16.msra.mxu1 %v16491_v14  ;;  %v16557_v14 = vld [vmem:[%s23453_s10 + $0x568] ss:$16 sps:$4 sm:$0xff]  }
 0x89c   : > { %13596 = vmatprep.mubr.bf16.mxu1 %v9588_v61  ;;  %13197 = vmatprep.subr.bf16.mxu0 %v16496_v32  ;;  %v16562_v32 = vld [vmem:[%s23453_s10 + $0x584] ss:$16 sps:$4 sm:$0xff]   ;;  %v16565_v61 = vld [vmem:[%s23453_s10 + $0x58c] ss:$16 sps:$4 sm:$0xff]  }
 0x89d   : > { %13566 = vmatprep.subr.bf16.mxu1 %v16499_v1  ;;  %v16560_v1 = vld [vmem:[%s23453_s10 + $0x580] ss:$16 sps:$4 sm:$0xff]  }
 0x89e   : > { %13198 = vmatpush1.bf16.msra.mxu0 %v16494_v62  ;;  %v16563_v62 = vld [vmem:[%s23453_s10 + $0x588] ss:$16 sps:$4 sm:$0xff]  }
 0x89f   : > { %13567 = vmatpush1.bf16.msra.mxu1 %v16497_v30  ;;  %13199 = vmatprep.subr.bf16.mxu0 %v16502_v10  ;;  %v16568_v30 = vld [vmem:[%s23453_s10 + $0x5a4] ss:$16 sps:$4 sm:$0xff]   ;;  %v16571_v10 = vld [vmem:[%s23453_s10 + $0x5ac] ss:$16 sps:$4 sm:$0xff]  }
 0x8a0   : > { %13568 = vmatprep.subr.bf16.mxu1 %v16505_v49  ;;  %v16566_v49 = vld [vmem:[%s23453_s10 + $0x5a0] ss:$16 sps:$4 sm:$0xff]  }
 0x8a2   : > { %13200 = vmatpush1.bf16.msra.mxu0 %v16500_v20  ;;  %v16569_v20 = vld [vmem:[%s23453_s10 + $0x5a8] ss:$16 sps:$4 sm:$0xff]  }
 0x8a3   : > { %13569 = vmatpush1.bf16.msra.mxu1 %v16503_v60  ;;  %13201 = vmatprep.subr.bf16.mxu0 %v16508_v45  ;;  %v16574_v60 = vld [vmem:[%s23453_s10 + $0x5c4] ss:$16 sps:$4 sm:$0xff]   ;;  %v16577_v45 = vld [vmem:[%s23453_s10 + $0x5cc] ss:$16 sps:$4 sm:$0xff]  }
 0x8a4   : > { %13570 = vmatprep.subr.bf16.mxu1 %v16511_v57  ;;  %v16572_v57 = vld [vmem:[%s23453_s10 + $0x5c0] ss:$16 sps:$4 sm:$0xff]  }
 0x8a6   : > { %13202 = vmatpush1.bf16.msra.mxu0 %v16506_v29  ;;  %v16575_v29 = vld [vmem:[%s23453_s10 + $0x5c8] ss:$16 sps:$4 sm:$0xff]  }
 0x8a7   : > { %13571 = vmatpush1.bf16.msra.mxu1 %v16509_v9  ;;  %13203 = vmatprep.subr.bf16.mxu0 %v16514_v31  ;;  %v16580_v9 = vld [vmem:[%s23453_s10 + $0x5e4] ss:$16 sps:$4 sm:$0xff]   ;;  %v16583_v31 = vld [vmem:[%s23453_s10 + $0x5ec] ss:$16 sps:$4 sm:$0xff]  }
 0x8a8   : > { %13572 = vmatprep.subr.bf16.mxu1 %v16517_v54  ;;  %v16578_v54 = vld [vmem:[%s23453_s10 + $0x5e0] ss:$16 sps:$4 sm:$0xff]  }
 0x8aa   : > { %13204 = vmatpush1.bf16.msra.mxu0 %v16512_v27  ;;  %v16581_v27 = vld [vmem:[%s23453_s10 + $0x5e8] ss:$16 sps:$4 sm:$0xff]  }
 0x8ab   : > { %13573 = vmatpush1.bf16.msra.mxu1 %v16515_v12  ;;  %13205 = vmatprep.subr.bf16.mxu0 %v16520_v22  ;;  %v16586_v12 = vld [vmem:[%s23453_s10 + $0x604] ss:$16 sps:$4 sm:$0xff]   ;;  %v16589_v22 = vld [vmem:[%s23453_s10 + $0x60c] ss:$16 sps:$4 sm:$0xff]  }
 0x8ac   : > { %13574 = vmatprep.subr.bf16.mxu1 %v16523_v55  ;;  %v21970_v55 = vrot.slane %v9591_v5, %v17487_v50  ;;  %v16595_v5 = vld [vmem:[%s23453_s10 + $0x62c] ss:$16 sps:$4 sm:$0xff]  }
 0x8ae   : > { %13206 = vmatpush1.bf16.msra.mxu0 %v16518_v7  ;;  %v16584_v7 = vld [vmem:[%s23453_s10 + $0x600] ss:$16 sps:$4 sm:$0xff]   ;;  %v9599_v59 = vcombine.high %v21970_v55, %v21970_v55 }
 0x8af   : > { %13575 = vmatpush1.bf16.msra.mxu1 %v16521_v56  ;;  %13207 = vmatprep.subr.bf16.mxu0 %v16526_v38  ;;  %v16587_v56 = vld [vmem:[%s23453_s10 + $0x608] ss:$16 sps:$4 sm:$0xff]   ;;  %v16592_v38 = vld [vmem:[%s23453_s10 + $0x624] ss:$16 sps:$4 sm:$0xff]  }
 0x8b0   : > { %13576 = vmatprep.subr.bf16.mxu1 %v16529_v3  ;;  %v16590_v3 = vld [vmem:[%s23453_s10 + $0x620] ss:$16 sps:$4 sm:$0xff]  }
 0x8b2   : > { %13208 = vmatpush1.bf16.msra.mxu0 %v16524_v8  ;;  %v16593_v8 = vld [vmem:[%s23453_s10 + $0x628] ss:$16 sps:$4 sm:$0xff]  }
 0x8b3   : > { %13577 = vmatpush1.bf16.msra.mxu1 %v16527_v58  ;;  %13209 = vmatprep.subr.bf16.mxu0 %v16532_v63  ;;  %v16598_v58 = vld [vmem:[%s23453_s10 + $0x644] ss:$16 sps:$4 sm:$0xff]   ;;  %v16596_v63 = vld [vmem:[%s23453_s10 + $0x640] ss:$16 sps:$4 sm:$0xff]  }
 0x8b4   : > { %13578 = vmatprep.subr.bf16.mxu1 %v16535_v28  ;;  %v16599_v28 = vld [vmem:[%s23453_s10 + $0x648] ss:$16 sps:$4 sm:$0xff]  }
 0x8b6   : > { %13210 = vmatpush1.bf16.msra.mxu0 %v16530_v35  ;;  %v16604_v35 = vld [vmem:[%s23453_s10 + $0x664] ss:$16 sps:$4 sm:$0xff]  }
 0x8b7   : > { %13579 = vmatpush1.bf16.msra.mxu1 %v16533_v43  ;;  %13211 = vmatprep.subr.bf16.mxu0 %v16538_v51  ;;  %v16607_v43 = vld [vmem:[%s23453_s10 + $0x66c] ss:$16 sps:$4 sm:$0xff]   ;;  %v16602_v51 = vld [vmem:[%s23453_s10 + $0x660] ss:$16 sps:$4 sm:$0xff]  }
 0x8b8   : > { %13580 = vmatprep.subr.bf16.mxu1 %v16541_v52  ;;  %v16605_v52 = vld [vmem:[%s23453_s10 + $0x668] ss:$16 sps:$4 sm:$0xff]  }
 0x8ba   : > { %13212 = vmatpush1.bf16.msra.mxu0 %v16536_v13  ;;  %v16610_v13 = vld [vmem:[%s23453_s10 + $0x684] ss:$16 sps:$4 sm:$0xff]  }
 0x8bb   : > { %13581 = vmatpush1.bf16.msra.mxu1 %v16539_v48  ;;  %13213 = vmatprep.subr.bf16.mxu0 %v16544_v11  ;;  %v16613_v48 = vld [vmem:[%s23453_s10 + $0x68c] ss:$16 sps:$4 sm:$0xff]   ;;  %v16608_v11 = vld [vmem:[%s23453_s10 + $0x680] ss:$16 sps:$4 sm:$0xff]  }
 0x8bc   : > { %13582 = vmatprep.subr.bf16.mxu1 %v16547_v25  ;;  %v16611_v25 = vld [vmem:[%s23453_s10 + $0x688] ss:$16 sps:$4 sm:$0xff]  }
 0x8be   : > { %13214 = vmatpush1.bf16.msra.mxu0 %v16542_v37  ;;  %v16616_v37 = vld [vmem:[%s23453_s10 + $0x6a4] ss:$16 sps:$4 sm:$0xff]  }
 0x8bf   : > { %13583 = vmatpush1.bf16.msra.mxu1 %v16545_v2  ;;  %13215 = vmatprep.subr.bf16.mxu0 %v16550_v23  ;;  %v16619_v2 = vld [vmem:[%s23453_s10 + $0x6ac] ss:$16 sps:$4 sm:$0xff]   ;;  %v16614_v23 = vld [vmem:[%s23453_s10 + $0x6a0] ss:$16 sps:$4 sm:$0xff]  }
 0x8c0   : > { %13584 = vmatprep.subr.bf16.mxu1 %v16553_v40  ;;  %v16617_v40 = vld [vmem:[%s23453_s10 + $0x6a8] ss:$16 sps:$4 sm:$0xff]  }
 0x8c2   : > { %13216 = vmatpush1.bf16.msra.mxu0 %v16548_v16  ;;  %v16622_v16 = vld [vmem:[%s23453_s10 + $0x6c4] ss:$16 sps:$4 sm:$0xff]  }
 0x8c3   : > { %13585 = vmatpush1.bf16.msra.mxu1 %v16551_v21  ;;  %13217 = vmatprep.subr.bf16.mxu0 %v16556_v26  ;;  %v16625_v21 = vld [vmem:[%s23453_s10 + $0x6cc] ss:$16 sps:$4 sm:$0xff]   ;;  %v16620_v26 = vld [vmem:[%s23453_s10 + $0x6c0] ss:$16 sps:$4 sm:$0xff]  }
 0x8c4   : > { %13586 = vmatprep.subr.bf16.mxu1 %v16559_v0  ;;  %v16623_v0 = vld [vmem:[%s23453_s10 + $0x6c8] ss:$16 sps:$4 sm:$0xff]  }
 0x8c6   : > { %13218 = vmatpush1.bf16.msra.mxu0 %v16554_v41  ;;  %v16628_v41 = vld [vmem:[%s23453_s10 + $0x6e4] ss:$16 sps:$4 sm:$0xff]  }
 0x8c7   : > { %13587 = vmatpush1.bf16.msra.mxu1 %v16557_v14  ;;  %13219 = vmatprep.subr.bf16.mxu0 %v16562_v32  ;;  %v16631_v14 = vld [vmem:[%s23453_s10 + $0x6ec] ss:$16 sps:$4 sm:$0xff]   ;;  %v16626_v32 = vld [vmem:[%s23453_s10 + $0x6e0] ss:$16 sps:$4 sm:$0xff]  }
 0x8c8   : > { %13588 = vmatprep.subr.bf16.mxu1 %v16565_v61  ;;  %v16629_v61 = vld [vmem:[%s23453_s10 + $0x6e8] ss:$16 sps:$4 sm:$0xff]  }
 0x8ca   : > { %13220 = vmatpush1.bf16.msra.mxu0 %v16560_v1  ;;  %v16634_v1 = vld [vmem:[%s23453_s10 + $0x704] ss:$16 sps:$4 sm:$0xff]  }
 0x8cb   : > { %13589 = vmatpush1.bf16.msra.mxu1 %v16563_v62  ;;  %13221 = vmatprep.subr.bf16.mxu0 %v16568_v30  ;;  %v16637_v62 = vld [vmem:[%s23453_s10 + $0x70c] ss:$16 sps:$4 sm:$0xff]   ;;  %v16632_v30 = vld [vmem:[%s23453_s10 + $0x700] ss:$16 sps:$4 sm:$0xff]  }
 0x8cc   : > { %13590 = vmatprep.subr.bf16.mxu1 %v16571_v10  ;;  %v16635_v10 = vld [vmem:[%s23453_s10 + $0x708] ss:$16 sps:$4 sm:$0xff]  }
 0x8ce   : > { %13222 = vmatpush1.bf16.msra.mxu0 %v16566_v49  ;;  %v16640_v49 = vld [vmem:[%s23453_s10 + $0x724] ss:$16 sps:$4 sm:$0xff]  }
 0x8cf   : > { %13591 = vmatpush1.bf16.msra.mxu1 %v16569_v20  ;;  %13223 = vmatprep.subr.bf16.mxu0 %v16574_v60  ;;  %v16643_v20 = vld [vmem:[%s23453_s10 + $0x72c] ss:$16 sps:$4 sm:$0xff]   ;;  %v16638_v60 = vld [vmem:[%s23453_s10 + $0x720] ss:$16 sps:$4 sm:$0xff]  }
 0x8d0   : > { %13592 = vmatprep.subr.bf16.mxu1 %v16577_v45  ;;  %v16641_v45 = vld [vmem:[%s23453_s10 + $0x728] ss:$16 sps:$4 sm:$0xff]  }
 0x8d2   : > { %13224 = vmatpush1.bf16.msra.mxu0 %v16572_v57  ;;  %v16646_v57 = vld [vmem:[%s23453_s10 + $0x744] ss:$16 sps:$4 sm:$0xff]  }
 0x8d3   : > { %13593 = vmatpush1.bf16.msra.mxu1 %v16575_v29  ;;  %13225 = vmatprep.subr.bf16.mxu0 %v16580_v9  ;;  %v16649_v29 = vld [vmem:[%s23453_s10 + $0x74c] ss:$16 sps:$4 sm:$0xff]   ;;  %v16644_v9 = vld [vmem:[%s23453_s10 + $0x740] ss:$16 sps:$4 sm:$0xff]  }
 0x8d4   : > { %13594 = vmatprep.subr.bf16.mxu1 %v16583_v31  ;;  %v16647_v31 = vld [vmem:[%s23453_s10 + $0x748] ss:$16 sps:$4 sm:$0xff]  }
 0x8d6   : > { %13226 = vmatpush1.bf16.msra.mxu0 %v16578_v54  ;;  %v16652_v54 = vld [vmem:[%s23453_s10 + $0x764] ss:$16 sps:$4 sm:$0xff]  }
 0x8d7   : > { %13595 = vmatpush1.bf16.msra.mxu1 %v16581_v27  ;;  %13236 = vmatprep.subr.bf16.mxu0 %v16586_v12  ;;  %v16655_v27 = vld [vmem:[%s23453_s10 + $0x76c] ss:$16 sps:$4 sm:$0xff]   ;;  %v16650_v12 = vld [vmem:[%s23453_s10 + $0x760] ss:$16 sps:$4 sm:$0xff]  }
 0x8d8   : > { %13605 = vmatprep.subr.bf16.mxu1 %v16589_v22  ;;  %v16653_v22 = vld [vmem:[%s23453_s10 + $0x768] ss:$16 sps:$4 sm:$0xff]  }
 0x8d9   : > { %13228 = vmatmul.mubr.bf16.vlgmr.msra.gmra.mrb[96].mxu0 %v21768_v19 }
 0x8da   : > { %13597 = vmatmul.mubr.bf16.vlgmr.msra.gmra.mrb[56].mxu1 %v21768_v19  ;;  %13237 = vmatpush1.bf16.msra.mxu0 %v16584_v7  ;;  %v16601_v19 = vld [vmem:[%s23453_s10 + $0x64c] ss:$16 sps:$4 sm:$0xff]   ;;  %v16658_v7 = vld [vmem:[%s23453_s10 + $0x784] ss:$16 sps:$4 sm:$0xff]  }
 0x8db   : > { %13268 = vmatprep.mubr.bf16.mxu0 %v9599_v59  ;;  %13606 = vmatpush1.bf16.msra.mxu1 %v16587_v56  ;;  %v16661_v56 = vld [vmem:[%s23453_s10 + $0x78c] ss:$16 sps:$4 sm:$0xff]  }
 0x8dc   : > { %13637 = vmatprep.mubr.bf16.mxu1 %v9599_v59  ;;  %13238 = vmatprep.subr.bf16.mxu0 %v16592_v38  ;;  %v16656_v38 = vld [vmem:[%s23453_s10 + $0x780] ss:$16 sps:$4 sm:$0xff]   ;;  %v16659_v59 = vld [vmem:[%s23453_s10 + $0x788] ss:$16 sps:$4 sm:$0xff]  }
 0x8dd   : > { %13607 = vmatprep.subr.bf16.mxu1 %v16595_v5  ;;  %v16664_v5 = vld [vmem:[%s23453_s10 + $0x7a4] ss:$16 sps:$4 sm:$0xff]  }
 0x8de   : > { %13239 = vmatpush1.bf16.msra.mxu0 %v16590_v3  ;;  %v16667_v3 = vld [vmem:[%s23453_s10 + $0x7ac] ss:$16 sps:$4 sm:$0xff]  }
 0x8df   : > { %13608 = vmatpush1.bf16.msra.mxu1 %v16593_v8  ;;  %13240 = vmatprep.subr.bf16.mxu0 %v16598_v58  ;;  %v16662_v8 = vld [vmem:[%s23453_s10 + $0x7a0] ss:$16 sps:$4 sm:$0xff]   ;;  %v16665_v58 = vld [vmem:[%s23453_s10 + $0x7a8] ss:$16 sps:$4 sm:$0xff]  }
 0x8e0   : > { %13609 = vmatprep.subr.bf16.mxu1 %v16601_v19  ;;  %v16670_v19 = vld [vmem:[%s23453_s10 + $0x7c4] ss:$16 sps:$4 sm:$0xff]  }
 0x8e2   : > { %13241 = vmatpush1.bf16.msra.mxu0 %v16596_v63  ;;  %v16673_v63 = vld [vmem:[%s23453_s10 + $0x7cc] ss:$16 sps:$4 sm:$0xff]  }
 0x8e3   : > { %13610 = vmatpush1.bf16.msra.mxu1 %v16599_v28  ;;  %13242 = vmatprep.subr.bf16.mxu0 %v16604_v35  ;;  %v16668_v28 = vld [vmem:[%s23453_s10 + $0x7c0] ss:$16 sps:$4 sm:$0xff]   ;;  %v16671_v35 = vld [vmem:[%s23453_s10 + $0x7c8] ss:$16 sps:$4 sm:$0xff]  }
 0x8e4   : > { %13611 = vmatprep.subr.bf16.mxu1 %v16607_v43  ;;  %v16676_v43 = vld [vmem:[%s23453_s10 + $0x7e4] ss:$16 sps:$4 sm:$0xff]  }
 0x8e6   : > { %13243 = vmatpush1.bf16.msra.mxu0 %v16602_v51  ;;  %v16679_v51 = vld [vmem:[%s23453_s10 + $0x7ec] ss:$16 sps:$4 sm:$0xff]  }
 0x8e7   : > { %13612 = vmatpush1.bf16.msra.mxu1 %v16605_v52  ;;  %13244 = vmatprep.subr.bf16.mxu0 %v16610_v13  ;;  %v16674_v52 = vld [vmem:[%s23453_s10 + $0x7e0] ss:$16 sps:$4 sm:$0xff]   ;;  %v16677_v13 = vld [vmem:[%s23453_s10 + $0x7e8] ss:$16 sps:$4 sm:$0xff]  }
 0x8e8   : > { %13613 = vmatprep.subr.bf16.mxu1 %v16613_v48  ;;  %v16682_v48 = vld [vmem:[%s23453_s10 + $0x804] ss:$16 sps:$4 sm:$0xff]  }
 0x8ea   : > { %13245 = vmatpush1.bf16.msra.mxu0 %v16608_v11  ;;  %v16685_v11 = vld [vmem:[%s23453_s10 + $0x80c] ss:$16 sps:$4 sm:$0xff]  }
 0x8eb   : > { %13614 = vmatpush1.bf16.msra.mxu1 %v16611_v25  ;;  %13246 = vmatprep.subr.bf16.mxu0 %v16616_v37  ;;  %v22172_v25 = vrot.slane %v9602_v53, %v17487_v50  ;;  %v16680_v37 = vld [vmem:[%s23453_s10 + $0x800] ss:$16 sps:$4 sm:$0xff]   ;;  %v16691_v53 = vld [vmem:[%s23453_s10 + $0x82c] ss:$16 sps:$4 sm:$0xff]  }
 0x8ec   : > { %13615 = vmatprep.subr.bf16.mxu1 %v16619_v2  ;;  %v16683_v2 = vld [vmem:[%s23453_s10 + $0x808] ss:$16 sps:$4 sm:$0xff]  }
 0x8ed   : > { %v9610_v18 = vcombine.high %v22172_v25, %v22172_v25 }
 0x8ee   : > { %13247 = vmatpush1.bf16.msra.mxu0 %v16614_v23  ;;  %v16688_v23 = vld [vmem:[%s23453_s10 + $0x824] ss:$16 sps:$4 sm:$0xff]  }
 0x8ef   : > { %13616 = vmatpush1.bf16.msra.mxu1 %v16617_v40  ;;  %13248 = vmatprep.subr.bf16.mxu0 %v16622_v16  ;;  %v16686_v40 = vld [vmem:[%s23453_s10 + $0x820] ss:$16 sps:$4 sm:$0xff]   ;;  %v16689_v16 = vld [vmem:[%s23453_s10 + $0x828] ss:$16 sps:$4 sm:$0xff]  }
 0x8f0   : > { %13617 = vmatprep.subr.bf16.mxu1 %v16625_v21  ;;  %v16694_v21 = vld [vmem:[%s23453_s10 + $0x844] ss:$16 sps:$4 sm:$0xff]  }
 0x8f2   : > { %13249 = vmatpush1.bf16.msra.mxu0 %v16620_v26  ;;  %v16692_v26 = vld [vmem:[%s23453_s10 + $0x840] ss:$16 sps:$4 sm:$0xff]  }
 0x8f3   : > { %13618 = vmatpush1.bf16.msra.mxu1 %v16623_v0  ;;  %13250 = vmatprep.subr.bf16.mxu0 %v16628_v41  ;;  %v16695_v0 = vld [vmem:[%s23453_s10 + $0x848] ss:$16 sps:$4 sm:$0xff]   ;;  %v16700_v41 = vld [vmem:[%s23453_s10 + $0x864] ss:$16 sps:$4 sm:$0xff]  }
 0x8f4   : > { %13619 = vmatprep.subr.bf16.mxu1 %v16631_v14  ;;  %v16703_v14 = vld [vmem:[%s23453_s10 + $0x86c] ss:$16 sps:$4 sm:$0xff]  }
 0x8f6   : > { %13251 = vmatpush1.bf16.msra.mxu0 %v16626_v32  ;;  %v16698_v32 = vld [vmem:[%s23453_s10 + $0x860] ss:$16 sps:$4 sm:$0xff]  }
 0x8f7   : > { %13620 = vmatpush1.bf16.msra.mxu1 %v16629_v61  ;;  %13252 = vmatprep.subr.bf16.mxu0 %v16634_v1  ;;  %v16701_v61 = vld [vmem:[%s23453_s10 + $0x868] ss:$16 sps:$4 sm:$0xff]   ;;  %v16706_v1 = vld [vmem:[%s23453_s10 + $0x884] ss:$16 sps:$4 sm:$0xff]  }
 0x8f8   : > { %13621 = vmatprep.subr.bf16.mxu1 %v16637_v62  ;;  %v16709_v62 = vld [vmem:[%s23453_s10 + $0x88c] ss:$16 sps:$4 sm:$0xff]  }
 0x8fa   : > { %13253 = vmatpush1.bf16.msra.mxu0 %v16632_v30  ;;  %v16704_v30 = vld [vmem:[%s23453_s10 + $0x880] ss:$16 sps:$4 sm:$0xff]  }
 0x8fb   : > { %13622 = vmatpush1.bf16.msra.mxu1 %v16635_v10  ;;  %13254 = vmatprep.subr.bf16.mxu0 %v16640_v49  ;;  %v16707_v10 = vld [vmem:[%s23453_s10 + $0x888] ss:$16 sps:$4 sm:$0xff]   ;;  %v16712_v49 = vld [vmem:[%s23453_s10 + $0x8a4] ss:$16 sps:$4 sm:$0xff]  }
 0x8fc   : > { %13623 = vmatprep.subr.bf16.mxu1 %v16643_v20  ;;  %v16715_v20 = vld [vmem:[%s23453_s10 + $0x8ac] ss:$16 sps:$4 sm:$0xff]  }
 0x8fe   : > { %13255 = vmatpush1.bf16.msra.mxu0 %v16638_v60  ;;  %v16710_v60 = vld [vmem:[%s23453_s10 + $0x8a0] ss:$16 sps:$4 sm:$0xff]  }
 0x8ff   : > { %13624 = vmatpush1.bf16.msra.mxu1 %v16641_v45  ;;  %13256 = vmatprep.subr.bf16.mxu0 %v16646_v57  ;;  %v16713_v45 = vld [vmem:[%s23453_s10 + $0x8a8] ss:$16 sps:$4 sm:$0xff]   ;;  %v16718_v57 = vld [vmem:[%s23453_s10 + $0x8c4] ss:$16 sps:$4 sm:$0xff]  }
 0x900   : > { %13625 = vmatprep.subr.bf16.mxu1 %v16649_v29  ;;  %v16721_v29 = vld [vmem:[%s23453_s10 + $0x8cc] ss:$16 sps:$4 sm:$0xff]  }
 0x902   : > { %13257 = vmatpush1.bf16.msra.mxu0 %v16644_v9  ;;  %v16716_v9 = vld [vmem:[%s23453_s10 + $0x8c0] ss:$16 sps:$4 sm:$0xff]  }
 0x903   : > { %13626 = vmatpush1.bf16.msra.mxu1 %v16647_v31  ;;  %13258 = vmatprep.subr.bf16.mxu0 %v16652_v54  ;;  %v16719_v31 = vld [vmem:[%s23453_s10 + $0x8c8] ss:$16 sps:$4 sm:$0xff]   ;;  %v16724_v54 = vld [vmem:[%s23453_s10 + $0x8e4] ss:$16 sps:$4 sm:$0xff]  }
 0x904   : > { %13627 = vmatprep.subr.bf16.mxu1 %v16655_v27  ;;  %v16727_v27 = vld [vmem:[%s23453_s10 + $0x8ec] ss:$16 sps:$4 sm:$0xff]  }
 0x906   : > { %13259 = vmatpush1.bf16.msra.mxu0 %v16650_v12  ;;  %v16722_v12 = vld [vmem:[%s23453_s10 + $0x8e0] ss:$16 sps:$4 sm:$0xff]  }
 0x907   : > { %13628 = vmatpush1.bf16.msra.mxu1 %v16653_v22  ;;  %13260 = vmatprep.subr.bf16.mxu0 %v16658_v7  ;;  %v16725_v22 = vld [vmem:[%s23453_s10 + $0x8e8] ss:$16 sps:$4 sm:$0xff]   ;;  %v16730_v7 = vld [vmem:[%s23453_s10 + $0x904] ss:$16 sps:$4 sm:$0xff]  }
 0x908   : > { %13629 = vmatprep.subr.bf16.mxu1 %v16661_v56  ;;  %v16733_v56 = vld [vmem:[%s23453_s10 + $0x90c] ss:$16 sps:$4 sm:$0xff]  }
 0x90a   : > { %13261 = vmatpush1.bf16.msra.mxu0 %v16656_v38  ;;  %v16728_v38 = vld [vmem:[%s23453_s10 + $0x900] ss:$16 sps:$4 sm:$0xff]  }
 0x90b   : > { %13630 = vmatpush1.bf16.msra.mxu1 %v16659_v59  ;;  %13262 = vmatprep.subr.bf16.mxu0 %v16664_v5  ;;  %v16731_v59 = vld [vmem:[%s23453_s10 + $0x908] ss:$16 sps:$4 sm:$0xff]   ;;  %v16736_v5 = vld [vmem:[%s23453_s10 + $0x924] ss:$16 sps:$4 sm:$0xff]  }
 0x90c   : > { %13631 = vmatprep.subr.bf16.mxu1 %v16667_v3  ;;  %v16739_v3 = vld [vmem:[%s23453_s10 + $0x92c] ss:$16 sps:$4 sm:$0xff]  }
 0x90e   : > { %13263 = vmatpush1.bf16.msra.mxu0 %v16662_v8  ;;  %v16734_v8 = vld [vmem:[%s23453_s10 + $0x920] ss:$16 sps:$4 sm:$0xff]  }
 0x90f   : > { %13632 = vmatpush1.bf16.msra.mxu1 %v16665_v58  ;;  %13264 = vmatprep.subr.bf16.mxu0 %v16670_v19  ;;  %v16737_v58 = vld [vmem:[%s23453_s10 + $0x928] ss:$16 sps:$4 sm:$0xff]   ;;  %v16742_v19 = vld [vmem:[%s23453_s10 + $0x944] ss:$16 sps:$4 sm:$0xff]  }
 0x910   : > { %13633 = vmatprep.subr.bf16.mxu1 %v16673_v63  ;;  %v16745_v63 = vld [vmem:[%s23453_s10 + $0x94c] ss:$16 sps:$4 sm:$0xff]  }
 0x912   : > { %13265 = vmatpush1.bf16.msra.mxu0 %v16668_v28  ;;  %v16740_v28 = vld [vmem:[%s23453_s10 + $0x940] ss:$16 sps:$4 sm:$0xff]  }
 0x913   : > { %13634 = vmatpush1.bf16.msra.mxu1 %v16671_v35  ;;  %13266 = vmatprep.subr.bf16.mxu0 %v16676_v43  ;;  %v16743_v35 = vld [vmem:[%s23453_s10 + $0x948] ss:$16 sps:$4 sm:$0xff]   ;;  %v16748_v43 = vld [vmem:[%s23453_s10 + $0x964] ss:$16 sps:$4 sm:$0xff]  }
 0x914   : > { %13635 = vmatprep.subr.bf16.mxu1 %v16679_v51  ;;  %v16751_v51 = vld [vmem:[%s23453_s10 + $0x96c] ss:$16 sps:$4 sm:$0xff]  }
 0x916   : > { %13267 = vmatpush1.bf16.msra.mxu0 %v16674_v52  ;;  %v16746_v52 = vld [vmem:[%s23453_s10 + $0x960] ss:$16 sps:$4 sm:$0xff]  }
 0x917   : > { %13636 = vmatpush1.bf16.msra.mxu1 %v16677_v13  ;;  %13277 = vmatprep.subr.bf16.mxu0 %v16682_v48  ;;  %v16749_v13 = vld [vmem:[%s23453_s10 + $0x968] ss:$16 sps:$4 sm:$0xff]   ;;  %v16754_v48 = vld [vmem:[%s23453_s10 + $0x984] ss:$16 sps:$4 sm:$0xff]  }
 0x918   : > { %13646 = vmatprep.subr.bf16.mxu1 %v16685_v11  ;;  %v16757_v11 = vld [vmem:[%s23453_s10 + $0x98c] ss:$16 sps:$4 sm:$0xff]  }
 0x919   : > { %13269 = vmatmul.mubr.bf16.vlgmr.msra.gmra.mrb[96].mxu0 %v21970_v55 }
 0x91a   : > { %13638 = vmatmul.mubr.bf16.vlgmr.msra.gmra.mrb[56].mxu1 %v21970_v55  ;;  %13278 = vmatpush1.bf16.msra.mxu0 %v16680_v37  ;;  %v16697_v55 = vld [vmem:[%s23453_s10 + $0x84c] ss:$16 sps:$4 sm:$0xff]   ;;  %v16752_v37 = vld [vmem:[%s23453_s10 + $0x980] ss:$16 sps:$4 sm:$0xff]  }
 0x91b   : > { %13309 = vmatprep.mubr.bf16.mxu0 %v9610_v18  ;;  %13647 = vmatpush1.bf16.msra.mxu1 %v16683_v2  ;;  %v16755_v2 = vld [vmem:[%s23453_s10 + $0x988] ss:$16 sps:$4 sm:$0xff]  }
 0x91c   : > { %13678 = vmatprep.mubr.bf16.mxu1 %v9610_v18  ;;  %13279 = vmatprep.subr.bf16.mxu0 %v16688_v23  ;;  %v16760_v23 = vld [vmem:[%s23453_s10 + $0x9a4] ss:$16 sps:$4 sm:$0xff]   ;;  %v16763_v18 = vld [vmem:[%s23453_s10 + $0x9ac] ss:$16 sps:$4 sm:$0xff]  }
 0x91d   : > { %13648 = vmatprep.subr.bf16.mxu1 %v16691_v53  ;;  %v16758_v53 = vld [vmem:[%s23453_s10 + $0x9a0] ss:$16 sps:$4 sm:$0xff]  }
 0x91e   : > { %13280 = vmatpush1.bf16.msra.mxu0 %v16686_v40  ;;  %v16761_v40 = vld [vmem:[%s23453_s10 + $0x9a8] ss:$16 sps:$4 sm:$0xff]  }
 0x91f   : > { %13649 = vmatpush1.bf16.msra.mxu1 %v16689_v16  ;;  %13281 = vmatprep.subr.bf16.mxu0 %v16694_v21  ;;  %v16766_v16 = vld [vmem:[%s23453_s10 + $0x9c4] ss:$16 sps:$4 sm:$0xff]   ;;  %v16769_v21 = vld [vmem:[%s23453_s10 + $0x9cc] ss:$16 sps:$4 sm:$0xff]  }
 0x920   : > { %13650 = vmatprep.subr.bf16.mxu1 %v16697_v55  ;;  %v16764_v55 = vld [vmem:[%s23453_s10 + $0x9c0] ss:$16 sps:$4 sm:$0xff]  }
 0x922   : > { %13282 = vmatpush1.bf16.msra.mxu0 %v16692_v26  ;;  %v16767_v26 = vld [vmem:[%s23453_s10 + $0x9c8] ss:$16 sps:$4 sm:$0xff]  }
 0x923   : > { %13651 = vmatpush1.bf16.msra.mxu1 %v16695_v0  ;;  %13283 = vmatprep.subr.bf16.mxu0 %v16700_v41  ;;  %v16772_v0 = vld [vmem:[%s23453_s10 + $0x9e4] ss:$16 sps:$4 sm:$0xff]   ;;  %v16775_v41 = vld [vmem:[%s23453_s10 + $0x9ec] ss:$16 sps:$4 sm:$0xff]  }
 0x924   : > { %13652 = vmatprep.subr.bf16.mxu1 %v16703_v14  ;;  %v16770_v14 = vld [vmem:[%s23453_s10 + $0x9e0] ss:$16 sps:$4 sm:$0xff]  }
 0x926   : > { %13284 = vmatpush1.bf16.msra.mxu0 %v16698_v32  ;;  %v16773_v32 = vld [vmem:[%s23453_s10 + $0x9e8] ss:$16 sps:$4 sm:$0xff]  }
 0x927   : > { %13653 = vmatpush1.bf16.msra.mxu1 %v16701_v61  ;;  %13285 = vmatprep.subr.bf16.mxu0 %v16706_v1  ;;  %v16778_v61 = vld [vmem:[%s23453_s10 + $0xa04] ss:$16 sps:$4 sm:$0xff]   ;;  %v16781_v1 = vld [vmem:[%s23453_s10 + $0xa0c] ss:$16 sps:$4 sm:$0xff]  }
 0x928   : > { %13654 = vmatprep.subr.bf16.mxu1 %v16709_v62  ;;  %v22374_v62 = vrot.slane %v9613_v46, %v17487_v50  ;;  %v16787_v46 = vld [vmem:[%s23453_s10 + $0xa2c] ss:$16 sps:$4 sm:$0xff]  }
 0x92a   : > { %13286 = vmatpush1.bf16.msra.mxu0 %v16704_v30  ;;  %v16776_v30 = vld [vmem:[%s23453_s10 + $0xa00] ss:$16 sps:$4 sm:$0xff]   ;;  %v9621_v36 = vcombine.high %v22374_v62, %v22374_v62 }
 0x92b   : > { %13655 = vmatpush1.bf16.msra.mxu1 %v16707_v10  ;;  %13287 = vmatprep.subr.bf16.mxu0 %v16712_v49  ;;  %v16779_v10 = vld [vmem:[%s23453_s10 + $0xa08] ss:$16 sps:$4 sm:$0xff]   ;;  %v16784_v49 = vld [vmem:[%s23453_s10 + $0xa24] ss:$16 sps:$4 sm:$0xff]  }
 0x92c   : > { %13656 = vmatprep.subr.bf16.mxu1 %v16715_v20  ;;  %v16782_v20 = vld [vmem:[%s23453_s10 + $0xa20] ss:$16 sps:$4 sm:$0xff]  }
 0x92e   : > { %13288 = vmatpush1.bf16.msra.mxu0 %v16710_v60  ;;  %v16785_v60 = vld [vmem:[%s23453_s10 + $0xa28] ss:$16 sps:$4 sm:$0xff]  }
 0x92f   : > { %13657 = vmatpush1.bf16.msra.mxu1 %v16713_v45  ;;  %13289 = vmatprep.subr.bf16.mxu0 %v16718_v57  ;;  %v16790_v45 = vld [vmem:[%s23453_s10 + $0xa44] ss:$16 sps:$4 sm:$0xff]   ;;  %v16788_v57 = vld [vmem:[%s23453_s10 + $0xa40] ss:$16 sps:$4 sm:$0xff]  }
 0x930   : > { %13658 = vmatprep.subr.bf16.mxu1 %v16721_v29  ;;  %v16791_v29 = vld [vmem:[%s23453_s10 + $0xa48] ss:$16 sps:$4 sm:$0xff]  }
 0x932   : > { %13290 = vmatpush1.bf16.msra.mxu0 %v16716_v9  ;;  %v16796_v9 = vld [vmem:[%s23453_s10 + $0xa64] ss:$16 sps:$4 sm:$0xff]  }
 0x933   : > { %13659 = vmatpush1.bf16.msra.mxu1 %v16719_v31  ;;  %13291 = vmatprep.subr.bf16.mxu0 %v16724_v54  ;;  %v16799_v31 = vld [vmem:[%s23453_s10 + $0xa6c] ss:$16 sps:$4 sm:$0xff]   ;;  %v16794_v54 = vld [vmem:[%s23453_s10 + $0xa60] ss:$16 sps:$4 sm:$0xff]  }
 0x934   : > { %13660 = vmatprep.subr.bf16.mxu1 %v16727_v27  ;;  %v16797_v27 = vld [vmem:[%s23453_s10 + $0xa68] ss:$16 sps:$4 sm:$0xff]  }
 0x936   : > { %13292 = vmatpush1.bf16.msra.mxu0 %v16722_v12  ;;  %v16802_v12 = vld [vmem:[%s23453_s10 + $0xa84] ss:$16 sps:$4 sm:$0xff]  }
 0x937   : > { %13661 = vmatpush1.bf16.msra.mxu1 %v16725_v22  ;;  %13293 = vmatprep.subr.bf16.mxu0 %v16730_v7  ;;  %v16805_v22 = vld [vmem:[%s23453_s10 + $0xa8c] ss:$16 sps:$4 sm:$0xff]   ;;  %v16800_v7 = vld [vmem:[%s23453_s10 + $0xa80] ss:$16 sps:$4 sm:$0xff]  }
 0x938   : > { %13662 = vmatprep.subr.bf16.mxu1 %v16733_v56  ;;  %v16803_v56 = vld [vmem:[%s23453_s10 + $0xa88] ss:$16 sps:$4 sm:$0xff]  }
 0x93a   : > { %13294 = vmatpush1.bf16.msra.mxu0 %v16728_v38  ;;  %v16808_v38 = vld [vmem:[%s23453_s10 + $0xaa4] ss:$16 sps:$4 sm:$0xff]  }
 0x93b   : > { %13663 = vmatpush1.bf16.msra.mxu1 %v16731_v59  ;;  %13295 = vmatprep.subr.bf16.mxu0 %v16736_v5  ;;  %v16811_v59 = vld [vmem:[%s23453_s10 + $0xaac] ss:$16 sps:$4 sm:$0xff]   ;;  %v16806_v5 = vld [vmem:[%s23453_s10 + $0xaa0] ss:$16 sps:$4 sm:$0xff]  }
 0x93c   : > { %13664 = vmatprep.subr.bf16.mxu1 %v16739_v3  ;;  %v16809_v3 = vld [vmem:[%s23453_s10 + $0xaa8] ss:$16 sps:$4 sm:$0xff]  }
 0x93e   : > { %13296 = vmatpush1.bf16.msra.mxu0 %v16734_v8  ;;  %v16814_v8 = vld [vmem:[%s23453_s10 + $0xac4] ss:$16 sps:$4 sm:$0xff]  }
 0x93f   : > { %13665 = vmatpush1.bf16.msra.mxu1 %v16737_v58  ;;  %13297 = vmatprep.subr.bf16.mxu0 %v16742_v19  ;;  %v16817_v58 = vld [vmem:[%s23453_s10 + $0xacc] ss:$16 sps:$4 sm:$0xff]   ;;  %v16812_v19 = vld [vmem:[%s23453_s10 + $0xac0] ss:$16 sps:$4 sm:$0xff]  }
 0x940   : > { %13666 = vmatprep.subr.bf16.mxu1 %v16745_v63  ;;  %v16815_v63 = vld [vmem:[%s23453_s10 + $0xac8] ss:$16 sps:$4 sm:$0xff]  }
 0x942   : > { %13298 = vmatpush1.bf16.msra.mxu0 %v16740_v28  ;;  %v16820_v28 = vld [vmem:[%s23453_s10 + $0xae4] ss:$16 sps:$4 sm:$0xff]  }
 0x943   : > { %13667 = vmatpush1.bf16.msra.mxu1 %v16743_v35  ;;  %13299 = vmatprep.subr.bf16.mxu0 %v16748_v43  ;;  %v16823_v35 = vld [vmem:[%s23453_s10 + $0xaec] ss:$16 sps:$4 sm:$0xff]   ;;  %v16818_v43 = vld [vmem:[%s23453_s10 + $0xae0] ss:$16 sps:$4 sm:$0xff]  }
 0x944   : > { %13668 = vmatprep.subr.bf16.mxu1 %v16751_v51  ;;  %v16821_v51 = vld [vmem:[%s23453_s10 + $0xae8] ss:$16 sps:$4 sm:$0xff]  }
 0x946   : > { %13300 = vmatpush1.bf16.msra.mxu0 %v16746_v52  ;;  %v16826_v52 = vld [vmem:[%s23453_s10 + $0xb04] ss:$16 sps:$4 sm:$0xff]  }
 0x947   : > { %13669 = vmatpush1.bf16.msra.mxu1 %v16749_v13  ;;  %13301 = vmatprep.subr.bf16.mxu0 %v16754_v48  ;;  %v16829_v13 = vld [vmem:[%s23453_s10 + $0xb0c] ss:$16 sps:$4 sm:$0xff]   ;;  %v16824_v48 = vld [vmem:[%s23453_s10 + $0xb00] ss:$16 sps:$4 sm:$0xff]  }
 0x948   : > { %13670 = vmatprep.subr.bf16.mxu1 %v16757_v11  ;;  %v16827_v11 = vld [vmem:[%s23453_s10 + $0xb08] ss:$16 sps:$4 sm:$0xff]  }
 0x94a   : > { %13302 = vmatpush1.bf16.msra.mxu0 %v16752_v37  ;;  %v16832_v37 = vld [vmem:[%s23453_s10 + $0xb24] ss:$16 sps:$4 sm:$0xff]  }
 0x94b   : > { %13671 = vmatpush1.bf16.msra.mxu1 %v16755_v2  ;;  %13303 = vmatprep.subr.bf16.mxu0 %v16760_v23  ;;  %v16835_v2 = vld [vmem:[%s23453_s10 + $0xb2c] ss:$16 sps:$4 sm:$0xff]   ;;  %v16830_v23 = vld [vmem:[%s23453_s10 + $0xb20] ss:$16 sps:$4 sm:$0xff]  }
 0x94c   : > { %13672 = vmatprep.subr.bf16.mxu1 %v16763_v18  ;;  %v16833_v18 = vld [vmem:[%s23453_s10 + $0xb28] ss:$16 sps:$4 sm:$0xff]  }
 0x94e   : > { %13304 = vmatpush1.bf16.msra.mxu0 %v16758_v53  ;;  %v16838_v53 = vld [vmem:[%s23453_s10 + $0xb44] ss:$16 sps:$4 sm:$0xff]  }
 0x94f   : > { %13673 = vmatpush1.bf16.msra.mxu1 %v16761_v40  ;;  %13305 = vmatprep.subr.bf16.mxu0 %v16766_v16  ;;  %v16841_v40 = vld [vmem:[%s23453_s10 + $0xb4c] ss:$16 sps:$4 sm:$0xff]   ;;  %v16836_v16 = vld [vmem:[%s23453_s10 + $0xb40] ss:$16 sps:$4 sm:$0xff]  }
 0x950   : > { %13674 = vmatprep.subr.bf16.mxu1 %v16769_v21  ;;  %v16839_v21 = vld [vmem:[%s23453_s10 + $0xb48] ss:$16 sps:$4 sm:$0xff]  }
 0x952   : > { %13306 = vmatpush1.bf16.msra.mxu0 %v16764_v55  ;;  %v16844_v55 = vld [vmem:[%s23453_s10 + $0xb64] ss:$16 sps:$4 sm:$0xff]  }
 0x953   : > { %13675 = vmatpush1.bf16.msra.mxu1 %v16767_v26  ;;  %13307 = vmatprep.subr.bf16.mxu0 %v16772_v0  ;;  %v16847_v26 = vld [vmem:[%s23453_s10 + $0xb6c] ss:$16 sps:$4 sm:$0xff]   ;;  %v16842_v0 = vld [vmem:[%s23453_s10 + $0xb60] ss:$16 sps:$4 sm:$0xff]  }
 0x954   : > { %13676 = vmatprep.subr.bf16.mxu1 %v16775_v41  ;;  %v16845_v41 = vld [vmem:[%s23453_s10 + $0xb68] ss:$16 sps:$4 sm:$0xff]  }
 0x956   : > { %13308 = vmatpush1.bf16.msra.mxu0 %v16770_v14  ;;  %v16850_v14 = vld [vmem:[%s23453_s10 + $0xb84] ss:$16 sps:$4 sm:$0xff]  }
 0x957   : > { %13677 = vmatpush1.bf16.msra.mxu1 %v16773_v32  ;;  %13318 = vmatprep.subr.bf16.mxu0 %v16778_v61  ;;  %v16853_v32 = vld [vmem:[%s23453_s10 + $0xb8c] ss:$16 sps:$4 sm:$0xff]   ;;  %v16848_v61 = vld [vmem:[%s23453_s10 + $0xb80] ss:$16 sps:$4 sm:$0xff]  }
 0x958   : > { %13687 = vmatprep.subr.bf16.mxu1 %v16781_v1  ;;  %v16851_v1 = vld [vmem:[%s23453_s10 + $0xb88] ss:$16 sps:$4 sm:$0xff]  }
 0x959   : > { %13310 = vmatmul.mubr.bf16.vlgmr.msra.gmra.mrb[96].mxu0 %v22172_v25 }
 0x95a   : > { %13679 = vmatmul.mubr.bf16.vlgmr.msra.gmra.mrb[56].mxu1 %v22172_v25  ;;  %13319 = vmatpush1.bf16.msra.mxu0 %v16776_v30  ;;  %v16793_v25 = vld [vmem:[%s23453_s10 + $0xa4c] ss:$16 sps:$4 sm:$0xff]   ;;  %v16856_v30 = vld [vmem:[%s23453_s10 + $0xba4] ss:$16 sps:$4 sm:$0xff]  }
 0x95b   : > { %13350 = vmatprep.mubr.bf16.mxu0 %v9621_v36  ;;  %13688 = vmatpush1.bf16.msra.mxu1 %v16779_v10  ;;  %v16859_v10 = vld [vmem:[%s23453_s10 + $0xbac] ss:$16 sps:$4 sm:$0xff]  }
 0x95c   : > { %13719 = vmatprep.mubr.bf16.mxu1 %v9621_v36  ;;  %13320 = vmatprep.subr.bf16.mxu0 %v16784_v49  ;;  %v16854_v49 = vld [vmem:[%s23453_s10 + $0xba0] ss:$16 sps:$4 sm:$0xff]   ;;  %v16857_v36 = vld [vmem:[%s23453_s10 + $0xba8] ss:$16 sps:$4 sm:$0xff]  }
 0x95d   : > { %13689 = vmatprep.subr.bf16.mxu1 %v16787_v46  ;;  %v16862_v46 = vld [vmem:[%s23453_s10 + $0xbc4] ss:$16 sps:$4 sm:$0xff]  }
 0x95e   : > { %13321 = vmatpush1.bf16.msra.mxu0 %v16782_v20  ;;  %v16865_v20 = vld [vmem:[%s23453_s10 + $0xbcc] ss:$16 sps:$4 sm:$0xff]  }
 0x95f   : > { %13690 = vmatpush1.bf16.msra.mxu1 %v16785_v60  ;;  %13322 = vmatprep.subr.bf16.mxu0 %v16790_v45  ;;  %v16860_v60 = vld [vmem:[%s23453_s10 + $0xbc0] ss:$16 sps:$4 sm:$0xff]   ;;  %v16863_v45 = vld [vmem:[%s23453_s10 + $0xbc8] ss:$16 sps:$4 sm:$0xff]  }
 0x960   : > { %13691 = vmatprep.subr.bf16.mxu1 %v16793_v25  ;;  %v16868_v25 = vld [vmem:[%s23453_s10 + $0xbe4] ss:$16 sps:$4 sm:$0xff]  }
 0x962   : > { %13323 = vmatpush1.bf16.msra.mxu0 %v16788_v57  ;;  %v16871_v57 = vld [vmem:[%s23453_s10 + $0xbec] ss:$16 sps:$4 sm:$0xff]  }
 0x963   : > { %13692 = vmatpush1.bf16.msra.mxu1 %v16791_v29  ;;  %13324 = vmatprep.subr.bf16.mxu0 %v16796_v9  ;;  %v9624_v29 = vcombine.low %v21590_v6, %v21286_v47  ;;  %v16866_v9 = vld [vmem:[%s23453_s10 + $0xbe0] ss:$16 sps:$4 sm:$0xff]   ;;  %v16877_v47 = vld [vmem:[%s23453_s10 + $0xc0c] ss:$16 sps:$4 sm:$0xff]  }
 0x964   : > { %13693 = vmatprep.subr.bf16.mxu1 %v16799_v31  ;;  %v16869_v31 = vld [vmem:[%s23453_s10 + $0xbe8] ss:$16 sps:$4 sm:$0xff]  }
 0x965   : > { %v22575_v6 = vrot.slane %v9624_v29, %v17487_v50  ;;  %v16949_v29 = vld [vmem:[%s23453_s10 + $0xd8c] ss:$16 sps:$4 sm:$0xff]  }
 0x966   : > { %13325 = vmatpush1.bf16.msra.mxu0 %v16794_v54  ;;  %v16874_v54 = vld [vmem:[%s23453_s10 + $0xc04] ss:$16 sps:$4 sm:$0xff]  }
 0x967   : > { %13694 = vmatpush1.bf16.msra.mxu1 %v16797_v27  ;;  %13326 = vmatprep.subr.bf16.mxu0 %v16802_v12  ;;  %v16872_v27 = vld [vmem:[%s23453_s10 + $0xc00] ss:$16 sps:$4 sm:$0xff]   ;;  %v16875_v12 = vld [vmem:[%s23453_s10 + $0xc08] ss:$16 sps:$4 sm:$0xff]  }
 0x968   : > { %13695 = vmatprep.subr.bf16.mxu1 %v16805_v22  ;;  %v16880_v22 = vld [vmem:[%s23453_s10 + $0xc24] ss:$16 sps:$4 sm:$0xff]  }
 0x96a   : > { %13327 = vmatpush1.bf16.msra.mxu0 %v16800_v7  ;;  %v9632_v7 = vcombine.high %v22575_v6, %v22575_v6 }
 0x96b   : > { %13696 = vmatpush1.bf16.msra.mxu1 %v16803_v56  ;;  %13328 = vmatprep.subr.bf16.mxu0 %v16808_v38  ;;  %v16883_v56 = vld [vmem:[%s23453_s10 + $0xc2c] ss:$16 sps:$4 sm:$0xff]   ;;  %v16878_v38 = vld [vmem:[%s23453_s10 + $0xc20] ss:$16 sps:$4 sm:$0xff]  }
 0x96c   : > { %13697 = vmatprep.subr.bf16.mxu1 %v16811_v59  ;;  %v16881_v59 = vld [vmem:[%s23453_s10 + $0xc28] ss:$16 sps:$4 sm:$0xff]  }
 0x96e   : > { %13329 = vmatpush1.bf16.msra.mxu0 %v16806_v5  ;;  %v16886_v5 = vld [vmem:[%s23453_s10 + $0xc44] ss:$16 sps:$4 sm:$0xff]  }
 0x96f   : > { %13698 = vmatpush1.bf16.msra.mxu1 %v16809_v3  ;;  %13330 = vmatprep.subr.bf16.mxu0 %v16814_v8  ;;  %v16884_v3 = vld [vmem:[%s23453_s10 + $0xc40] ss:$16 sps:$4 sm:$0xff]   ;;  %v16887_v8 = vld [vmem:[%s23453_s10 + $0xc48] ss:$16 sps:$4 sm:$0xff]  }
 0x970   : > { %13699 = vmatprep.subr.bf16.mxu1 %v16817_v58  ;;  %v16892_v58 = vld [vmem:[%s23453_s10 + $0xc64] ss:$16 sps:$4 sm:$0xff]  }
 0x972   : > { %13331 = vmatpush1.bf16.msra.mxu0 %v16812_v19  ;;  %v16895_v19 = vld [vmem:[%s23453_s10 + $0xc6c] ss:$16 sps:$4 sm:$0xff]  }
 0x973   : > { %13700 = vmatpush1.bf16.msra.mxu1 %v16815_v63  ;;  %13332 = vmatprep.subr.bf16.mxu0 %v16820_v28  ;;  %v16890_v63 = vld [vmem:[%s23453_s10 + $0xc60] ss:$16 sps:$4 sm:$0xff]   ;;  %v16893_v28 = vld [vmem:[%s23453_s10 + $0xc68] ss:$16 sps:$4 sm:$0xff]  }
 0x974   : > { %13701 = vmatprep.subr.bf16.mxu1 %v16823_v35  ;;  %v16898_v35 = vld [vmem:[%s23453_s10 + $0xc84] ss:$16 sps:$4 sm:$0xff]  }
 0x976   : > { %13333 = vmatpush1.bf16.msra.mxu0 %v16818_v43  ;;  %v16901_v43 = vld [vmem:[%s23453_s10 + $0xc8c] ss:$16 sps:$4 sm:$0xff]  }
 0x977   : > { %13702 = vmatpush1.bf16.msra.mxu1 %v16821_v51  ;;  %13334 = vmatprep.subr.bf16.mxu0 %v16826_v52  ;;  %v16896_v51 = vld [vmem:[%s23453_s10 + $0xc80] ss:$16 sps:$4 sm:$0xff]   ;;  %v16899_v52 = vld [vmem:[%s23453_s10 + $0xc88] ss:$16 sps:$4 sm:$0xff]  }
 0x978   : > { %13703 = vmatprep.subr.bf16.mxu1 %v16829_v13  ;;  %v16904_v13 = vld [vmem:[%s23453_s10 + $0xca4] ss:$16 sps:$4 sm:$0xff]  }
 0x97a   : > { %13335 = vmatpush1.bf16.msra.mxu0 %v16824_v48  ;;  %v16907_v48 = vld [vmem:[%s23453_s10 + $0xcac] ss:$16 sps:$4 sm:$0xff]  }
 0x97b   : > { %13704 = vmatpush1.bf16.msra.mxu1 %v16827_v11  ;;  %13336 = vmatprep.subr.bf16.mxu0 %v16832_v37  ;;  %v16902_v11 = vld [vmem:[%s23453_s10 + $0xca0] ss:$16 sps:$4 sm:$0xff]   ;;  %v16905_v37 = vld [vmem:[%s23453_s10 + $0xca8] ss:$16 sps:$4 sm:$0xff]  }
 0x97c   : > { %13705 = vmatprep.subr.bf16.mxu1 %v16835_v2  ;;  %v16910_v2 = vld [vmem:[%s23453_s10 + $0xcc4] ss:$16 sps:$4 sm:$0xff]  }
 0x97e   : > { %13337 = vmatpush1.bf16.msra.mxu0 %v16830_v23  ;;  %v16913_v23 = vld [vmem:[%s23453_s10 + $0xccc] ss:$16 sps:$4 sm:$0xff]  }
 0x97f   : > { %13706 = vmatpush1.bf16.msra.mxu1 %v16833_v18  ;;  %13338 = vmatprep.subr.bf16.mxu0 %v16838_v53  ;;  %v16908_v18 = vld [vmem:[%s23453_s10 + $0xcc0] ss:$16 sps:$4 sm:$0xff]   ;;  %v16911_v53 = vld [vmem:[%s23453_s10 + $0xcc8] ss:$16 sps:$4 sm:$0xff]  }
 0x980   : > { %13707 = vmatprep.subr.bf16.mxu1 %v16841_v40  ;;  %v16916_v40 = vld [vmem:[%s23453_s10 + $0xce4] ss:$16 sps:$4 sm:$0xff]  }
 0x982   : > { %13339 = vmatpush1.bf16.msra.mxu0 %v16836_v16  ;;  %v16919_v16 = vld [vmem:[%s23453_s10 + $0xcec] ss:$16 sps:$4 sm:$0xff]  }
 0x983   : > { %13708 = vmatpush1.bf16.msra.mxu1 %v16839_v21  ;;  %13340 = vmatprep.subr.bf16.mxu0 %v16844_v55  ;;  %v16914_v21 = vld [vmem:[%s23453_s10 + $0xce0] ss:$16 sps:$4 sm:$0xff]   ;;  %v16917_v55 = vld [vmem:[%s23453_s10 + $0xce8] ss:$16 sps:$4 sm:$0xff]  }
 0x984   : > { %13709 = vmatprep.subr.bf16.mxu1 %v16847_v26  ;;  %v16922_v26 = vld [vmem:[%s23453_s10 + $0xd04] ss:$16 sps:$4 sm:$0xff]  }
 0x986   : > { %13341 = vmatpush1.bf16.msra.mxu0 %v16842_v0  ;;  %v16925_v0 = vld [vmem:[%s23453_s10 + $0xd0c] ss:$16 sps:$4 sm:$0xff]  }
 0x987   : > { %13710 = vmatpush1.bf16.msra.mxu1 %v16845_v41  ;;  %13342 = vmatprep.subr.bf16.mxu0 %v16850_v14  ;;  %v16920_v41 = vld [vmem:[%s23453_s10 + $0xd00] ss:$16 sps:$4 sm:$0xff]   ;;  %v16923_v14 = vld [vmem:[%s23453_s10 + $0xd08] ss:$16 sps:$4 sm:$0xff]  }
 0x988   : > { %13711 = vmatprep.subr.bf16.mxu1 %v16853_v32  ;;  %v16928_v32 = vld [vmem:[%s23453_s10 + $0xd24] ss:$16 sps:$4 sm:$0xff]  }
 0x98a   : > { %13343 = vmatpush1.bf16.msra.mxu0 %v16848_v61  ;;  %v16931_v61 = vld [vmem:[%s23453_s10 + $0xd2c] ss:$16 sps:$4 sm:$0xff]  }
 0x98b   : > { %13712 = vmatpush1.bf16.msra.mxu1 %v16851_v1  ;;  %13344 = vmatprep.subr.bf16.mxu0 %v16856_v30  ;;  %v16926_v1 = vld [vmem:[%s23453_s10 + $0xd20] ss:$16 sps:$4 sm:$0xff]   ;;  %v16929_v30 = vld [vmem:[%s23453_s10 + $0xd28] ss:$16 sps:$4 sm:$0xff]  }
 0x98c   : > { %13713 = vmatprep.subr.bf16.mxu1 %v16859_v10  ;;  %v16934_v10 = vld [vmem:[%s23453_s10 + $0xd44] ss:$16 sps:$4 sm:$0xff]  }
 0x98e   : > { %13345 = vmatpush1.bf16.msra.mxu0 %v16854_v49  ;;  %v16937_v49 = vld [vmem:[%s23453_s10 + $0xd4c] ss:$16 sps:$4 sm:$0xff]  }
 0x98f   : > { %13714 = vmatpush1.bf16.msra.mxu1 %v16857_v36  ;;  %13346 = vmatprep.subr.bf16.mxu0 %v16862_v46  ;;  %v16932_v36 = vld [vmem:[%s23453_s10 + $0xd40] ss:$16 sps:$4 sm:$0xff]   ;;  %v16935_v46 = vld [vmem:[%s23453_s10 + $0xd48] ss:$16 sps:$4 sm:$0xff]  }
 0x990   : > { %13715 = vmatprep.subr.bf16.mxu1 %v16865_v20  ;;  %v16940_v20 = vld [vmem:[%s23453_s10 + $0xd64] ss:$16 sps:$4 sm:$0xff]  }
 0x992   : > { %13347 = vmatpush1.bf16.msra.mxu0 %v16860_v60  ;;  %v16943_v60 = vld [vmem:[%s23453_s10 + $0xd6c] ss:$16 sps:$4 sm:$0xff]  }
 0x993   : > { %13716 = vmatpush1.bf16.msra.mxu1 %v16863_v45  ;;  %13348 = vmatprep.subr.bf16.mxu0 %v16868_v25  ;;  %v16938_v45 = vld [vmem:[%s23453_s10 + $0xd60] ss:$16 sps:$4 sm:$0xff]   ;;  %v16941_v25 = vld [vmem:[%s23453_s10 + $0xd68] ss:$16 sps:$4 sm:$0xff]  }
 0x994   : > { %13717 = vmatprep.subr.bf16.mxu1 %v16871_v57  ;;  %v16946_v57 = vld [vmem:[%s23453_s10 + $0xd84] ss:$16 sps:$4 sm:$0xff]  }
 0x996   : > { %13349 = vmatpush1.bf16.msra.mxu0 %v16866_v9  ;;  %v16944_v9 = vld [vmem:[%s23453_s10 + $0xd80] ss:$16 sps:$4 sm:$0xff]  }
 0x997   : > { %13718 = vmatpush1.bf16.msra.mxu1 %v16869_v31  ;;  %13359 = vmatprep.subr.bf16.mxu0 %v16874_v54  ;;  %v16947_v31 = vld [vmem:[%s23453_s10 + $0xd88] ss:$16 sps:$4 sm:$0xff]   ;;  %v16952_v54 = vld [vmem:[%s23453_s10 + $0xda4] ss:$16 sps:$4 sm:$0xff]  }
 0x998   : > { %13728 = vmatprep.subr.bf16.mxu1 %v16877_v47  ;;  %v16955_v47 = vld [vmem:[%s23453_s10 + $0xdac] ss:$16 sps:$4 sm:$0xff]  }
 0x999   : > { %13351 = vmatmul.mubr.bf16.vlgmr.msra.gmra.mrb[96].mxu0 %v22374_v62 }
 0x99a   : > { %13720 = vmatmul.mubr.bf16.vlgmr.msra.gmra.mrb[56].mxu1 %v22374_v62  ;;  %13360 = vmatpush1.bf16.msra.mxu0 %v16872_v27  ;;  %v16889_v62 = vld [vmem:[%s23453_s10 + $0xc4c] ss:$16 sps:$4 sm:$0xff]   ;;  %v16950_v27 = vld [vmem:[%s23453_s10 + $0xda0] ss:$16 sps:$4 sm:$0xff]  }
 0x99b   : > { %13391 = vmatprep.mubr.bf16.mxu0 %v9632_v7  ;;  %13729 = vmatpush1.bf16.msra.mxu1 %v16875_v12  ;;  %v16953_v12 = vld [vmem:[%s23453_s10 + $0xda8] ss:$16 sps:$4 sm:$0xff]  }
 0x99c   : > { %13760 = vmatprep.mubr.bf16.mxu1 %v9632_v7  ;;  %13361 = vmatprep.subr.bf16.mxu0 %v16880_v22  ;;  %v16958_v22 = vld [vmem:[%s23453_s10 + $0xdc4] ss:$16 sps:$4 sm:$0xff]   ;;  %v16961_v7 = vld [vmem:[%s23453_s10 + $0xdcc] ss:$16 sps:$4 sm:$0xff]  }
 0x99d   : > { %13730 = vmatprep.subr.bf16.mxu1 %v16883_v56  ;;  %v16956_v56 = vld [vmem:[%s23453_s10 + $0xdc0] ss:$16 sps:$4 sm:$0xff]  }
 0x99e   : > { %13362 = vmatpush1.bf16.msra.mxu0 %v16878_v38  ;;  %v16959_v38 = vld [vmem:[%s23453_s10 + $0xdc8] ss:$16 sps:$4 sm:$0xff]  }
 0x99f   : > { %13731 = vmatpush1.bf16.msra.mxu1 %v16881_v59  ;;  %13363 = vmatprep.subr.bf16.mxu0 %v16886_v5  ;;  %v16964_v59 = vld [vmem:[%s23453_s10 + $0xde4] ss:$16 sps:$4 sm:$0xff]   ;;  %v16967_v5 = vld [vmem:[%s23453_s10 + $0xdec] ss:$16 sps:$4 sm:$0xff]  }
 0x9a0   : > { %13732 = vmatprep.subr.bf16.mxu1 %v16889_v62  ;;  %v16962_v62 = vld [vmem:[%s23453_s10 + $0xde0] ss:$16 sps:$4 sm:$0xff]  }
 0x9a2   : > { %13364 = vmatpush1.bf16.msra.mxu0 %v16884_v3  ;;  %v16965_v3 = vld [vmem:[%s23453_s10 + $0xde8] ss:$16 sps:$4 sm:$0xff]  }
 0x9a3   : > { %13733 = vmatpush1.bf16.msra.mxu1 %v16887_v8  ;;  %13365 = vmatprep.subr.bf16.mxu0 %v16892_v58  ;;  %v16970_v8 = vld [vmem:[%s23453_s10 + $0xe04] ss:$16 sps:$4 sm:$0xff]   ;;  %v16973_v58 = vld [vmem:[%s23453_s10 + $0xe0c] ss:$16 sps:$4 sm:$0xff]  }
 0x9a4   : > { %13734 = vmatprep.subr.bf16.mxu1 %v16895_v19  ;;  %v22777_v19 = vrot.slane %v9635_v17, %v17487_v50  ;;  %v16974_v17 = vld [vmem:[%s23453_s10 + $0xe20] ss:$16 sps:$4 sm:$0xff]  }
 0x9a6   : > { %13366 = vmatpush1.bf16.msra.mxu0 %v16890_v63  ;;  %v16968_v63 = vld [vmem:[%s23453_s10 + $0xe00] ss:$16 sps:$4 sm:$0xff]   ;;  %v9643_v4 = vcombine.high %v22777_v19, %v22777_v19 }
 0x9a7   : > { %13735 = vmatpush1.bf16.msra.mxu1 %v16893_v28  ;;  %13367 = vmatprep.subr.bf16.mxu0 %v16898_v35  ;;  %v16971_v28 = vld [vmem:[%s23453_s10 + $0xe08] ss:$16 sps:$4 sm:$0xff]   ;;  %v16976_v35 = vld [vmem:[%s23453_s10 + $0xe24] ss:$16 sps:$4 sm:$0xff]  }
 0x9a8   : > { %13736 = vmatprep.subr.bf16.mxu1 %v16901_v43  ;;  %v16977_v43 = vld [vmem:[%s23453_s10 + $0xe28] ss:$16 sps:$4 sm:$0xff]  }
 0x9aa   : > { %13368 = vmatpush1.bf16.msra.mxu0 %v16896_v51  ;;  %v16982_v51 = vld [vmem:[%s23453_s10 + $0xe44] ss:$16 sps:$4 sm:$0xff]  }
 0x9ab   : > { %13737 = vmatpush1.bf16.msra.mxu1 %v16899_v52  ;;  %13369 = vmatprep.subr.bf16.mxu0 %v16904_v13  ;;  %v16980_v52 = vld [vmem:[%s23453_s10 + $0xe40] ss:$16 sps:$4 sm:$0xff]   ;;  %v16983_v13 = vld [vmem:[%s23453_s10 + $0xe48] ss:$16 sps:$4 sm:$0xff]  }
 0x9ac   : > { %13738 = vmatprep.subr.bf16.mxu1 %v16907_v48  ;;  %v16988_v48 = vld [vmem:[%s23453_s10 + $0xe64] ss:$16 sps:$4 sm:$0xff]  }
 0x9ae   : > { %13370 = vmatpush1.bf16.msra.mxu0 %v16902_v11  ;;  %v16991_v11 = vld [vmem:[%s23453_s10 + $0xe6c] ss:$16 sps:$4 sm:$0xff]  }
 0x9af   : > { %13739 = vmatpush1.bf16.msra.mxu1 %v16905_v37  ;;  %13371 = vmatprep.subr.bf16.mxu0 %v16910_v2  ;;  %v16986_v37 = vld [vmem:[%s23453_s10 + $0xe60] ss:$16 sps:$4 sm:$0xff]   ;;  %v16989_v2 = vld [vmem:[%s23453_s10 + $0xe68] ss:$16 sps:$4 sm:$0xff]  }
 0x9b0   : > { %13740 = vmatprep.subr.bf16.mxu1 %v16913_v23  ;;  %v16994_v23 = vld [vmem:[%s23453_s10 + $0xe84] ss:$16 sps:$4 sm:$0xff]  }
 0x9b2   : > { %13372 = vmatpush1.bf16.msra.mxu0 %v16908_v18  ;;  %v16997_v18 = vld [vmem:[%s23453_s10 + $0xe8c] ss:$16 sps:$4 sm:$0xff]  }
 0x9b3   : > { %13741 = vmatpush1.bf16.msra.mxu1 %v16911_v53  ;;  %13373 = vmatprep.subr.bf16.mxu0 %v16916_v40  ;;  %v16992_v53 = vld [vmem:[%s23453_s10 + $0xe80] ss:$16 sps:$4 sm:$0xff]   ;;  %v16995_v40 = vld [vmem:[%s23453_s10 + $0xe88] ss:$16 sps:$4 sm:$0xff]  }
 0x9b4   : > { %13742 = vmatprep.subr.bf16.mxu1 %v16919_v16  ;;  %v17000_v16 = vld [vmem:[%s23453_s10 + $0xea4] ss:$16 sps:$4 sm:$0xff]  }
 0x9b6   : > { %13374 = vmatpush1.bf16.msra.mxu0 %v16914_v21  ;;  %v17003_v21 = vld [vmem:[%s23453_s10 + $0xeac] ss:$16 sps:$4 sm:$0xff]  }
 0x9b7   : > { %13743 = vmatpush1.bf16.msra.mxu1 %v16917_v55  ;;  %13375 = vmatprep.subr.bf16.mxu0 %v16922_v26  ;;  %v16998_v55 = vld [vmem:[%s23453_s10 + $0xea0] ss:$16 sps:$4 sm:$0xff]   ;;  %v17001_v26 = vld [vmem:[%s23453_s10 + $0xea8] ss:$16 sps:$4 sm:$0xff]  }
 0x9b8   : > { %13744 = vmatprep.subr.bf16.mxu1 %v16925_v0  ;;  %v17006_v0 = vld [vmem:[%s23453_s10 + $0xec4] ss:$16 sps:$4 sm:$0xff]  }
 0x9ba   : > { %13376 = vmatpush1.bf16.msra.mxu0 %v16920_v41  ;;  %v17009_v41 = vld [vmem:[%s23453_s10 + $0xecc] ss:$16 sps:$4 sm:$0xff]  }
 0x9bb   : > { %13745 = vmatpush1.bf16.msra.mxu1 %v16923_v14  ;;  %13377 = vmatprep.subr.bf16.mxu0 %v16928_v32  ;;  %v17004_v14 = vld [vmem:[%s23453_s10 + $0xec0] ss:$16 sps:$4 sm:$0xff]   ;;  %v17007_v32 = vld [vmem:[%s23453_s10 + $0xec8] ss:$16 sps:$4 sm:$0xff]  }
 0x9bc   : > { %13746 = vmatprep.subr.bf16.mxu1 %v16931_v61  ;;  %v17012_v61 = vld [vmem:[%s23453_s10 + $0xee4] ss:$16 sps:$4 sm:$0xff]  }
 0x9be   : > { %13378 = vmatpush1.bf16.msra.mxu0 %v16926_v1  ;;  %v17015_v1 = vld [vmem:[%s23453_s10 + $0xeec] ss:$16 sps:$4 sm:$0xff]  }
 0x9bf   : > { %13747 = vmatpush1.bf16.msra.mxu1 %v16929_v30  ;;  %13379 = vmatprep.subr.bf16.mxu0 %v16934_v10  ;;  %v17010_v30 = vld [vmem:[%s23453_s10 + $0xee0] ss:$16 sps:$4 sm:$0xff]   ;;  %v17013_v10 = vld [vmem:[%s23453_s10 + $0xee8] ss:$16 sps:$4 sm:$0xff]  }
 0x9c0   : > { %13748 = vmatprep.subr.bf16.mxu1 %v16937_v49  ;;  %v17018_v49 = vld [vmem:[%s23453_s10 + $0xf04] ss:$16 sps:$4 sm:$0xff]  }
 0x9c2   : > { %13380 = vmatpush1.bf16.msra.mxu0 %v16932_v36  ;;  %v17021_v36 = vld [vmem:[%s23453_s10 + $0xf0c] ss:$16 sps:$4 sm:$0xff]  }
 0x9c3   : > { %13749 = vmatpush1.bf16.msra.mxu1 %v16935_v46  ;;  %13381 = vmatprep.subr.bf16.mxu0 %v16940_v20  ;;  %v17016_v46 = vld [vmem:[%s23453_s10 + $0xf00] ss:$16 sps:$4 sm:$0xff]   ;;  %v17019_v20 = vld [vmem:[%s23453_s10 + $0xf08] ss:$16 sps:$4 sm:$0xff]  }
 0x9c4   : > { %13750 = vmatprep.subr.bf16.mxu1 %v16943_v60  ;;  %v17024_v60 = vld [vmem:[%s23453_s10 + $0xf24] ss:$16 sps:$4 sm:$0xff]  }
 0x9c6   : > { %13382 = vmatpush1.bf16.msra.mxu0 %v16938_v45  ;;  %v17027_v45 = vld [vmem:[%s23453_s10 + $0xf2c] ss:$16 sps:$4 sm:$0xff]  }
 0x9c7   : > { %13751 = vmatpush1.bf16.msra.mxu1 %v16941_v25  ;;  %13383 = vmatprep.subr.bf16.mxu0 %v16946_v57  ;;  %v17022_v25 = vld [vmem:[%s23453_s10 + $0xf20] ss:$16 sps:$4 sm:$0xff]   ;;  %v17025_v57 = vld [vmem:[%s23453_s10 + $0xf28] ss:$16 sps:$4 sm:$0xff]  }
 0x9c8   : > { %13752 = vmatprep.subr.bf16.mxu1 %v16949_v29  ;;  %v17030_v29 = vld [vmem:[%s23453_s10 + $0xf44] ss:$16 sps:$4 sm:$0xff]  }
 0x9ca   : > { %13384 = vmatpush1.bf16.msra.mxu0 %v16944_v9  ;;  %v17033_v9 = vld [vmem:[%s23453_s10 + $0xf4c] ss:$16 sps:$4 sm:$0xff]  }
 0x9cb   : > { %13753 = vmatpush1.bf16.msra.mxu1 %v16947_v31  ;;  %13385 = vmatprep.subr.bf16.mxu0 %v16952_v54  ;;  %v17028_v31 = vld [vmem:[%s23453_s10 + $0xf40] ss:$16 sps:$4 sm:$0xff]   ;;  %v17031_v54 = vld [vmem:[%s23453_s10 + $0xf48] ss:$16 sps:$4 sm:$0xff]  }
 0x9cc   : > { %13754 = vmatprep.subr.bf16.mxu1 %v16955_v47  ;;  %v17036_v47 = vld [vmem:[%s23453_s10 + $0xf64] ss:$16 sps:$4 sm:$0xff]  }
 0x9ce   : > { %13386 = vmatpush1.bf16.msra.mxu0 %v16950_v27  ;;  %v17039_v27 = vld [vmem:[%s23453_s10 + $0xf6c] ss:$16 sps:$4 sm:$0xff]  }
 0x9cf   : > { %13755 = vmatpush1.bf16.msra.mxu1 %v16953_v12  ;;  %13387 = vmatprep.subr.bf16.mxu0 %v16958_v22  ;;  %v17034_v12 = vld [vmem:[%s23453_s10 + $0xf60] ss:$16 sps:$4 sm:$0xff]   ;;  %v17037_v22 = vld [vmem:[%s23453_s10 + $0xf68] ss:$16 sps:$4 sm:$0xff]  }
 0x9d0   : > { %13756 = vmatprep.subr.bf16.mxu1 %v16961_v7  ;;  %v17042_v7 = vld [vmem:[%s23453_s10 + $0xf84] ss:$16 sps:$4 sm:$0xff]  }
 0x9d2   : > { %13388 = vmatpush1.bf16.msra.mxu0 %v16956_v56  ;;  %v17045_v56 = vld [vmem:[%s23453_s10 + $0xf8c] ss:$16 sps:$4 sm:$0xff]  }
 0x9d3   : > { %13757 = vmatpush1.bf16.msra.mxu1 %v16959_v38  ;;  %13389 = vmatprep.subr.bf16.mxu0 %v16964_v59  ;;  %v17040_v38 = vld [vmem:[%s23453_s10 + $0xf80] ss:$16 sps:$4 sm:$0xff]   ;;  %v17043_v59 = vld [vmem:[%s23453_s10 + $0xf88] ss:$16 sps:$4 sm:$0xff]  }
 0x9d4   : > { %13758 = vmatprep.subr.bf16.mxu1 %v16967_v5  ;;  %v17048_v5 = vld [vmem:[%s23453_s10 + $0xfa4] ss:$16 sps:$4 sm:$0xff]  }
 0x9d6   : > { %13390 = vmatpush1.bf16.msra.mxu0 %v16962_v62  ;;  %v17051_v62 = vld [vmem:[%s23453_s10 + $0xfac] ss:$16 sps:$4 sm:$0xff]  }
 0x9d7   : > { %13759 = vmatpush1.bf16.msra.mxu1 %v16965_v3  ;;  %13400 = vmatprep.subr.bf16.mxu0 %v16970_v8  ;;  %v17046_v3 = vld [vmem:[%s23453_s10 + $0xfa0] ss:$16 sps:$4 sm:$0xff]   ;;  %v17049_v8 = vld [vmem:[%s23453_s10 + $0xfa8] ss:$16 sps:$4 sm:$0xff]  }
 0x9d8   : > { %13769 = vmatprep.subr.bf16.mxu1 %v16973_v58  ;;  %v17054_v58 = vld [vmem:[%s23453_s10 + $0xfc4] ss:$16 sps:$4 sm:$0xff]  }
 0x9d9   : > { %13392 = vmatmul.mubr.bf16.vlgmr.msra.gmra.mrb[96].mxu0 %v22575_v6 }
 0x9da   : > { %13761 = vmatmul.mubr.bf16.vlgmr.msra.gmra.mrb[56].mxu1 %v22575_v6  ;;  %13401 = vmatpush1.bf16.msra.mxu0 %v16968_v63  ;;  %v16985_v6 = vld [vmem:[%s23453_s10 + $0xe4c] ss:$16 sps:$4 sm:$0xff]  }
 0x9db   : > { %13432 = vmatprep.mubr.bf16.mxu0 %v9643_v4  ;;  %13770 = vmatpush1.bf16.msra.mxu1 %v16971_v28  ;;  %v17057_v63 = vld [vmem:[%s23453_s10 + $0xfcc] ss:$16 sps:$4 sm:$0xff]   ;;  %v17052_v28 = vld [vmem:[%s23453_s10 + $0xfc0] ss:$16 sps:$4 sm:$0xff]  }
 0x9dc   : > { %13801 = vmatprep.mubr.bf16.mxu1 %v9643_v4  ;;  %13402 = vmatprep.subr.bf16.mxu0 %v16976_v35  ;;  %v17055_v35 = vld [vmem:[%s23453_s10 + $0xfc8] ss:$16 sps:$4 sm:$0xff]   ;;  %v17060_v4 = vld [vmem:[%s23453_s10 + $0xfe4] ss:$16 sps:$4 sm:$0xff]  }
 0x9dd   : > { %13771 = vmatprep.subr.bf16.mxu1 %v16979_v24  ;;  %v17063_v24 = vld [vmem:[%s23453_s10 + $0xfec] ss:$16 sps:$4 sm:$0xff]  }
 0x9de   : > { %13403 = vmatpush1.bf16.msra.mxu0 %v16974_v17  ;;  %v17058_v17 = vld [vmem:[%s23453_s10 + $0xfe0] ss:$16 sps:$4 sm:$0xff]  }
 0x9df   : > { %13772 = vmatpush1.bf16.msra.mxu1 %v16977_v43  ;;  %13404 = vmatprep.subr.bf16.mxu0 %v16982_v51  ;;  %v17061_v43 = vld [vmem:[%s23453_s10 + $0xfe8] ss:$16 sps:$4 sm:$0xff]   ;;  %v17066_v51 = vld [vmem:[%s23453_s10 + $0x1004] ss:$16 sps:$4 sm:$0xff]  }
 0x9e0   : > { %13773 = vmatprep.subr.bf16.mxu1 %v16985_v6  ;;  %v17069_v6 = vld [vmem:[%s23453_s10 + $0x100c] ss:$16 sps:$4 sm:$0xff]  }
 0x9e2   : > { %13405 = vmatpush1.bf16.msra.mxu0 %v16980_v52  ;;  %v22979_v52 = vrot.slane %v9646_v15, %v17487_v50  ;;  %v17073_v15 = vld [vmem:[%s23453_s10 + $0x1028] ss:$16 sps:$4 sm:$0xff]  }
 0x9e3   : > { %13774 = vmatpush1.bf16.msra.mxu1 %v16983_v13  ;;  %13406 = vmatprep.subr.bf16.mxu0 %v16988_v48  ;;  %v17064_v13 = vld [vmem:[%s23453_s10 + $0x1000] ss:$16 sps:$4 sm:$0xff]   ;;  %v17067_v48 = vld [vmem:[%s23453_s10 + $0x1008] ss:$16 sps:$4 sm:$0xff]  }
 0x9e4   : > { %13775 = vmatprep.subr.bf16.mxu1 %v16991_v11  ;;  %v17072_v11 = vld [vmem:[%s23453_s10 + $0x1024] ss:$16 sps:$4 sm:$0xff]   ;;  %v9654_v50 = vcombine.high %v22979_v52, %v22979_v52 }
 0x9e6   : > { %13407 = vmatpush1.bf16.msra.mxu0 %v16986_v37  ;;  %v17078_v37 = vld [vmem:[%s23453_s10 + $0x1044] ss:$16 sps:$4 sm:$0xff]  }
 0x9e7   : > { %13776 = vmatpush1.bf16.msra.mxu1 %v16989_v2  ;;  %13408 = vmatprep.subr.bf16.mxu0 %v16994_v23  ;;  %v17076_v2 = vld [vmem:[%s23453_s10 + $0x1040] ss:$16 sps:$4 sm:$0xff]   ;;  %v17079_v23 = vld [vmem:[%s23453_s10 + $0x1048] ss:$16 sps:$4 sm:$0xff]  }
 0x9e8   : > { %13777 = vmatprep.subr.bf16.mxu1 %v16997_v18  ;;  %v17084_v18 = vld [vmem:[%s23453_s10 + $0x1064] ss:$16 sps:$4 sm:$0xff]  }
 0x9ea   : > { %13409 = vmatpush1.bf16.msra.mxu0 %v16992_v53  ;;  %v17087_v53 = vld [vmem:[%s23453_s10 + $0x106c] ss:$16 sps:$4 sm:$0xff]  }
 0x9eb   : > { %13778 = vmatpush1.bf16.msra.mxu1 %v16995_v40  ;;  %13410 = vmatprep.subr.bf16.mxu0 %v17000_v16  ;;  %v17082_v40 = vld [vmem:[%s23453_s10 + $0x1060] ss:$16 sps:$4 sm:$0xff]   ;;  %v17085_v16 = vld [vmem:[%s23453_s10 + $0x1068] ss:$16 sps:$4 sm:$0xff]  }
 0x9ec   : > { %13779 = vmatprep.subr.bf16.mxu1 %v17003_v21  ;;  %v17090_v21 = vld [vmem:[%s23453_s10 + $0x1084] ss:$16 sps:$4 sm:$0xff]  }
 0x9ee   : > { %13411 = vmatpush1.bf16.msra.mxu0 %v16998_v55  ;;  %v17093_v55 = vld [vmem:[%s23453_s10 + $0x108c] ss:$16 sps:$4 sm:$0xff]  }
 0x9ef   : > { %13780 = vmatpush1.bf16.msra.mxu1 %v17001_v26  ;;  %13412 = vmatprep.subr.bf16.mxu0 %v17006_v0  ;;  %v17088_v26 = vld [vmem:[%s23453_s10 + $0x1080] ss:$16 sps:$4 sm:$0xff]   ;;  %v17091_v0 = vld [vmem:[%s23453_s10 + $0x1088] ss:$16 sps:$4 sm:$0xff]  }
 0x9f0   : > { %13781 = vmatprep.subr.bf16.mxu1 %v17009_v41  ;;  %v17096_v41 = vld [vmem:[%s23453_s10 + $0x10a4] ss:$16 sps:$4 sm:$0xff]  }
 0x9f2   : > { %13413 = vmatpush1.bf16.msra.mxu0 %v17004_v14  ;;  %v17099_v14 = vld [vmem:[%s23453_s10 + $0x10ac] ss:$16 sps:$4 sm:$0xff]  }
 0x9f3   : > { %13782 = vmatpush1.bf16.msra.mxu1 %v17007_v32  ;;  %13414 = vmatprep.subr.bf16.mxu0 %v17012_v61  ;;  %v17094_v32 = vld [vmem:[%s23453_s10 + $0x10a0] ss:$16 sps:$4 sm:$0xff]   ;;  %v17097_v61 = vld [vmem:[%s23453_s10 + $0x10a8] ss:$16 sps:$4 sm:$0xff]  }
 0x9f4   : > { %13783 = vmatprep.subr.bf16.mxu1 %v17015_v1  ;;  %v17102_v1 = vld [vmem:[%s23453_s10 + $0x10c4] ss:$16 sps:$4 sm:$0xff]  }
 0x9f6   : > { %13415 = vmatpush1.bf16.msra.mxu0 %v17010_v30  ;;  %v17105_v30 = vld [vmem:[%s23453_s10 + $0x10cc] ss:$16 sps:$4 sm:$0xff]  }
 0x9f7   : > { %13784 = vmatpush1.bf16.msra.mxu1 %v17013_v10  ;;  %13416 = vmatprep.subr.bf16.mxu0 %v17018_v49  ;;  %v17100_v10 = vld [vmem:[%s23453_s10 + $0x10c0] ss:$16 sps:$4 sm:$0xff]   ;;  %v17103_v49 = vld [vmem:[%s23453_s10 + $0x10c8] ss:$16 sps:$4 sm:$0xff]  }
 0x9f8   : > { %13785 = vmatprep.subr.bf16.mxu1 %v17021_v36  ;;  %v17108_v36 = vld [vmem:[%s23453_s10 + $0x10e4] ss:$16 sps:$4 sm:$0xff]  }
 0x9fa   : > { %13417 = vmatpush1.bf16.msra.mxu0 %v17016_v46  ;;  %v17111_v46 = vld [vmem:[%s23453_s10 + $0x10ec] ss:$16 sps:$4 sm:$0xff]  }
 0x9fb   : > { %13786 = vmatpush1.bf16.msra.mxu1 %v17019_v20  ;;  %13418 = vmatprep.subr.bf16.mxu0 %v17024_v60  ;;  %v17106_v20 = vld [vmem:[%s23453_s10 + $0x10e0] ss:$16 sps:$4 sm:$0xff]   ;;  %v17109_v60 = vld [vmem:[%s23453_s10 + $0x10e8] ss:$16 sps:$4 sm:$0xff]  }
 0x9fc   : > { %13787 = vmatprep.subr.bf16.mxu1 %v17027_v45  ;;  %v17114_v45 = vld [vmem:[%s23453_s10 + $0x1104] ss:$16 sps:$4 sm:$0xff]  }
 0x9fe   : > { %13419 = vmatpush1.bf16.msra.mxu0 %v17022_v25  ;;  %v17117_v25 = vld [vmem:[%s23453_s10 + $0x110c] ss:$16 sps:$4 sm:$0xff]  }
 0x9ff   : > { %13788 = vmatpush1.bf16.msra.mxu1 %v17025_v57  ;;  %13420 = vmatprep.subr.bf16.mxu0 %v17030_v29  ;;  %v17112_v57 = vld [vmem:[%s23453_s10 + $0x1100] ss:$16 sps:$4 sm:$0xff]   ;;  %v17115_v29 = vld [vmem:[%s23453_s10 + $0x1108] ss:$16 sps:$4 sm:$0xff]  }
 0xa00   : > { %13789 = vmatprep.subr.bf16.mxu1 %v17033_v9  ;;  %v17120_v9 = vld [vmem:[%s23453_s10 + $0x1124] ss:$16 sps:$4 sm:$0xff]  }
 0xa02   : > { %13421 = vmatpush1.bf16.msra.mxu0 %v17028_v31  ;;  %v17123_v31 = vld [vmem:[%s23453_s10 + $0x112c] ss:$16 sps:$4 sm:$0xff]  }
 0xa03   : > { %13790 = vmatpush1.bf16.msra.mxu1 %v17031_v54  ;;  %13422 = vmatprep.subr.bf16.mxu0 %v17036_v47  ;;  %v17118_v54 = vld [vmem:[%s23453_s10 + $0x1120] ss:$16 sps:$4 sm:$0xff]   ;;  %v17121_v47 = vld [vmem:[%s23453_s10 + $0x1128] ss:$16 sps:$4 sm:$0xff]  }
 0xa04   : > { %13791 = vmatprep.subr.bf16.mxu1 %v17039_v27  ;;  %v17126_v27 = vld [vmem:[%s23453_s10 + $0x1144] ss:$16 sps:$4 sm:$0xff]  }
 0xa06   : > { %13423 = vmatpush1.bf16.msra.mxu0 %v17034_v12  ;;  %v17129_v12 = vld [vmem:[%s23453_s10 + $0x114c] ss:$16 sps:$4 sm:$0xff]  }
 0xa07   : > { %13792 = vmatpush1.bf16.msra.mxu1 %v17037_v22  ;;  %13424 = vmatprep.subr.bf16.mxu0 %v17042_v7  ;;  %v17124_v22 = vld [vmem:[%s23453_s10 + $0x1140] ss:$16 sps:$4 sm:$0xff]   ;;  %v17127_v7 = vld [vmem:[%s23453_s10 + $0x1148] ss:$16 sps:$4 sm:$0xff]  }
 0xa08   : > { %13793 = vmatprep.subr.bf16.mxu1 %v17045_v56  ;;  %v17132_v56 = vld [vmem:[%s23453_s10 + $0x1164] ss:$16 sps:$4 sm:$0xff]  }
 0xa0a   : > { %13425 = vmatpush1.bf16.msra.mxu0 %v17040_v38  ;;  %v17135_v38 = vld [vmem:[%s23453_s10 + $0x116c] ss:$16 sps:$4 sm:$0xff]  }
 0xa0b   : > { %13794 = vmatpush1.bf16.msra.mxu1 %v17043_v59  ;;  %13426 = vmatprep.subr.bf16.mxu0 %v17048_v5  ;;  %v17130_v59 = vld [vmem:[%s23453_s10 + $0x1160] ss:$16 sps:$4 sm:$0xff]   ;;  %v17133_v5 = vld [vmem:[%s23453_s10 + $0x1168] ss:$16 sps:$4 sm:$0xff]  }
 0xa0c   : > { %13795 = vmatprep.subr.bf16.mxu1 %v17051_v62  ;;  %v17138_v62 = vld [vmem:[%s23453_s10 + $0x1184] ss:$16 sps:$4 sm:$0xff]  }
 0xa0e   : > { %13427 = vmatpush1.bf16.msra.mxu0 %v17046_v3  ;;  %v17141_v3 = vld [vmem:[%s23453_s10 + $0x118c] ss:$16 sps:$4 sm:$0xff]  }
 0xa0f   : > { %13796 = vmatpush1.bf16.msra.mxu1 %v17049_v8  ;;  %13428 = vmatprep.subr.bf16.mxu0 %v17054_v58  ;;  %v17136_v8 = vld [vmem:[%s23453_s10 + $0x1180] ss:$16 sps:$4 sm:$0xff]   ;;  %v17139_v58 = vld [vmem:[%s23453_s10 + $0x1188] ss:$16 sps:$4 sm:$0xff]  }
 0xa10   : > { %13797 = vmatprep.subr.bf16.mxu1 %v17057_v63  ;;  %v17144_v63 = vld [vmem:[%s23453_s10 + $0x11a4] ss:$16 sps:$4 sm:$0xff]  }
 0xa12   : > { %13429 = vmatpush1.bf16.msra.mxu0 %v17052_v28  ;;  %v17147_v28 = vld [vmem:[%s23453_s10 + $0x11ac] ss:$16 sps:$4 sm:$0xff]  }
 0xa13   : > { %13798 = vmatpush1.bf16.msra.mxu1 %v17055_v35  ;;  %13430 = vmatprep.subr.bf16.mxu0 %v17060_v4  ;;  %v17142_v35 = vld [vmem:[%s23453_s10 + $0x11a0] ss:$16 sps:$4 sm:$0xff]   ;;  %v17145_v4 = vld [vmem:[%s23453_s10 + $0x11a8] ss:$16 sps:$4 sm:$0xff]  }
 0xa14   : > { %13799 = vmatprep.subr.bf16.mxu1 %v17063_v24  ;;  %v17150_v24 = vld [vmem:[%s23453_s10 + $0x11c4] ss:$16 sps:$4 sm:$0xff]  }
 0xa16   : > { %13431 = vmatpush1.bf16.msra.mxu0 %v17058_v17  ;;  %v17153_v17 = vld [vmem:[%s23453_s10 + $0x11cc] ss:$16 sps:$4 sm:$0xff]  }
 0xa17   : > { %13800 = vmatpush1.bf16.msra.mxu1 %v17061_v43  ;;  %13441 = vmatprep.subr.bf16.mxu0 %v17066_v51  ;;  %v17148_v43 = vld [vmem:[%s23453_s10 + $0x11c0] ss:$16 sps:$4 sm:$0xff]   ;;  %v17151_v51 = vld [vmem:[%s23453_s10 + $0x11c8] ss:$16 sps:$4 sm:$0xff]  }
 0xa18   : > { %13810 = vmatprep.subr.bf16.mxu1 %v17069_v6  ;;  %v17156_v6 = vld [vmem:[%s23453_s10 + $0x11e4] ss:$16 sps:$4 sm:$0xff]  }
 0xa19   : > { %13433 = vmatmul.mubr.bf16.vlgmr.msra.gmra.mrb[96].mxu0 %v22777_v19 }
 0xa1a   : > { %13802 = vmatmul.mubr.bf16.vlgmr.msra.gmra.mrb[56].mxu1 %v22777_v19  ;;  %13442 = vmatpush1.bf16.msra.mxu0 %v17064_v13  ;;  %v17081_v19 = vld [vmem:[%s23453_s10 + $0x104c] ss:$16 sps:$4 sm:$0xff]  }
 0xa1b   : > { %13473 = vmatprep.mubr.bf16.mxu0 %v9654_v50  ;;  %13811 = vmatpush1.bf16.msra.mxu1 %v17067_v48  ;;  %v17159_v13 = vld [vmem:[%s23453_s10 + $0x11ec] ss:$16 sps:$4 sm:$0xff]   ;;  %v17154_v48 = vld [vmem:[%s23453_s10 + $0x11e0] ss:$16 sps:$4 sm:$0xff]  }
 0xa1c   : > { %13842 = vmatprep.mubr.bf16.mxu1 %v9654_v50  ;;  %13443 = vmatprep.subr.bf16.mxu0 %v17072_v11  ;;  %v17157_v11 = vld [vmem:[%s23453_s10 + $0x11e8] ss:$16 sps:$4 sm:$0xff]   ;;  %v17162_v50 = vld [vmem:[%s23456_s13 + $0x4] ss:$8 sps:$4 sm:$0xff]  }
 0xa1d   : > { %13812 = vmatprep.subr.bf16.mxu1 %v17075_v44  ;;  %v17160_v44 = vld [vmem:[%s23456_s13] ss:$8 sps:$4 sm:$0xff]  }
 0xa1e   : > { %13444 = vmatpush1.bf16.msra.mxu0 %v17070_v42  ;;  %v17165_v42 = vld [vmem:[%s23456_s13 + $0x14] ss:$8 sps:$4 sm:$0xff]  }
 0xa1f   : > { %13813 = vmatpush1.bf16.msra.mxu1 %v17073_v15  ;;  %13445 = vmatprep.subr.bf16.mxu0 %v17078_v37  ;;  %v17163_v15 = vld [vmem:[%s23456_s13 + $0x10] ss:$8 sps:$4 sm:$0xff]   ;;  %v17168_v37 = vld [vmem:[%s23456_s13 + $0x24] ss:$8 sps:$4 sm:$0xff]  }
 0xa20   : > { %13814 = vmatprep.subr.bf16.mxu1 %v17081_v19  ;;  %v17166_v19 = vld [vmem:[%s23456_s13 + $0x20] ss:$8 sps:$4 sm:$0xff]  }
 0xa22   : > { %13446 = vmatpush1.bf16.msra.mxu0 %v17076_v2  ;;  %v17169_v2 = vld [vmem:[%s23456_s13 + $0x30] ss:$8 sps:$4 sm:$0xff]  }
 0xa23   : > { %13815 = vmatpush1.bf16.msra.mxu1 %v17079_v23  ;;  %13447 = vmatprep.subr.bf16.mxu0 %v17084_v18  ;;  %v17174_v23 = vld [vmem:[%s23456_s13 + $0x44] ss:$8 sps:$4 sm:$0xff]   ;;  %v17172_v18 = vld [vmem:[%s23456_s13 + $0x40] ss:$8 sps:$4 sm:$0xff]  }
 0xa24   : > { %13816 = vmatprep.subr.bf16.mxu1 %v17087_v53  ;;  %v17177_v53 = vld [vmem:[%s23456_s13 + $0x54] ss:$8 sps:$4 sm:$0xff]  }
 0xa26   : > { %13448 = vmatpush1.bf16.msra.mxu0 %v17082_v40  ;;  %v17175_v40 = vld [vmem:[%s23456_s13 + $0x50] ss:$8 sps:$4 sm:$0xff]  }
 0xa27   : > { %13817 = vmatpush1.bf16.msra.mxu1 %v17085_v16  ;;  %13449 = vmatprep.subr.bf16.mxu0 %v17090_v21  ;;  %v17180_v16 = vld [vmem:[%s23456_s13 + $0x64] ss:$8 sps:$4 sm:$0xff]   ;;  %v17178_v21 = vld [vmem:[%s23456_s13 + $0x60] ss:$8 sps:$4 sm:$0xff]  }
 0xa28   : > { %13818 = vmatprep.subr.bf16.mxu1 %v17093_v55  ;;  %v17183_v55 = vld [vmem:[%s23456_s13 + $0x74] ss:$8 sps:$4 sm:$0xff]  }
 0xa2a   : > { %13450 = vmatpush1.bf16.msra.mxu0 %v17088_v26  ;;  %v17181_v26 = vld [vmem:[%s23456_s13 + $0x70] ss:$8 sps:$4 sm:$0xff]  }
 0xa2b   : > { %13819 = vmatpush1.bf16.msra.mxu1 %v17091_v0  ;;  %13451 = vmatprep.subr.bf16.mxu0 %v17096_v41  ;;  %v17186_v0 = vld [vmem:[%s23456_s13 + $0x84] ss:$8 sps:$4 sm:$0xff]   ;;  %v17184_v41 = vld [vmem:[%s23456_s13 + $0x80] ss:$8 sps:$4 sm:$0xff]  }
 0xa2c   : > { %13820 = vmatprep.subr.bf16.mxu1 %v17099_v14  ;;  %v17189_v14 = vld [vmem:[%s23456_s13 + $0x94] ss:$8 sps:$4 sm:$0xff]  }
 0xa2e   : > { %13452 = vmatpush1.bf16.msra.mxu0 %v17094_v32  ;;  %v17187_v32 = vld [vmem:[%s23456_s13 + $0x90] ss:$8 sps:$4 sm:$0xff]  }
 0xa2f   : > { %13821 = vmatpush1.bf16.msra.mxu1 %v17097_v61  ;;  %13453 = vmatprep.subr.bf16.mxu0 %v17102_v1  ;;  %v17192_v61 = vld [vmem:[%s23456_s13 + $0xa4] ss:$8 sps:$4 sm:$0xff]   ;;  %v17190_v1 = vld [vmem:[%s23456_s13 + $0xa0] ss:$8 sps:$4 sm:$0xff]  }
 0xa30   : > { %13822 = vmatprep.subr.bf16.mxu1 %v17105_v30  ;;  %v17193_v30 = vld [vmem:[%s23456_s13 + $0xb0] ss:$8 sps:$4 sm:$0xff]  }
 0xa32   : > { %13454 = vmatpush1.bf16.msra.mxu0 %v17100_v10  ;;  %v17195_v10 = vld [vmem:[%s23456_s13 + $0xb4] ss:$8 sps:$4 sm:$0xff]  }
 0xa33   : > { %13823 = vmatpush1.bf16.msra.mxu1 %v17103_v49  ;;  %13455 = vmatprep.subr.bf16.mxu0 %v17108_v36  ;;  %v17198_v49 = vld [vmem:[%s23456_s13 + $0xc4] ss:$8 sps:$4 sm:$0xff]   ;;  %v17196_v36 = vld [vmem:[%s23456_s13 + $0xc0] ss:$8 sps:$4 sm:$0xff]  }
 0xa34   : > { %13824 = vmatprep.subr.bf16.mxu1 %v17111_v46  ;;  %v17201_v46 = vld [vmem:[%s23456_s13 + $0xd4] ss:$8 sps:$4 sm:$0xff]  }
 0xa36   : > { %13456 = vmatpush1.bf16.msra.mxu0 %v17106_v20  ;;  %v17199_v20 = vld [vmem:[%s23456_s13 + $0xd0] ss:$8 sps:$4 sm:$0xff]  }
 0xa37   : > { %13825 = vmatpush1.bf16.msra.mxu1 %v17109_v60  ;;  %13457 = vmatprep.subr.bf16.mxu0 %v17114_v45  ;;  %v17204_v60 = vld [vmem:[%s23456_s13 + $0xe4] ss:$8 sps:$4 sm:$0xff]   ;;  %v17202_v45 = vld [vmem:[%s23456_s13 + $0xe0] ss:$8 sps:$4 sm:$0xff]  }
 0xa38   : > { %13826 = vmatprep.subr.bf16.mxu1 %v17117_v25  ;;  %v17207_v25 = vld [vmem:[%s23456_s13 + $0xf4] ss:$8 sps:$4 sm:$0xff]  }
 0xa3a   : > { %13458 = vmatpush1.bf16.msra.mxu0 %v17112_v57  ;;  %v17205_v57 = vld [vmem:[%s23456_s13 + $0xf0] ss:$8 sps:$4 sm:$0xff]  }
 0xa3b   : > { %13827 = vmatpush1.bf16.msra.mxu1 %v17115_v29  ;;  %13459 = vmatprep.subr.bf16.mxu0 %v17120_v9  ;;  %v17210_v29 = vld [vmem:[%s23456_s13 + $0x104] ss:$8 sps:$4 sm:$0xff]   ;;  %v13851_v9 = vld [vmem:[%s23454_s11] sm:$0xf] }
 0xa3c   : > { %13828 = vmatprep.subr.bf16.mxu1 %v17123_v31  ;;  %v13863_v31 = vsub.s32 2, %v23686_v34 }
 0xa3e   : > { %13460 = vmatpush1.bf16.msra.mxu0 %v17118_v54  ;;  %v13867_v54 = vsub.s32 3, %v23686_v34 }
 0xa3f   : > { %13829 = vmatpush1.bf16.msra.mxu1 %v17121_v47  ;;  %13461 = vmatprep.subr.bf16.mxu0 %v17126_v27  ;;  %v13877_v47 = vld [vmem:[%s23455_s12] sm:$0xf]  ;;  %v13856_v27 = vrot.slane %v13851_v9, %v21261_v33 }
 0xa40   : > { %13830 = vmatprep.subr.bf16.mxu1 %v17129_v12  ;;  %v13864_v12 = vrot.slane %v13851_v9, %v13863_v31  ;;  %v13894_v34 = vrot.slane %v13877_v47, %v13867_v54 }
 0xa42   : > { %13462 = vmatpush1.bf16.msra.mxu0 %v17124_v22  ;;  %v13860_v22 = vrot.slane %v13851_v9, %v21270_v39 }
 0xa43   : > { %13831 = vmatpush1.bf16.msra.mxu1 %v17127_v7  ;;  %13463 = vmatprep.subr.bf16.mxu0 %v17132_v56  ;;  %v13882_v7 = vrot.slane %v13877_v47, %v21261_v33  ;;  %v13868_v56 = vrot.slane %v13851_v9, %v13867_v54  ;;  %v17222_v9 = vld [vmem:[%s23456_s13 + $0x144] ss:$8 sps:$4 sm:$0xff]   ;;  %v17225_v54 = vld [vmem:[%s23456_s13 + $0x154] ss:$8 sps:$4 sm:$0xff]  }
 0xa44   : > { %13832 = vmatprep.subr.bf16.mxu1 %v17135_v38 }
 0xa46   : > { %13464 = vmatpush1.bf16.msra.mxu0 %v17130_v59  ;;  %v13890_v59 = vrot.slane %v13877_v47, %v13863_v31  ;;  %v17220_v31 = vld [vmem:[%s23456_s13 + $0x140] ss:$8 sps:$4 sm:$0xff]  }
 0xa47   : > { %13833 = vmatpush1.bf16.msra.mxu1 %v17133_v5  ;;  %13465 = vmatprep.subr.bf16.mxu0 %v17138_v62  ;;  %v13886_v5 = vrot.slane %v13877_v47, %v21270_v39  ;;  %v17223_v47 = vld [vmem:[%s23456_s13 + $0x150] ss:$8 sps:$4 sm:$0xff]  }
 0xa48   : > { %13834 = vmatprep.subr.bf16.mxu1 %v17141_v3 }
 0xa4a   : > { %13466 = vmatpush1.bf16.msra.mxu0 %v17136_v8 }
 0xa4b   : > { %13835 = vmatpush1.bf16.msra.mxu1 %v17139_v58  ;;  %13467 = vmatprep.subr.bf16.mxu0 %v17144_v63 }
 0xa4c   : > { %13836 = vmatprep.subr.bf16.mxu1 %v17147_v28 }
 0xa4e   : > { %13468 = vmatpush1.bf16.msra.mxu0 %v17142_v35 }
 0xa4f   : > { %13837 = vmatpush1.bf16.msra.mxu1 %v17145_v4  ;;  %13469 = vmatprep.subr.bf16.mxu0 %v17150_v24 }
 0xa50   : > { %13838 = vmatprep.subr.bf16.mxu1 %v17153_v17 }
 0xa52   : > { %13470 = vmatpush1.bf16.msra.mxu0 %v17148_v43 }
 0xa53   : > { %13839 = vmatpush1.bf16.msra.mxu1 %v17151_v51  ;;  %13471 = vmatprep.subr.bf16.mxu0 %v17156_v6 }
 0xa54   : > { %13840 = vmatprep.subr.bf16.mxu1 %v17159_v13 }
 0xa56   : > { %13472 = vmatpush1.bf16.msra.mxu0 %v17154_v48 }
 0xa57   : > { %13841 = vmatpush1.bf16.msra.mxu1 %v17157_v11  ;;  %14336 = vmatprep.subr.bf16.mxu0 %v17162_v50 }
 0xa59   : > { %13474 = vmatmul.mubr.bf16.vlgmr.msra.gmra.mrb[96].mxu0 %v22979_v52 }
 0xa5a   : > { %13843 = vmatmul.mubr.bf16.vlgmr.msra.gmra.mrb[56].mxu1 %v22979_v52  ;;  %14337 = vmatpush1.bf16.msra.mxu0 %v17160_v44  ;;  %v17171_v52 = vld [vmem:[%s23456_s13 + $0x34] ss:$8 sps:$4 sm:$0xff]  }
 0xa5b   : > { %14338 = vmatprep.subr.bf16.mxu0 %v17165_v42 }
 0xa5e   : > { %14339 = vmatpush1.bf16.msra.mxu0 %v17163_v15 }
 0xa5f   : > { %14340 = vmatprep.subr.bf16.mxu0 %v17168_v37 }
 0xa62   : > { %14341 = vmatpush1.bf16.msra.mxu0 %v17166_v19 }
 0xa63   : > { %14342 = vmatprep.subr.bf16.mxu0 %v17171_v52 }
 0xa66   : > { %14343 = vmatpush1.bf16.msra.mxu0 %v17169_v2 }
 0xa67   : > { %14344 = vmatprep.subr.bf16.mxu0 %v17174_v23 }
 0xa6a   : > { %14345 = vmatpush1.bf16.msra.mxu0 %v17172_v18 }
 0xa6b   : > { %14346 = vmatprep.subr.bf16.mxu0 %v17177_v53 }
 0xa6e   : > { %14347 = vmatpush1.bf16.msra.mxu0 %v17175_v40 }
 0xa6f   : > { %14348 = vmatprep.subr.bf16.mxu0 %v17180_v16 }
 0xa72   : > { %14349 = vmatpush1.bf16.msra.mxu0 %v17178_v21 }
 0xa73   : > { %14350 = vmatprep.subr.bf16.mxu0 %v17183_v55 }
 0xa76   : > { %14351 = vmatpush1.bf16.msra.mxu0 %v17181_v26 }
 0xa77   : > { %14352 = vmatprep.subr.bf16.mxu0 %v17186_v0 }
 0xa7a   : > { %14353 = vmatpush1.bf16.msra.mxu0 %v17184_v41 }
 0xa7b   : > { %14354 = vmatprep.subr.bf16.mxu0 %v17189_v14 }
 0xa7e   : > { %14355 = vmatpush1.bf16.msra.mxu0 %v17187_v32 }
 0xa7f   : > { %14356 = vmatprep.subr.bf16.mxu0 %v17192_v61 }
 0xa82   : > { %14357 = vmatpush1.bf16.msra.mxu0 %v17190_v1 }
 0xa83   : > { %14358 = vmatprep.subr.bf16.mxu0 %v17195_v10 }
 0xa86   : > { %14359 = vmatpush1.bf16.msra.mxu0 %v17193_v30 }
 0xa87   : > { %14360 = vmatprep.subr.bf16.mxu0 %v17198_v49  ;;  %v17208_v49 = vld [vmem:[%s23456_s13 + $0x100] ss:$8 sps:$4 sm:$0xff]  }
 0xa8a   : > { %14361 = vmatpush1.bf16.msra.mxu0 %v17196_v36 }
 0xa8b   : > { %14362 = vmatprep.subr.bf16.mxu0 %v17201_v46  ;;  %v17213_v46 = vld [vmem:[%s23456_s13 + $0x114] ss:$8 sps:$4 sm:$0xff]  }
 0xa8e   : > { %14363 = vmatpush1.bf16.msra.mxu0 %v17199_v20 }
 0xa8f   : > { %14364 = vmatprep.subr.bf16.mxu0 %v17204_v60  ;;  %v17211_v60 = vld [vmem:[%s23456_s13 + $0x110] ss:$8 sps:$4 sm:$0xff]  }
 0xa92   : > { %14365 = vmatpush1.bf16.msra.mxu0 %v17202_v45  ;;  %v17216_v45 = vld [vmem:[%s23456_s13 + $0x124] ss:$8 sps:$4 sm:$0xff]  }
 0xa93   : > { %14366 = vmatprep.subr.bf16.mxu0 %v17207_v25  ;;  %v17214_v25 = vld [vmem:[%s23456_s13 + $0x120] ss:$8 sps:$4 sm:$0xff]  }
 0xa96   : > { %14367 = vmatpush1.bf16.msra.mxu0 %v17205_v57  ;;  %v17219_v57 = vld [vmem:[%s23456_s13 + $0x134] ss:$8 sps:$4 sm:$0xff]  }
 0xa97   : > { %14377 = vmatprep.subr.bf16.mxu0 %v17210_v29  ;;  %v17217_v29 = vld [vmem:[%s23456_s13 + $0x130] ss:$8 sps:$4 sm:$0xff]  }
 0xb2c   : > { %v13475_v38 = vpop.f32.mrb[96].mxu0 }
 0xb2d   : > { %v13873_v62 = vmul.f32 %v13856_v27, %v13475_v38  ;;  %v13844_v3 = vpop.f32.mrb[56].mxu1  ;;  %v13477_v8 = vpop.f32.mrb[97].mxu0  ;;  %v17228_v27 = vld [vmem:[%s23456_s13 + $0x164] ss:$8 sps:$4 sm:$0xff]   ;;  %v17232_v38 = vld [vmem:[%s23456_s13 + $0x180] ss:$8 sps:$4 sm:$0xff]  }
 0xb2e   : > { %v13875_v58 = vmul.f32 %v13864_v12, %v13844_v3  ;;  %v13874_v63 = vmul.f32 %v13860_v22, %v13477_v8  ;;  %v13846_v28 = vpop.f32.mrb[57].mxu1  ;;  %v13479_v35 = vpop.f32.mrb[98].mxu0  ;;  %v17226_v12 = vld [vmem:[%s23456_s13 + $0x160] ss:$8 sps:$4 sm:$0xff]   ;;  %v17231_v22 = vld [vmem:[%s23456_s13 + $0x174] ss:$8 sps:$4 sm:$0xff]  }
 0xb2f   : > { %v13899_v4 = vadd.f32 %v13882_v7, %v13873_v62  ;;  %v13876_v24 = vmul.f32 %v13868_v56, %v13846_v28  ;;  %v13848_v17 = vpop.f32.mrb[58].mxu1  ;;  %v13480_v43 = vpop.f32.mrb[99].mxu0  ;;  %v17229_v7 = vld [vmem:[%s23456_s13 + $0x170] ss:$8 sps:$4 sm:$0xff]   ;;  %v17234_v56 = vld [vmem:[%s23456_s13 + $0x184] ss:$8 sps:$4 sm:$0xff]  }
 0xb30   : > { %v23284_v51 = vadd.f32 %v13890_v59, %v13875_v58  ;;  %v13900_v6 = vadd.f32 %v13886_v5, %v13874_v63  ;;  %v13849_v13 = vpop.f32.mrb[59].mxu1  ;;  %v17237_v5 = vld [vmem:[%s23456_s13 + $0x194] ss:$8 sps:$4 sm:$0xff]   ;;  %v17235_v62 = vld [vmem:[%s23456_s13 + $0x190] ss:$8 sps:$4 sm:$0xff]  }
 0xb31   : > { %v13903_v48 = vmax.f32 %v13899_v4, 0.0  ;;  %v13902_v11 = vadd.f32 %v13894_v34, %v13876_v24  ;;  %v17240_v8 = vld [vmem:[%s23456_s13 + $0x1a4] ss:$8 sps:$4 sm:$0xff]   ;;  %v17238_v34 = vld [vmem:[%s23456_s13 + $0x1a0] ss:$8 sps:$4 sm:$0xff]  }
 0xb32   : > { %v13904_v50 = vmax.f32 %v13900_v6, 0.0  ;;  %v13905_v59 = vmax.f32 %v23284_v51, 0.0  ;;  %v17243_v63 = vld [vmem:[%s23456_s13 + $0x1b4] ss:$8 sps:$4 sm:$0xff]   ;;  %v17241_v28 = vld [vmem:[%s23456_s13 + $0x1b0] ss:$8 sps:$4 sm:$0xff]  }
 0xb33   : > { %v13907_v44 = vrot.slane %v13903_v48, 4  ;;  %v13906_v42 = vmax.f32 %v13902_v11, 0.0  ;;  %v17246_v4 = vld [vmem:[%s23456_s13 + $0x1c4] ss:$8 sps:$4 sm:$0xff]   ;;  %v17244_v24 = vld [vmem:[%s23456_s13 + $0x1c0] ss:$8 sps:$4 sm:$0xff]  }
 0xb34   : > { %v13913_v15 = vrot.slane %v13904_v50, 4  ;;  %v13919_v3 = vrot.slane %v13905_v59, 4  ;;  %v17249_v43 = vld [vmem:[%s23456_s13 + $0x1d4] ss:$8 sps:$4 sm:$0xff]   ;;  %v17247_v51 = vld [vmem:[%s23456_s13 + $0x1d0] ss:$8 sps:$4 sm:$0xff]  }
 0xb35   : > { %v13908_v37 = vadd.f32 %v13907_v44, %v13903_v48  ;;  %v13925_v19 = vrot.slane %v13906_v42, 4  ;;  %v17252_v13 = vld [vmem:[%s23456_s13 + $0x1e4] ss:$8 sps:$4 sm:$0xff]   ;;  %v17250_v48 = vld [vmem:[%s23456_s13 + $0x1e0] ss:$8 sps:$4 sm:$0xff]  }
 0xb36   : > { %v13914_v52 = vadd.f32 %v13913_v15, %v13904_v50  ;;  %v13920_v58 = vadd.f32 %v13919_v3, %v13905_v59  ;;  %v17255_v11 = vld [vmem:[%s23456_s13 + $0x1f4] ss:$8 sps:$4 sm:$0xff]   ;;  %v17253_v44 = vld [vmem:[%s23456_s13 + $0x1f0] ss:$8 sps:$4 sm:$0xff]   ;;  %v17256_v15 = vld [vmem:[%s23458_s15 + $0x40] sm:$0xff]  }
 0xb37   : > { %v13909_v2 = vrot.slane %v13908_v37, 2  ;;  %v13926_v23 = vadd.f32 %v13925_v19, %v13906_v42 }
 0xb38   : > { %v13915_v18 = vrot.slane %v13914_v52, 2  ;;  %v13921_v35 = vrot.slane %v13920_v58, 2 }
 0xb39   : > { %v13910_v53 = vadd.f32 %v13909_v2, %v13908_v37  ;;  %v13927_v40 = vrot.slane %v13926_v23, 2  ;;  %v17257_v37 = vld [vmem:[%s23458_s15] sm:$0xff]   ;;  %v17259_v2 = vld [vmem:[%s23458_s15 + $0x8] sm:$0xff]  }
 0xb3a   : > { %v13916_v16 = vadd.f32 %v13915_v18, %v13914_v52  ;;  %v13922_v17 = vadd.f32 %v13921_v35, %v13920_v58  ;;  %v17258_v52 = vld [vmem:[%s23458_s15 + $0x48] sm:$0xff]   ;;  %v17261_v18 = vld [vmem:[%s23458_s15 + $0x10] sm:$0xff]  }
 0xb3b   : > { %v13911_v21 = vrot.slane %v13910_v53, 1  ;;  %v13928_v55 = vadd.f32 %v13927_v40, %v13926_v23  ;;  %v17260_v23 = vld [vmem:[%s23458_s15 + $0x50] sm:$0xff]   ;;  %v17263_v40 = vld [vmem:[%s23458_s15 + $0x18] sm:$0xff]  }
 0xb3c   : > { %v13917_v26 = vrot.slane %v13916_v16, 1  ;;  %v13923_v6 = vrot.slane %v13922_v17, 1 }
 0xb3d   : > { %v13912_v0 = vadd.f32 %v13911_v21, %v13910_v53  ;;  %v13929_v41 = vrot.slane %v13928_v55, 1  ;;  %v17262_v53 = vld [vmem:[%s23458_s15 + $0x58] sm:$0xff]   ;;  %v17265_v21 = vld [vmem:[%s23458_s15 + $0x20] sm:$0xff]  }
 0xb3e   : > { %v13918_v14 = vadd.f32 %v13917_v26, %v13916_v16  ;;  %v13924_v50 = vadd.f32 %v13923_v6, %v13922_v17  ;;  %v17264_v16 = vld [vmem:[%s23458_s15 + $0x60] sm:$0xff]   ;;  %v17267_v26 = vld [vmem:[%s23458_s15 + $0x28] sm:$0xff]  }
 0xb3f   : > { %v13932_v32 = vmul.f32 0.125, %v13912_v0  ;;  %v13930_v61 = vadd.f32 %v13929_v41, %v13928_v55  ;;  %v17266_v55 = vld [vmem:[%s23458_s15 + $0x68] sm:$0xff]   ;;  %v17268_v0 = vld [vmem:[%s23458_s15 + $0x70] sm:$0xff]  }
 0xb40   : > { %v13933_v1 = vmul.f32 0.125, %v13918_v14  ;;  %v13934_v42 = vmul.f32 0.125, %v13924_v50  ;;  %v17269_v41 = vld [vmem:[%s23458_s15 + $0x30] sm:$0xff]   ;;  %v17270_v14 = vld [vmem:[%s23458_s15 + $0x78] sm:$0xff]  }
 0xb41   : > { %v13935_v30 = vmul.f32 0.125, %v13930_v61  ;;  %v13936_v36 = vpack.c.bf16 %v13932_v32, %v13932_v32  ;;  %v17271_v32 = vld [vmem:[%s23458_s15 + $0x38] sm:$0xff]   ;;  %v14004_v61 = vld [vmem:[%s23457_s14] sm:$0x3] }
 0xb42   : > { %v13937_v10 = vpack.c.bf16 %v13933_v1, %v13933_v1  ;;  %v13938_v19 = vpack.c.bf16 %v13934_v42, %v13934_v42  ;;  %v14329_v1 = vrot.slane %v14004_v61, %v21261_v33  ;;  %v14454_v33 = vld [vmem:[%s23459_s16] sm:$0x1] }
 0xb43   : > { %v13939_v20 = vpack.c.bf16 %v13935_v30, %v13935_v30  ;;  %v14333_v30 = vrot.slane %v14004_v61, %v21270_v39 }
 0xb44   : > { %14368 = vmatprep.mubr.bf16.mxu0 %v13937_v10 }
 0xb45   : > { %14369 = vmatmul.mubr.bf16.vlgmr.msra.gmra.mrb[100].mxu0 %v13936_v36 }
 0xb46   : > { %14378 = vmatpush1.bf16.msra.mxu0 %v17208_v49  ;;  %14409 = vmatprep.mubr.bf16.mxu0 %v13939_v20 }
 0xb47   : > { %14379 = vmatprep.subr.bf16.mxu0 %v17213_v46 }
 0xb4a   : > { %14380 = vmatpush1.bf16.msra.mxu0 %v17211_v60 }
 0xb4b   : > { %14381 = vmatprep.subr.bf16.mxu0 %v17216_v45 }
 0xb4e   : > { %14382 = vmatpush1.bf16.msra.mxu0 %v17214_v25 }
 0xb4f   : > { %14383 = vmatprep.subr.bf16.mxu0 %v17219_v57 }
 0xb52   : > { %14384 = vmatpush1.bf16.msra.mxu0 %v17217_v29 }
 0xb53   : > { %14385 = vmatprep.subr.bf16.mxu0 %v17222_v9 }
 0xb56   : > { %14386 = vmatpush1.bf16.msra.mxu0 %v17220_v31 }
 0xb57   : > { %14387 = vmatprep.subr.bf16.mxu0 %v17225_v54 }
 0xb5a   : > { %14388 = vmatpush1.bf16.msra.mxu0 %v17223_v47 }
 0xb5b   : > { %14389 = vmatprep.subr.bf16.mxu0 %v17228_v27 }
 0xb5e   : > { %14390 = vmatpush1.bf16.msra.mxu0 %v17226_v12 }
 0xb5f   : > { %14391 = vmatprep.subr.bf16.mxu0 %v17231_v22 }
 0xb62   : > { %14392 = vmatpush1.bf16.msra.mxu0 %v17229_v7 }
 0xb63   : > { %14393 = vmatprep.subr.bf16.mxu0 %v17234_v56 }
 0xb66   : > { %14394 = vmatpush1.bf16.msra.mxu0 %v17232_v38 }
 0xb67   : > { %14395 = vmatprep.subr.bf16.mxu0 %v17237_v5 }
 0xb6a   : > { %14396 = vmatpush1.bf16.msra.mxu0 %v17235_v62 }
 0xb6b   : > { %14397 = vmatprep.subr.bf16.mxu0 %v17240_v8 }
 0xb6e   : > { %14398 = vmatpush1.bf16.msra.mxu0 %v17238_v34 }
 0xb6f   : > { %14399 = vmatprep.subr.bf16.mxu0 %v17243_v63 }
 0xb72   : > { %14400 = vmatpush1.bf16.msra.mxu0 %v17241_v28 }
 0xb73   : > { %14401 = vmatprep.subr.bf16.mxu0 %v17246_v4 }
 0xb76   : > { %14402 = vmatpush1.bf16.msra.mxu0 %v17244_v24 }
 0xb77   : > { %14403 = vmatprep.subr.bf16.mxu0 %v17249_v43 }
 0xb7a   : > { %14404 = vmatpush1.bf16.msra.mxu0 %v17247_v51 }
 0xb7b   : > { %14405 = vmatprep.subr.bf16.mxu0 %v17252_v13 }
 0xb7e   : > { %14406 = vmatpush1.bf16.msra.mxu0 %v17250_v48 }
 0xb7f   : > { %14407 = vmatprep.subr.bf16.mxu0 %v17255_v11 }
 0xb82   : > { %14408 = vmatpush1.bf16.msra.mxu0 %v17253_v44 }
 0xb83   : > { %15769 = vmatprep.subr.bf16.mxu0 %v17256_v15 }
 0xb85   : > { %14410 = vmatmul.mubr.bf16.vlgmr.msra.gmra.mrb[100].mxu0 %v13938_v19 }
 0xb86   : > { %15770 = vmatpush3.bf16.msra.mxu0 %v17257_v37 }
 0xb87   : > { %15771 = vmatprep.subr.bf16.mxu0 %v17258_v52 }
 0xb8a   : > { %15772 = vmatpush3.bf16.msra.mxu0 %v17259_v2 }
 0xb8b   : > { %15773 = vmatprep.subr.bf16.mxu0 %v17260_v23 }
 0xb8e   : > { %15774 = vmatpush3.bf16.msra.mxu0 %v17261_v18 }
 0xb8f   : > { %15775 = vmatprep.subr.bf16.mxu0 %v17262_v53 }
 0xb92   : > { %15776 = vmatpush3.bf16.msra.mxu0 %v17263_v40 }
 0xb93   : > { %15777 = vmatprep.subr.bf16.mxu0 %v17264_v16 }
 0xb96   : > { %15778 = vmatpush3.bf16.msra.mxu0 %v17265_v21 }
 0xb97   : > { %15779 = vmatprep.subr.bf16.mxu0 %v17266_v55 }
 0xb9a   : > { %15780 = vmatpush3.bf16.msra.mxu0 %v17267_v26 }
 0xb9b   : > { %15781 = vmatprep.subr.bf16.mxu0 %v17268_v0 }
 0xb9e   : > { %15782 = vmatpush3.bf16.msra.mxu0 %v17269_v41 }
 0xb9f   : > { %15783 = vmatprep.subr.bf16.mxu0 %v17270_v14 }
 0xba2   : > { %15784 = vmatpush3.bf16.msra.mxu0 %v17271_v32 }
 0xc58   : > { %v14411_v10 = vpop.f32.mrb[100].mxu0 }
 0xc59   : > { %v15897_v49 = vadd.f32 %v14411_v10, %v14329_v1  ;;  %v14413_v36 = vpop.f32.mrb[101].mxu0 }
 0xc5a   : > { %v15898_v46 = vadd.f32 %v14413_v36, %v14333_v30  ;;  %v14415_v20 = vpop.f32.mrb[102].mxu0 }
 0xc5b   : > { %v14418_v60 = vmax.f32 %v15897_v49, 0.0  ;;  %v14416_v45 = vpop.f32.mrb[103].mxu0 }
 0xc5c   : > { %v14419_v25 = vmax.f32 %v15898_v46, 0.0 }
 0xc5d   : > { %v14420_v29 = vpack.c.bf16 %v14418_v60, %v14418_v60 }
 0xc5e   : > { %v14421_v57 = vpack.c.bf16 %v14419_v25, %v14419_v25 }
 0xc60   : > { %14583 = vmatprep.mubr.bf16.mxu0 %v14421_v57 }
 0xc61   : > { %14584 = vmatmul.mubr.bf16.vlgmr.msra.gmra.mrb[104].mxu0 %v14420_v29 }
 0xd34   : > { %v15785_v9 = vpop.f32.mrb[104].mxu0 }
 0xd35   : > { %v15786_v31 = vpop.f32.mrb[105].mxu0 }
 0xd36   : > { %v15787_v39 = vadd.f32 %v15786_v31, %v15785_v9  ;;  %v15788_v54 = vpop.f32.mrb[106].mxu0 }
 0xd37   : > { %v15789_v47 = vpop.f32.mrb[107].mxu0 }
 0xd38   : > { %v14586_v27 = vadd.f32 %v15787_v39, %v14454_v33 }
 0xd3a   : > { %14592 = vst.msk [vmem:[%s544_s27] sm:$0x1] %vm14591_vm6, %v14586_v27 }
 0xd3b PF: > { %s27_s24 = sadd.s32 1, %s17291_s24  }
 0xd3c   : > { %p24_p4 = scmp.ge.s32.totalorder %s27_s24, 4  }
 0xd3e   :  { %26 = sbr.rel (!%p24_p4) target bundleno = 3 (0x3), region = 118 }

</bundles_post_ra>
